<compile_context>
chip_gen: v7x
topology: tpu7x:2x2x1
jax: 0.10.0
libtpu: 0.0.40
codegen_flags: <defaults>
</compile_context>

<pallas_src>
import functools

import jax
import jax.numpy as jnp
from jax.experimental import pallas as pl
from jax.experimental.pallas import tpu as pltpu

NOISE_DIM = 100

LAYER_DEFS = [
    # (Cin, Cout, kernel, stride, padding, has_bn_relu)
    (NOISE_DIM, 512, 4, 1, 0, True),
    (512, 256, 4, 2, 1, True),
    (256, 128, 4, 2, 1, True),
    (128, 64, 4, 2, 1, True),
    (64, 3, 4, 2, 1, False),   # last layer -> Tanh
]


def _round_up(x, m):
    return (x + m - 1) // m * m


# ---------------------------------------------------------------------------
# Pallas kernels
# ---------------------------------------------------------------------------
def _bmm_kernel(a_ref, b_ref, o_ref, acc_ref, *, activation):
    """Batched (over leading phase axis) tiled matmul with fused epilogue."""
    @pl.when(pl.program_id(3) == 0)
    def _():
        acc_ref[...] = jnp.zeros_like(acc_ref)

    acc_ref[...] += jnp.dot(a_ref[0], b_ref[0],
                            preferred_element_type=jnp.float32)

    @pl.when(pl.program_id(3) == pl.num_programs(3) - 1)
    def _():
        r = acc_ref[...]
        if activation == "tanh":
            r = jnp.tanh(r)
        o_ref[0] = r.astype(o_ref.dtype)


def pallas_bmm(a, b, activation="none"):
    """a: (P, M, K); b: (P, Kp, Np) pre-padded bf16 weights.

    Returns (P, Mp, Np) float32; caller slices [:, :M] if M was padded.
    bf16 MXU inputs, f32 accumulation, optional fused tanh epilogue.
    """
    P, M, K = a.shape
    Pb, Kp, Np = b.shape
    assert Pb == P and Kp >= K and Kp % 128 == 0 and Np % 128 == 0

    tm = min(256, _round_up(M, 16))
    Mp = _round_up(M, tm)
    tn = min(1024, Np)
    tk = min(2048, Kp)
    assert Np % tn == 0 and Kp % tk == 0

    a = a.astype(jnp.bfloat16)
    if (Mp, Kp) != (M, K):
        a = jnp.pad(a, ((0, 0), (0, Mp - M), (0, Kp - K)))

    kernel = functools.partial(_bmm_kernel, activation=activation)
    out = pl.pallas_call(
        kernel,
        out_shape=jax.ShapeDtypeStruct((P, Mp, Np), jnp.float32),
        grid_spec=pltpu.PrefetchScalarGridSpec(
            num_scalar_prefetch=0,
            grid=(P, Mp // tm, Np // tn, Kp // tk),
            in_specs=[
                pl.BlockSpec((1, tm, tk), lambda p, i, j, k: (p, i, k)),
                pl.BlockSpec((1, tk, tn), lambda p, i, j, k: (p, k, j)),
            ],
            out_specs=pl.BlockSpec((1, tm, tn), lambda p, i, j, k: (p, i, j)),
            scratch_shapes=[pltpu.VMEM((tm, tn), jnp.float32)],
        ),
        compiler_params=pltpu.CompilerParams(
            dimension_semantics=("parallel", "parallel", "parallel",
                                 "arbitrary")),
    )(a, b)
    return out


def _bn_relu_kernel(x_ref, scale_ref, shift_ref, o_ref):
    y = x_ref[...] * scale_ref[...] + shift_ref[...]
    o_ref[...] = jnp.maximum(y, 0.0).astype(o_ref.dtype)


def pallas_bn_relu(x, gamma, beta, eps=1e-5):
    """x: (rows, C) float32, C a multiple of 128 (lane-dense).

    Training-mode BatchNorm (batch statistics) + ReLU, emitting bf16 for the
    next layer's MXU matmul. Stats are a cheap XLA reduction; the apply is a
    fused Pallas kernel.
    """
    rows, C = x.shape
    mean = jnp.mean(x, axis=0)
    var = jnp.mean(jnp.square(x - mean), axis=0)   # biased var, PyTorch-style
    inv = gamma / jnp.sqrt(var + eps)
    scale = inv.reshape(1, C).astype(jnp.float32)
    shift = (beta - mean * inv).reshape(1, C).astype(jnp.float32)

    tr = min(1024, _round_up(rows, 16))
    Rp = _round_up(rows, tr)
    x_p = x if Rp == rows else jnp.pad(x, ((0, Rp - rows), (0, 0)))

    out = pl.pallas_call(
        _bn_relu_kernel,
        out_shape=jax.ShapeDtypeStruct((Rp, C), jnp.bfloat16),
        grid=(Rp // tr,),
        in_specs=[
            pl.BlockSpec((tr, C), lambda i: (i, 0)),
            pl.BlockSpec((1, C), lambda i: (0, 0)),
            pl.BlockSpec((1, C), lambda i: (0, 0)),
        ],
        out_specs=pl.BlockSpec((tr, C), lambda i: (i, 0)),
        compiler_params=pltpu.CompilerParams(
            dimension_semantics=("parallel",)),
    )(x_p, scale, shift)
    return out if Rp == rows else out[:rows]


# ---------------------------------------------------------------------------
# Stride-2 ConvTranspose2d via phase decomposition (4 phases x 2x2 taps)
# ---------------------------------------------------------------------------
def conv_transpose_s2(x, wm_stack, activation="none"):
    """x: (N, H, W, Cin_p) bf16 NHWC (channels padded to 128 multiple).
    wm_stack: (4, 4*Cin_p, Cout_p) bf16, phases in (ry, rx) row-major order.
    Returns (N, 2H, 2W, Cout_p) float32.
    """
    N, H, W, Cin = x.shape
    Cout_p = wm_stack.shape[-1]
    M = N * H * W

    xp = jnp.pad(x, ((0, 0), (1, 1), (1, 1), (0, 0)))
    a_phases = []
    for ry in range(2):
        for rx in range(2):
            taps = [xp[:, ry + dy:ry + dy + H, rx + dx:rx + dx + W, :]
                    for dy in range(2) for dx in range(2)]
            a_phases.append(
                jnp.concatenate(taps, axis=-1).reshape(M, 4 * Cin))
    a = jnp.stack(a_phases, axis=0)                       # (4, M, 4*Cin) bf16

    o = pallas_bmm(a, wm_stack, activation=activation)    # (4, Mp, Cout_p)
    o = o[:, :M].reshape(2, 2, N, H, W, Cout_p)
    # out[n, 2*py+ry, 2*px+rx, c] = o[ry, rx, n, py, px, c]
    o = jnp.transpose(o, (2, 3, 0, 4, 1, 5))              # (N, H, 2, W, 2, C)
    return o.reshape(N, 2 * H, 2 * W, Cout_p)


# ---------------------------------------------------------------------------
# Parameters (PyTorch layout) and one-time matmul-ready preprocessing
# ---------------------------------------------------------------------------
def init_params(key):
    params = {}
    for li, (cin, cout, k, _, _, has_bn) in enumerate(LAYER_DEFS):
        key, wk, gk, bk = jax.random.split(key, 4)
        params[f"W{li}"] = 0.02 * jax.random.normal(
            wk, (cin, cout, k, k), jnp.float32)
        if has_bn:
            params[f"gamma{li}"] = (1.0 + 0.1 * jax.random.normal(
                gk, (cout,), jnp.float32))
            params[f"beta{li}"] = 0.1 * jax.random.normal(
                bk, (cout,), jnp.float32)
    return params


def prepare_params(params):
    """One-time: build padded bf16 matmul weights and padded BN params."""
    prepped = {}

    # Layer 0: (N,100,1,1) ConvTranspose(100,512,4,1,0) == dense matmul
    W0 = params["W0"]                                     # (100, 512, 4, 4)
    w0m = jnp.transpose(W0, (0, 2, 3, 1)).reshape(NOISE_DIM, 4 * 4 * 512)
    kp0 = _round_up(NOISE_DIM, 128)
    w0m = jnp.pad(w0m, ((0, kp0 - NOISE_DIM), (0, 0)))
    prepped["w0"] = w0m.astype(jnp.bfloat16)[None]        # (1, 128, 8192)
    prepped["gamma0"] = params["gamma0"]
    prepped["beta0"] = params["beta0"]

    # Layers 1..4: stride-2, k=4, pad=1 -> per phase a 2x2-tap kernel.
    # tap (dy,dx) of phase (ry,rx) uses W[:, :, 3-ry-2*dy, 3-rx-2*dx]
    for li in range(1, 5):
        cin, cout, k, _, _, has_bn = LAYER_DEFS[li]
        cin_p = _round_up(cin, 128)
        cout_p = _round_up(cout, 128)
        W = params[f"W{li}"]                              # (cin, cout, 4, 4)
        phase_mats = []
        for ry in range(2):
            for rx in range(2):
                blocks = []
                for dy in range(2):
                    for dx in range(2):
                        ky = 3 - ry - 2 * dy
                        kx = 3 - rx - 2 * dx
                        blk = W[:, :, ky, kx]             # (cin, cout)
                        blk = jnp.pad(blk, ((0, cin_p - cin),
                                            (0, cout_p - cout)))
                        blocks.append(blk)
                phase_mats.append(jnp.concatenate(blocks, axis=0))
        prepped[f"wm{li}"] = jnp.stack(phase_mats, 0).astype(jnp.bfloat16)
        if has_bn:
            prepped[f"gamma{li}"] = jnp.pad(params[f"gamma{li}"],
                                            (0, cout_p - cout))
            prepped[f"beta{li}"] = jnp.pad(params[f"beta{li}"],
                                           (0, cout_p - cout))
    return prepped


# ---------------------------------------------------------------------------
# Generator forward (NCHW in, NHWC internally, NCHW out)
# ---------------------------------------------------------------------------
@jax.jit
def generator_forward(z_nchw, prepped):
    N = z_nchw.shape[0]
    z = z_nchw.reshape(1, N, NOISE_DIM).astype(jnp.bfloat16)

    # Layer 0: dense matmul -> (N, 4, 4, 512), then BN + ReLU
    h = pallas_bmm(z, prepped["w0"])[0, :N]               # (N, 8192) f32
    flat = pallas_bn_relu(h.reshape(N * 16, 512),
                          prepped["gamma0"], prepped["beta0"])
    x = flat.reshape(N, 4, 4, 512)                        # bf16 NHWC

    # Layers 1..3: phase-decomposed ConvTranspose + BN + ReLU
    for li in range(1, 4):
        y = conv_transpose_s2(x, prepped[f"wm{li}"], activation="none")
        Nb, Hh, Ww, Cc = y.shape
        flat = pallas_bn_relu(y.reshape(Nb * Hh * Ww, Cc),
                              prepped[f"gamma{li}"], prepped[f"beta{li}"])
        x = flat.reshape(Nb, Hh, Ww, Cc)

    # Layer 4: ConvTranspose with tanh fused into the matmul epilogue
    y = conv_transpose_s2(x, prepped["wm4"], activation="tanh")
    out = y[..., :3]                                      # strip channel pad
    return jnp.transpose(out, (0, 3, 1, 2))               # NCHW, float32


if __name__ == "__main__":
    key = jax.random.PRNGKey(0)
    pkey, zkey = jax.random.split(key)
    params = init_params(pkey)
    prepped = prepare_params(params)

    batch = 2
    z = jax.random.normal(zkey, (batch, NOISE_DIM, 1, 1), jnp.float32)

    out = generator_forward(z, prepped)
    out = jax.block_until_ready(out)

    assert out.shape == (batch, 3, 64, 64), out.shape
    assert out.dtype == jnp.float32
    assert bool(jnp.all(jnp.isfinite(out)))
    assert bool(jnp.all(jnp.abs(out) <= 1.0 + 1e-6))      # Tanh range
    print("KERNEL_OK")
</pallas_src>

<mosaic_0001>
module attributes {stable_mosaic.version = 11 : i64} {
  func.func @_bmm_kernel(%arg0: i32, %arg1: i32, %arg2: i32, %arg3: i32, %arg4: memref<1x16x128xbf16, #tpu.memory_space<vmem>>, %arg5: memref<1x128x1024xbf16, #tpu.memory_space<vmem>>, %arg6: memref<1x16x1024xf32, #tpu.memory_space<vmem>>, %arg7: memref<16x1024xf32, #tpu.memory_space<vmem>>) attributes {dimension_semantics = [#tpu.dimension_semantics<parallel>, #tpu.dimension_semantics<parallel>, #tpu.dimension_semantics<parallel>, #tpu.dimension_semantics<arbitrary>], iteration_bounds = array<i64: 1, 1, 8, 1>, scalar_prefetch = 0 : i64, scratch_operands = 1 : i64, tpu.core_type = #tpu.core_type<tc>, window_params = [{transform_indices = @transform_0, window_bounds = array<i64: 1, 16, 128>}, {transform_indices = @transform_1, window_bounds = array<i64: 1, 128, 1024>}, {transform_indices = @transform_2, window_bounds = array<i64: 1, 16, 1024>}]} {
    %c0_i32 = arith.constant 0 : i32
    %0 = arith.cmpi eq, %arg3, %c0_i32 : i32
    %1 = arith.extui %0 : i1 to i32
    %c0_i32_0 = arith.constant 0 : i32
    %2 = arith.cmpi ne, %1, %c0_i32_0 : i32
    scf.if %2 {
      %cst_12 = arith.constant 0.000000e+00 : f32
      %14 = vector.broadcast %cst_12 : f32 to vector<16x1024xf32>
      %c0_13 = arith.constant 0 : index
      %c0_14 = arith.constant 0 : index
      %15 = vector.load %arg7[%c0_13, %c0_14] : memref<16x1024xf32, #tpu.memory_space<vmem>>, vector<16x1024xf32>
      tpu.vector_store %arg7[%c0_13, %c0_14], %14 {strides = array<i32>} : memref<16x1024xf32, #tpu.memory_space<vmem>>, vector<16x1024xf32>,
    } else {
    }
    %c0 = arith.constant 0 : index
    %c0_1 = arith.constant 0 : index
    %3 = vector.load %arg7[%c0, %c0_1] : memref<16x1024xf32, #tpu.memory_space<vmem>>, vector<16x1024xf32>
    %c0_2 = arith.constant 0 : index
    %c0_3 = arith.constant 0 : index
    %c0_4 = arith.constant 0 : index
    %4 = vector.load %arg4[%c0_2, %c0_3, %c0_4] : memref<1x16x128xbf16, #tpu.memory_space<vmem>>, vector<1x16x128xbf16>
    %5 = vector.shape_cast %4 : vector<1x16x128xbf16> to vector<16x128xbf16>
    %c0_5 = arith.constant 0 : index
    %c0_6 = arith.constant 0 : index
    %c0_7 = arith.constant 0 : index
    %6 = vector.load %arg5[%c0_5, %c0_6, %c0_7] : memref<1x128x1024xbf16, #tpu.memory_space<vmem>>, vector<1x128x1024xbf16>
    %7 = vector.shape_cast %6 : vector<1x128x1024xbf16> to vector<128x1024xbf16>
    %cst = arith.constant dense<0.000000e+00> : vector<16x1024xf32>
    %8 = tpu.matmul %5, %7, %cst {dimension_numbers = #tpu.dot_dimension_numbers<[1], [0], [0], [1], [0, 0, 1, 1], [], []>} : vector<16x128xbf16>, vector<128x1024xbf16>, vector<16x1024xf32> -> vector<16x1024xf32>
    %9 = arith.addf %3, %8 : vector<16x1024xf32>
    %c0_8 = arith.constant 0 : index
    %c0_9 = arith.constant 0 : index
    %10 = vector.load %arg7[%c0_8, %c0_9] : memref<16x1024xf32, #tpu.memory_space<vmem>>, vector<16x1024xf32>
    tpu.vector_store %arg7[%c0_8, %c0_9], %9 {strides = array<i32>} : memref<16x1024xf32, #tpu.memory_space<vmem>>, vector<16x1024xf32>,
    %c0_i32_10 = arith.constant 0 : i32
    %11 = arith.cmpi eq, %arg3, %c0_i32_10 : i32
    %12 = arith.extui %11 : i1 to i32
    %c0_i32_11 = arith.constant 0 : i32
    %13 = arith.cmpi ne, %12, %c0_i32_11 : i32
    scf.if %13 {
      %c0_12 = arith.constant 0 : index
      %c0_13 = arith.constant 0 : index
      %14 = vector.load %arg7[%c0_12, %c0_13] : memref<16x1024xf32, #tpu.memory_space<vmem>>, vector<16x1024xf32>
      %c0_14 = arith.constant 0 : index
      %c0_15 = arith.constant 0 : index
      %c0_16 = arith.constant 0 : index
      %15 = vector.load %arg6[%c0_14, %c0_15, %c0_16] : memref<1x16x1024xf32, #tpu.memory_space<vmem>>, vector<1x16x1024xf32>
      %16 = vector.shape_cast %15 : vector<1x16x1024xf32> to vector<16x1024xf32>
      %17 = vector.shape_cast %14 : vector<16x1024xf32> to vector<1x16x1024xf32>
      tpu.vector_store %arg6[%c0_14, %c0_15, %c0_16], %17 {strides = array<i32>} : memref<1x16x1024xf32, #tpu.memory_space<vmem>>, vector<1x16x1024xf32>,
    } else {
    }
    return
  }
  func.func @transform_0(%arg0: i32, %arg1: i32, %arg2: i32, %arg3: i32) -> (i32, i32, i32) {
    %c0_i32 = arith.constant 0 : i32
    return %arg0, %arg1, %arg3 : i32, i32, i32
  }
  func.func @transform_1(%arg0: i32, %arg1: i32, %arg2: i32, %arg3: i32) -> (i32, i32, i32) {
    %c0_i32 = arith.constant 0 : i32
    return %arg0, %arg3, %arg2 : i32, i32, i32
  }
  func.func @transform_2(%arg0: i32, %arg1: i32, %arg2: i32, %arg3: i32) -> (i32, i32, i32) {
    %c0_i32 = arith.constant 0 : i32
    return %arg0, %arg1, %arg2 : i32, i32, i32
  }
}

module attributes {stable_mosaic.version = 11 : i64} {
  func.func @_bn_relu_kernel(%arg0: i32, %arg1: memref<32x512xf32, #tpu.memory_space<vmem>>, %arg2: memref<1x512xf32, #tpu.memory_space<vmem>>, %arg3: memref<1x512xf32, #tpu.memory_space<vmem>>, %arg4: memref<32x512xbf16, #tpu.memory_space<vmem>>) attributes {dimension_semantics = [#tpu.dimension_semantics<parallel>], iteration_bounds = array<i64: 1>, scalar_prefetch = 0 : i64, scratch_operands = 0 : i64, tpu.core_type = #tpu.core_type<tc>, window_params = [{transform_indices = @transform_0, window_bounds = array<i64: 32, 512>}, {pipeline_mode = #tpu.pipeline_mode<synchronous>, transform_indices = @transform_1, window_bounds = array<i64: 1, 512>}, {pipeline_mode = #tpu.pipeline_mode<synchronous>, transform_indices = @transform_2, window_bounds = array<i64: 1, 512>}, {transform_indices = @transform_3, window_bounds = array<i64: 32, 512>}]} {
    %c0 = arith.constant 0 : index
    %c0_0 = arith.constant 0 : index
    %0 = vector.load %arg1[%c0, %c0_0] : memref<32x512xf32, #tpu.memory_space<vmem>>, vector<32x512xf32>
    %c0_1 = arith.constant 0 : index
    %c0_2 = arith.constant 0 : index
    %1 = vector.load %arg2[%c0_1, %c0_2] : memref<1x512xf32, #tpu.memory_space<vmem>>, vector<1x512xf32>
    %2 = vector.broadcast %1 : vector<1x512xf32> to vector<32x512xf32>
    %3 = arith.mulf %0, %2 : vector<32x512xf32>
    %c0_3 = arith.constant 0 : index
    %c0_4 = arith.constant 0 : index
    %4 = vector.load %arg3[%c0_3, %c0_4] : memref<1x512xf32, #tpu.memory_space<vmem>>, vector<1x512xf32>
    %5 = vector.broadcast %4 : vector<1x512xf32> to vector<32x512xf32>
    %6 = arith.addf %3, %5 : vector<32x512xf32>
    %cst = arith.constant 0.000000e+00 : f32
    %7 = vector.broadcast %cst : f32 to vector<32x512xf32>
    %8 = arith.maximumf %6, %7 : vector<32x512xf32>
    %9 = arith.truncf %8 : vector<32x512xf32> to vector<32x512xbf16>
    %c0_5 = arith.constant 0 : index
    %c0_6 = arith.constant 0 : index
    %10 = vector.load %arg4[%c0_5, %c0_6] : memref<32x512xbf16, #tpu.memory_space<vmem>>, vector<32x512xbf16>
    tpu.vector_store %arg4[%c0_5, %c0_6], %9 {strides = array<i32>} : memref<32x512xbf16, #tpu.memory_space<vmem>>, vector<32x512xbf16>,
    return
  }
  func.func @transform_0(%arg0: i32) -> (i32, i32) {
    %c0_i32 = arith.constant 0 : i32
    %c0_i32_0 = arith.constant 0 : i32
    return %arg0, %c0_i32 : i32, i32
  }
  func.func @transform_1(%arg0: i32) -> (i32, i32) {
    %c0_i32 = arith.constant 0 : i32
    %c0_i32_0 = arith.constant 0 : i32
    %c0_i32_1 = arith.constant 0 : i32
    return %c0_i32, %c0_i32_0 : i32, i32
  }
  func.func @transform_2(%arg0: i32) -> (i32, i32) {
    %c0_i32 = arith.constant 0 : i32
    %c0_i32_0 = arith.constant 0 : i32
    %c0_i32_1 = arith.constant 0 : i32
    return %c0_i32, %c0_i32_0 : i32, i32
  }
  func.func @transform_3(%arg0: i32) -> (i32, i32) {
    %c0_i32 = arith.constant 0 : i32
    %c0_i32_0 = arith.constant 0 : i32
    return %arg0, %c0_i32 : i32, i32
  }
}

module attributes {stable_mosaic.version = 11 : i64} {
  func.func @_bmm_kernel(%arg0: i32, %arg1: i32, %arg2: i32, %arg3: i32, %arg4: memref<1x32x2048xbf16, #tpu.memory_space<vmem>>, %arg5: memref<1x2048x256xbf16, #tpu.memory_space<vmem>>, %arg6: memref<1x32x256xf32, #tpu.memory_space<vmem>>, %arg7: memref<32x256xf32, #tpu.memory_space<vmem>>) attributes {dimension_semantics = [#tpu.dimension_semantics<parallel>, #tpu.dimension_semantics<parallel>, #tpu.dimension_semantics<parallel>, #tpu.dimension_semantics<arbitrary>], iteration_bounds = array<i64: 4, 1, 1, 1>, scalar_prefetch = 0 : i64, scratch_operands = 1 : i64, tpu.core_type = #tpu.core_type<tc>, window_params = [{transform_indices = @transform_0, window_bounds = array<i64: 1, 32, 2048>}, {transform_indices = @transform_1, window_bounds = array<i64: 1, 2048, 256>}, {transform_indices = @transform_2, window_bounds = array<i64: 1, 32, 256>}]} {
    %c0_i32 = arith.constant 0 : i32
    %0 = arith.cmpi eq, %arg3, %c0_i32 : i32
    %1 = arith.extui %0 : i1 to i32
    %c0_i32_0 = arith.constant 0 : i32
    %2 = arith.cmpi ne, %1, %c0_i32_0 : i32
    scf.if %2 {
      %cst_12 = arith.constant 0.000000e+00 : f32
      %14 = vector.broadcast %cst_12 : f32 to vector<32x256xf32>
      %c0_13 = arith.constant 0 : index
      %c0_14 = arith.constant 0 : index
      %15 = vector.load %arg7[%c0_13, %c0_14] : memref<32x256xf32, #tpu.memory_space<vmem>>, vector<32x256xf32>
      tpu.vector_store %arg7[%c0_13, %c0_14], %14 {strides = array<i32>} : memref<32x256xf32, #tpu.memory_space<vmem>>, vector<32x256xf32>,
    } else {
    }
    %c0 = arith.constant 0 : index
    %c0_1 = arith.constant 0 : index
    %3 = vector.load %arg7[%c0, %c0_1] : memref<32x256xf32, #tpu.memory_space<vmem>>, vector<32x256xf32>
    %c0_2 = arith.constant 0 : index
    %c0_3 = arith.constant 0 : index
    %c0_4 = arith.constant 0 : index
    %4 = vector.load %arg4[%c0_2, %c0_3, %c0_4] : memref<1x32x2048xbf16, #tpu.memory_space<vmem>>, vector<1x32x2048xbf16>
    %5 = vector.shape_cast %4 : vector<1x32x2048xbf16> to vector<32x2048xbf16>
    %c0_5 = arith.constant 0 : index
    %c0_6 = arith.constant 0 : index
    %c0_7 = arith.constant 0 : index
    %6 = vector.load %arg5[%c0_5, %c0_6, %c0_7] : memref<1x2048x256xbf16, #tpu.memory_space<vmem>>, vector<1x2048x256xbf16>
    %7 = vector.shape_cast %6 : vector<1x2048x256xbf16> to vector<2048x256xbf16>
    %cst = arith.constant dense<0.000000e+00> : vector<32x256xf32>
    %8 = tpu.matmul %5, %7, %cst {dimension_numbers = #tpu.dot_dimension_numbers<[1], [0], [0], [1], [0, 0, 1, 1], [], []>} : vector<32x2048xbf16>, vector<2048x256xbf16>, vector<32x256xf32> -> vector<32x256xf32>
    %9 = arith.addf %3, %8 : vector<32x256xf32>
    %c0_8 = arith.constant 0 : index
    %c0_9 = arith.constant 0 : index
    %10 = vector.load %arg7[%c0_8, %c0_9] : memref<32x256xf32, #tpu.memory_space<vmem>>, vector<32x256xf32>
    tpu.vector_store %arg7[%c0_8, %c0_9], %9 {strides = array<i32>} : memref<32x256xf32, #tpu.memory_space<vmem>>, vector<32x256xf32>,
    %c0_i32_10 = arith.constant 0 : i32
    %11 = arith.cmpi eq, %arg3, %c0_i32_10 : i32
    %12 = arith.extui %11 : i1 to i32
    %c0_i32_11 = arith.constant 0 : i32
    %13 = arith.cmpi ne, %12, %c0_i32_11 : i32
    scf.if %13 {
      %c0_12 = arith.constant 0 : index
      %c0_13 = arith.constant 0 : index
      %14 = vector.load %arg7[%c0_12, %c0_13] : memref<32x256xf32, #tpu.memory_space<vmem>>, vector<32x256xf32>
      %c0_14 = arith.constant 0 : index
      %c0_15 = arith.constant 0 : index
      %c0_16 = arith.constant 0 : index
      %15 = vector.load %arg6[%c0_14, %c0_15, %c0_16] : memref<1x32x256xf32, #tpu.memory_space<vmem>>, vector<1x32x256xf32>
      %16 = vector.shape_cast %15 : vector<1x32x256xf32> to vector<32x256xf32>
      %17 = vector.shape_cast %14 : vector<32x256xf32> to vector<1x32x256xf32>
      tpu.vector_store %arg6[%c0_14, %c0_15, %c0_16], %17 {strides = array<i32>} : memref<1x32x256xf32, #tpu.memory_space<vmem>>, vector<1x32x256xf32>,
    } else {
    }
    return
  }
  func.func @transform_0(%arg0: i32, %arg1: i32, %arg2: i32, %arg3: i32) -> (i32, i32, i32) {
    %c0_i32 = arith.constant 0 : i32
    return %arg0, %arg1, %arg3 : i32, i32, i32
  }
  func.func @transform_1(%arg0: i32, %arg1: i32, %arg2: i32, %arg3: i32) -> (i32, i32, i32) {
    %c0_i32 = arith.constant 0 : i32
    return %arg0, %arg3, %arg2 : i32, i32, i32
  }
  func.func @transform_2(%arg0: i32, %arg1: i32, %arg2: i32, %arg3: i32) -> (i32, i32, i32) {
    %c0_i32 = arith.constant 0 : i32
    return %arg0, %arg1, %arg2 : i32, i32, i32
  }
}

module attributes {stable_mosaic.version = 11 : i64} {
  func.func @_bn_relu_kernel(%arg0: i32, %arg1: memref<128x256xf32, #tpu.memory_space<vmem>>, %arg2: memref<1x256xf32, #tpu.memory_space<vmem>>, %arg3: memref<1x256xf32, #tpu.memory_space<vmem>>, %arg4: memref<128x256xbf16, #tpu.memory_space<vmem>>) attributes {dimension_semantics = [#tpu.dimension_semantics<parallel>], iteration_bounds = array<i64: 1>, scalar_prefetch = 0 : i64, scratch_operands = 0 : i64, tpu.core_type = #tpu.core_type<tc>, window_params = [{transform_indices = @transform_0, window_bounds = array<i64: 128, 256>}, {pipeline_mode = #tpu.pipeline_mode<synchronous>, transform_indices = @transform_1, window_bounds = array<i64: 1, 256>}, {pipeline_mode = #tpu.pipeline_mode<synchronous>, transform_indices = @transform_2, window_bounds = array<i64: 1, 256>}, {transform_indices = @transform_3, window_bounds = array<i64: 128, 256>}]} {
    %c0 = arith.constant 0 : index
    %c0_0 = arith.constant 0 : index
    %0 = vector.load %arg1[%c0, %c0_0] : memref<128x256xf32, #tpu.memory_space<vmem>>, vector<128x256xf32>
    %c0_1 = arith.constant 0 : index
    %c0_2 = arith.constant 0 : index
    %1 = vector.load %arg2[%c0_1, %c0_2] : memref<1x256xf32, #tpu.memory_space<vmem>>, vector<1x256xf32>
    %2 = vector.broadcast %1 : vector<1x256xf32> to vector<128x256xf32>
    %3 = arith.mulf %0, %2 : vector<128x256xf32>
    %c0_3 = arith.constant 0 : index
    %c0_4 = arith.constant 0 : index
    %4 = vector.load %arg3[%c0_3, %c0_4] : memref<1x256xf32, #tpu.memory_space<vmem>>, vector<1x256xf32>
    %5 = vector.broadcast %4 : vector<1x256xf32> to vector<128x256xf32>
    %6 = arith.addf %3, %5 : vector<128x256xf32>
    %cst = arith.constant 0.000000e+00 : f32
    %7 = vector.broadcast %cst : f32 to vector<128x256xf32>
    %8 = arith.maximumf %6, %7 : vector<128x256xf32>
    %9 = arith.truncf %8 : vector<128x256xf32> to vector<128x256xbf16>
    %c0_5 = arith.constant 0 : index
    %c0_6 = arith.constant 0 : index
    %10 = vector.load %arg4[%c0_5, %c0_6] : memref<128x256xbf16, #tpu.memory_space<vmem>>, vector<128x256xbf16>
    tpu.vector_store %arg4[%c0_5, %c0_6], %9 {strides = array<i32>} : memref<128x256xbf16, #tpu.memory_space<vmem>>, vector<128x256xbf16>,
    return
  }
  func.func @transform_0(%arg0: i32) -> (i32, i32) {
    %c0_i32 = arith.constant 0 : i32
    %c0_i32_0 = arith.constant 0 : i32
    return %arg0, %c0_i32 : i32, i32
  }
  func.func @transform_1(%arg0: i32) -> (i32, i32) {
    %c0_i32 = arith.constant 0 : i32
    %c0_i32_0 = arith.constant 0 : i32
    %c0_i32_1 = arith.constant 0 : i32
    return %c0_i32, %c0_i32_0 : i32, i32
  }
  func.func @transform_2(%arg0: i32) -> (i32, i32) {
    %c0_i32 = arith.constant 0 : i32
    %c0_i32_0 = arith.constant 0 : i32
    %c0_i32_1 = arith.constant 0 : i32
    return %c0_i32, %c0_i32_0 : i32, i32
  }
  func.func @transform_3(%arg0: i32) -> (i32, i32) {
    %c0_i32 = arith.constant 0 : i32
    %c0_i32_0 = arith.constant 0 : i32
    return %arg0, %c0_i32 : i32, i32
  }
}

module attributes {stable_mosaic.version = 11 : i64} {
  func.func @_bmm_kernel(%arg0: i32, %arg1: i32, %arg2: i32, %arg3: i32, %arg4: memref<1x128x1024xbf16, #tpu.memory_space<vmem>>, %arg5: memref<1x1024x128xbf16, #tpu.memory_space<vmem>>, %arg6: memref<1x128x128xf32, #tpu.memory_space<vmem>>, %arg7: memref<128x128xf32, #tpu.memory_space<vmem>>) attributes {dimension_semantics = [#tpu.dimension_semantics<parallel>, #tpu.dimension_semantics<parallel>, #tpu.dimension_semantics<parallel>, #tpu.dimension_semantics<arbitrary>], iteration_bounds = array<i64: 4, 1, 1, 1>, scalar_prefetch = 0 : i64, scratch_operands = 1 : i64, tpu.core_type = #tpu.core_type<tc>, window_params = [{transform_indices = @transform_0, window_bounds = array<i64: 1, 128, 1024>}, {transform_indices = @transform_1, window_bounds = array<i64: 1, 1024, 128>}, {transform_indices = @transform_2, window_bounds = array<i64: 1, 128, 128>}]} {
    %c0_i32 = arith.constant 0 : i32
    %0 = arith.cmpi eq, %arg3, %c0_i32 : i32
    %1 = arith.extui %0 : i1 to i32
    %c0_i32_0 = arith.constant 0 : i32
    %2 = arith.cmpi ne, %1, %c0_i32_0 : i32
    scf.if %2 {
      %cst_12 = arith.constant 0.000000e+00 : f32
      %14 = vector.broadcast %cst_12 : f32 to vector<128x128xf32>
      %c0_13 = arith.constant 0 : index
      %c0_14 = arith.constant 0 : index
      %15 = vector.load %arg7[%c0_13, %c0_14] : memref<128x128xf32, #tpu.memory_space<vmem>>, vector<128x128xf32>
      tpu.vector_store %arg7[%c0_13, %c0_14], %14 {strides = array<i32>} : memref<128x128xf32, #tpu.memory_space<vmem>>, vector<128x128xf32>,
    } else {
    }
    %c0 = arith.constant 0 : index
    %c0_1 = arith.constant 0 : index
    %3 = vector.load %arg7[%c0, %c0_1] : memref<128x128xf32, #tpu.memory_space<vmem>>, vector<128x128xf32>
    %c0_2 = arith.constant 0 : index
    %c0_3 = arith.constant 0 : index
    %c0_4 = arith.constant 0 : index
    %4 = vector.load %arg4[%c0_2, %c0_3, %c0_4] : memref<1x128x1024xbf16, #tpu.memory_space<vmem>>, vector<1x128x1024xbf16>
    %5 = vector.shape_cast %4 : vector<1x128x1024xbf16> to vector<128x1024xbf16>
    %c0_5 = arith.constant 0 : index
    %c0_6 = arith.constant 0 : index
    %c0_7 = arith.constant 0 : index
    %6 = vector.load %arg5[%c0_5, %c0_6, %c0_7] : memref<1x1024x128xbf16, #tpu.memory_space<vmem>>, vector<1x1024x128xbf16>
    %7 = vector.shape_cast %6 : vector<1x1024x128xbf16> to vector<1024x128xbf16>
    %cst = arith.constant dense<0.000000e+00> : vector<128x128xf32>
    %8 = tpu.matmul %5, %7, %cst {dimension_numbers = #tpu.dot_dimension_numbers<[1], [0], [0], [1], [0, 0, 1, 1], [], []>} : vector<128x1024xbf16>, vector<1024x128xbf16>, vector<128x128xf32> -> vector<128x128xf32>
    %9 = arith.addf %3, %8 : vector<128x128xf32>
    %c0_8 = arith.constant 0 : index
    %c0_9 = arith.constant 0 : index
    %10 = vector.load %arg7[%c0_8, %c0_9] : memref<128x128xf32, #tpu.memory_space<vmem>>, vector<128x128xf32>
    tpu.vector_store %arg7[%c0_8, %c0_9], %9 {strides = array<i32>} : memref<128x128xf32, #tpu.memory_space<vmem>>, vector<128x128xf32>,
    %c0_i32_10 = arith.constant 0 : i32
    %11 = arith.cmpi eq, %arg3, %c0_i32_10 : i32
    %12 = arith.extui %11 : i1 to i32
    %c0_i32_11 = arith.constant 0 : i32
    %13 = arith.cmpi ne, %12, %c0_i32_11 : i32
    scf.if %13 {
      %c0_12 = arith.constant 0 : index
      %c0_13 = arith.constant 0 : index
      %14 = vector.load %arg7[%c0_12, %c0_13] : memref<128x128xf32, #tpu.memory_space<vmem>>, vector<128x128xf32>
      %c0_14 = arith.constant 0 : index
      %c0_15 = arith.constant 0 : index
      %c0_16 = arith.constant 0 : index
      %15 = vector.load %arg6[%c0_14, %c0_15, %c0_16] : memref<1x128x128xf32, #tpu.memory_space<vmem>>, vector<1x128x128xf32>
      %16 = vector.shape_cast %15 : vector<1x128x128xf32> to vector<128x128xf32>
      %17 = vector.shape_cast %14 : vector<128x128xf32> to vector<1x128x128xf32>
      tpu.vector_store %arg6[%c0_14, %c0_15, %c0_16], %17 {strides = array<i32>} : memref<1x128x128xf32, #tpu.memory_space<vmem>>, vector<1x128x128xf32>,
    } else {
    }
    return
  }
  func.func @transform_0(%arg0: i32, %arg1: i32, %arg2: i32, %arg3: i32) -> (i32, i32, i32) {
    %c0_i32 = arith.constant 0 : i32
    return %arg0, %arg1, %arg3 : i32, i32, i32
  }
  func.func @transform_1(%arg0: i32, %arg1: i32, %arg2: i32, %arg3: i32) -> (i32, i32, i32) {
    %c0_i32 = arith.constant 0 : i32
    return %arg0, %arg3, %arg2 : i32, i32, i32
  }
  func.func @transform_2(%arg0: i32, %arg1: i32, %arg2: i32, %arg3: i32) -> (i32, i32, i32) {
    %c0_i32 = arith.constant 0 : i32
    return %arg0, %arg1, %arg2 : i32, i32, i32
  }
}

module attributes {stable_mosaic.version = 11 : i64} {
  func.func @_bn_relu_kernel(%arg0: i32, %arg1: memref<512x128xf32, #tpu.memory_space<vmem>>, %arg2: memref<1x128xf32, #tpu.memory_space<vmem>>, %arg3: memref<1x128xf32, #tpu.memory_space<vmem>>, %arg4: memref<512x128xbf16, #tpu.memory_space<vmem>>) attributes {dimension_semantics = [#tpu.dimension_semantics<parallel>], iteration_bounds = array<i64: 1>, scalar_prefetch = 0 : i64, scratch_operands = 0 : i64, tpu.core_type = #tpu.core_type<tc>, window_params = [{transform_indices = @transform_0, window_bounds = array<i64: 512, 128>}, {pipeline_mode = #tpu.pipeline_mode<synchronous>, transform_indices = @transform_1, window_bounds = array<i64: 1, 128>}, {pipeline_mode = #tpu.pipeline_mode<synchronous>, transform_indices = @transform_2, window_bounds = array<i64: 1, 128>}, {transform_indices = @transform_3, window_bounds = array<i64: 512, 128>}]} {
    %c0 = arith.constant 0 : index
    %c0_0 = arith.constant 0 : index
    %0 = vector.load %arg1[%c0, %c0_0] : memref<512x128xf32, #tpu.memory_space<vmem>>, vector<512x128xf32>
    %c0_1 = arith.constant 0 : index
    %c0_2 = arith.constant 0 : index
    %1 = vector.load %arg2[%c0_1, %c0_2] : memref<1x128xf32, #tpu.memory_space<vmem>>, vector<1x128xf32>
    %2 = vector.broadcast %1 : vector<1x128xf32> to vector<512x128xf32>
    %3 = arith.mulf %0, %2 : vector<512x128xf32>
    %c0_3 = arith.constant 0 : index
    %c0_4 = arith.constant 0 : index
    %4 = vector.load %arg3[%c0_3, %c0_4] : memref<1x128xf32, #tpu.memory_space<vmem>>, vector<1x128xf32>
    %5 = vector.broadcast %4 : vector<1x128xf32> to vector<512x128xf32>
    %6 = arith.addf %3, %5 : vector<512x128xf32>
    %cst = arith.constant 0.000000e+00 : f32
    %7 = vector.broadcast %cst : f32 to vector<512x128xf32>
    %8 = arith.maximumf %6, %7 : vector<512x128xf32>
    %9 = arith.truncf %8 : vector<512x128xf32> to vector<512x128xbf16>
    %c0_5 = arith.constant 0 : index
    %c0_6 = arith.constant 0 : index
    %10 = vector.load %arg4[%c0_5, %c0_6] : memref<512x128xbf16, #tpu.memory_space<vmem>>, vector<512x128xbf16>
    tpu.vector_store %arg4[%c0_5, %c0_6], %9 {strides = array<i32>} : memref<512x128xbf16, #tpu.memory_space<vmem>>, vector<512x128xbf16>,
    return
  }
  func.func @transform_0(%arg0: i32) -> (i32, i32) {
    %c0_i32 = arith.constant 0 : i32
    %c0_i32_0 = arith.constant 0 : i32
    return %arg0, %c0_i32 : i32, i32
  }
  func.func @transform_1(%arg0: i32) -> (i32, i32) {
    %c0_i32 = arith.constant 0 : i32
    %c0_i32_0 = arith.constant 0 : i32
    %c0_i32_1 = arith.constant 0 : i32
    return %c0_i32, %c0_i32_0 : i32, i32
  }
  func.func @transform_2(%arg0: i32) -> (i32, i32) {
    %c0_i32 = arith.constant 0 : i32
    %c0_i32_0 = arith.constant 0 : i32
    %c0_i32_1 = arith.constant 0 : i32
    return %c0_i32, %c0_i32_0 : i32, i32
  }
  func.func @transform_3(%arg0: i32) -> (i32, i32) {
    %c0_i32 = arith.constant 0 : i32
    %c0_i32_0 = arith.constant 0 : i32
    return %arg0, %c0_i32 : i32, i32
  }
}

module attributes {stable_mosaic.version = 11 : i64} {
  func.func @_bmm_kernel(%arg0: i32, %arg1: i32, %arg2: i32, %arg3: i32, %arg4: memref<1x256x512xbf16, #tpu.memory_space<vmem>>, %arg5: memref<1x512x128xbf16, #tpu.memory_space<vmem>>, %arg6: memref<1x256x128xf32, #tpu.memory_space<vmem>>, %arg7: memref<256x128xf32, #tpu.memory_space<vmem>>) attributes {dimension_semantics = [#tpu.dimension_semantics<parallel>, #tpu.dimension_semantics<parallel>, #tpu.dimension_semantics<parallel>, #tpu.dimension_semantics<arbitrary>], iteration_bounds = array<i64: 4, 2, 1, 1>, scalar_prefetch = 0 : i64, scratch_operands = 1 : i64, tpu.core_type = #tpu.core_type<tc>, window_params = [{transform_indices = @transform_0, window_bounds = array<i64: 1, 256, 512>}, {transform_indices = @transform_1, window_bounds = array<i64: 1, 512, 128>}, {transform_indices = @transform_2, window_bounds = array<i64: 1, 256, 128>}]} {
    %c0_i32 = arith.constant 0 : i32
    %0 = arith.cmpi eq, %arg3, %c0_i32 : i32
    %1 = arith.extui %0 : i1 to i32
    %c0_i32_0 = arith.constant 0 : i32
    %2 = arith.cmpi ne, %1, %c0_i32_0 : i32
    scf.if %2 {
      %cst_12 = arith.constant 0.000000e+00 : f32
      %14 = vector.broadcast %cst_12 : f32 to vector<256x128xf32>
      %c0_13 = arith.constant 0 : index
      %c0_14 = arith.constant 0 : index
      %15 = vector.load %arg7[%c0_13, %c0_14] : memref<256x128xf32, #tpu.memory_space<vmem>>, vector<256x128xf32>
      tpu.vector_store %arg7[%c0_13, %c0_14], %14 {strides = array<i32>} : memref<256x128xf32, #tpu.memory_space<vmem>>, vector<256x128xf32>,
    } else {
    }
    %c0 = arith.constant 0 : index
    %c0_1 = arith.constant 0 : index
    %3 = vector.load %arg7[%c0, %c0_1] : memref<256x128xf32, #tpu.memory_space<vmem>>, vector<256x128xf32>
    %c0_2 = arith.constant 0 : index
    %c0_3 = arith.constant 0 : index
    %c0_4 = arith.constant 0 : index
    %4 = vector.load %arg4[%c0_2, %c0_3, %c0_4] : memref<1x256x512xbf16, #tpu.memory_space<vmem>>, vector<1x256x512xbf16>
    %5 = vector.shape_cast %4 : vector<1x256x512xbf16> to vector<256x512xbf16>
    %c0_5 = arith.constant 0 : index
    %c0_6 = arith.constant 0 : index
    %c0_7 = arith.constant 0 : index
    %6 = vector.load %arg5[%c0_5, %c0_6, %c0_7] : memref<1x512x128xbf16, #tpu.memory_space<vmem>>, vector<1x512x128xbf16>
    %7 = vector.shape_cast %6 : vector<1x512x128xbf16> to vector<512x128xbf16>
    %cst = arith.constant dense<0.000000e+00> : vector<256x128xf32>
    %8 = tpu.matmul %5, %7, %cst {dimension_numbers = #tpu.dot_dimension_numbers<[1], [0], [0], [1], [0, 0, 1, 1], [], []>} : vector<256x512xbf16>, vector<512x128xbf16>, vector<256x128xf32> -> vector<256x128xf32>
    %9 = arith.addf %3, %8 : vector<256x128xf32>
    %c0_8 = arith.constant 0 : index
    %c0_9 = arith.constant 0 : index
    %10 = vector.load %arg7[%c0_8, %c0_9] : memref<256x128xf32, #tpu.memory_space<vmem>>, vector<256x128xf32>
    tpu.vector_store %arg7[%c0_8, %c0_9], %9 {strides = array<i32>} : memref<256x128xf32, #tpu.memory_space<vmem>>, vector<256x128xf32>,
    %c0_i32_10 = arith.constant 0 : i32
    %11 = arith.cmpi eq, %arg3, %c0_i32_10 : i32
    %12 = arith.extui %11 : i1 to i32
    %c0_i32_11 = arith.constant 0 : i32
    %13 = arith.cmpi ne, %12, %c0_i32_11 : i32
    scf.if %13 {
      %c0_12 = arith.constant 0 : index
      %c0_13 = arith.constant 0 : index
      %14 = vector.load %arg7[%c0_12, %c0_13] : memref<256x128xf32, #tpu.memory_space<vmem>>, vector<256x128xf32>
      %c0_14 = arith.constant 0 : index
      %c0_15 = arith.constant 0 : index
      %c0_16 = arith.constant 0 : index
      %15 = vector.load %arg6[%c0_14, %c0_15, %c0_16] : memref<1x256x128xf32, #tpu.memory_space<vmem>>, vector<1x256x128xf32>
      %16 = vector.shape_cast %15 : vector<1x256x128xf32> to vector<256x128xf32>
      %17 = vector.shape_cast %14 : vector<256x128xf32> to vector<1x256x128xf32>
      tpu.vector_store %arg6[%c0_14, %c0_15, %c0_16], %17 {strides = array<i32>} : memref<1x256x128xf32, #tpu.memory_space<vmem>>, vector<1x256x128xf32>,
    } else {
    }
    return
  }
  func.func @transform_0(%arg0: i32, %arg1: i32, %arg2: i32, %arg3: i32) -> (i32, i32, i32) {
    %c0_i32 = arith.constant 0 : i32
    return %arg0, %arg1, %arg3 : i32, i32, i32
  }
  func.func @transform_1(%arg0: i32, %arg1: i32, %arg2: i32, %arg3: i32) -> (i32, i32, i32) {
    %c0_i32 = arith.constant 0 : i32
    return %arg0, %arg3, %arg2 : i32, i32, i32
  }
  func.func @transform_2(%arg0: i32, %arg1: i32, %arg2: i32, %arg3: i32) -> (i32, i32, i32) {
    %c0_i32 = arith.constant 0 : i32
    return %arg0, %arg1, %arg2 : i32, i32, i32
  }
}

module attributes {stable_mosaic.version = 11 : i64} {
  func.func @_bn_relu_kernel(%arg0: i32, %arg1: memref<1024x128xf32, #tpu.memory_space<vmem>>, %arg2: memref<1x128xf32, #tpu.memory_space<vmem>>, %arg3: memref<1x128xf32, #tpu.memory_space<vmem>>, %arg4: memref<1024x128xbf16, #tpu.memory_space<vmem>>) attributes {dimension_semantics = [#tpu.dimension_semantics<parallel>], iteration_bounds = array<i64: 2>, scalar_prefetch = 0 : i64, scratch_operands = 0 : i64, tpu.core_type = #tpu.core_type<tc>, window_params = [{transform_indices = @transform_0, window_bounds = array<i64: 1024, 128>}, {pipeline_mode = #tpu.pipeline_mode<synchronous>, transform_indices = @transform_1, window_bounds = array<i64: 1, 128>}, {pipeline_mode = #tpu.pipeline_mode<synchronous>, transform_indices = @transform_2, window_bounds = array<i64: 1, 128>}, {transform_indices = @transform_3, window_bounds = array<i64: 1024, 128>}]} {
    %c0 = arith.constant 0 : index
    %c0_0 = arith.constant 0 : index
    %0 = vector.load %arg1[%c0, %c0_0] : memref<1024x128xf32, #tpu.memory_space<vmem>>, vector<1024x128xf32>
    %c0_1 = arith.constant 0 : index
    %c0_2 = arith.constant 0 : index
    %1 = vector.load %arg2[%c0_1, %c0_2] : memref<1x128xf32, #tpu.memory_space<vmem>>, vector<1x128xf32>
    %2 = vector.broadcast %1 : vector<1x128xf32> to vector<1024x128xf32>
    %3 = arith.mulf %0, %2 : vector<1024x128xf32>
    %c0_3 = arith.constant 0 : index
    %c0_4 = arith.constant 0 : index
    %4 = vector.load %arg3[%c0_3, %c0_4] : memref<1x128xf32, #tpu.memory_space<vmem>>, vector<1x128xf32>
    %5 = vector.broadcast %4 : vector<1x128xf32> to vector<1024x128xf32>
    %6 = arith.addf %3, %5 : vector<1024x128xf32>
    %cst = arith.constant 0.000000e+00 : f32
    %7 = vector.broadcast %cst : f32 to vector<1024x128xf32>
    %8 = arith.maximumf %6, %7 : vector<1024x128xf32>
    %9 = arith.truncf %8 : vector<1024x128xf32> to vector<1024x128xbf16>
    %c0_5 = arith.constant 0 : index
    %c0_6 = arith.constant 0 : index
    %10 = vector.load %arg4[%c0_5, %c0_6] : memref<1024x128xbf16, #tpu.memory_space<vmem>>, vector<1024x128xbf16>
    tpu.vector_store %arg4[%c0_5, %c0_6], %9 {strides = array<i32>} : memref<1024x128xbf16, #tpu.memory_space<vmem>>, vector<1024x128xbf16>,
    return
  }
  func.func @transform_0(%arg0: i32) -> (i32, i32) {
    %c0_i32 = arith.constant 0 : i32
    %c0_i32_0 = arith.constant 0 : i32
    return %arg0, %c0_i32 : i32, i32
  }
  func.func @transform_1(%arg0: i32) -> (i32, i32) {
    %c0_i32 = arith.constant 0 : i32
    %c0_i32_0 = arith.constant 0 : i32
    %c0_i32_1 = arith.constant 0 : i32
    return %c0_i32, %c0_i32_0 : i32, i32
  }
  func.func @transform_2(%arg0: i32) -> (i32, i32) {
    %c0_i32 = arith.constant 0 : i32
    %c0_i32_0 = arith.constant 0 : i32
    %c0_i32_1 = arith.constant 0 : i32
    return %c0_i32, %c0_i32_0 : i32, i32
  }
  func.func @transform_3(%arg0: i32) -> (i32, i32) {
    %c0_i32 = arith.constant 0 : i32
    %c0_i32_0 = arith.constant 0 : i32
    return %arg0, %c0_i32 : i32, i32
  }
}

module attributes {stable_mosaic.version = 11 : i64} {
  func.func @_bmm_kernel(%arg0: i32, %arg1: i32, %arg2: i32, %arg3: i32, %arg4: memref<1x256x512xbf16, #tpu.memory_space<vmem>>, %arg5: memref<1x512x128xbf16, #tpu.memory_space<vmem>>, %arg6: memref<1x256x128xf32, #tpu.memory_space<vmem>>, %arg7: memref<256x128xf32, #tpu.memory_space<vmem>>) attributes {dimension_semantics = [#tpu.dimension_semantics<parallel>, #tpu.dimension_semantics<parallel>, #tpu.dimension_semantics<parallel>, #tpu.dimension_semantics<arbitrary>], iteration_bounds = array<i64: 4, 8, 1, 1>, scalar_prefetch = 0 : i64, scratch_operands = 1 : i64, tpu.core_type = #tpu.core_type<tc>, window_params = [{transform_indices = @transform_0, window_bounds = array<i64: 1, 256, 512>}, {transform_indices = @transform_1, window_bounds = array<i64: 1, 512, 128>}, {transform_indices = @transform_2, window_bounds = array<i64: 1, 256, 128>}]} {
    %c0_i32 = arith.constant 0 : i32
    %0 = arith.cmpi eq, %arg3, %c0_i32 : i32
    %1 = arith.extui %0 : i1 to i32
    %c0_i32_0 = arith.constant 0 : i32
    %2 = arith.cmpi ne, %1, %c0_i32_0 : i32
    scf.if %2 {
      %cst_12 = arith.constant 0.000000e+00 : f32
      %14 = vector.broadcast %cst_12 : f32 to vector<256x128xf32>
      %c0_13 = arith.constant 0 : index
      %c0_14 = arith.constant 0 : index
      %15 = vector.load %arg7[%c0_13, %c0_14] : memref<256x128xf32, #tpu.memory_space<vmem>>, vector<256x128xf32>
      tpu.vector_store %arg7[%c0_13, %c0_14], %14 {strides = array<i32>} : memref<256x128xf32, #tpu.memory_space<vmem>>, vector<256x128xf32>,
    } else {
    }
    %c0 = arith.constant 0 : index
    %c0_1 = arith.constant 0 : index
    %3 = vector.load %arg7[%c0, %c0_1] : memref<256x128xf32, #tpu.memory_space<vmem>>, vector<256x128xf32>
    %c0_2 = arith.constant 0 : index
    %c0_3 = arith.constant 0 : index
    %c0_4 = arith.constant 0 : index
    %4 = vector.load %arg4[%c0_2, %c0_3, %c0_4] : memref<1x256x512xbf16, #tpu.memory_space<vmem>>, vector<1x256x512xbf16>
    %5 = vector.shape_cast %4 : vector<1x256x512xbf16> to vector<256x512xbf16>
    %c0_5 = arith.constant 0 : index
    %c0_6 = arith.constant 0 : index
    %c0_7 = arith.constant 0 : index
    %6 = vector.load %arg5[%c0_5, %c0_6, %c0_7] : memref<1x512x128xbf16, #tpu.memory_space<vmem>>, vector<1x512x128xbf16>
    %7 = vector.shape_cast %6 : vector<1x512x128xbf16> to vector<512x128xbf16>
    %cst = arith.constant dense<0.000000e+00> : vector<256x128xf32>
    %8 = tpu.matmul %5, %7, %cst {dimension_numbers = #tpu.dot_dimension_numbers<[1], [0], [0], [1], [0, 0, 1, 1], [], []>} : vector<256x512xbf16>, vector<512x128xbf16>, vector<256x128xf32> -> vector<256x128xf32>
    %9 = arith.addf %3, %8 : vector<256x128xf32>
    %c0_8 = arith.constant 0 : index
    %c0_9 = arith.constant 0 : index
    %10 = vector.load %arg7[%c0_8, %c0_9] : memref<256x128xf32, #tpu.memory_space<vmem>>, vector<256x128xf32>
    tpu.vector_store %arg7[%c0_8, %c0_9], %9 {strides = array<i32>} : memref<256x128xf32, #tpu.memory_space<vmem>>, vector<256x128xf32>,
    %c0_i32_10 = arith.constant 0 : i32
    %11 = arith.cmpi eq, %arg3, %c0_i32_10 : i32
    %12 = arith.extui %11 : i1 to i32
    %c0_i32_11 = arith.constant 0 : i32
    %13 = arith.cmpi ne, %12, %c0_i32_11 : i32
    scf.if %13 {
      %c0_12 = arith.constant 0 : index
      %c0_13 = arith.constant 0 : index
      %14 = vector.load %arg7[%c0_12, %c0_13] : memref<256x128xf32, #tpu.memory_space<vmem>>, vector<256x128xf32>
      %15 = math.tanh %14 : vector<256x128xf32>
      %c0_14 = arith.constant 0 : index
      %c0_15 = arith.constant 0 : index
      %c0_16 = arith.constant 0 : index
      %16 = vector.load %arg6[%c0_14, %c0_15, %c0_16] : memref<1x256x128xf32, #tpu.memory_space<vmem>>, vector<1x256x128xf32>
      %17 = vector.shape_cast %16 : vector<1x256x128xf32> to vector<256x128xf32>
      %18 = vector.shape_cast %15 : vector<256x128xf32> to vector<1x256x128xf32>
      tpu.vector_store %arg6[%c0_14, %c0_15, %c0_16], %18 {strides = array<i32>} : memref<1x256x128xf32, #tpu.memory_space<vmem>>, vector<1x256x128xf32>,
    } else {
    }
    return
  }
  func.func @transform_0(%arg0: i32, %arg1: i32, %arg2: i32, %arg3: i32) -> (i32, i32, i32) {
    %c0_i32 = arith.constant 0 : i32
    return %arg0, %arg1, %arg3 : i32, i32, i32
  }
  func.func @transform_1(%arg0: i32, %arg1: i32, %arg2: i32, %arg3: i32) -> (i32, i32, i32) {
    %c0_i32 = arith.constant 0 : i32
    return %arg0, %arg3, %arg2 : i32, i32, i32
  }
  func.func @transform_2(%arg0: i32, %arg1: i32, %arg2: i32, %arg3: i32) -> (i32, i32, i32) {
    %c0_i32 = arith.constant 0 : i32
    return %arg0, %arg1, %arg2 : i32, i32, i32
  }
}

</mosaic_0001>

<bundles_post_ra>
// kernel: squeeze.1
= control target key start
LH: loop header
LB: loop body
LE: loop exit
PB: predicated region body
PF: predicated region fallthrough
CT: control target
= control target key end

     0   :  { %s1540_s0 = inlined_call_operand.vmem [shape: f32[1,2,8192], index: 0, kind: input, shape index: {}]   ;;  %s1541_s1 = inlined_call_operand.vmem [shape: f32[32,512], index: 1, kind: output, shape index: {}]  }
   0x1   :  { %v764_v0 = vld [vmem:[%s1540_s0 + $0x7e] sm:$0x3]  ;;  %v765_v1 = vld [vmem:[%s1540_s0 + $0x7c] sm:$0x3]  ;;  %v766_v2 = vld [vmem:[%s1540_s0 + $0x7a] sm:$0x3] }
   0x2   :  { %8 = vst [vmem:[#allocation0 + $0x1f8] sm:$0x3] %v764_v0  ;;  %13 = vst [vmem:[#allocation0 + $0x1f0] sm:$0x3] %v765_v1  ;;  %v767_v3 = vld [vmem:[%s1540_s0 + $0x78] sm:$0x3] }
   0x3   :  { %18 = vst [vmem:[#allocation0 + $0x1e8] sm:$0x3] %v766_v2  ;;  %v768_v4 = vld [vmem:[%s1540_s0 + $0x76] sm:$0x3]  ;;  %v769_v5 = vld [vmem:[%s1540_s0 + $0x74] sm:$0x3] }
   0x4   :  { %23 = vst [vmem:[#allocation0 + $0x1e0] sm:$0x3] %v767_v3  ;;  %28 = vst [vmem:[#allocation0 + $0x1d8] sm:$0x3] %v768_v4  ;;  %v770_v6 = vld [vmem:[%s1540_s0 + $0x72] sm:$0x3] }
   0x5   :  { %33 = vst [vmem:[#allocation0 + $0x1d0] sm:$0x3] %v769_v5  ;;  %v771_v7 = vld [vmem:[%s1540_s0 + $0x70] sm:$0x3]  ;;  %v772_v8 = vld [vmem:[%s1540_s0 + $0x6e] sm:$0x3] }
   0x6   :  { %38 = vst [vmem:[#allocation0 + $0x1c8] sm:$0x3] %v770_v6  ;;  %43 = vst [vmem:[#allocation0 + $0x1c0] sm:$0x3] %v771_v7  ;;  %v773_v9 = vld [vmem:[%s1540_s0 + $0x6c] sm:$0x3] }
   0x7   :  { %48 = vst [vmem:[#allocation0 + $0x1b8] sm:$0x3] %v772_v8  ;;  %v774_v10 = vld [vmem:[%s1540_s0 + $0x6a] sm:$0x3]  ;;  %v775_v11 = vld [vmem:[%s1540_s0 + $0x68] sm:$0x3] }
   0x8   :  { %53 = vst [vmem:[#allocation0 + $0x1b0] sm:$0x3] %v773_v9  ;;  %58 = vst [vmem:[#allocation0 + $0x1a8] sm:$0x3] %v774_v10  ;;  %v776_v12 = vld [vmem:[%s1540_s0 + $0x66] sm:$0x3] }
   0x9   :  { %63 = vst [vmem:[#allocation0 + $0x1a0] sm:$0x3] %v775_v11  ;;  %v777_v13 = vld [vmem:[%s1540_s0 + $0x64] sm:$0x3]  ;;  %v778_v14 = vld [vmem:[%s1540_s0 + $0x62] sm:$0x3] }
   0xa   :  { %68 = vst [vmem:[#allocation0 + $0x198] sm:$0x3] %v776_v12  ;;  %73 = vst [vmem:[#allocation0 + $0x190] sm:$0x3] %v777_v13  ;;  %v779_v15 = vld [vmem:[%s1540_s0 + $0x60] sm:$0x3] }
   0xb   :  { %78 = vst [vmem:[#allocation0 + $0x188] sm:$0x3] %v778_v14  ;;  %v780_v16 = vld [vmem:[%s1540_s0 + $0x5e] sm:$0x3]  ;;  %v781_v17 = vld [vmem:[%s1540_s0 + $0x5c] sm:$0x3] }
   0xc   :  { %83 = vst [vmem:[#allocation0 + $0x180] sm:$0x3] %v779_v15  ;;  %88 = vst [vmem:[#allocation0 + $0x178] sm:$0x3] %v780_v16  ;;  %v782_v18 = vld [vmem:[%s1540_s0 + $0x5a] sm:$0x3] }
   0xd   :  { %93 = vst [vmem:[#allocation0 + $0x170] sm:$0x3] %v781_v17  ;;  %v783_v19 = vld [vmem:[%s1540_s0 + $0x58] sm:$0x3]  ;;  %v784_v20 = vld [vmem:[%s1540_s0 + $0x56] sm:$0x3] }
   0xe   :  { %98 = vst [vmem:[#allocation0 + $0x168] sm:$0x3] %v782_v18  ;;  %103 = vst [vmem:[#allocation0 + $0x160] sm:$0x3] %v783_v19  ;;  %v785_v21 = vld [vmem:[%s1540_s0 + $0x54] sm:$0x3] }
   0xf   :  { %108 = vst [vmem:[#allocation0 + $0x158] sm:$0x3] %v784_v20  ;;  %v786_v22 = vld [vmem:[%s1540_s0 + $0x52] sm:$0x3]  ;;  %v787_v23 = vld [vmem:[%s1540_s0 + $0x50] sm:$0x3] }
  0x10   :  { %113 = vst [vmem:[#allocation0 + $0x150] sm:$0x3] %v785_v21  ;;  %118 = vst [vmem:[#allocation0 + $0x148] sm:$0x3] %v786_v22  ;;  %v788_v24 = vld [vmem:[%s1540_s0 + $0x4e] sm:$0x3] }
  0x11   :  { %123 = vst [vmem:[#allocation0 + $0x140] sm:$0x3] %v787_v23  ;;  %v789_v25 = vld [vmem:[%s1540_s0 + $0x4c] sm:$0x3]  ;;  %v790_v26 = vld [vmem:[%s1540_s0 + $0x4a] sm:$0x3] }
  0x12   :  { %128 = vst [vmem:[#allocation0 + $0x138] sm:$0x3] %v788_v24  ;;  %133 = vst [vmem:[#allocation0 + $0x130] sm:$0x3] %v789_v25  ;;  %v791_v27 = vld [vmem:[%s1540_s0 + $0x48] sm:$0x3] }
  0x13   :  { %138 = vst [vmem:[#allocation0 + $0x128] sm:$0x3] %v790_v26  ;;  %v792_v28 = vld [vmem:[%s1540_s0 + $0x46] sm:$0x3]  ;;  %v793_v29 = vld [vmem:[%s1540_s0 + $0x44] sm:$0x3] }
  0x14   :  { %143 = vst [vmem:[#allocation0 + $0x120] sm:$0x3] %v791_v27  ;;  %148 = vst [vmem:[#allocation0 + $0x118] sm:$0x3] %v792_v28  ;;  %v794_v30 = vld [vmem:[%s1540_s0 + $0x42] sm:$0x3] }
  0x15   :  { %153 = vst [vmem:[#allocation0 + $0x110] sm:$0x3] %v793_v29  ;;  %v795_v31 = vld [vmem:[%s1540_s0 + $0x40] sm:$0x3]  ;;  %v796_v32 = vld [vmem:[%s1540_s0 + $0x3e] sm:$0x3] }
  0x16   :  { %158 = vst [vmem:[#allocation0 + $0x108] sm:$0x3] %v794_v30  ;;  %163 = vst [vmem:[#allocation0 + $0x100] sm:$0x3] %v795_v31  ;;  %v797_v33 = vld [vmem:[%s1540_s0 + $0x3c] sm:$0x3] }
  0x17   :  { %168 = vst [vmem:[#allocation0 + $0xf8] sm:$0x3] %v796_v32  ;;  %v798_v34 = vld [vmem:[%s1540_s0 + $0x3a] sm:$0x3]  ;;  %v799_v35 = vld [vmem:[%s1540_s0 + $0x38] sm:$0x3] }
  0x18   :  { %173 = vst [vmem:[#allocation0 + $0xf0] sm:$0x3] %v797_v33  ;;  %178 = vst [vmem:[#allocation0 + $0xe8] sm:$0x3] %v798_v34  ;;  %v800_v36 = vld [vmem:[%s1540_s0 + $0x36] sm:$0x3] }
  0x19   :  { %183 = vst [vmem:[#allocation0 + $0xe0] sm:$0x3] %v799_v35  ;;  %v801_v37 = vld [vmem:[%s1540_s0 + $0x34] sm:$0x3]  ;;  %v802_v38 = vld [vmem:[%s1540_s0 + $0x32] sm:$0x3] }
  0x1a   :  { %188 = vst [vmem:[#allocation0 + $0xd8] sm:$0x3] %v800_v36  ;;  %193 = vst [vmem:[#allocation0 + $0xd0] sm:$0x3] %v801_v37  ;;  %v803_v39 = vld [vmem:[%s1540_s0 + $0x30] sm:$0x3] }
  0x1b   :  { %198 = vst [vmem:[#allocation0 + $0xc8] sm:$0x3] %v802_v38  ;;  %v804_v40 = vld [vmem:[%s1540_s0 + $0x2e] sm:$0x3]  ;;  %v805_v41 = vld [vmem:[%s1540_s0 + $0x2c] sm:$0x3] }
  0x1c   :  { %203 = vst [vmem:[#allocation0 + $0xc0] sm:$0x3] %v803_v39  ;;  %208 = vst [vmem:[#allocation0 + $0xb8] sm:$0x3] %v804_v40  ;;  %v806_v42 = vld [vmem:[%s1540_s0 + $0x2a] sm:$0x3] }
  0x1d   :  { %213 = vst [vmem:[#allocation0 + $0xb0] sm:$0x3] %v805_v41  ;;  %v807_v43 = vld [vmem:[%s1540_s0 + $0x28] sm:$0x3]  ;;  %v808_v44 = vld [vmem:[%s1540_s0 + $0x26] sm:$0x3] }
  0x1e   :  { %218 = vst [vmem:[#allocation0 + $0xa8] sm:$0x3] %v806_v42  ;;  %223 = vst [vmem:[#allocation0 + $0xa0] sm:$0x3] %v807_v43  ;;  %v809_v45 = vld [vmem:[%s1540_s0 + $0x24] sm:$0x3] }
  0x1f   :  { %228 = vst [vmem:[#allocation0 + $0x98] sm:$0x3] %v808_v44  ;;  %v810_v46 = vld [vmem:[%s1540_s0 + $0x22] sm:$0x3]  ;;  %v811_v47 = vld [vmem:[%s1540_s0 + $0x20] sm:$0x3] }
  0x20   :  { %233 = vst [vmem:[#allocation0 + $0x90] sm:$0x3] %v809_v45  ;;  %238 = vst [vmem:[#allocation0 + $0x88] sm:$0x3] %v810_v46  ;;  %v812_v48 = vld [vmem:[%s1540_s0 + $0x1e] sm:$0x3] }
  0x21   :  { %243 = vst [vmem:[#allocation0 + $0x80] sm:$0x3] %v811_v47  ;;  %v813_v49 = vld [vmem:[%s1540_s0 + $0x1c] sm:$0x3]  ;;  %v814_v50 = vld [vmem:[%s1540_s0 + $0x1a] sm:$0x3] }
  0x22   :  { %248 = vst [vmem:[#allocation0 + $0x78] sm:$0x3] %v812_v48  ;;  %253 = vst [vmem:[#allocation0 + $0x70] sm:$0x3] %v813_v49  ;;  %v815_v51 = vld [vmem:[%s1540_s0 + $0x18] sm:$0x3] }
  0x23   :  { %258 = vst [vmem:[#allocation0 + $0x68] sm:$0x3] %v814_v50  ;;  %v816_v52 = vld [vmem:[%s1540_s0 + $0x16] sm:$0x3]  ;;  %v817_v53 = vld [vmem:[%s1540_s0 + $0x14] sm:$0x3] }
  0x24   :  { %263 = vst [vmem:[#allocation0 + $0x60] sm:$0x3] %v815_v51  ;;  %268 = vst [vmem:[#allocation0 + $0x58] sm:$0x3] %v816_v52  ;;  %v818_v54 = vld [vmem:[%s1540_s0 + $0x12] sm:$0x3] }
  0x25   :  { %273 = vst [vmem:[#allocation0 + $0x50] sm:$0x3] %v817_v53  ;;  %v819_v55 = vld [vmem:[%s1540_s0 + $0x10] sm:$0x3]  ;;  %v820_v56 = vld [vmem:[%s1540_s0 + $0xe] sm:$0x3] }
  0x26   :  { %278 = vst [vmem:[#allocation0 + $0x48] sm:$0x3] %v818_v54  ;;  %283 = vst [vmem:[#allocation0 + $0x40] sm:$0x3] %v819_v55  ;;  %v821_v57 = vld [vmem:[%s1540_s0 + $0xc] sm:$0x3] }
  0x27   :  { %288 = vst [vmem:[#allocation0 + $0x38] sm:$0x3] %v820_v56  ;;  %v822_v58 = vld [vmem:[%s1540_s0 + $0xa] sm:$0x3]  ;;  %v823_v59 = vld [vmem:[%s1540_s0 + $0x8] sm:$0x3] }
  0x28   :  { %293 = vst [vmem:[#allocation0 + $0x30] sm:$0x3] %v821_v57  ;;  %298 = vst [vmem:[#allocation0 + $0x28] sm:$0x3] %v822_v58  ;;  %v824_v60 = vld [vmem:[%s1540_s0 + $0x6] sm:$0x3] }
  0x29   :  { %303 = vst [vmem:[#allocation0 + $0x20] sm:$0x3] %v823_v59  ;;  %v825_v61 = vld [vmem:[%s1540_s0 + $0x4] sm:$0x3]  ;;  %v826_v62 = vld [vmem:[%s1540_s0 + $0x2] sm:$0x3] }
  0x2a   :  { %308 = vst [vmem:[#allocation0 + $0x18] sm:$0x3] %v824_v60  ;;  %313 = vst [vmem:[#allocation0 + $0x10] sm:$0x3] %v825_v61  ;;  %v318_v63 = vld [vmem:[%s1540_s0] sm:$0x3] }
  0x2b   :  { %317 = vst [vmem:[#allocation0 + $0x8] sm:$0x3] %v826_v62  ;;  %v451_v0 = vld [vmem:[#allocation0 + $0xb0] sm:$0x3]   ;;  %v457_v1 = vld [vmem:[#allocation0 + $0xb8] sm:$0x3]  }
  0x2c   :  { %319 = vst [vmem:[#allocation0] sm:$0x3] %v318_v63  ;;  %v433_v2 = vld [vmem:[#allocation0 + $0x98] sm:$0x3]   ;;  %v439_v3 = vld [vmem:[#allocation0 + $0xa0] sm:$0x3]  }
  0x2d   :  { %v445_v4 = vld [vmem:[#allocation0 + $0xa8] sm:$0x3]   ;;  %870 = vst [vmem:[%s1541_s1 + $0x15] sm:$0x1] %v451_v0   ;;  %871 = vst [vmem:[%s1541_s1 + $0x54] sm:$0x2] %v451_v0  }
  0x2e   :  { %872 = vst [vmem:[%s1541_s1 + $0x1d] sm:$0x1] %v457_v1   ;;  %873 = vst [vmem:[%s1541_s1 + $0x5c] sm:$0x2] %v457_v1   ;;  %v415_v5 = vld [vmem:[#allocation0 + $0x80] sm:$0x3]  }
  0x2f   :  { %v421_v6 = vld [vmem:[#allocation0 + $0x88] sm:$0x3]   ;;  %v427_v7 = vld [vmem:[#allocation0 + $0x90] sm:$0x3]   ;;  %864 = vst [vmem:[%s1541_s1 + $0x1c] sm:$0x1] %v433_v2  }
  0x30   :  { %865 = vst [vmem:[%s1541_s1 + $0x5b] sm:$0x2] %v433_v2   ;;  %866 = vst [vmem:[%s1541_s1 + $0x5] sm:$0x1] %v439_v3   ;;  %v397_v8 = vld [vmem:[#allocation0 + $0x68] sm:$0x3]  }
  0x31   :  { %867 = vst [vmem:[%s1541_s1 + $0x44] sm:$0x2] %v439_v3   ;;  %868 = vst [vmem:[%s1541_s1 + $0xd] sm:$0x1] %v445_v4   ;;  %v403_v9 = vld [vmem:[#allocation0 + $0x70] sm:$0x3]  }
  0x32   :  { %869 = vst [vmem:[%s1541_s1 + $0x4c] sm:$0x2] %v445_v4   ;;  %v409_v10 = vld [vmem:[#allocation0 + $0x78] sm:$0x3]   ;;  %858 = vst [vmem:[%s1541_s1 + $0x4] sm:$0x1] %v415_v5  }
  0x33   :  { %859 = vst [vmem:[%s1541_s1 + $0x43] sm:$0x2] %v415_v5   ;;  %860 = vst [vmem:[%s1541_s1 + $0xc] sm:$0x1] %v421_v6   ;;  %v379_v11 = vld [vmem:[#allocation0 + $0x50] sm:$0x3]  }
  0x34   :  { %861 = vst [vmem:[%s1541_s1 + $0x4b] sm:$0x2] %v421_v6   ;;  %862 = vst [vmem:[%s1541_s1 + $0x14] sm:$0x1] %v427_v7   ;;  %v385_v12 = vld [vmem:[#allocation0 + $0x58] sm:$0x3]  }
  0x35   :  { %863 = vst [vmem:[%s1541_s1 + $0x53] sm:$0x2] %v427_v7   ;;  %v391_v13 = vld [vmem:[#allocation0 + $0x60] sm:$0x3]   ;;  %852 = vst [vmem:[%s1541_s1 + $0xb] sm:$0x1] %v397_v8  }
  0x36   :  { %853 = vst [vmem:[%s1541_s1 + $0x4a] sm:$0x2] %v397_v8   ;;  %854 = vst [vmem:[%s1541_s1 + $0x13] sm:$0x1] %v403_v9   ;;  %v361_v14 = vld [vmem:[#allocation0 + $0x38] sm:$0x3]  }
  0x37   :  { %855 = vst [vmem:[%s1541_s1 + $0x52] sm:$0x2] %v403_v9   ;;  %856 = vst [vmem:[%s1541_s1 + $0x1b] sm:$0x1] %v409_v10   ;;  %v367_v15 = vld [vmem:[#allocation0 + $0x40] sm:$0x3]  }
  0x38   :  { %857 = vst [vmem:[%s1541_s1 + $0x5a] sm:$0x2] %v409_v10   ;;  %v373_v16 = vld [vmem:[#allocation0 + $0x48] sm:$0x3]   ;;  %846 = vst [vmem:[%s1541_s1 + $0x12] sm:$0x1] %v379_v11  }
  0x39   :  { %847 = vst [vmem:[%s1541_s1 + $0x51] sm:$0x2] %v379_v11   ;;  %848 = vst [vmem:[%s1541_s1 + $0x1a] sm:$0x1] %v385_v12   ;;  %v343_v17 = vld [vmem:[#allocation0 + $0x20] sm:$0x3]  }
  0x3a   :  { %849 = vst [vmem:[%s1541_s1 + $0x59] sm:$0x2] %v385_v12   ;;  %850 = vst [vmem:[%s1541_s1 + $0x3] sm:$0x1] %v391_v13   ;;  %v349_v18 = vld [vmem:[#allocation0 + $0x28] sm:$0x3]  }
  0x3b   :  { %851 = vst [vmem:[%s1541_s1 + $0x42] sm:$0x2] %v391_v13   ;;  %v355_v19 = vld [vmem:[#allocation0 + $0x30] sm:$0x3]   ;;  %840 = vst [vmem:[%s1541_s1 + $0x19] sm:$0x1] %v361_v14  }
  0x3c   :  { %841 = vst [vmem:[%s1541_s1 + $0x58] sm:$0x2] %v361_v14   ;;  %842 = vst [vmem:[%s1541_s1 + $0x2] sm:$0x1] %v367_v15   ;;  %v325_v20 = vld [vmem:[#allocation0 + $0x8] sm:$0x3]  }
  0x3d   :  { %843 = vst [vmem:[%s1541_s1 + $0x41] sm:$0x2] %v367_v15   ;;  %844 = vst [vmem:[%s1541_s1 + $0xa] sm:$0x1] %v373_v16   ;;  %v331_v21 = vld [vmem:[#allocation0 + $0x10] sm:$0x3]  }
  0x3e   :  { %845 = vst [vmem:[%s1541_s1 + $0x49] sm:$0x2] %v373_v16   ;;  %v337_v22 = vld [vmem:[#allocation0 + $0x18] sm:$0x3]   ;;  %834 = vst [vmem:[%s1541_s1 + $0x1] sm:$0x1] %v343_v17  }
  0x3f   :  { %835 = vst [vmem:[%s1541_s1 + $0x40] sm:$0x2] %v343_v17   ;;  %836 = vst [vmem:[%s1541_s1 + $0x9] sm:$0x1] %v349_v18   ;;  %v320_v23 = vld [vmem:[#allocation0] sm:$0x3]  }
  0x40   :  { %837 = vst [vmem:[%s1541_s1 + $0x48] sm:$0x2] %v349_v18   ;;  %838 = vst [vmem:[%s1541_s1 + $0x11] sm:$0x1] %v355_v19   ;;  %v463_v24 = vld [vmem:[#allocation0 + $0xc0] sm:$0x3]  }
  0x41   :  { %839 = vst [vmem:[%s1541_s1 + $0x50] sm:$0x2] %v355_v19   ;;  %828 = vst [vmem:[%s1541_s1 + $0x8] sm:$0x1] %v325_v20   ;;  %v469_v25 = vld [vmem:[#allocation0 + $0xc8] sm:$0x3]  }
  0x42   :  { %829 = vst [vmem:[%s1541_s1 + $0x47] sm:$0x2] %v325_v20   ;;  %830 = vst [vmem:[%s1541_s1 + $0x10] sm:$0x1] %v331_v21   ;;  %v475_v26 = vld [vmem:[#allocation0 + $0xd0] sm:$0x3]  }
  0x43   :  { %831 = vst [vmem:[%s1541_s1 + $0x4f] sm:$0x2] %v331_v21   ;;  %832 = vst [vmem:[%s1541_s1 + $0x18] sm:$0x1] %v337_v22   ;;  %v481_v27 = vld [vmem:[#allocation0 + $0xd8] sm:$0x3]  }
  0x44   :  { %833 = vst [vmem:[%s1541_s1 + $0x57] sm:$0x2] %v337_v22   ;;  %321 = vst [vmem:[%s1541_s1] sm:$0x1] %v320_v23   ;;  %v487_v28 = vld [vmem:[#allocation0 + $0xe0] sm:$0x3]  }
  0x45   :  { %827 = vst [vmem:[%s1541_s1 + $0x3f] sm:$0x2] %v320_v23   ;;  %874 = vst [vmem:[%s1541_s1 + $0x6] sm:$0x1] %v463_v24   ;;  %v493_v29 = vld [vmem:[#allocation0 + $0xe8] sm:$0x3]  }
  0x46   :  { %875 = vst [vmem:[%s1541_s1 + $0x45] sm:$0x2] %v463_v24   ;;  %876 = vst [vmem:[%s1541_s1 + $0xe] sm:$0x1] %v469_v25   ;;  %v499_v30 = vld [vmem:[#allocation0 + $0xf0] sm:$0x3]  }
  0x47   :  { %877 = vst [vmem:[%s1541_s1 + $0x4d] sm:$0x2] %v469_v25   ;;  %878 = vst [vmem:[%s1541_s1 + $0x16] sm:$0x1] %v475_v26   ;;  %v505_v31 = vld [vmem:[#allocation0 + $0xf8] sm:$0x3]  }
  0x48   :  { %879 = vst [vmem:[%s1541_s1 + $0x55] sm:$0x2] %v475_v26   ;;  %880 = vst [vmem:[%s1541_s1 + $0x1e] sm:$0x1] %v481_v27   ;;  %v511_v32 = vld [vmem:[#allocation0 + $0x100] sm:$0x3]  }
  0x49   :  { %881 = vst [vmem:[%s1541_s1 + $0x5d] sm:$0x2] %v481_v27   ;;  %882 = vst [vmem:[%s1541_s1 + $0x7] sm:$0x1] %v487_v28   ;;  %v517_v33 = vld [vmem:[#allocation0 + $0x108] sm:$0x3]  }
  0x4a   :  { %883 = vst [vmem:[%s1541_s1 + $0x46] sm:$0x2] %v487_v28   ;;  %884 = vst [vmem:[%s1541_s1 + $0xf] sm:$0x1] %v493_v29   ;;  %v523_v34 = vld [vmem:[#allocation0 + $0x110] sm:$0x3]  }
  0x4b   :  { %885 = vst [vmem:[%s1541_s1 + $0x4e] sm:$0x2] %v493_v29   ;;  %886 = vst [vmem:[%s1541_s1 + $0x17] sm:$0x1] %v499_v30   ;;  %v529_v35 = vld [vmem:[#allocation0 + $0x118] sm:$0x3]  }
  0x4c   :  { %887 = vst [vmem:[%s1541_s1 + $0x56] sm:$0x2] %v499_v30   ;;  %888 = vst [vmem:[%s1541_s1 + $0x1f] sm:$0x1] %v505_v31   ;;  %v535_v36 = vld [vmem:[#allocation0 + $0x120] sm:$0x3]  }
  0x4d   :  { %889 = vst [vmem:[%s1541_s1 + $0x5e] sm:$0x2] %v505_v31   ;;  %890 = vst [vmem:[%s1541_s1 + $0x20] sm:$0x1] %v511_v32   ;;  %v541_v37 = vld [vmem:[#allocation0 + $0x128] sm:$0x3]  }
  0x4e   :  { %891 = vst [vmem:[%s1541_s1 + $0x5f] sm:$0x2] %v511_v32   ;;  %892 = vst [vmem:[%s1541_s1 + $0x28] sm:$0x1] %v517_v33   ;;  %v547_v38 = vld [vmem:[#allocation0 + $0x130] sm:$0x3]  }
  0x4f   :  { %893 = vst [vmem:[%s1541_s1 + $0x67] sm:$0x2] %v517_v33   ;;  %894 = vst [vmem:[%s1541_s1 + $0x30] sm:$0x1] %v523_v34   ;;  %v553_v39 = vld [vmem:[#allocation0 + $0x138] sm:$0x3]  }
  0x50   :  { %895 = vst [vmem:[%s1541_s1 + $0x6f] sm:$0x2] %v523_v34   ;;  %896 = vst [vmem:[%s1541_s1 + $0x38] sm:$0x1] %v529_v35   ;;  %v559_v40 = vld [vmem:[#allocation0 + $0x140] sm:$0x3]  }
  0x51   :  { %897 = vst [vmem:[%s1541_s1 + $0x77] sm:$0x2] %v529_v35   ;;  %898 = vst [vmem:[%s1541_s1 + $0x21] sm:$0x1] %v535_v36   ;;  %v565_v41 = vld [vmem:[#allocation0 + $0x148] sm:$0x3]  }
  0x52   :  { %899 = vst [vmem:[%s1541_s1 + $0x60] sm:$0x2] %v535_v36   ;;  %900 = vst [vmem:[%s1541_s1 + $0x29] sm:$0x1] %v541_v37   ;;  %v571_v42 = vld [vmem:[#allocation0 + $0x150] sm:$0x3]  }
  0x53   :  { %901 = vst [vmem:[%s1541_s1 + $0x68] sm:$0x2] %v541_v37   ;;  %902 = vst [vmem:[%s1541_s1 + $0x31] sm:$0x1] %v547_v38   ;;  %v577_v43 = vld [vmem:[#allocation0 + $0x158] sm:$0x3]  }
  0x54   :  { %903 = vst [vmem:[%s1541_s1 + $0x70] sm:$0x2] %v547_v38   ;;  %904 = vst [vmem:[%s1541_s1 + $0x39] sm:$0x1] %v553_v39   ;;  %v583_v44 = vld [vmem:[#allocation0 + $0x160] sm:$0x3]  }
  0x55   :  { %905 = vst [vmem:[%s1541_s1 + $0x78] sm:$0x2] %v553_v39   ;;  %906 = vst [vmem:[%s1541_s1 + $0x22] sm:$0x1] %v559_v40   ;;  %v589_v45 = vld [vmem:[#allocation0 + $0x168] sm:$0x3]  }
  0x56   :  { %907 = vst [vmem:[%s1541_s1 + $0x61] sm:$0x2] %v559_v40   ;;  %908 = vst [vmem:[%s1541_s1 + $0x2a] sm:$0x1] %v565_v41   ;;  %v595_v46 = vld [vmem:[#allocation0 + $0x170] sm:$0x3]  }
  0x57   :  { %909 = vst [vmem:[%s1541_s1 + $0x69] sm:$0x2] %v565_v41   ;;  %910 = vst [vmem:[%s1541_s1 + $0x32] sm:$0x1] %v571_v42   ;;  %v601_v47 = vld [vmem:[#allocation0 + $0x178] sm:$0x3]  }
  0x58   :  { %911 = vst [vmem:[%s1541_s1 + $0x71] sm:$0x2] %v571_v42   ;;  %912 = vst [vmem:[%s1541_s1 + $0x3a] sm:$0x1] %v577_v43   ;;  %v607_v48 = vld [vmem:[#allocation0 + $0x180] sm:$0x3]  }
  0x59   :  { %913 = vst [vmem:[%s1541_s1 + $0x79] sm:$0x2] %v577_v43   ;;  %914 = vst [vmem:[%s1541_s1 + $0x23] sm:$0x1] %v583_v44   ;;  %v613_v49 = vld [vmem:[#allocation0 + $0x188] sm:$0x3]  }
  0x5a   :  { %915 = vst [vmem:[%s1541_s1 + $0x62] sm:$0x2] %v583_v44   ;;  %916 = vst [vmem:[%s1541_s1 + $0x2b] sm:$0x1] %v589_v45   ;;  %v619_v50 = vld [vmem:[#allocation0 + $0x190] sm:$0x3]  }
  0x5b   :  { %917 = vst [vmem:[%s1541_s1 + $0x6a] sm:$0x2] %v589_v45   ;;  %918 = vst [vmem:[%s1541_s1 + $0x33] sm:$0x1] %v595_v46   ;;  %v625_v51 = vld [vmem:[#allocation0 + $0x198] sm:$0x3]  }
  0x5c   :  { %919 = vst [vmem:[%s1541_s1 + $0x72] sm:$0x2] %v595_v46   ;;  %920 = vst [vmem:[%s1541_s1 + $0x3b] sm:$0x1] %v601_v47   ;;  %v631_v52 = vld [vmem:[#allocation0 + $0x1a0] sm:$0x3]  }
  0x5d   :  { %921 = vst [vmem:[%s1541_s1 + $0x7a] sm:$0x2] %v601_v47   ;;  %922 = vst [vmem:[%s1541_s1 + $0x24] sm:$0x1] %v607_v48   ;;  %v637_v53 = vld [vmem:[#allocation0 + $0x1a8] sm:$0x3]  }
  0x5e   :  { %923 = vst [vmem:[%s1541_s1 + $0x63] sm:$0x2] %v607_v48   ;;  %924 = vst [vmem:[%s1541_s1 + $0x2c] sm:$0x1] %v613_v49   ;;  %v643_v54 = vld [vmem:[#allocation0 + $0x1b0] sm:$0x3]  }
  0x5f   :  { %925 = vst [vmem:[%s1541_s1 + $0x6b] sm:$0x2] %v613_v49   ;;  %926 = vst [vmem:[%s1541_s1 + $0x34] sm:$0x1] %v619_v50   ;;  %v649_v55 = vld [vmem:[#allocation0 + $0x1b8] sm:$0x3]  }
  0x60   :  { %927 = vst [vmem:[%s1541_s1 + $0x73] sm:$0x2] %v619_v50   ;;  %928 = vst [vmem:[%s1541_s1 + $0x3c] sm:$0x1] %v625_v51   ;;  %v655_v56 = vld [vmem:[#allocation0 + $0x1c0] sm:$0x3]  }
  0x61   :  { %929 = vst [vmem:[%s1541_s1 + $0x7b] sm:$0x2] %v625_v51   ;;  %930 = vst [vmem:[%s1541_s1 + $0x25] sm:$0x1] %v631_v52   ;;  %v661_v57 = vld [vmem:[#allocation0 + $0x1c8] sm:$0x3]  }
  0x62   :  { %931 = vst [vmem:[%s1541_s1 + $0x64] sm:$0x2] %v631_v52   ;;  %932 = vst [vmem:[%s1541_s1 + $0x2d] sm:$0x1] %v637_v53   ;;  %v667_v58 = vld [vmem:[#allocation0 + $0x1d0] sm:$0x3]  }
  0x63   :  { %933 = vst [vmem:[%s1541_s1 + $0x6c] sm:$0x2] %v637_v53   ;;  %934 = vst [vmem:[%s1541_s1 + $0x35] sm:$0x1] %v643_v54   ;;  %v673_v59 = vld [vmem:[#allocation0 + $0x1d8] sm:$0x3]  }
  0x64   :  { %935 = vst [vmem:[%s1541_s1 + $0x74] sm:$0x2] %v643_v54   ;;  %936 = vst [vmem:[%s1541_s1 + $0x3d] sm:$0x1] %v649_v55   ;;  %v679_v60 = vld [vmem:[#allocation0 + $0x1e0] sm:$0x3]  }
  0x65   :  { %937 = vst [vmem:[%s1541_s1 + $0x7c] sm:$0x2] %v649_v55   ;;  %938 = vst [vmem:[%s1541_s1 + $0x26] sm:$0x1] %v655_v56   ;;  %v685_v61 = vld [vmem:[#allocation0 + $0x1e8] sm:$0x3]  }
  0x66   :  { %939 = vst [vmem:[%s1541_s1 + $0x65] sm:$0x2] %v655_v56   ;;  %940 = vst [vmem:[%s1541_s1 + $0x2e] sm:$0x1] %v661_v57   ;;  %v691_v62 = vld [vmem:[#allocation0 + $0x1f0] sm:$0x3]  }
  0x67   :  { %941 = vst [vmem:[%s1541_s1 + $0x6d] sm:$0x2] %v661_v57   ;;  %942 = vst [vmem:[%s1541_s1 + $0x36] sm:$0x1] %v667_v58   ;;  %v697_v63 = vld [vmem:[#allocation0 + $0x1f8] sm:$0x3]  }
  0x68   :  { %943 = vst [vmem:[%s1541_s1 + $0x75] sm:$0x2] %v667_v58   ;;  %944 = vst [vmem:[%s1541_s1 + $0x3e] sm:$0x1] %v673_v59  }
  0x69   :  { %945 = vst [vmem:[%s1541_s1 + $0x7d] sm:$0x2] %v673_v59   ;;  %946 = vst [vmem:[%s1541_s1 + $0x27] sm:$0x1] %v679_v60  }
  0x6a   :  { %947 = vst [vmem:[%s1541_s1 + $0x66] sm:$0x2] %v679_v60   ;;  %948 = vst [vmem:[%s1541_s1 + $0x2f] sm:$0x1] %v685_v61  }
  0x6b   :  { %949 = vst [vmem:[%s1541_s1 + $0x6e] sm:$0x2] %v685_v61   ;;  %950 = vst [vmem:[%s1541_s1 + $0x37] sm:$0x1] %v691_v62  }
  0x6c   :  { %951 = vst [vmem:[%s1541_s1 + $0x76] sm:$0x2] %v691_v62   ;;  %952 = vst [vmem:[%s1541_s1 + $0x3f] sm:$0x1] %v697_v63  }
  0x6d   :  { %953 = vst [vmem:[%s1541_s1 + $0x7e] sm:$0x2] %v697_v63  }

// kernel: generator_forward.10
= control target key start
LH: loop header
LB: loop body
LE: loop exit
PB: predicated region body
PF: predicated region fallthrough
CT: control target
= control target key end

     0   :  { %v32_v0 = vlaneseq  ;;  %s308_s1 = inlined_call_operand.vmem [shape: f32[1,512], index: 1, kind: input, shape index: {}]   ;;  %s309_s2 = inlined_call_operand.vmem [shape: f32[1,512], index: 2, kind: input, shape index: {}]   ;;  %s310_s0 = inlined_call_operand.vmem [shape: f32[32,512], index: 0, kind: input, shape index: {}]   ;;  %s311_s3 = inlined_call_operand.vmem [shape: bf16[32,512], index: 3, kind: output, shape index: {}]  }
   0x1   :  { %v30_v2 = vld [vmem:[%s308_s1] sm:$0xf]  ;;  %v15_v5 = vld [vmem:[%s310_s0 + $0x8] sm:$0xff]  ;;  %v16_v10 = vld [vmem:[%s310_s0 + $0x10] sm:$0xff] }
   0x2   :  { %v33_v1 = vshrl.u32 %v32_v0, 7  ;;  %v68_v3 = vld [vmem:[%s309_s2] sm:$0xf]  ;;  %v19_v12 = vld [vmem:[%s310_s0 + $0x28] sm:$0xff]  ;;  %v17_v17 = vld [vmem:[%s310_s0 + $0x18] sm:$0xff] }
   0x3   :  { %v14_v4 = vld [vmem:[%s310_s0] sm:$0xff]  ;;  %v20_v18 = vld [vmem:[%s310_s0 + $0x30] sm:$0xff]  ;;  %v21_v19 = vld [vmem:[%s310_s0 + $0x38] sm:$0xff] }
   0x4   :  { %v34_v6 = vsub.s32 0, %v33_v1  ;;  %v38_v7 = vsub.s32 1, %v33_v1  ;;  %v42_v8 = vsub.s32 2, %v33_v1  ;;  %v46_v9 = vsub.s32 3, %v33_v1  ;;  %v18_v11 = vld [vmem:[%s310_s0 + $0x20] sm:$0xff]  ;;  %v23_v41 = vld [vmem:[%s310_s0 + $0x48] sm:$0xff] }
   0x5   :  { %v22_v40 = vld [vmem:[%s310_s0 + $0x40] sm:$0xff]  ;;  %v24_v46 = vld [vmem:[%s310_s0 + $0x50] sm:$0xff]  ;;  %v25_v47 = vld [vmem:[%s310_s0 + $0x58] sm:$0xff] }
   0x6   :  { %v35_v13 = vrot.slane %v30_v2, %v34_v6  ;;  %v39_v14 = vrot.slane %v30_v2, %v38_v7  ;;  %v239_v15 = vrot.slane %v68_v3, %v34_v6  ;;  %v241_v16 = vrot.slane %v68_v3, %v38_v7  ;;  %v26_v52 = vld [vmem:[%s310_s0 + $0x60] sm:$0xff]  ;;  %v27_v53 = vld [vmem:[%s310_s0 + $0x68] sm:$0xff]  ;;  %v28_v58 = vld [vmem:[%s310_s0 + $0x70] sm:$0xff] }
   0x7   :  { %v43_v20 = vrot.slane %v30_v2, %v42_v8  ;;  %v47_v21 = vrot.slane %v30_v2, %v46_v9  ;;  %v81_v22 = vrot.slane %v68_v3, %v42_v8  ;;  %v85_v23 = vrot.slane %v68_v3, %v46_v9  ;;  %v29_v59 = vld [vmem:[%s310_s0 + $0x78] sm:$0xff] }
   0x8   :  { %v52_v24 = vmul.f32 %v35_v13, %v14_v4  ;;  %v53_v25 = vmul.f32 %v39_v14, %v15_v5  ;;  %v56_v26 = vmul.f32 %v35_v13, %v18_v11  ;;  %v57_v27 = vmul.f32 %v39_v14, %v19_v12 }
   0x9   :  { %v54_v28 = vmul.f32 %v43_v20, %v16_v10  ;;  %v55_v29 = vmul.f32 %v47_v21, %v17_v17  ;;  %v58_v30 = vmul.f32 %v43_v20, %v20_v18  ;;  %v59_v31 = vmul.f32 %v47_v21, %v21_v19 }
   0xa   :  { %v90_v32 = vadd.f32 %v239_v15, %v52_v24  ;;  %v91_v33 = vadd.f32 %v241_v16, %v53_v25  ;;  %v94_v34 = vadd.f32 %v239_v15, %v56_v26  ;;  %v95_v35 = vadd.f32 %v241_v16, %v57_v27 }
   0xb   :  { %v92_v36 = vadd.f32 %v81_v22, %v54_v28  ;;  %v93_v37 = vadd.f32 %v85_v23, %v55_v29  ;;  %v96_v38 = vadd.f32 %v81_v22, %v58_v30  ;;  %v97_v39 = vadd.f32 %v85_v23, %v59_v31 }
   0xc   :  { %v106_v42 = vmax.f32 %v90_v32, 0.0  ;;  %v107_v43 = vmax.f32 %v91_v33, 0.0  ;;  %v110_v44 = vmax.f32 %v94_v34, 0.0  ;;  %v111_v45 = vmax.f32 %v95_v35, 0.0 }
   0xd   :  { %v108_v48 = vmax.f32 %v92_v36, 0.0  ;;  %v109_v49 = vmax.f32 %v93_v37, 0.0  ;;  %v112_v50 = vmax.f32 %v96_v38, 0.0  ;;  %v113_v51 = vmax.f32 %v97_v39, 0.0 }
   0xe   :  { %v190_v54 = vpack.c.bf16 %v107_v43, %v106_v42  ;;  %v192_v55 = vpack.c.bf16 %v111_v45, %v110_v44  ;;  %v60_v56 = vmul.f32 %v35_v13, %v22_v40  ;;  %v61_v57 = vmul.f32 %v39_v14, %v23_v41 }
   0xf   :  { %v191_v60 = vpack.c.bf16 %v109_v49, %v108_v48  ;;  %v193_v61 = vpack.c.bf16 %v113_v51, %v112_v50  ;;  %v62_v62 = vmul.f32 %v43_v20, %v24_v46  ;;  %v63_v63 = vmul.f32 %v47_v21, %v25_v47 }
  0x10   :  { %170 = vst [vmem:[%s311_s3] sm:$0xff] %v190_v54  ;;  %172 = vst [vmem:[%s311_s3 + $0x10] sm:$0xff] %v192_v55  ;;  %v98_v0 = vadd.f32 %v239_v15, %v60_v56  ;;  %v99_v1 = vadd.f32 %v241_v16, %v61_v57  ;;  %v64_v2 = vmul.f32 %v35_v13, %v26_v52 }
  0x11   :  { %v65_v3 = vmul.f32 %v39_v14, %v27_v53  ;;  %171 = vst [vmem:[%s311_s3 + $0x8] sm:$0xff] %v191_v60  ;;  %173 = vst [vmem:[%s311_s3 + $0x18] sm:$0xff] %v193_v61  ;;  %v100_v4 = vadd.f32 %v81_v22, %v62_v62  ;;  %v101_v5 = vadd.f32 %v85_v23, %v63_v63 }
  0x12   :  { %v66_v6 = vmul.f32 %v43_v20, %v28_v58  ;;  %v67_v7 = vmul.f32 %v47_v21, %v29_v59  ;;  %v114_v8 = vmax.f32 %v98_v0, 0.0  ;;  %v115_v9 = vmax.f32 %v99_v1, 0.0 }
  0x13   :  { %v102_v10 = vadd.f32 %v239_v15, %v64_v2  ;;  %v103_v11 = vadd.f32 %v241_v16, %v65_v3  ;;  %v116_v12 = vmax.f32 %v100_v4, 0.0  ;;  %v117_v13 = vmax.f32 %v101_v5, 0.0 }
  0x14   :  { %v104_v14 = vadd.f32 %v81_v22, %v66_v6  ;;  %v105_v17 = vadd.f32 %v85_v23, %v67_v7  ;;  %v194_v18 = vpack.c.bf16 %v115_v9, %v114_v8 }
  0x15   :  { %v118_v19 = vmax.f32 %v102_v10, 0.0  ;;  %v119_v24 = vmax.f32 %v103_v11, 0.0  ;;  %v195_v25 = vpack.c.bf16 %v117_v13, %v116_v12 }
  0x16   :  { %v120_v26 = vmax.f32 %v104_v14, 0.0  ;;  %v121_v27 = vmax.f32 %v105_v17, 0.0  ;;  %174 = vst [vmem:[%s311_s3 + $0x20] sm:$0xff] %v194_v18 }
  0x17   :  { %v196_v20 = vpack.c.bf16 %v119_v24, %v118_v19  ;;  %175 = vst [vmem:[%s311_s3 + $0x28] sm:$0xff] %v195_v25 }
  0x18   :  { %v197_v15 = vpack.c.bf16 %v121_v27, %v120_v26 }
  0x19   :  { %176 = vst [vmem:[%s311_s3 + $0x30] sm:$0xff] %v196_v20 }
  0x1a   :  { %177 = vst [vmem:[%s311_s3 + $0x38] sm:$0xff] %v197_v15 }

// kernel: generator_forward.9
= control target key start
LH: loop header
LB: loop body
LE: loop exit
PB: predicated region body
PF: predicated region fallthrough
CT: control target
= control target key end

     0   :  { %7 = vsyncpa [#allocation4], 0  ;;  %s1582_s0 = inlined_call_operand.vmem [shape: bf16[1,16,128], index: 0, kind: input, shape index: {}]   ;;  %s1583_s1 = inlined_call_operand.hbm [shape: bf16[1,128,8192], index: 1, kind: input, shape index: {}]   ;;  %s1584_s2 = inlined_call_operand.vmem [shape: f32[1,16,8192], index: 2, kind: output, shape index: {}]  }
   0x1   :  { %9 = vsyncpa [#allocation4 + $0x1], 0  ;;  %s1333_s9 = smov 0   ;;  %s1335_s10 = smov 0  }
   0x2   :  { %s1337_s11 = smov 0   ;;  %s1339_s12 = smov 0  }
   0x3   :  { %s1341_s13 = smov 0   ;;  %s1343_s14 = smov 0  }
   0x4 LB: > { %s1088_s15 = sadd.s32 4294967295, %s1311_s14   ;;  %s33_s16 = sadd.s32 1, %s1307_s13  ;;  %s1311_s14 = sphi %s1343_s14, %s15_s14   ;;  %s1307_s13 = sphi %s1341_s13, %s1595_s13   ;;  %s1303_s12 = sphi %s1339_s12, %s1594_s12   ;;  %s1299_s11 = sphi %s1337_s11, %s1593_s11   ;;  %s1295_s10 = sphi %s1335_s10, %s1592_s10   ;;  %s1291_s9 = sphi %s1333_s9, %s1591_s9  }
   0x5   : > { %p35_p0 = scmp.ge.s32.totalorder %s33_s16, 8  ;;  %s82_s17 = sadd.s32 1, %s1299_s11 }
   0x6   : > { %p89_p1 = scmp.ne.s32.totalorder %s1299_s11, %s1295_s10  ;;  %p90_p2 = scmp.eq.s32.totalorder %s1311_s14, 0 }
   0x7   : > { %s1597_s16 = smov (%p35_p0, %s33_s16), 0  ;;  %p95_p4 = scmp.ne.s32.totalorder %s1295_s10, %s1291_s9 }
   0x8   : > { %p1369_p3 = por %p90_p2, %p89_p1  ;;  %s78_s19 = ssub.s32 %s1307_s13, %s1597_s16 }
   0x9   : > { %p96_p5 = scmp.eq.s32.totalorder %s1088_s15, 0  ;;  %p80_p6 = scmp.eq.s32.totalorder %s78_s19, 0 }
   0xa   : > { %p123_p7 = scmp.eq.s32.totalorder %s1088_s15, 7  ;;  %p1177_p10 = scmp.lt.s32.totalorder %s1311_s14, 8 }
   0xb   : > { %p1376_p8 = por %p96_p5, %p95_p4  ;;  %s165_s23 = sand.u32 1, %s1299_s11  }
   0xc   : > { %s1381_s21 = scalar_select %p80_p6, %s1299_s11, %s82_s17  }
   0xd   : > { %p1383_p9 = por %p123_p7, %p89_p1  ;;  %s1169_s24 = sshll.u32 %s1307_s13, 9 }
   0xe   : > { %s1093_s25 = sshll.u32 %s165_s23, 9  ;;  %s1393_s28 = scalar_lea.hbm %s1583_s1, %s1169_s24 }
   0xf   : > { %s1587_s22 = scalar_select %p1383_p9, 1, 0 }
  0x10   : > { %s169_s29 = scalar_lea.vmem [#allocation3], %s1093_s25  ;;  %p1397_p11 = pnand %p1177_p10, %p1369_p3 }
  0x11   : > { %s181_s30 = sshll.u32 %s169_s29, 4  ;;  %s1404_s4 = scalar_lea.sflag [#allocation4], %s165_s23  ;;  %s1401_s30 = int_to_ptr.vmem [resolvable:$true] %s181_s30 }
  0x12   : > { %s1231_s5 = scalar_lea.hbm %s1393_s28, 8192  ;;  %p1233_p0 = pneg %p1397_p11 }
  0x13   : > { %p1232_p13 = scmp.ne.s32.totalorder %s1393_s28, %s1231_s5  ;;  %s1236_s8 = scalar_lea.hbm %s1583_s1, 65536 }
  0x14   : > { %p1237_p3 = scmp.lt.u32.totalorder %s1393_s28, %s1583_s1  ;;  %p1238_p4 = scmp.lt.u32.totalorder %s1236_s8, %s1231_s5 }
  0x15   : > { %p1234_p1 = pnand %p1233_p0, %p1232_p13  ;;  %p1240_p6 = scmp.lt.u32.totalorder %s1231_s5, %s1393_s28 }
  0x16   : > { %p1239_p5 = por %p1238_p4, %p1237_p3 }
  0x17   : > { %p1235_p2 = pneg %p1234_p1 }
  0x18   : > { %p1241_p7 = por %p1240_p6, %p1239_p5 }
  0x1a   : > { %p1242_p10 = pnand %p1241_p7, %p1235_p2 }
  0x1c   : > { %1245 = shalt.err (!%p1242_p10)
}
  0x1d   : > { %s1246_s17 = scalar_lea.vmem %s1401_s30, 8192  ;;  %s1313_s18 = smov [#allocation3]  }
  0x1e   : > { %p1247_p13 = scmp.ne.s32.totalorder %s1401_s30, %s1246_s17  ;;  %s1251_s19 = sshll.u32 %s1313_s18, 4  ;;  %s1252_s19 = int_to_ptr.vmem [resolvable:$false] %s1251_s19 }
  0x1f   : > { %s1253_s23 = scalar_lea.vmem %s1252_s19, 16384  ;;  %p1254_p9 = scmp.lt.s32.totalorder %s1401_s30, %s1252_s19 }
  0x20   : > { %p1249_p1 = pnand %p1247_p13, %p1233_p0  ;;  %p1255_p3 = scmp.lt.s32.totalorder %s1253_s23, %s1246_s17 }
  0x22   : > { %p1250_p12 = pneg %p1249_p1  ;;  %p1256_p4 = por %p1255_p3, %p1254_p9 }
  0x24   : > { %p1257_p5 = pnand %p1256_p4, %p1250_p12 }
  0x26   : > { %1260 = shalt.err (!%p1257_p5)
}
  0x27   : > { %s1314_s24 = smov 4096   ;;  %s1315_s25 = smov 512  }
  0x28   : > { %s1316_s26 = smov 32   ;;  %p189_p0 = scmp.lt.s32.totalorder %s1311_s14, 9 }
  0x29   : > { %1176 = dma.hbm_to_vmem [thread:$0]  (!%p1397_p11), %s1393_s28, 8192, %s1401_s30, %s1404_s4, %s1314_s24, %s1315_s25, %s1316_s26  }
  0x2a   : > { %p1589_p2 = scmp.ge.s32.totalorder %s1311_s14, 1 }
  0x2c   : > { %p190_p6 = pnand %p1589_p2, %p189_p0 }
  0x2d   : > { %s1436_s27 = sand.u32 (!%p190_p6), 1, %s1295_s10  }
  0x2e   : > { %193 = sbr.rel (%p190_p6) target bundleno = 346 (0x15a), region = 28  ;;  %s1097_s29 = sshll.u32 (!%p190_p6), %s1436_s27, 9 }
  0x2f   : > { %s196_s5 = scalar_lea.sflag (!%p190_p6), [#allocation4], %s1436_s27  ;;  %s1440_s6 = scalar_lea.vmem (!%p190_p6), [#allocation3], %s1097_s29 }
  0x35   : > { %1286 = dma.done.wait (%p1376_p8), %s196_s5, 8192  }
  0x36   : > { %1288 = vsyncadd (%p1376_p8), %s196_s5, 4294959104  ;;  %v1317_v0 = vmov 0   ;;  %v287_v1 = vld [vmem:[%s1440_s6] sm:$0xff]  ;;  %v288_v3 = vld [vmem:[%s1440_s6 + $0x8] sm:$0xff]  ;;  %s1098_s30 = sshll.u32 %s1436_s27, 7  ;;  %p1590_p8 = scmp.ne.s32.totalorder %s1587_s22, 0 }
  0x37   : > { %709 = vmatprep.mubr.bf16.mxu0 %v1317_v0  ;;  %752 = vmatprep.mubr.bf16.mxu1 %v1317_v0  ;;  %v291_v2 = vld [vmem:[%s1440_s6 + $0x20] sm:$0xff]  ;;  %v292_v5 = vld [vmem:[%s1440_s6 + $0x28] sm:$0xff]  ;;  %v289_v63 = vld [vmem:[%s1440_s6 + $0x10] sm:$0xff]  ;;  %s1524_s3 = scalar_lea.vmem [#allocation5], %s1098_s30  ;;  %s1170_s4 = sshll.u32 (%p1590_p8), %s1303_s12, 6 }
  0x38   : > { %v1101_v4 = vcombine.high %v287_v1, %v291_v2  ;;  %v1100_v6 = vcombine.low %v287_v1, %v291_v2  ;;  %v295_v7 = vld [vmem:[%s1440_s6 + $0x40] sm:$0xff]  ;;  %v1103_v9 = vcombine.high %v288_v3, %v292_v5  ;;  %v1102_v10 = vcombine.low %v288_v3, %v292_v5  ;;  %v296_v12 = vld [vmem:[%s1440_s6 + $0x48] sm:$0xff]  ;;  %v293_v1 = vld [vmem:[%s1440_s6 + $0x30] sm:$0xff]  ;;  %s930_s9 = scalar_lea.vmem (%p1590_p8), %s1584_s2, %s1170_s4 }
  0x39   : > { %v299_v8 = vld [vmem:[%s1440_s6 + $0x60] sm:$0xff]  ;;  %v300_v13 = vld [vmem:[%s1440_s6 + $0x68] sm:$0xff]  ;;  %v290_v2 = vld [vmem:[%s1440_s6 + $0x18] sm:$0xff] }
  0x3a   : > { %v1109_v11 = vcombine.high %v295_v7, %v299_v8  ;;  %v303_v14 = vld [vmem:[%s1440_s6 + $0x80] sm:$0xff]  ;;  %677 = vmatprep.subr.bf16.mxu0 %v1101_v4  ;;  %v1111_v15 = vcombine.high %v296_v12, %v300_v13  ;;  %v304_v17 = vld [vmem:[%s1440_s6 + $0x88] sm:$0xff]  ;;  %720 = vmatprep.subr.bf16.mxu1 %v1103_v9  ;;  %v1108_v19 = vcombine.low %v295_v7, %v299_v8  ;;  %v294_v3 = vld [vmem:[%s1440_s6 + $0x38] sm:$0xff] }
  0x3b   : > { %v307_v16 = vld [vmem:[%s1440_s6 + $0xa0] sm:$0xff]  ;;  %v308_v18 = vld [vmem:[%s1440_s6 + $0xa8] sm:$0xff]  ;;  %678 = vmatpush1.bf16.msra.mxu0 %v1100_v6  ;;  %721 = vmatpush1.bf16.msra.mxu1 %v1102_v10  ;;  %v1110_v20 = vcombine.low %v296_v12, %v300_v13  ;;  %v1105_v6 = vcombine.high %v289_v63, %v293_v1  ;;  %v1107_v7 = vcombine.high %v290_v2, %v294_v3  ;;  %v297_v8 = vld [vmem:[%s1440_s6 + $0x50] sm:$0xff] }
  0x3c   : > { %679 = vmatprep.subr.bf16.mxu0 %v1109_v11  ;;  %v1117_v21 = vcombine.high %v303_v14, %v307_v16  ;;  %722 = vmatprep.subr.bf16.mxu1 %v1111_v15  ;;  %v1119_v22 = vcombine.high %v304_v17, %v308_v18  ;;  %v311_v23 = vld [vmem:[%s1440_s6 + $0xc0] sm:$0xff]  ;;  %v312_v25 = vld [vmem:[%s1440_s6 + $0xc8] sm:$0xff]  ;;  %v1116_v27 = vcombine.low %v303_v14, %v307_v16  ;;  %v301_v9 = vld [vmem:[%s1440_s6 + $0x70] sm:$0xff] }
  0x3d   : > { %v315_v24 = vld [vmem:[%s1440_s6 + $0xe0] sm:$0xff]  ;;  %v316_v26 = vld [vmem:[%s1440_s6 + $0xe8] sm:$0xff]  ;;  %v1118_v28 = vcombine.low %v304_v17, %v308_v18  ;;  %v298_v11 = vld [vmem:[%s1440_s6 + $0x58] sm:$0xff]  ;;  %v1104_v13 = vcombine.low %v289_v63, %v293_v1  ;;  %v1106_v14 = vcombine.low %v290_v2, %v294_v3  ;;  %v1113_v15 = vcombine.high %v297_v8, %v301_v9 }
  0x3e   : > { %v1125_v29 = vcombine.high %v311_v23, %v315_v24  ;;  %v1127_v30 = vcombine.high %v312_v25, %v316_v26  ;;  %v319_v31 = vld [vmem:[%s1440_s6 + $0x100] sm:$0xff]  ;;  %v320_v33 = vld [vmem:[%s1440_s6 + $0x108] sm:$0xff]  ;;  %v1124_v35 = vcombine.low %v311_v23, %v315_v24  ;;  %v1126_v36 = vcombine.low %v312_v25, %v316_v26  ;;  %v302_v12 = vld [vmem:[%s1440_s6 + $0x78] sm:$0xff] }
  0x3f   : > { %680 = vmatpush1.bf16.msra.mxu0 %v1108_v19  ;;  %723 = vmatpush1.bf16.msra.mxu1 %v1110_v20  ;;  %v323_v32 = vld [vmem:[%s1440_s6 + $0x120] sm:$0xff]  ;;  %v324_v34 = vld [vmem:[%s1440_s6 + $0x128] sm:$0xff]  ;;  %v1115_v16 = vcombine.high %v298_v11, %v302_v12  ;;  %v305_v17 = vld [vmem:[%s1440_s6 + $0x90] sm:$0xff] }
  0x40   : > { %681 = vmatprep.subr.bf16.mxu0 %v1117_v21  ;;  %724 = vmatprep.subr.bf16.mxu1 %v1119_v22  ;;  %v1133_v37 = vcombine.high %v319_v31, %v323_v32  ;;  %v1135_v38 = vcombine.high %v320_v33, %v324_v34  ;;  %v327_v39 = vld [vmem:[%s1440_s6 + $0x140] sm:$0xff]  ;;  %v328_v41 = vld [vmem:[%s1440_s6 + $0x148] sm:$0xff]  ;;  %v1132_v43 = vcombine.low %v319_v31, %v323_v32  ;;  %v309_v18 = vld [vmem:[%s1440_s6 + $0xb0] sm:$0xff] }
  0x41   : > { %v331_v40 = vld [vmem:[%s1440_s6 + $0x160] sm:$0xff]  ;;  %v332_v42 = vld [vmem:[%s1440_s6 + $0x168] sm:$0xff]  ;;  %v1134_v44 = vcombine.low %v320_v33, %v324_v34  ;;  %v306_v19 = vld [vmem:[%s1440_s6 + $0x98] sm:$0xff]  ;;  %v1112_v21 = vcombine.low %v297_v8, %v301_v9  ;;  %v1114_v22 = vcombine.low %v298_v11, %v302_v12  ;;  %v1121_v23 = vcombine.high %v305_v17, %v309_v18 }
  0x42   : > { %v1141_v45 = vcombine.high %v327_v39, %v331_v40  ;;  %v1143_v46 = vcombine.high %v328_v41, %v332_v42  ;;  %v335_v47 = vld [vmem:[%s1440_s6 + $0x180] sm:$0xff]  ;;  %v336_v49 = vld [vmem:[%s1440_s6 + $0x188] sm:$0xff]  ;;  %v1140_v51 = vcombine.low %v327_v39, %v331_v40  ;;  %v1142_v52 = vcombine.low %v328_v41, %v332_v42  ;;  %v310_v20 = vld [vmem:[%s1440_s6 + $0xb8] sm:$0xff] }
  0x43   : > { %682 = vmatpush1.bf16.msra.mxu0 %v1116_v27  ;;  %725 = vmatpush1.bf16.msra.mxu1 %v1118_v28  ;;  %v339_v48 = vld [vmem:[%s1440_s6 + $0x1a0] sm:$0xff]  ;;  %v340_v50 = vld [vmem:[%s1440_s6 + $0x1a8] sm:$0xff]  ;;  %v1123_v24 = vcombine.high %v306_v19, %v310_v20  ;;  %v313_v25 = vld [vmem:[%s1440_s6 + $0xd0] sm:$0xff] }
  0x44   : > { %683 = vmatprep.subr.bf16.mxu0 %v1125_v29  ;;  %726 = vmatprep.subr.bf16.mxu1 %v1127_v30  ;;  %v1149_v53 = vcombine.high %v335_v47, %v339_v48  ;;  %v1151_v54 = vcombine.high %v336_v49, %v340_v50  ;;  %v343_v55 = vld [vmem:[%s1440_s6 + $0x1c0] sm:$0xff]  ;;  %v344_v57 = vld [vmem:[%s1440_s6 + $0x1c8] sm:$0xff]  ;;  %v1148_v59 = vcombine.low %v335_v47, %v339_v48  ;;  %v317_v26 = vld [vmem:[%s1440_s6 + $0xf0] sm:$0xff] }
  0x45   : > { %v347_v56 = vld [vmem:[%s1440_s6 + $0x1e0] sm:$0xff]  ;;  %v348_v58 = vld [vmem:[%s1440_s6 + $0x1e8] sm:$0xff]  ;;  %v1150_v60 = vcombine.low %v336_v49, %v340_v50  ;;  %v314_v27 = vld [vmem:[%s1440_s6 + $0xd8] sm:$0xff]  ;;  %v1120_v29 = vcombine.low %v305_v17, %v309_v18  ;;  %v1122_v30 = vcombine.low %v306_v19, %v310_v20  ;;  %v1129_v31 = vcombine.high %v313_v25, %v317_v26 }
  0x46   : > { %v1157_v61 = vcombine.high %v343_v55, %v347_v56  ;;  %v1159_v62 = vcombine.high %v344_v57, %v348_v58  ;;  %v1156_v4 = vcombine.low %v343_v55, %v347_v56  ;;  %v1158_v5 = vcombine.low %v344_v57, %v348_v58  ;;  %v1489_v10 = vld [vmem:[%s1582_s0] sm:$0xff]   ;;  %v318_v28 = vld [vmem:[%s1440_s6 + $0xf8] sm:$0xff]  ;;  %v321_v33 = vld [vmem:[%s1440_s6 + $0x110] sm:$0xff] }
  0x47   : > { %684 = vmatpush1.bf16.msra.mxu0 %v1124_v35  ;;  %727 = vmatpush1.bf16.msra.mxu1 %v1126_v36  ;;  %v1131_v32 = vcombine.high %v314_v27, %v318_v28  ;;  %v325_v34 = vld [vmem:[%s1440_s6 + $0x130] sm:$0xff]  ;;  %v322_v35 = vld [vmem:[%s1440_s6 + $0x118] sm:$0xff] }
  0x48   : > { %685 = vmatprep.subr.bf16.mxu0 %v1133_v37  ;;  %728 = vmatprep.subr.bf16.mxu1 %v1135_v38  ;;  %v326_v36 = vld [vmem:[%s1440_s6 + $0x138] sm:$0xff]  ;;  %v1128_v37 = vcombine.low %v313_v25, %v317_v26  ;;  %v1137_v38 = vcombine.high %v321_v33, %v325_v34  ;;  %v329_v40 = vld [vmem:[%s1440_s6 + $0x150] sm:$0xff] }
  0x49   : > { %v1139_v39 = vcombine.high %v322_v35, %v326_v36  ;;  %v333_v41 = vld [vmem:[%s1440_s6 + $0x170] sm:$0xff]  ;;  %v330_v42 = vld [vmem:[%s1440_s6 + $0x158] sm:$0xff] }
  0x4a   : > { %v337_v48 = vld [vmem:[%s1440_s6 + $0x190] sm:$0xff]  ;;  %v338_v50 = vld [vmem:[%s1440_s6 + $0x198] sm:$0xff] }
  0x4b   : > { %686 = vmatpush1.bf16.msra.mxu0 %v1132_v43  ;;  %729 = vmatpush1.bf16.msra.mxu1 %v1134_v44  ;;  %v334_v43 = vld [vmem:[%s1440_s6 + $0x178] sm:$0xff]  ;;  %v1136_v44 = vcombine.low %v321_v33, %v325_v34  ;;  %v341_v49 = vld [vmem:[%s1440_s6 + $0x1b0] sm:$0xff] }
  0x4c   : > { %687 = vmatprep.subr.bf16.mxu0 %v1141_v45  ;;  %730 = vmatprep.subr.bf16.mxu1 %v1143_v46  ;;  %v1138_v45 = vcombine.low %v322_v35, %v326_v36  ;;  %v1145_v46 = vcombine.high %v329_v40, %v333_v41  ;;  %v1147_v47 = vcombine.high %v330_v42, %v334_v43  ;;  %v345_v56 = vld [vmem:[%s1440_s6 + $0x1d0] sm:$0xff]  ;;  %v346_v58 = vld [vmem:[%s1440_s6 + $0x1d8] sm:$0xff] }
  0x4d   : > { %v349_v57 = vld [vmem:[%s1440_s6 + $0x1f0] sm:$0xff] }
  0x4e   : > { %v1160_v1 = vcombine.low %v345_v56, %v349_v57 }
  0x4f   : > { %688 = vmatpush1.bf16.msra.mxu0 %v1140_v51  ;;  %731 = vmatpush1.bf16.msra.mxu1 %v1142_v52  ;;  %v342_v51 = vld [vmem:[%s1440_s6 + $0x1b8] sm:$0xff]  ;;  %v1144_v52 = vcombine.low %v329_v40, %v333_v41 }
  0x50   : > { %689 = vmatprep.subr.bf16.mxu0 %v1149_v53  ;;  %732 = vmatprep.subr.bf16.mxu1 %v1151_v54  ;;  %v1146_v53 = vcombine.low %v330_v42, %v334_v43  ;;  %v1153_v54 = vcombine.high %v337_v48, %v341_v49  ;;  %v1155_v55 = vcombine.high %v338_v50, %v342_v51 }
  0x53   : > { %690 = vmatpush1.bf16.msra.mxu0 %v1148_v59  ;;  %733 = vmatpush1.bf16.msra.mxu1 %v1150_v60  ;;  %v350_v59 = vld [vmem:[%s1440_s6 + $0x1f8] sm:$0xff]  ;;  %v1152_v60 = vcombine.low %v337_v48, %v341_v49 }
  0x54   : > { %691 = vmatprep.subr.bf16.mxu0 %v1157_v61  ;;  %734 = vmatprep.subr.bf16.mxu1 %v1159_v62  ;;  %v1154_v61 = vcombine.low %v338_v50, %v342_v51  ;;  %v1161_v62 = vcombine.high %v345_v56, %v349_v57  ;;  %v1163_v63 = vcombine.high %v346_v58, %v350_v59 }
  0x55   : > { %v1162_v2 = vcombine.low %v346_v58, %v350_v59 }
  0x57   : > { %692 = vmatpush1.bf16.msra.mxu0 %v1156_v4  ;;  %735 = vmatpush1.bf16.msra.mxu1 %v1158_v5 }
  0x58   : > { %763 = vmatprep.subr.bf16.mxu0 %v1105_v6  ;;  %806 = vmatprep.subr.bf16.mxu1 %v1107_v7 }
  0x5a   : > { %710 = vmatmul.mubr.bf16.vlgmr.msra.gmra.mrb[0].mxu0 %v1489_v10  ;;  %753 = vmatmul.mubr.bf16.vlgmr.msra.gmra.mrb[0].mxu1 %v1489_v10 }
  0x5b   : > { %764 = vmatpush1.bf16.msra.mxu0 %v1104_v13  ;;  %807 = vmatpush1.bf16.msra.mxu1 %v1106_v14 }
  0x5c   : > { %765 = vmatprep.subr.bf16.mxu0 %v1113_v15  ;;  %808 = vmatprep.subr.bf16.mxu1 %v1115_v16 }
  0x5d   : > { %795 = vmatprep.mubr.bf16.mxu0 %v1317_v0  ;;  %838 = vmatprep.mubr.bf16.mxu1 %v1317_v0  ;;  %v1130_v0 = vcombine.low %v314_v27, %v318_v28 }
  0x5f   : > { %766 = vmatpush1.bf16.msra.mxu0 %v1112_v21  ;;  %809 = vmatpush1.bf16.msra.mxu1 %v1114_v22 }
  0x60   : > { %767 = vmatprep.subr.bf16.mxu0 %v1121_v23  ;;  %810 = vmatprep.subr.bf16.mxu1 %v1123_v24 }
  0x63   : > { %768 = vmatpush1.bf16.msra.mxu0 %v1120_v29  ;;  %811 = vmatpush1.bf16.msra.mxu1 %v1122_v30 }
  0x64   : > { %769 = vmatprep.subr.bf16.mxu0 %v1129_v31  ;;  %812 = vmatprep.subr.bf16.mxu1 %v1131_v32 }
  0x67   : > { %770 = vmatpush1.bf16.msra.mxu0 %v1128_v37  ;;  %813 = vmatpush1.bf16.msra.mxu1 %v1130_v0 }
  0x68   : > { %771 = vmatprep.subr.bf16.mxu0 %v1137_v38  ;;  %814 = vmatprep.subr.bf16.mxu1 %v1139_v39 }
  0x6b   : > { %772 = vmatpush1.bf16.msra.mxu0 %v1136_v44  ;;  %815 = vmatpush1.bf16.msra.mxu1 %v1138_v45 }
  0x6c   : > { %773 = vmatprep.subr.bf16.mxu0 %v1145_v46  ;;  %816 = vmatprep.subr.bf16.mxu1 %v1147_v47 }
  0x6f   : > { %774 = vmatpush1.bf16.msra.mxu0 %v1144_v52  ;;  %817 = vmatpush1.bf16.msra.mxu1 %v1146_v53 }
  0x70   : > { %775 = vmatprep.subr.bf16.mxu0 %v1153_v54  ;;  %818 = vmatprep.subr.bf16.mxu1 %v1155_v55 }
  0x73   : > { %776 = vmatpush1.bf16.msra.mxu0 %v1152_v60  ;;  %819 = vmatpush1.bf16.msra.mxu1 %v1154_v61 }
  0x74   : > { %777 = vmatprep.subr.bf16.mxu0 %v1161_v62  ;;  %820 = vmatprep.subr.bf16.mxu1 %v1163_v63 }
  0x77   : > { %778 = vmatpush1.bf16.msra.mxu0 %v1160_v1  ;;  %821 = vmatpush1.bf16.msra.mxu1 %v1162_v2 }
  0x7a   : > { %796 = vmatmul.mubr.bf16.vlgmr.msra.gmra.mrb[4].mxu0 %v1489_v10  ;;  %839 = vmatmul.mubr.bf16.vlgmr.msra.gmra.mrb[4].mxu1 %v1489_v10 }
 0x12d   : > { %v711_v3 = vpop.f32.mrb[0].mxu0  ;;  %v754_v4 = vpop.f32.mrb[0].mxu1 }
 0x12e   : > { %900 = vst [vmem:[%s1524_s3] sm:$0xff] %v711_v3  ;;  %v713_v5 = vpop.f32.mrb[1].mxu0  ;;  %902 = vst [vmem:[%s1524_s3 + $0x10] sm:$0xff] %v754_v4  ;;  %v756_v6 = vpop.f32.mrb[1].mxu1 }
 0x12f   : > { %901 = vst [vmem:[%s1524_s3 + $0x8] sm:$0xff] %v713_v5  ;;  %v715_v7 = vpop.f32.mrb[2].mxu0  ;;  %903 = vst [vmem:[%s1524_s3 + $0x18] sm:$0xff] %v756_v6  ;;  %v758_v8 = vpop.f32.mrb[2].mxu1 }
 0x130   : > { %908 = vst [vmem:[%s1524_s3 + $0x40] sm:$0xff] %v715_v7  ;;  %v717_v9 = vpop.f32.mrb[3].mxu0  ;;  %910 = vst [vmem:[%s1524_s3 + $0x50] sm:$0xff] %v758_v8  ;;  %v760_v10 = vpop.f32.mrb[3].mxu1 }
 0x131   : > { %909 = vst [vmem:[%s1524_s3 + $0x48] sm:$0xff] %v717_v9  ;;  %911 = vst [vmem:[%s1524_s3 + $0x58] sm:$0xff] %v760_v10 }
 0x135   : > { %v943_v19 = vld [vmem:[%s1524_s3] sm:$0xff] (%p1590_p8)  ;;  %v947_v21 = vld [vmem:[%s1524_s3 + $0x10] sm:$0xff] (%p1590_p8) }
 0x136   : > { %v945_v20 = vld [vmem:[%s1524_s3 + $0x8] sm:$0xff] (%p1590_p8)  ;;  %v949_v22 = vld [vmem:[%s1524_s3 + $0x18] sm:$0xff] (%p1590_p8)  ;;  %944 = vst [vmem:[%s930_s9] sm:$0xff] (%p1590_p8), %v943_v19  ;;  %948 = vst [vmem:[%s930_s9 + $0x10] sm:$0xff] (%p1590_p8), %v947_v21 }
 0x137   : > { %946 = vst [vmem:[%s930_s9 + $0x8] sm:$0xff] (%p1590_p8), %v945_v20  ;;  %950 = vst [vmem:[%s930_s9 + $0x18] sm:$0xff] (%p1590_p8), %v949_v22  ;;  %v959_v27 = vld [vmem:[%s1524_s3 + $0x40] sm:$0xff] (%p1590_p8)  ;;  %v963_v29 = vld [vmem:[%s1524_s3 + $0x50] sm:$0xff] (%p1590_p8) }
 0x138   : > { %960 = vst [vmem:[%s930_s9 + $0x200] sm:$0xff] (%p1590_p8), %v959_v27  ;;  %v961_v28 = vld [vmem:[%s1524_s3 + $0x48] sm:$0xff] (%p1590_p8)  ;;  %v965_v30 = vld [vmem:[%s1524_s3 + $0x58] sm:$0xff] (%p1590_p8)  ;;  %964 = vst [vmem:[%s930_s9 + $0x210] sm:$0xff] (%p1590_p8), %v963_v29 }
 0x139   : > { %962 = vst [vmem:[%s930_s9 + $0x208] sm:$0xff] (%p1590_p8), %v961_v28  ;;  %966 = vst [vmem:[%s930_s9 + $0x218] sm:$0xff] (%p1590_p8), %v965_v30 }
 0x14b   : > { %922 = sbr.rel (!%p1590_p8) target bundleno = 346 (0x15a), region = 44 }
 0x14d   : > { %v797_v11 = vpop.f32.mrb[4].mxu0  ;;  %v840_v12 = vpop.f32.mrb[4].mxu1 }
 0x14e   : > { %904 = vst [vmem:[%s1524_s3 + $0x20] sm:$0xff] %v797_v11  ;;  %v799_v13 = vpop.f32.mrb[5].mxu0  ;;  %906 = vst [vmem:[%s1524_s3 + $0x30] sm:$0xff] %v840_v12  ;;  %v842_v14 = vpop.f32.mrb[5].mxu1 }
 0x14f   : > { %905 = vst [vmem:[%s1524_s3 + $0x28] sm:$0xff] %v799_v13  ;;  %v801_v15 = vpop.f32.mrb[6].mxu0  ;;  %907 = vst [vmem:[%s1524_s3 + $0x38] sm:$0xff] %v842_v14  ;;  %v844_v16 = vpop.f32.mrb[6].mxu1 }
 0x150   : > { %912 = vst [vmem:[%s1524_s3 + $0x60] sm:$0xff] %v801_v15  ;;  %v803_v17 = vpop.f32.mrb[7].mxu0  ;;  %914 = vst [vmem:[%s1524_s3 + $0x70] sm:$0xff] %v844_v16  ;;  %v846_v18 = vpop.f32.mrb[7].mxu1 }
 0x151   : > { %913 = vst [vmem:[%s1524_s3 + $0x68] sm:$0xff] %v803_v17  ;;  %915 = vst [vmem:[%s1524_s3 + $0x78] sm:$0xff] %v846_v18 }
 0x155   : > { %v951_v23 = vld [vmem:[%s1524_s3 + $0x20] sm:$0xff]  ;;  %v955_v25 = vld [vmem:[%s1524_s3 + $0x30] sm:$0xff] }
 0x156   : > { %v953_v24 = vld [vmem:[%s1524_s3 + $0x28] sm:$0xff]  ;;  %952 = vst [vmem:[%s930_s9 + $0x20] sm:$0xff] %v951_v23  ;;  %v957_v26 = vld [vmem:[%s1524_s3 + $0x38] sm:$0xff]  ;;  %956 = vst [vmem:[%s930_s9 + $0x30] sm:$0xff] %v955_v25 }
 0x157   : > { %954 = vst [vmem:[%s930_s9 + $0x28] sm:$0xff] %v953_v24  ;;  %958 = vst [vmem:[%s930_s9 + $0x38] sm:$0xff] %v957_v26  ;;  %v967_v31 = vld [vmem:[%s1524_s3 + $0x60] sm:$0xff]  ;;  %v971_v33 = vld [vmem:[%s1524_s3 + $0x70] sm:$0xff] }
 0x158   : > { %v969_v32 = vld [vmem:[%s1524_s3 + $0x68] sm:$0xff]  ;;  %968 = vst [vmem:[%s930_s9 + $0x220] sm:$0xff] %v967_v31  ;;  %972 = vst [vmem:[%s930_s9 + $0x230] sm:$0xff] %v971_v33  ;;  %v973_v34 = vld [vmem:[%s1524_s3 + $0x78] sm:$0xff] }
 0x159   : > { %970 = vst [vmem:[%s930_s9 + $0x228] sm:$0xff] %v969_v32  ;;  %974 = vst [vmem:[%s930_s9 + $0x238] sm:$0xff] %v973_v34 }
 0x15a PF: > { %s15_s14 = sadd.s32 1, %s1311_s14   ;;  %s1591_s9 = smov %s1295_s10 }
 0x15b   : > { %p12_p9 = scmp.ge.s32.totalorder %s15_s14, 10   ;;  %s1592_s10 = smov %s1299_s11 }
 0x15c   : > { %s1593_s11 = smov %s1381_s21  ;;  %s1594_s12 = smov %s1307_s13 }
 0x15d   : > { %s1595_s13 = smov %s1597_s16  ;;  %14 = sbr.rel (!%p12_p9) target bundleno = 4 (0x4), region = 102 }
 0x164   :  { %990 = vsyncpa [#allocation4], 1 }
 0x165   :  { %992 = vsyncpa [#allocation4 + $0x1], 1 }

// kernel: generator_forward.12
= control target key start
LH: loop header
LB: loop body
LE: loop exit
PB: predicated region body
PF: predicated region fallthrough
CT: control target
= control target key end

     0   :  { %v48_v0 = vlaneseq  ;;  %s556_s1 = inlined_call_operand.vmem [shape: f32[1,256], index: 1, kind: input, shape index: {}]   ;;  %s557_s2 = inlined_call_operand.vmem [shape: f32[1,256], index: 2, kind: input, shape index: {}]   ;;  %s558_s0 = inlined_call_operand.vmem [shape: f32[128,256], index: 0, kind: input, shape index: {}]   ;;  %s559_s3 = inlined_call_operand.vmem [shape: bf16[128,256], index: 3, kind: output, shape index: {}]  }
   0x1   :  { %v46_v2 = vld [vmem:[%s556_s1] sm:$0x3]  ;;  %v15_v5 = vld [vmem:[%s558_s0 + $0x8] sm:$0xff]  ;;  %v16_v8 = vld [vmem:[%s558_s0 + $0x10] sm:$0xff] }
   0x2   :  { %v49_v1 = vshrl.u32 %v48_v0, 7  ;;  %v90_v3 = vld [vmem:[%s557_s2] sm:$0x3]  ;;  %v17_v9 = vld [vmem:[%s558_s0 + $0x18] sm:$0xff]  ;;  %v19_v15 = vld [vmem:[%s558_s0 + $0x28] sm:$0xff] }
   0x3   :  { %v14_v4 = vld [vmem:[%s558_s0] sm:$0xff]  ;;  %v20_v16 = vld [vmem:[%s558_s0 + $0x30] sm:$0xff]  ;;  %v21_v17 = vld [vmem:[%s558_s0 + $0x38] sm:$0xff] }
   0x4   :  { %v50_v6 = vsub.s32 0, %v49_v1  ;;  %v54_v7 = vsub.s32 1, %v49_v1  ;;  %v18_v10 = vld [vmem:[%s558_s0 + $0x20] sm:$0xff]  ;;  %v23_v35 = vld [vmem:[%s558_s0 + $0x48] sm:$0xff]  ;;  %v24_v40 = vld [vmem:[%s558_s0 + $0x50] sm:$0xff] }
   0x5   :  { %v22_v34 = vld [vmem:[%s558_s0 + $0x40] sm:$0xff]  ;;  %v25_v41 = vld [vmem:[%s558_s0 + $0x58] sm:$0xff]  ;;  %v27_v47 = vld [vmem:[%s558_s0 + $0x68] sm:$0xff] }
   0x6   :  { %v355_v11 = vrot.slane %v46_v2, %v50_v6  ;;  %v357_v12 = vrot.slane %v46_v2, %v54_v7  ;;  %v359_v13 = vrot.slane %v90_v3, %v50_v6  ;;  %v361_v14 = vrot.slane %v90_v3, %v54_v7  ;;  %v26_v46 = vld [vmem:[%s558_s0 + $0x60] sm:$0xff]  ;;  %v28_v52 = vld [vmem:[%s558_s0 + $0x70] sm:$0xff]  ;;  %v29_v53 = vld [vmem:[%s558_s0 + $0x78] sm:$0xff] }
   0x7   :  { %v30_v2 = vld [vmem:[%s558_s0 + $0x80] sm:$0xff]  ;;  %v31_v7 = vld [vmem:[%s558_s0 + $0x88] sm:$0xff] }
   0x8   :  { %v58_v18 = vmul.f32 %v355_v11, %v14_v4  ;;  %v59_v19 = vmul.f32 %v357_v12, %v15_v5  ;;  %v60_v20 = vmul.f32 %v355_v11, %v16_v8  ;;  %v61_v21 = vmul.f32 %v357_v12, %v17_v9 }
   0x9   :  { %v62_v22 = vmul.f32 %v355_v11, %v18_v10  ;;  %v63_v23 = vmul.f32 %v357_v12, %v19_v15  ;;  %v64_v24 = vmul.f32 %v355_v11, %v20_v16  ;;  %v65_v25 = vmul.f32 %v357_v12, %v21_v17  ;;  %v32_v16 = vld [vmem:[%s558_s0 + $0x90] sm:$0xff]  ;;  %v33_v17 = vld [vmem:[%s558_s0 + $0x98] sm:$0xff] }
   0xa   :  { %v102_v26 = vadd.f32 %v359_v13, %v58_v18  ;;  %v103_v27 = vadd.f32 %v361_v14, %v59_v19  ;;  %v104_v28 = vadd.f32 %v359_v13, %v60_v20  ;;  %v105_v29 = vadd.f32 %v361_v14, %v61_v21 }
   0xb   :  { %v106_v30 = vadd.f32 %v359_v13, %v62_v22  ;;  %v107_v31 = vadd.f32 %v361_v14, %v63_v23  ;;  %v108_v32 = vadd.f32 %v359_v13, %v64_v24  ;;  %v109_v33 = vadd.f32 %v361_v14, %v65_v25  ;;  %v34_v22 = vld [vmem:[%s558_s0 + $0xa0] sm:$0xff]  ;;  %v35_v23 = vld [vmem:[%s558_s0 + $0xa8] sm:$0xff] }
   0xc   :  { %v134_v36 = vmax.f32 %v102_v26, 0.0  ;;  %v135_v37 = vmax.f32 %v103_v27, 0.0  ;;  %v136_v38 = vmax.f32 %v104_v28, 0.0  ;;  %v137_v39 = vmax.f32 %v105_v29, 0.0  ;;  %v36_v28 = vld [vmem:[%s558_s0 + $0xb0] sm:$0xff] }
   0xd   :  { %v138_v42 = vmax.f32 %v106_v30, 0.0  ;;  %v139_v43 = vmax.f32 %v107_v31, 0.0  ;;  %v140_v44 = vmax.f32 %v108_v32, 0.0  ;;  %v141_v45 = vmax.f32 %v109_v33, 0.0  ;;  %v37_v33 = vld [vmem:[%s558_s0 + $0xb8] sm:$0xff] }
   0xe   :  { %v298_v48 = vpack.c.bf16 %v135_v37, %v134_v36  ;;  %v299_v49 = vpack.c.bf16 %v137_v39, %v136_v38  ;;  %v66_v50 = vmul.f32 %v355_v11, %v22_v34  ;;  %v67_v51 = vmul.f32 %v357_v12, %v23_v35  ;;  %v38_v38 = vld [vmem:[%s558_s0 + $0xc0] sm:$0xff] }
   0xf   :  { %v300_v54 = vpack.c.bf16 %v139_v43, %v138_v42  ;;  %v301_v55 = vpack.c.bf16 %v141_v45, %v140_v44  ;;  %v68_v56 = vmul.f32 %v355_v11, %v24_v40  ;;  %v69_v57 = vmul.f32 %v357_v12, %v25_v41 }
  0x10   :  { %262 = vst [vmem:[%s559_s3] sm:$0xff] %v298_v48  ;;  %263 = vst [vmem:[%s559_s3 + $0x8] sm:$0xff] %v299_v49  ;;  %v110_v58 = vadd.f32 %v359_v13, %v66_v50  ;;  %v111_v59 = vadd.f32 %v361_v14, %v67_v51  ;;  %v70_v60 = vmul.f32 %v355_v11, %v26_v46 }
  0x11   :  { %v71_v61 = vmul.f32 %v357_v12, %v27_v47  ;;  %264 = vst [vmem:[%s559_s3 + $0x10] sm:$0xff] %v300_v54  ;;  %265 = vst [vmem:[%s559_s3 + $0x18] sm:$0xff] %v301_v55  ;;  %v112_v62 = vadd.f32 %v359_v13, %v68_v56  ;;  %v113_v63 = vadd.f32 %v361_v14, %v69_v57  ;;  %v39_v47 = vld [vmem:[%s558_s0 + $0xc8] sm:$0xff] }
  0x12   :  { %v72_v0 = vmul.f32 %v355_v11, %v28_v52  ;;  %v73_v1 = vmul.f32 %v357_v12, %v29_v53  ;;  %v142_v3 = vmax.f32 %v110_v58, 0.0  ;;  %v143_v4 = vmax.f32 %v111_v59, 0.0  ;;  %v40_v52 = vld [vmem:[%s558_s0 + $0xd0] sm:$0xff]  ;;  %v41_v53 = vld [vmem:[%s558_s0 + $0xd8] sm:$0xff]  ;;  %v42_v58 = vld [vmem:[%s558_s0 + $0xe0] sm:$0xff] }
  0x13   :  { %v114_v5 = vadd.f32 %v359_v13, %v70_v60  ;;  %v115_v6 = vadd.f32 %v361_v14, %v71_v61  ;;  %v144_v8 = vmax.f32 %v112_v62, 0.0  ;;  %v145_v9 = vmax.f32 %v113_v63, 0.0  ;;  %v43_v59 = vld [vmem:[%s558_s0 + $0xe8] sm:$0xff] }
  0x14   :  { %v116_v10 = vadd.f32 %v359_v13, %v72_v0  ;;  %v117_v15 = vadd.f32 %v361_v14, %v73_v1  ;;  %v302_v18 = vpack.c.bf16 %v143_v4, %v142_v3  ;;  %v74_v21 = vmul.f32 %v355_v11, %v30_v2  ;;  %v44_v0 = vld [vmem:[%s558_s0 + $0xf0] sm:$0xff] }
  0x15   :  { %v146_v19 = vmax.f32 %v114_v5, 0.0  ;;  %v147_v20 = vmax.f32 %v115_v6, 0.0  ;;  %v303_v24 = vpack.c.bf16 %v145_v9, %v144_v8  ;;  %v75_v27 = vmul.f32 %v357_v12, %v31_v7  ;;  %v45_v5 = vld [vmem:[%s558_s0 + $0xf8] sm:$0xff] }
  0x16   :  { %v148_v25 = vmax.f32 %v116_v10, 0.0  ;;  %v149_v26 = vmax.f32 %v117_v15, 0.0  ;;  %266 = vst [vmem:[%s559_s3 + $0x20] sm:$0xff] %v302_v18  ;;  %v118_v30 = vadd.f32 %v359_v13, %v74_v21  ;;  %v76_v31 = vmul.f32 %v355_v11, %v32_v16 }
  0x17   :  { %v304_v29 = vpack.c.bf16 %v147_v20, %v146_v19  ;;  %v77_v32 = vmul.f32 %v357_v12, %v33_v17  ;;  %267 = vst [vmem:[%s559_s3 + $0x28] sm:$0xff] %v303_v24  ;;  %v119_v35 = vadd.f32 %v361_v14, %v75_v27  ;;  %v78_v36 = vmul.f32 %v355_v11, %v34_v22 }
  0x18   :  { %v305_v34 = vpack.c.bf16 %v149_v26, %v148_v25  ;;  %v79_v37 = vmul.f32 %v357_v12, %v35_v23  ;;  %v150_v39 = vmax.f32 %v118_v30, 0.0  ;;  %v120_v40 = vadd.f32 %v359_v13, %v76_v31 }
  0x19   :  { %268 = vst [vmem:[%s559_s3 + $0x30] sm:$0xff] %v304_v29  ;;  %v121_v41 = vadd.f32 %v361_v14, %v77_v32  ;;  %v80_v42 = vmul.f32 %v355_v11, %v36_v28  ;;  %v151_v43 = vmax.f32 %v119_v35, 0.0  ;;  %v122_v44 = vadd.f32 %v359_v13, %v78_v36 }
  0x1a   :  { %269 = vst [vmem:[%s559_s3 + $0x38] sm:$0xff] %v305_v34  ;;  %v123_v45 = vadd.f32 %v361_v14, %v79_v37  ;;  %v81_v46 = vmul.f32 %v357_v12, %v37_v33  ;;  %v152_v48 = vmax.f32 %v120_v40, 0.0  ;;  %v82_v51 = vmul.f32 %v355_v11, %v38_v38 }
  0x1b   :  { %v153_v49 = vmax.f32 %v121_v41, 0.0  ;;  %v124_v50 = vadd.f32 %v359_v13, %v80_v42  ;;  %v306_v54 = vpack.c.bf16 %v151_v43, %v150_v39  ;;  %v154_v55 = vmax.f32 %v122_v44, 0.0 }
  0x1c   :  { %v155_v56 = vmax.f32 %v123_v45, 0.0  ;;  %v125_v57 = vadd.f32 %v361_v14, %v81_v46  ;;  %v83_v62 = vmul.f32 %v357_v12, %v39_v47  ;;  %v126_v63 = vadd.f32 %v359_v13, %v82_v51 }
  0x1d   :  { %v307_v60 = vpack.c.bf16 %v153_v49, %v152_v48  ;;  %v156_v61 = vmax.f32 %v124_v50, 0.0  ;;  %270 = vst [vmem:[%s559_s3 + $0x40] sm:$0xff] %v306_v54  ;;  %v84_v3 = vmul.f32 %v355_v11, %v40_v52  ;;  %v85_v4 = vmul.f32 %v357_v12, %v41_v53 }
  0x1e   :  { %v308_v1 = vpack.c.bf16 %v155_v56, %v154_v55  ;;  %v157_v2 = vmax.f32 %v125_v57, 0.0  ;;  %v127_v6 = vadd.f32 %v361_v14, %v83_v62  ;;  %v158_v7 = vmax.f32 %v126_v63, 0.0 }
  0x1f   :  { %271 = vst [vmem:[%s559_s3 + $0x48] sm:$0xff] %v307_v60  ;;  %v86_v8 = vmul.f32 %v355_v11, %v42_v58  ;;  %v87_v9 = vmul.f32 %v357_v12, %v43_v59  ;;  %v128_v15 = vadd.f32 %v359_v13, %v84_v3  ;;  %v129_v16 = vadd.f32 %v361_v14, %v85_v4 }
  0x20   :  { %272 = vst [vmem:[%s559_s3 + $0x50] sm:$0xff] %v308_v1  ;;  %v309_v10 = vpack.c.bf16 %v157_v2, %v156_v61  ;;  %v88_v17 = vmul.f32 %v355_v11, %v44_v0  ;;  %v159_v18 = vmax.f32 %v127_v6, 0.0  ;;  %v89_v21 = vmul.f32 %v357_v12, %v45_v5 }
  0x21   :  { %v130_v19 = vadd.f32 %v359_v13, %v86_v8  ;;  %v131_v20 = vadd.f32 %v361_v14, %v87_v9  ;;  %v160_v22 = vmax.f32 %v128_v15, 0.0  ;;  %v161_v23 = vmax.f32 %v129_v16, 0.0 }
  0x22   :  { %273 = vst [vmem:[%s559_s3 + $0x58] sm:$0xff] %v309_v10  ;;  %v132_v24 = vadd.f32 %v359_v13, %v88_v17  ;;  %v310_v25 = vpack.c.bf16 %v159_v18, %v158_v7  ;;  %v133_v11 = vadd.f32 %v361_v14, %v89_v21 }
  0x23   :  { %v162_v26 = vmax.f32 %v130_v19, 0.0  ;;  %v163_v27 = vmax.f32 %v131_v20, 0.0  ;;  %v311_v28 = vpack.c.bf16 %v161_v23, %v160_v22 }
  0x24   :  { %v164_v29 = vmax.f32 %v132_v24, 0.0  ;;  %274 = vst [vmem:[%s559_s3 + $0x60] sm:$0xff] %v310_v25  ;;  %v165_v30 = vmax.f32 %v133_v11, 0.0 }
  0x25   :  { %v312_v12 = vpack.c.bf16 %v163_v27, %v162_v26  ;;  %275 = vst [vmem:[%s559_s3 + $0x68] sm:$0xff] %v311_v28 }
  0x26   :  { %v313_v13 = vpack.c.bf16 %v165_v30, %v164_v29 }
  0x27   :  { %276 = vst [vmem:[%s559_s3 + $0x70] sm:$0xff] %v312_v12 }
  0x28   :  { %277 = vst [vmem:[%s559_s3 + $0x78] sm:$0xff] %v313_v13 }

// kernel: generator_forward.11
= control target key start
LH: loop header
LB: loop body
LE: loop exit
PB: predicated region body
PF: predicated region fallthrough
CT: control target
= control target key end

     0   :  { %s3440_s9 = smov 0   ;;  %s3442_s10 = smov 0   ;;  %s3831_s0 = inlined_call_operand.vmem [shape: bf16[4,32,2048], index: 0, kind: input, shape index: {}]   ;;  %s3832_s1 = inlined_call_operand.vmem [shape: bf16[4,2048,256], index: 1, kind: input, shape index: {}]   ;;  %s3833_s2 = inlined_call_operand.vmem [shape: f32[4,32,256], index: 2, kind: output, shape index: {}]  }
   0x1   :  { %s3444_s11 = smov 0  }
   0x2 LB: > { %s38_s12 = sadd.s32 1, %s3419_s10  ;;  %p2637_p0 = scmp.ge.s32.totalorder %s3423_s11, 1  ;;  %s3423_s11 = sphi %s3444_s11, %s12_s11   ;;  %s3419_s10 = sphi %s3442_s10, %s3835_s10   ;;  %s3415_s9 = sphi %s3440_s9, %s3834_s9  }
   0x3   : > { %p40_p1 = scmp.ge.s32.totalorder %s38_s12, 4  ;;  %p182_p2 = scmp.lt.s32.totalorder %s3423_s11, 5 }
   0x5   : > { %s3837_s12 = smov (%p40_p1, %s38_s12), 0  ;;  %p183_p3 = pnand %p2637_p0, %p182_p2 }
   0x6   : > { %p238_p4 = scmp.lt.s32.totalorder (!%p183_p3), %s3415_s9, 3 }
   0x7   : > { %186 = sbr.rel (%p183_p3) target bundleno = 501 (0x1f5), region = 28 }
   0xe   : > { %s3839_s9 = smov (!%p238_p4, %s3415_s9), 3 }
   0xf   : > { %s2935_s13 = sshll.u32 %s3839_s9, 11  ;;  %s2934_s17 = sshll.u32 %s3839_s9, 8 }
  0x10   : > { %s3464_s16 = scalar_lea.vmem %s3832_s1, %s2935_s13  ;;  %s3514_s20 = scalar_lea.vmem %s3831_s0, %s2934_s17 }
  0x11   : > { %v3017_v0 = vld [vmem:[%s3464_s16 + $0x4] ss:$8 sps:$4 sm:$0xff]   ;;  %v3021_v2 = vld [vmem:[%s3464_s16] ss:$8 sps:$4 sm:$0xff]   ;;  %v3023_v4 = vld [vmem:[%s3464_s16 + $0x14] ss:$8 sps:$4 sm:$0xff]  }
  0x12   : > { %v3019_v1 = vld [vmem:[%s3464_s16 + $0x404] ss:$8 sps:$4 sm:$0xff]   ;;  %2032 = vmatprep.subr.bf16.mxu1 %v3017_v0  ;;  %v3022_v3 = vld [vmem:[%s3464_s16 + $0x400] ss:$8 sps:$4 sm:$0xff]   ;;  %v3025_v5 = vld [vmem:[%s3464_s16 + $0x414] ss:$8 sps:$4 sm:$0xff]  }
  0x13   : > { %2244 = vmatprep.subr.bf16.mxu0 %v3019_v1  ;;  %2033 = vmatpush1.bf16.msra.mxu1 %v3021_v2  ;;  %v3027_v6 = vld [vmem:[%s3464_s16 + $0x10] ss:$8 sps:$4 sm:$0xff]   ;;  %v3029_v8 = vld [vmem:[%s3464_s16 + $0x24] ss:$8 sps:$4 sm:$0xff]   ;;  %v3033_v10 = vld [vmem:[%s3464_s16 + $0x20] ss:$8 sps:$4 sm:$0xff]  }
  0x14   : > { %2245 = vmatpush1.bf16.msra.mxu0 %v3022_v3  ;;  %2034 = vmatprep.subr.bf16.mxu1 %v3023_v4  ;;  %v3028_v7 = vld [vmem:[%s3464_s16 + $0x410] ss:$8 sps:$4 sm:$0xff]   ;;  %v3031_v9 = vld [vmem:[%s3464_s16 + $0x424] ss:$8 sps:$4 sm:$0xff]   ;;  %v3034_v11 = vld [vmem:[%s3464_s16 + $0x420] ss:$8 sps:$4 sm:$0xff]  }
  0x15   : > { %2246 = vmatprep.subr.bf16.mxu0 %v3025_v5  ;;  %v3035_v12 = vld [vmem:[%s3464_s16 + $0x34] ss:$8 sps:$4 sm:$0xff]   ;;  %v3039_v14 = vld [vmem:[%s3464_s16 + $0x30] ss:$8 sps:$4 sm:$0xff]   ;;  %v3041_v16 = vld [vmem:[%s3464_s16 + $0x44] ss:$8 sps:$4 sm:$0xff]  }
  0x16   : > { %v3037_v13 = vld [vmem:[%s3464_s16 + $0x434] ss:$8 sps:$4 sm:$0xff]   ;;  %v3040_v15 = vld [vmem:[%s3464_s16 + $0x430] ss:$8 sps:$4 sm:$0xff]   ;;  %v3043_v17 = vld [vmem:[%s3464_s16 + $0x444] ss:$8 sps:$4 sm:$0xff]  }
  0x17   : > { %2035 = vmatpush1.bf16.msra.mxu1 %v3027_v6  ;;  %v3045_v18 = vld [vmem:[%s3464_s16 + $0x40] ss:$8 sps:$4 sm:$0xff]   ;;  %v3047_v20 = vld [vmem:[%s3464_s16 + $0x54] ss:$8 sps:$4 sm:$0xff]   ;;  %v3051_v22 = vld [vmem:[%s3464_s16 + $0x50] ss:$8 sps:$4 sm:$0xff]  }
  0x18   : > { %2247 = vmatpush1.bf16.msra.mxu0 %v3028_v7  ;;  %2036 = vmatprep.subr.bf16.mxu1 %v3029_v8  ;;  %v3046_v19 = vld [vmem:[%s3464_s16 + $0x440] ss:$8 sps:$4 sm:$0xff]   ;;  %v3049_v21 = vld [vmem:[%s3464_s16 + $0x454] ss:$8 sps:$4 sm:$0xff]   ;;  %v3052_v23 = vld [vmem:[%s3464_s16 + $0x450] ss:$8 sps:$4 sm:$0xff]  }
  0x19   : > { %2248 = vmatprep.subr.bf16.mxu0 %v3031_v9  ;;  %v3053_v24 = vld [vmem:[%s3464_s16 + $0x64] ss:$8 sps:$4 sm:$0xff]   ;;  %v3057_v26 = vld [vmem:[%s3464_s16 + $0x60] ss:$8 sps:$4 sm:$0xff]   ;;  %v3059_v28 = vld [vmem:[%s3464_s16 + $0x74] ss:$8 sps:$4 sm:$0xff]  }
  0x1a   : > { %v3055_v25 = vld [vmem:[%s3464_s16 + $0x464] ss:$8 sps:$4 sm:$0xff]   ;;  %v3058_v27 = vld [vmem:[%s3464_s16 + $0x460] ss:$8 sps:$4 sm:$0xff]   ;;  %v3061_v29 = vld [vmem:[%s3464_s16 + $0x474] ss:$8 sps:$4 sm:$0xff]  }
  0x1b   : > { %2037 = vmatpush1.bf16.msra.mxu1 %v3033_v10  ;;  %v3063_v30 = vld [vmem:[%s3464_s16 + $0x70] ss:$8 sps:$4 sm:$0xff]   ;;  %v3065_v32 = vld [vmem:[%s3464_s16 + $0x84] ss:$8 sps:$4 sm:$0xff]   ;;  %v3069_v34 = vld [vmem:[%s3464_s16 + $0x80] ss:$8 sps:$4 sm:$0xff]  }
  0x1c   : > { %2249 = vmatpush1.bf16.msra.mxu0 %v3034_v11  ;;  %2038 = vmatprep.subr.bf16.mxu1 %v3035_v12  ;;  %v3064_v31 = vld [vmem:[%s3464_s16 + $0x470] ss:$8 sps:$4 sm:$0xff]   ;;  %v3067_v33 = vld [vmem:[%s3464_s16 + $0x484] ss:$8 sps:$4 sm:$0xff]   ;;  %v3070_v35 = vld [vmem:[%s3464_s16 + $0x480] ss:$8 sps:$4 sm:$0xff]  }
  0x1d   : > { %2250 = vmatprep.subr.bf16.mxu0 %v3037_v13  ;;  %v3071_v36 = vld [vmem:[%s3464_s16 + $0x94] ss:$8 sps:$4 sm:$0xff]   ;;  %v3075_v38 = vld [vmem:[%s3464_s16 + $0x90] ss:$8 sps:$4 sm:$0xff]   ;;  %v3077_v40 = vld [vmem:[%s3464_s16 + $0xa4] ss:$8 sps:$4 sm:$0xff]  }
  0x1e   : > { %v3073_v37 = vld [vmem:[%s3464_s16 + $0x494] ss:$8 sps:$4 sm:$0xff]   ;;  %v3076_v39 = vld [vmem:[%s3464_s16 + $0x490] ss:$8 sps:$4 sm:$0xff]   ;;  %v3079_v41 = vld [vmem:[%s3464_s16 + $0x4a4] ss:$8 sps:$4 sm:$0xff]  }
  0x1f   : > { %2039 = vmatpush1.bf16.msra.mxu1 %v3039_v14  ;;  %v3081_v42 = vld [vmem:[%s3464_s16 + $0xa0] ss:$8 sps:$4 sm:$0xff]   ;;  %v3083_v44 = vld [vmem:[%s3464_s16 + $0xb4] ss:$8 sps:$4 sm:$0xff]   ;;  %v3087_v46 = vld [vmem:[%s3464_s16 + $0xb0] ss:$8 sps:$4 sm:$0xff]  }
  0x20   : > { %2251 = vmatpush1.bf16.msra.mxu0 %v3040_v15  ;;  %2040 = vmatprep.subr.bf16.mxu1 %v3041_v16  ;;  %v3082_v43 = vld [vmem:[%s3464_s16 + $0x4a0] ss:$8 sps:$4 sm:$0xff]   ;;  %v3085_v45 = vld [vmem:[%s3464_s16 + $0x4b4] ss:$8 sps:$4 sm:$0xff]   ;;  %v3088_v47 = vld [vmem:[%s3464_s16 + $0x4b0] ss:$8 sps:$4 sm:$0xff]  }
  0x21   : > { %2252 = vmatprep.subr.bf16.mxu0 %v3043_v17  ;;  %v304_v48 = vld [vmem:[%s3514_s20] sm:$0xff]  ;;  %v3095_v58 = vld [vmem:[%s3464_s16 + $0xd4] ss:$8 sps:$4 sm:$0xff]   ;;  %v3099_v60 = vld [vmem:[%s3464_s16 + $0xd0] ss:$8 sps:$4 sm:$0xff]   ;;  %s2936_s21 = sshll.u32 %s3839_s9, 6 }
  0x22   : > { %v312_v49 = vld [vmem:[%s3514_s20 + $0x40] sm:$0xff]  ;;  %v3097_v59 = vld [vmem:[%s3464_s16 + $0x4d4] ss:$8 sps:$4 sm:$0xff]   ;;  %v3100_v61 = vld [vmem:[%s3464_s16 + $0x4d0] ss:$8 sps:$4 sm:$0xff]   ;;  %s3812_s24 = scalar_lea.vmem %s3833_s2, %s2936_s21 }
  0x23   : > { %2041 = vmatpush1.bf16.msra.mxu1 %v3045_v18  ;;  %v3089_v50 = vld [vmem:[%s3464_s16 + $0xc4] ss:$8 sps:$4 sm:$0xff]   ;;  %v2645_v52 = vcombine.high %v304_v48, %v312_v49  ;;  %v3093_v56 = vld [vmem:[%s3464_s16 + $0xc0] ss:$8 sps:$4 sm:$0xff]   ;;  %v3107_v2 = vld [vmem:[%s3464_s16 + $0xf4] ss:$8 sps:$4 sm:$0xff]   ;;  %v2644_v8 = vcombine.low %v304_v48, %v312_v49 }
  0x24   : > { %2253 = vmatpush1.bf16.msra.mxu0 %v3046_v19  ;;  %2042 = vmatprep.subr.bf16.mxu1 %v3047_v20  ;;  %v3091_v51 = vld [vmem:[%s3464_s16 + $0x4c4] ss:$8 sps:$4 sm:$0xff]   ;;  %v3094_v57 = vld [vmem:[%s3464_s16 + $0x4c0] ss:$8 sps:$4 sm:$0xff]   ;;  %v3109_v3 = vld [vmem:[%s3464_s16 + $0x4f4] ss:$8 sps:$4 sm:$0xff]  }
  0x25   : > { %2254 = vmatprep.subr.bf16.mxu0 %v3049_v21  ;;  %v308_v53 = vld [vmem:[%s3514_s20 + $0x20] sm:$0xff]  ;;  %2064 = vmatprep.mubr.bf16.mxu1 %v2645_v52  ;;  %v3111_v4 = vld [vmem:[%s3464_s16 + $0xf0] ss:$8 sps:$4 sm:$0xff]   ;;  %v3121_v12 = vld [vmem:[%s3464_s16 + $0x114] ss:$8 sps:$4 sm:$0xff]  }
  0x26   : > { %v316_v54 = vld [vmem:[%s3514_s20 + $0x60] sm:$0xff]  ;;  %v3112_v5 = vld [vmem:[%s3464_s16 + $0x4f0] ss:$8 sps:$4 sm:$0xff]   ;;  %v3124_v13 = vld [vmem:[%s3464_s16 + $0x514] ss:$8 sps:$4 sm:$0xff]  }
  0x27   : > { %2043 = vmatpush1.bf16.msra.mxu1 %v3051_v22  ;;  %v2653_v55 = vcombine.high %v308_v53, %v316_v54  ;;  %v3101_v62 = vld [vmem:[%s3464_s16 + $0xe4] ss:$8 sps:$4 sm:$0xff]   ;;  %v3105_v0 = vld [vmem:[%s3464_s16 + $0xe0] ss:$8 sps:$4 sm:$0xff]   ;;  %v2652_v10 = vcombine.low %v308_v53, %v316_v54  ;;  %v3119_v14 = vld [vmem:[%s3464_s16 + $0x110] ss:$8 sps:$4 sm:$0xff]  }
  0x28   : > { %2255 = vmatpush1.bf16.msra.mxu0 %v3052_v23  ;;  %2044 = vmatprep.subr.bf16.mxu1 %v3053_v24  ;;  %v3103_v63 = vld [vmem:[%s3464_s16 + $0x4e4] ss:$8 sps:$4 sm:$0xff]   ;;  %v3106_v1 = vld [vmem:[%s3464_s16 + $0x4e0] ss:$8 sps:$4 sm:$0xff]   ;;  %v3122_v15 = vld [vmem:[%s3464_s16 + $0x510] ss:$8 sps:$4 sm:$0xff]  }
  0x29   : > { %2256 = vmatprep.subr.bf16.mxu0 %v3055_v25  ;;  %2276 = vmatprep.mubr.bf16.mxu0 %v2653_v55  ;;  %v3115_v6 = vld [vmem:[%s3464_s16 + $0x104] ss:$8 sps:$4 sm:$0xff]   ;;  %v3113_v9 = vld [vmem:[%s3464_s16 + $0x100] ss:$8 sps:$4 sm:$0xff]   ;;  %v3133_v20 = vld [vmem:[%s3464_s16 + $0x134] ss:$8 sps:$4 sm:$0xff]  }
  0x2a   : > { %v3118_v7 = vld [vmem:[%s3464_s16 + $0x504] ss:$8 sps:$4 sm:$0xff]   ;;  %v3116_v11 = vld [vmem:[%s3464_s16 + $0x500] ss:$8 sps:$4 sm:$0xff]   ;;  %v3136_v21 = vld [vmem:[%s3464_s16 + $0x534] ss:$8 sps:$4 sm:$0xff]  }
  0x2b   : > { %2045 = vmatpush1.bf16.msra.mxu1 %v3057_v26  ;;  %v3127_v16 = vld [vmem:[%s3464_s16 + $0x124] ss:$8 sps:$4 sm:$0xff]   ;;  %v3125_v18 = vld [vmem:[%s3464_s16 + $0x120] ss:$8 sps:$4 sm:$0xff]   ;;  %v3131_v22 = vld [vmem:[%s3464_s16 + $0x130] ss:$8 sps:$4 sm:$0xff]  }
  0x2c   : > { %2257 = vmatpush1.bf16.msra.mxu0 %v3058_v27  ;;  %2046 = vmatprep.subr.bf16.mxu1 %v3059_v28  ;;  %v3130_v17 = vld [vmem:[%s3464_s16 + $0x524] ss:$8 sps:$4 sm:$0xff]   ;;  %v3128_v19 = vld [vmem:[%s3464_s16 + $0x520] ss:$8 sps:$4 sm:$0xff]   ;;  %v3134_v23 = vld [vmem:[%s3464_s16 + $0x530] ss:$8 sps:$4 sm:$0xff]  }
  0x2d   : > { %2258 = vmatprep.subr.bf16.mxu0 %v3061_v29  ;;  %v3139_v24 = vld [vmem:[%s3464_s16 + $0x144] ss:$8 sps:$4 sm:$0xff]   ;;  %v3137_v26 = vld [vmem:[%s3464_s16 + $0x140] ss:$8 sps:$4 sm:$0xff]   ;;  %v3145_v28 = vld [vmem:[%s3464_s16 + $0x154] ss:$8 sps:$4 sm:$0xff]  }
  0x2e   : > { %v3142_v25 = vld [vmem:[%s3464_s16 + $0x544] ss:$8 sps:$4 sm:$0xff]   ;;  %v3140_v27 = vld [vmem:[%s3464_s16 + $0x540] ss:$8 sps:$4 sm:$0xff]   ;;  %v3148_v29 = vld [vmem:[%s3464_s16 + $0x554] ss:$8 sps:$4 sm:$0xff]  }
  0x2f   : > { %2047 = vmatpush1.bf16.msra.mxu1 %v3063_v30  ;;  %v320_v30 = vld [vmem:[%s3514_s20 + $0x80] sm:$0xff]  ;;  %v3583_v49 = vld [vmem:[%s3514_s20 + $0x28] sm:$0xff]  ;;  %v3158_v52 = vld [vmem:[%s3464_s16 + $0x570] ss:$8 sps:$4 sm:$0xff]  }
  0x30   : > { %2259 = vmatpush1.bf16.msra.mxu0 %v3064_v31  ;;  %2048 = vmatprep.subr.bf16.mxu1 %v3065_v32  ;;  %v328_v31 = vld [vmem:[%s3514_s20 + $0xc0] sm:$0xff]  ;;  %v3143_v32 = vld [vmem:[%s3464_s16 + $0x150] ss:$8 sps:$4 sm:$0xff]  }
  0x31   : > { %2260 = vmatprep.subr.bf16.mxu0 %v3067_v33  ;;  %v2661_v33 = vcombine.high %v320_v30, %v328_v31  ;;  %v3163_v54 = vld [vmem:[%s3464_s16 + $0x184] ss:$8 sps:$4 sm:$0xff]  }
  0x32   : > { %v3166_v55 = vld [vmem:[%s3464_s16 + $0x584] ss:$8 sps:$4 sm:$0xff]  }
  0x33   : > { %2049 = vmatpush1.bf16.msra.mxu1 %v3069_v34  ;;  %v3146_v34 = vld [vmem:[%s3464_s16 + $0x550] ss:$8 sps:$4 sm:$0xff]  }
  0x34   : > { %2261 = vmatpush1.bf16.msra.mxu0 %v3070_v35  ;;  %2050 = vmatprep.subr.bf16.mxu1 %v3071_v36  ;;  %v324_v35 = vld [vmem:[%s3514_s20 + $0xa0] sm:$0xff] }
  0x35   : > { %2262 = vmatprep.subr.bf16.mxu0 %v3073_v37  ;;  %v332_v36 = vld [vmem:[%s3514_s20 + $0xe0] sm:$0xff]  ;;  %v2660_v37 = vcombine.low %v320_v30, %v328_v31  ;;  %v3217_v30 = vld [vmem:[%s3464_s16 + $0x214] ss:$8 sps:$4 sm:$0xff]  }
  0x36   : > { %v3220_v31 = vld [vmem:[%s3464_s16 + $0x614] ss:$8 sps:$4 sm:$0xff]  }
  0x37   : > { %2051 = vmatpush1.bf16.msra.mxu1 %v3075_v38  ;;  %v3151_v38 = vld [vmem:[%s3464_s16 + $0x164] ss:$8 sps:$4 sm:$0xff]  }
  0x38   : > { %2263 = vmatpush1.bf16.msra.mxu0 %v3076_v39  ;;  %2052 = vmatprep.subr.bf16.mxu1 %v3077_v40  ;;  %v2669_v39 = vcombine.high %v324_v35, %v332_v36  ;;  %v2668_v40 = vcombine.low %v324_v35, %v332_v36  ;;  %v3215_v36 = vld [vmem:[%s3464_s16 + $0x210] ss:$8 sps:$4 sm:$0xff]  }
  0x39   : > { %2264 = vmatprep.subr.bf16.mxu0 %v3079_v41  ;;  %v3154_v41 = vld [vmem:[%s3464_s16 + $0x564] ss:$8 sps:$4 sm:$0xff]  }
  0x3b   : > { %2053 = vmatpush1.bf16.msra.mxu1 %v3081_v42  ;;  %v3149_v42 = vld [vmem:[%s3464_s16 + $0x160] ss:$8 sps:$4 sm:$0xff]  }
  0x3c   : > { %2265 = vmatpush1.bf16.msra.mxu0 %v3082_v43  ;;  %2054 = vmatprep.subr.bf16.mxu1 %v3083_v44  ;;  %v3152_v43 = vld [vmem:[%s3464_s16 + $0x560] ss:$8 sps:$4 sm:$0xff]  }
  0x3d   : > { %2266 = vmatprep.subr.bf16.mxu0 %v3085_v45  ;;  %v3573_v44 = vld [vmem:[%s3514_s20 + $0x8] sm:$0xff] }
  0x3e   : > { %v3576_v45 = vld [vmem:[%s3514_s20 + $0x48] sm:$0xff] }
  0x3f   : > { %2055 = vmatpush1.bf16.msra.mxu1 %v3087_v46  ;;  %v3157_v46 = vld [vmem:[%s3464_s16 + $0x174] ss:$8 sps:$4 sm:$0xff]   ;;  %v2647_v48 = vcombine.high %v3573_v44, %v3576_v45 }
  0x40   : > { %2267 = vmatpush1.bf16.msra.mxu0 %v3088_v47  ;;  %2056 = vmatprep.subr.bf16.mxu1 %v3089_v50  ;;  %v3160_v47 = vld [vmem:[%s3464_s16 + $0x574] ss:$8 sps:$4 sm:$0xff]   ;;  %v3586_v50 = vld [vmem:[%s3514_s20 + $0x68] sm:$0xff] }
  0x41   : > { %2268 = vmatprep.subr.bf16.mxu0 %v3091_v51  ;;  %v3155_v51 = vld [vmem:[%s3464_s16 + $0x170] ss:$8 sps:$4 sm:$0xff]   ;;  %v2655_v53 = vcombine.high %v3583_v49, %v3586_v50 }
  0x43   : > { %2057 = vmatpush1.bf16.msra.mxu1 %v3093_v56  ;;  %v3161_v56 = vld [vmem:[%s3464_s16 + $0x180] ss:$8 sps:$4 sm:$0xff]  }
  0x44   : > { %2269 = vmatpush1.bf16.msra.mxu0 %v3094_v57  ;;  %2058 = vmatprep.subr.bf16.mxu1 %v3095_v58  ;;  %v3164_v57 = vld [vmem:[%s3464_s16 + $0x580] ss:$8 sps:$4 sm:$0xff]   ;;  %v3169_v58 = vld [vmem:[%s3464_s16 + $0x194] ss:$8 sps:$4 sm:$0xff]  }
  0x45   : > { %2270 = vmatprep.subr.bf16.mxu0 %v3097_v59  ;;  %v3172_v59 = vld [vmem:[%s3464_s16 + $0x594] ss:$8 sps:$4 sm:$0xff]  }
  0x47   : > { %2059 = vmatpush1.bf16.msra.mxu1 %v3099_v60  ;;  %v3167_v60 = vld [vmem:[%s3464_s16 + $0x190] ss:$8 sps:$4 sm:$0xff]  }
  0x48   : > { %2271 = vmatpush1.bf16.msra.mxu0 %v3100_v61  ;;  %2060 = vmatprep.subr.bf16.mxu1 %v3101_v62  ;;  %v3170_v61 = vld [vmem:[%s3464_s16 + $0x590] ss:$8 sps:$4 sm:$0xff]   ;;  %v3175_v62 = vld [vmem:[%s3464_s16 + $0x1a4] ss:$8 sps:$4 sm:$0xff]  }
  0x49   : > { %2272 = vmatprep.subr.bf16.mxu0 %v3103_v63  ;;  %v3178_v63 = vld [vmem:[%s3464_s16 + $0x5a4] ss:$8 sps:$4 sm:$0xff]  }
  0x4b   : > { %2061 = vmatpush1.bf16.msra.mxu1 %v3105_v0  ;;  %v3173_v0 = vld [vmem:[%s3464_s16 + $0x1a0] ss:$8 sps:$4 sm:$0xff]  }
  0x4c   : > { %2273 = vmatpush1.bf16.msra.mxu0 %v3106_v1  ;;  %2062 = vmatprep.subr.bf16.mxu1 %v3107_v2  ;;  %v3176_v1 = vld [vmem:[%s3464_s16 + $0x5a0] ss:$8 sps:$4 sm:$0xff]   ;;  %v3181_v2 = vld [vmem:[%s3464_s16 + $0x1b4] ss:$8 sps:$4 sm:$0xff]  }
  0x4d   : > { %2274 = vmatprep.subr.bf16.mxu0 %v3109_v3  ;;  %v3184_v3 = vld [vmem:[%s3464_s16 + $0x5b4] ss:$8 sps:$4 sm:$0xff]  }
  0x4f   : > { %2063 = vmatpush1.bf16.msra.mxu1 %v3111_v4  ;;  %v3179_v4 = vld [vmem:[%s3464_s16 + $0x1b0] ss:$8 sps:$4 sm:$0xff]  }
  0x50   : > { %2275 = vmatpush1.bf16.msra.mxu0 %v3112_v5  ;;  %2085 = vmatprep.subr.bf16.mxu1 %v3115_v6  ;;  %v3182_v5 = vld [vmem:[%s3464_s16 + $0x5b0] ss:$8 sps:$4 sm:$0xff]   ;;  %v3187_v6 = vld [vmem:[%s3464_s16 + $0x1c4] ss:$8 sps:$4 sm:$0xff]  }
  0x51   : > { %2297 = vmatprep.subr.bf16.mxu0 %v3118_v7  ;;  %v3190_v7 = vld [vmem:[%s3464_s16 + $0x5c4] ss:$8 sps:$4 sm:$0xff]  }
  0x52   : > { %2065 = vmatmul.mubr.bf16.vlgmr.msra.gmra.mrb[0].mxu1 %v2644_v8  ;;  %v3185_v8 = vld [vmem:[%s3464_s16 + $0x1c0] ss:$8 sps:$4 sm:$0xff]  }
  0x53   : > { %2277 = vmatmul.mubr.bf16.vlgmr.msra.gmra.mrb[0].mxu0 %v2652_v10  ;;  %2086 = vmatpush1.bf16.msra.mxu1 %v3113_v9  ;;  %v3188_v9 = vld [vmem:[%s3464_s16 + $0x5c0] ss:$8 sps:$4 sm:$0xff]   ;;  %v3193_v10 = vld [vmem:[%s3464_s16 + $0x1d4] ss:$8 sps:$4 sm:$0xff]  }
  0x54   : > { %2298 = vmatpush1.bf16.msra.mxu0 %v3116_v11  ;;  %2087 = vmatprep.subr.bf16.mxu1 %v3121_v12  ;;  %v3196_v11 = vld [vmem:[%s3464_s16 + $0x5d4] ss:$8 sps:$4 sm:$0xff]   ;;  %v3191_v12 = vld [vmem:[%s3464_s16 + $0x1d0] ss:$8 sps:$4 sm:$0xff]  }
  0x55   : > { %2299 = vmatprep.subr.bf16.mxu0 %v3124_v13  ;;  %2074 = vmatprep.mubr.bf16.mxu1 %v2661_v33  ;;  %v3194_v13 = vld [vmem:[%s3464_s16 + $0x5d0] ss:$8 sps:$4 sm:$0xff]   ;;  %v333_v33 = vld [vmem:[%s3514_s20 + $0xe8] sm:$0xff] }
  0x56   : > { %2286 = vmatprep.mubr.bf16.mxu0 %v2669_v39  ;;  %v3226_v39 = vld [vmem:[%s3464_s16 + $0x624] ss:$8 sps:$4 sm:$0xff]  }
  0x57   : > { %2088 = vmatpush1.bf16.msra.mxu1 %v3119_v14  ;;  %v3199_v14 = vld [vmem:[%s3464_s16 + $0x1e4] ss:$8 sps:$4 sm:$0xff]  }
  0x58   : > { %2300 = vmatpush1.bf16.msra.mxu0 %v3122_v15  ;;  %2089 = vmatprep.subr.bf16.mxu1 %v3127_v16  ;;  %v3202_v15 = vld [vmem:[%s3464_s16 + $0x5e4] ss:$8 sps:$4 sm:$0xff]   ;;  %v3197_v16 = vld [vmem:[%s3464_s16 + $0x1e0] ss:$8 sps:$4 sm:$0xff]  }
  0x59   : > { %2301 = vmatprep.subr.bf16.mxu0 %v3130_v17  ;;  %v3200_v17 = vld [vmem:[%s3464_s16 + $0x5e0] ss:$8 sps:$4 sm:$0xff]  }
  0x5a   : > { %2075 = vmatmul.mubr.bf16.gmra.mrb[4].mxu1 %v2660_v37  ;;  %v3218_v37 = vld [vmem:[%s3464_s16 + $0x610] ss:$8 sps:$4 sm:$0xff]  }
  0x5b   : > { %2090 = vmatpush1.bf16.msra.mxu1 %v3125_v18  ;;  %2287 = vmatmul.mubr.bf16.gmra.mrb[4].mxu0 %v2668_v40  ;;  %v3205_v18 = vld [vmem:[%s3464_s16 + $0x1f4] ss:$8 sps:$4 sm:$0xff]   ;;  %v3221_v40 = vld [vmem:[%s3464_s16 + $0x220] ss:$8 sps:$4 sm:$0xff]  }
  0x5c   : > { %2302 = vmatpush1.bf16.msra.mxu0 %v3128_v19  ;;  %2091 = vmatprep.subr.bf16.mxu1 %v3133_v20  ;;  %v3208_v19 = vld [vmem:[%s3464_s16 + $0x5f4] ss:$8 sps:$4 sm:$0xff]   ;;  %v3203_v20 = vld [vmem:[%s3464_s16 + $0x1f0] ss:$8 sps:$4 sm:$0xff]  }
  0x5d   : > { %2303 = vmatprep.subr.bf16.mxu0 %v3136_v21  ;;  %2117 = vmatprep.mubr.bf16.mxu1 %v2647_v48  ;;  %v3206_v21 = vld [vmem:[%s3464_s16 + $0x5f0] ss:$8 sps:$4 sm:$0xff]   ;;  %v3229_v48 = vld [vmem:[%s3464_s16 + $0x234] ss:$8 sps:$4 sm:$0xff]  }
  0x5e   : > { %2329 = vmatprep.mubr.bf16.mxu0 %v2655_v53  ;;  %v3230_v53 = vld [vmem:[%s3464_s16 + $0x630] ss:$8 sps:$4 sm:$0xff]  }
  0x5f   : > { %2092 = vmatpush1.bf16.msra.mxu1 %v3131_v22  ;;  %v3211_v22 = vld [vmem:[%s3464_s16 + $0x204] ss:$8 sps:$4 sm:$0xff]  }
  0x60   : > { %2304 = vmatpush1.bf16.msra.mxu0 %v3134_v23  ;;  %2093 = vmatprep.subr.bf16.mxu1 %v3139_v24  ;;  %v3214_v23 = vld [vmem:[%s3464_s16 + $0x604] ss:$8 sps:$4 sm:$0xff]   ;;  %v3209_v24 = vld [vmem:[%s3464_s16 + $0x200] ss:$8 sps:$4 sm:$0xff]  }
  0x61   : > { %2305 = vmatprep.subr.bf16.mxu0 %v3142_v25  ;;  %v3212_v25 = vld [vmem:[%s3464_s16 + $0x600] ss:$8 sps:$4 sm:$0xff]  }
  0x63   : > { %2094 = vmatpush1.bf16.msra.mxu1 %v3137_v26  ;;  %v321_v26 = vld [vmem:[%s3514_s20 + $0x88] sm:$0xff] }
  0x64   : > { %2306 = vmatpush1.bf16.msra.mxu0 %v3140_v27  ;;  %2095 = vmatprep.subr.bf16.mxu1 %v3145_v28  ;;  %v2646_v27 = vcombine.low %v3573_v44, %v3576_v45  ;;  %v2654_v28 = vcombine.low %v3583_v49, %v3586_v50  ;;  %v3648_v45 = vld [vmem:[%s3514_s20 + $0x50] sm:$0xff] }
  0x65   : > { %2307 = vmatprep.subr.bf16.mxu0 %v3148_v29  ;;  %v329_v29 = vld [vmem:[%s3514_s20 + $0xc8] sm:$0xff]  ;;  %v3232_v49 = vld [vmem:[%s3464_s16 + $0x634] ss:$8 sps:$4 sm:$0xff]  }
  0x67   : > { %2096 = vmatpush1.bf16.msra.mxu1 %v3143_v32  ;;  %v325_v32 = vld [vmem:[%s3514_s20 + $0xa8] sm:$0xff] }
  0x68   : > { %2308 = vmatpush1.bf16.msra.mxu0 %v3146_v34  ;;  %2097 = vmatprep.subr.bf16.mxu1 %v3151_v38  ;;  %v2663_v34 = vcombine.high %v321_v26, %v329_v29  ;;  %v2671_v35 = vcombine.high %v325_v32, %v333_v33  ;;  %v3223_v38 = vld [vmem:[%s3464_s16 + $0x224] ss:$8 sps:$4 sm:$0xff]   ;;  %v2670_v44 = vcombine.low %v325_v32, %v333_v33  ;;  %v3293_v32 = vld [vmem:[%s3464_s16 + $0x2e0] ss:$8 sps:$4 sm:$0xff]  }
  0x69   : > { %2309 = vmatprep.subr.bf16.mxu0 %v3154_v41  ;;  %v3224_v41 = vld [vmem:[%s3464_s16 + $0x620] ss:$8 sps:$4 sm:$0xff]  }
  0x6a   : > { %v3296_v33 = vld [vmem:[%s3464_s16 + $0x6e0] ss:$8 sps:$4 sm:$0xff]  }
  0x6b   : > { %2098 = vmatpush1.bf16.msra.mxu1 %v3149_v42  ;;  %v3645_v42 = vld [vmem:[%s3514_s20 + $0x10] sm:$0xff] }
  0x6c   : > { %2310 = vmatpush1.bf16.msra.mxu0 %v3152_v43  ;;  %2099 = vmatprep.subr.bf16.mxu1 %v3157_v46  ;;  %v2662_v43 = vcombine.low %v321_v26, %v329_v29  ;;  %v3651_v46 = vld [vmem:[%s3514_s20 + $0x30] sm:$0xff]  ;;  %v2649_v50 = vcombine.high %v3645_v42, %v3648_v45 }
  0x6d   : > { %2311 = vmatprep.subr.bf16.mxu0 %v3160_v47  ;;  %v3654_v47 = vld [vmem:[%s3514_s20 + $0x70] sm:$0xff] }
  0x6e   : > { %v3289_v26 = vld [vmem:[%s3464_s16 + $0x2d4] ss:$8 sps:$4 sm:$0xff]   ;;  %v3290_v29 = vld [vmem:[%s3464_s16 + $0x6d0] ss:$8 sps:$4 sm:$0xff]  }
  0x6f   : > { %2100 = vmatpush1.bf16.msra.mxu1 %v3155_v51  ;;  %v2657_v51 = vcombine.high %v3651_v46, %v3654_v47 }
  0x70   : > { %2312 = vmatpush1.bf16.msra.mxu0 %v3158_v52  ;;  %2101 = vmatprep.subr.bf16.mxu1 %v3163_v54  ;;  %v3227_v52 = vld [vmem:[%s3464_s16 + $0x230] ss:$8 sps:$4 sm:$0xff]   ;;  %v3235_v54 = vld [vmem:[%s3464_s16 + $0x244] ss:$8 sps:$4 sm:$0xff]  }
  0x71   : > { %2313 = vmatprep.subr.bf16.mxu0 %v3166_v55  ;;  %v3238_v55 = vld [vmem:[%s3464_s16 + $0x644] ss:$8 sps:$4 sm:$0xff]  }
  0x73   : > { %2102 = vmatpush1.bf16.msra.mxu1 %v3161_v56  ;;  %v3233_v56 = vld [vmem:[%s3464_s16 + $0x240] ss:$8 sps:$4 sm:$0xff]  }
  0x74   : > { %2314 = vmatpush1.bf16.msra.mxu0 %v3164_v57  ;;  %2103 = vmatprep.subr.bf16.mxu1 %v3169_v58  ;;  %v3236_v57 = vld [vmem:[%s3464_s16 + $0x640] ss:$8 sps:$4 sm:$0xff]   ;;  %v3241_v58 = vld [vmem:[%s3464_s16 + $0x254] ss:$8 sps:$4 sm:$0xff]  }
  0x75   : > { %2315 = vmatprep.subr.bf16.mxu0 %v3172_v59  ;;  %v3244_v59 = vld [vmem:[%s3464_s16 + $0x654] ss:$8 sps:$4 sm:$0xff]  }
  0x77   : > { %2104 = vmatpush1.bf16.msra.mxu1 %v3167_v60  ;;  %v3239_v60 = vld [vmem:[%s3464_s16 + $0x250] ss:$8 sps:$4 sm:$0xff]  }
  0x78   : > { %2316 = vmatpush1.bf16.msra.mxu0 %v3170_v61  ;;  %2105 = vmatprep.subr.bf16.mxu1 %v3175_v62  ;;  %v3242_v61 = vld [vmem:[%s3464_s16 + $0x650] ss:$8 sps:$4 sm:$0xff]   ;;  %v3247_v62 = vld [vmem:[%s3464_s16 + $0x264] ss:$8 sps:$4 sm:$0xff]  }
  0x79   : > { %2317 = vmatprep.subr.bf16.mxu0 %v3178_v63  ;;  %v3250_v63 = vld [vmem:[%s3464_s16 + $0x664] ss:$8 sps:$4 sm:$0xff]  }
  0x7b   : > { %2106 = vmatpush1.bf16.msra.mxu1 %v3173_v0  ;;  %v3245_v0 = vld [vmem:[%s3464_s16 + $0x260] ss:$8 sps:$4 sm:$0xff]  }
  0x7c   : > { %2318 = vmatpush1.bf16.msra.mxu0 %v3176_v1  ;;  %2107 = vmatprep.subr.bf16.mxu1 %v3181_v2  ;;  %v3248_v1 = vld [vmem:[%s3464_s16 + $0x660] ss:$8 sps:$4 sm:$0xff]   ;;  %v3253_v2 = vld [vmem:[%s3464_s16 + $0x274] ss:$8 sps:$4 sm:$0xff]  }
  0x7d   : > { %2319 = vmatprep.subr.bf16.mxu0 %v3184_v3  ;;  %v3256_v3 = vld [vmem:[%s3464_s16 + $0x674] ss:$8 sps:$4 sm:$0xff]  }
  0x7f   : > { %2108 = vmatpush1.bf16.msra.mxu1 %v3179_v4  ;;  %v3251_v4 = vld [vmem:[%s3464_s16 + $0x270] ss:$8 sps:$4 sm:$0xff]  }
  0x80   : > { %2320 = vmatpush1.bf16.msra.mxu0 %v3182_v5  ;;  %2109 = vmatprep.subr.bf16.mxu1 %v3187_v6  ;;  %v3254_v5 = vld [vmem:[%s3464_s16 + $0x670] ss:$8 sps:$4 sm:$0xff]   ;;  %v3259_v6 = vld [vmem:[%s3464_s16 + $0x284] ss:$8 sps:$4 sm:$0xff]  }
  0x81   : > { %2321 = vmatprep.subr.bf16.mxu0 %v3190_v7  ;;  %v3262_v7 = vld [vmem:[%s3464_s16 + $0x684] ss:$8 sps:$4 sm:$0xff]  }
  0x83   : > { %2110 = vmatpush1.bf16.msra.mxu1 %v3185_v8  ;;  %v3257_v8 = vld [vmem:[%s3464_s16 + $0x280] ss:$8 sps:$4 sm:$0xff]  }
  0x84   : > { %2322 = vmatpush1.bf16.msra.mxu0 %v3188_v9  ;;  %2111 = vmatprep.subr.bf16.mxu1 %v3193_v10  ;;  %v3260_v9 = vld [vmem:[%s3464_s16 + $0x680] ss:$8 sps:$4 sm:$0xff]   ;;  %v3265_v10 = vld [vmem:[%s3464_s16 + $0x294] ss:$8 sps:$4 sm:$0xff]  }
  0x85   : > { %2323 = vmatprep.subr.bf16.mxu0 %v3196_v11  ;;  %v3268_v11 = vld [vmem:[%s3464_s16 + $0x694] ss:$8 sps:$4 sm:$0xff]  }
  0x87   : > { %2112 = vmatpush1.bf16.msra.mxu1 %v3191_v12  ;;  %v3263_v12 = vld [vmem:[%s3464_s16 + $0x290] ss:$8 sps:$4 sm:$0xff]  }
  0x88   : > { %2324 = vmatpush1.bf16.msra.mxu0 %v3194_v13  ;;  %2113 = vmatprep.subr.bf16.mxu1 %v3199_v14  ;;  %v3266_v13 = vld [vmem:[%s3464_s16 + $0x690] ss:$8 sps:$4 sm:$0xff]   ;;  %v3271_v14 = vld [vmem:[%s3464_s16 + $0x2a4] ss:$8 sps:$4 sm:$0xff]  }
  0x89   : > { %2325 = vmatprep.subr.bf16.mxu0 %v3202_v15  ;;  %v3274_v15 = vld [vmem:[%s3464_s16 + $0x6a4] ss:$8 sps:$4 sm:$0xff]  }
  0x8b   : > { %2114 = vmatpush1.bf16.msra.mxu1 %v3197_v16  ;;  %v3269_v16 = vld [vmem:[%s3464_s16 + $0x2a0] ss:$8 sps:$4 sm:$0xff]  }
  0x8c   : > { %2326 = vmatpush1.bf16.msra.mxu0 %v3200_v17  ;;  %2115 = vmatprep.subr.bf16.mxu1 %v3205_v18  ;;  %v3272_v17 = vld [vmem:[%s3464_s16 + $0x6a0] ss:$8 sps:$4 sm:$0xff]   ;;  %v3277_v18 = vld [vmem:[%s3464_s16 + $0x2b4] ss:$8 sps:$4 sm:$0xff]  }
  0x8d   : > { %2327 = vmatprep.subr.bf16.mxu0 %v3208_v19  ;;  %v3280_v19 = vld [vmem:[%s3464_s16 + $0x6b4] ss:$8 sps:$4 sm:$0xff]  }
  0x8f   : > { %2116 = vmatpush1.bf16.msra.mxu1 %v3203_v20  ;;  %v3275_v20 = vld [vmem:[%s3464_s16 + $0x2b0] ss:$8 sps:$4 sm:$0xff]  }
  0x90   : > { %2328 = vmatpush1.bf16.msra.mxu0 %v3206_v21  ;;  %2138 = vmatprep.subr.bf16.mxu1 %v3211_v22  ;;  %v3278_v21 = vld [vmem:[%s3464_s16 + $0x6b0] ss:$8 sps:$4 sm:$0xff]   ;;  %v3283_v22 = vld [vmem:[%s3464_s16 + $0x2c4] ss:$8 sps:$4 sm:$0xff]  }
  0x91   : > { %2350 = vmatprep.subr.bf16.mxu0 %v3214_v23  ;;  %v3286_v23 = vld [vmem:[%s3464_s16 + $0x6c4] ss:$8 sps:$4 sm:$0xff]  }
  0x92   : > { %2118 = vmatmul.mubr.bf16.vlgmr.msra.gmra.mrb[0].mxu1 %v2646_v27  ;;  %v3292_v27 = vld [vmem:[%s3464_s16 + $0x6d4] ss:$8 sps:$4 sm:$0xff]  }
  0x93   : > { %2330 = vmatmul.mubr.bf16.vlgmr.msra.gmra.mrb[0].mxu0 %v2654_v28  ;;  %2139 = vmatpush1.bf16.msra.mxu1 %v3209_v24  ;;  %v3281_v24 = vld [vmem:[%s3464_s16 + $0x2c0] ss:$8 sps:$4 sm:$0xff]   ;;  %v3287_v28 = vld [vmem:[%s3464_s16 + $0x2d0] ss:$8 sps:$4 sm:$0xff]  }
  0x94   : > { %2351 = vmatpush1.bf16.msra.mxu0 %v3212_v25  ;;  %2140 = vmatprep.subr.bf16.mxu1 %v3217_v30  ;;  %v3284_v25 = vld [vmem:[%s3464_s16 + $0x6c0] ss:$8 sps:$4 sm:$0xff]   ;;  %v3295_v30 = vld [vmem:[%s3464_s16 + $0x2e4] ss:$8 sps:$4 sm:$0xff]  }
  0x95   : > { %2352 = vmatprep.subr.bf16.mxu0 %v3220_v31  ;;  %2127 = vmatprep.mubr.bf16.mxu1 %v2663_v34  ;;  %v3298_v31 = vld [vmem:[%s3464_s16 + $0x6e4] ss:$8 sps:$4 sm:$0xff]   ;;  %v3301_v34 = vld [vmem:[%s3464_s16 + $0x2f4] ss:$8 sps:$4 sm:$0xff]  }
  0x96   : > { %2339 = vmatprep.mubr.bf16.mxu0 %v2671_v35  ;;  %v3304_v35 = vld [vmem:[%s3464_s16 + $0x6f4] ss:$8 sps:$4 sm:$0xff]  }
  0x97   : > { %2141 = vmatpush1.bf16.msra.mxu1 %v3215_v36  ;;  %v3299_v36 = vld [vmem:[%s3464_s16 + $0x2f0] ss:$8 sps:$4 sm:$0xff]  }
  0x98   : > { %2353 = vmatpush1.bf16.msra.mxu0 %v3218_v37  ;;  %2142 = vmatprep.subr.bf16.mxu1 %v3223_v38  ;;  %v3302_v37 = vld [vmem:[%s3464_s16 + $0x6f0] ss:$8 sps:$4 sm:$0xff]   ;;  %v3307_v38 = vld [vmem:[%s3464_s16 + $0x304] ss:$8 sps:$4 sm:$0xff]  }
  0x99   : > { %2354 = vmatprep.subr.bf16.mxu0 %v3226_v39  ;;  %v3310_v39 = vld [vmem:[%s3464_s16 + $0x704] ss:$8 sps:$4 sm:$0xff]  }
  0x9a   : > { %2128 = vmatmul.mubr.bf16.gmra.mrb[4].mxu1 %v2662_v43  ;;  %v2656_v43 = vcombine.low %v3651_v46, %v3654_v47  ;;  %v3311_v46 = vld [vmem:[%s3464_s16 + $0x310] ss:$8 sps:$4 sm:$0xff]  }
  0x9b   : > { %2340 = vmatmul.mubr.bf16.gmra.mrb[4].mxu0 %v2670_v44  ;;  %2143 = vmatpush1.bf16.msra.mxu1 %v3221_v40  ;;  %v322_v40 = vld [vmem:[%s3514_s20 + $0x90] sm:$0xff] }
  0x9c   : > { %2355 = vmatpush1.bf16.msra.mxu0 %v3224_v41  ;;  %2144 = vmatprep.subr.bf16.mxu1 %v3229_v48  ;;  %v2648_v41 = vcombine.low %v3645_v42, %v3648_v45  ;;  %v330_v44 = vld [vmem:[%s3514_s20 + $0xd0] sm:$0xff] }
  0x9d   : > { %2356 = vmatprep.subr.bf16.mxu0 %v3232_v49  ;;  %2170 = vmatprep.mubr.bf16.mxu1 %v2649_v50  ;;  %v326_v48 = vld [vmem:[%s3514_s20 + $0xb0] sm:$0xff]  ;;  %v3305_v50 = vld [vmem:[%s3464_s16 + $0x300] ss:$8 sps:$4 sm:$0xff]   ;;  %v2665_v42 = vcombine.high %v322_v40, %v330_v44 }
  0x9e   : > { %2382 = vmatprep.mubr.bf16.mxu0 %v2657_v51  ;;  %v334_v49 = vld [vmem:[%s3514_s20 + $0xf0] sm:$0xff]  ;;  %v3308_v51 = vld [vmem:[%s3464_s16 + $0x700] ss:$8 sps:$4 sm:$0xff]  }
  0x9f   : > { %2145 = vmatpush1.bf16.msra.mxu1 %v3227_v52  ;;  %v3313_v52 = vld [vmem:[%s3464_s16 + $0x314] ss:$8 sps:$4 sm:$0xff]   ;;  %v2673_v45 = vcombine.high %v326_v48, %v334_v49  ;;  %v3314_v47 = vld [vmem:[%s3464_s16 + $0x710] ss:$8 sps:$4 sm:$0xff]  }
  0xa0   : > { %2357 = vmatpush1.bf16.msra.mxu0 %v3230_v53  ;;  %2146 = vmatprep.subr.bf16.mxu1 %v3235_v54  ;;  %v3316_v53 = vld [vmem:[%s3464_s16 + $0x714] ss:$8 sps:$4 sm:$0xff]   ;;  %v3319_v54 = vld [vmem:[%s3464_s16 + $0x324] ss:$8 sps:$4 sm:$0xff]  }
  0xa1   : > { %2358 = vmatprep.subr.bf16.mxu0 %v3238_v55  ;;  %v3322_v55 = vld [vmem:[%s3464_s16 + $0x724] ss:$8 sps:$4 sm:$0xff]  }
  0xa3   : > { %2147 = vmatpush1.bf16.msra.mxu1 %v3233_v56  ;;  %v3731_v56 = vld [vmem:[%s3514_s20 + $0x18] sm:$0xff] }
  0xa4   : > { %2359 = vmatpush1.bf16.msra.mxu0 %v3236_v57  ;;  %2148 = vmatprep.subr.bf16.mxu1 %v3241_v58  ;;  %v2664_v57 = vcombine.low %v322_v40, %v330_v44  ;;  %v2672_v58 = vcombine.low %v326_v48, %v334_v49  ;;  %v3377_v40 = vld [vmem:[%s3464_s16 + $0x3c0] ss:$8 sps:$4 sm:$0xff]   ;;  %v3388_v44 = vld [vmem:[%s3464_s16 + $0x7d4] ss:$8 sps:$4 sm:$0xff]   ;;  %v3383_v48 = vld [vmem:[%s3464_s16 + $0x3d0] ss:$8 sps:$4 sm:$0xff]  }
  0xa5   : > { %2360 = vmatprep.subr.bf16.mxu0 %v3244_v59  ;;  %v3734_v59 = vld [vmem:[%s3514_s20 + $0x58] sm:$0xff] }
  0xa6   : > { %v3386_v49 = vld [vmem:[%s3464_s16 + $0x7d0] ss:$8 sps:$4 sm:$0xff]  }
  0xa7   : > { %2149 = vmatpush1.bf16.msra.mxu1 %v3239_v60  ;;  %v3737_v60 = vld [vmem:[%s3514_s20 + $0x38] sm:$0xff] }
  0xa8   : > { %2361 = vmatpush1.bf16.msra.mxu0 %v3242_v61  ;;  %2150 = vmatprep.subr.bf16.mxu1 %v3247_v62  ;;  %v3740_v61 = vld [vmem:[%s3514_s20 + $0x78] sm:$0xff]  ;;  %v3317_v62 = vld [vmem:[%s3464_s16 + $0x320] ss:$8 sps:$4 sm:$0xff]  }
  0xa9   : > { %2362 = vmatprep.subr.bf16.mxu0 %v3250_v63  ;;  %v3320_v63 = vld [vmem:[%s3464_s16 + $0x720] ss:$8 sps:$4 sm:$0xff]  }
  0xab   : > { %2151 = vmatpush1.bf16.msra.mxu1 %v3245_v0  ;;  %v3325_v0 = vld [vmem:[%s3464_s16 + $0x334] ss:$8 sps:$4 sm:$0xff]  }
  0xac   : > { %2363 = vmatpush1.bf16.msra.mxu0 %v3248_v1  ;;  %2152 = vmatprep.subr.bf16.mxu1 %v3253_v2  ;;  %v3328_v1 = vld [vmem:[%s3464_s16 + $0x734] ss:$8 sps:$4 sm:$0xff]   ;;  %v2651_v2 = vcombine.high %v3731_v56, %v3734_v59 }
  0xad   : > { %2364 = vmatprep.subr.bf16.mxu0 %v3256_v3  ;;  %v2659_v3 = vcombine.high %v3737_v60, %v3740_v61 }
  0xaf   : > { %2153 = vmatpush1.bf16.msra.mxu1 %v3251_v4  ;;  %v3323_v4 = vld [vmem:[%s3464_s16 + $0x330] ss:$8 sps:$4 sm:$0xff]  }
  0xb0   : > { %2365 = vmatpush1.bf16.msra.mxu0 %v3254_v5  ;;  %2154 = vmatprep.subr.bf16.mxu1 %v3259_v6  ;;  %v3326_v5 = vld [vmem:[%s3464_s16 + $0x730] ss:$8 sps:$4 sm:$0xff]   ;;  %v3331_v6 = vld [vmem:[%s3464_s16 + $0x344] ss:$8 sps:$4 sm:$0xff]  }
  0xb1   : > { %2366 = vmatprep.subr.bf16.mxu0 %v3262_v7  ;;  %v3334_v7 = vld [vmem:[%s3464_s16 + $0x744] ss:$8 sps:$4 sm:$0xff]  }
  0xb3   : > { %2155 = vmatpush1.bf16.msra.mxu1 %v3257_v8  ;;  %v3329_v8 = vld [vmem:[%s3464_s16 + $0x340] ss:$8 sps:$4 sm:$0xff]  }
  0xb4   : > { %2367 = vmatpush1.bf16.msra.mxu0 %v3260_v9  ;;  %2156 = vmatprep.subr.bf16.mxu1 %v3265_v10  ;;  %v3332_v9 = vld [vmem:[%s3464_s16 + $0x740] ss:$8 sps:$4 sm:$0xff]   ;;  %v3337_v10 = vld [vmem:[%s3464_s16 + $0x354] ss:$8 sps:$4 sm:$0xff]  }
  0xb5   : > { %2368 = vmatprep.subr.bf16.mxu0 %v3268_v11  ;;  %v3340_v11 = vld [vmem:[%s3464_s16 + $0x754] ss:$8 sps:$4 sm:$0xff]  }
  0xb7   : > { %2157 = vmatpush1.bf16.msra.mxu1 %v3263_v12  ;;  %v3335_v12 = vld [vmem:[%s3464_s16 + $0x350] ss:$8 sps:$4 sm:$0xff]  }
  0xb8   : > { %2369 = vmatpush1.bf16.msra.mxu0 %v3266_v13  ;;  %2158 = vmatprep.subr.bf16.mxu1 %v3271_v14  ;;  %v3338_v13 = vld [vmem:[%s3464_s16 + $0x750] ss:$8 sps:$4 sm:$0xff]   ;;  %v3343_v14 = vld [vmem:[%s3464_s16 + $0x364] ss:$8 sps:$4 sm:$0xff]  }
  0xb9   : > { %2370 = vmatprep.subr.bf16.mxu0 %v3274_v15  ;;  %v3346_v15 = vld [vmem:[%s3464_s16 + $0x764] ss:$8 sps:$4 sm:$0xff]  }
  0xbb   : > { %2159 = vmatpush1.bf16.msra.mxu1 %v3269_v16  ;;  %v3341_v16 = vld [vmem:[%s3464_s16 + $0x360] ss:$8 sps:$4 sm:$0xff]  }
  0xbc   : > { %2371 = vmatpush1.bf16.msra.mxu0 %v3272_v17  ;;  %2160 = vmatprep.subr.bf16.mxu1 %v3277_v18  ;;  %v3344_v17 = vld [vmem:[%s3464_s16 + $0x760] ss:$8 sps:$4 sm:$0xff]   ;;  %v3349_v18 = vld [vmem:[%s3464_s16 + $0x374] ss:$8 sps:$4 sm:$0xff]  }
  0xbd   : > { %2372 = vmatprep.subr.bf16.mxu0 %v3280_v19  ;;  %v3352_v19 = vld [vmem:[%s3464_s16 + $0x774] ss:$8 sps:$4 sm:$0xff]  }
  0xbf   : > { %2161 = vmatpush1.bf16.msra.mxu1 %v3275_v20  ;;  %v3347_v20 = vld [vmem:[%s3464_s16 + $0x370] ss:$8 sps:$4 sm:$0xff]  }
  0xc0   : > { %2373 = vmatpush1.bf16.msra.mxu0 %v3278_v21  ;;  %2162 = vmatprep.subr.bf16.mxu1 %v3283_v22  ;;  %v3350_v21 = vld [vmem:[%s3464_s16 + $0x770] ss:$8 sps:$4 sm:$0xff]   ;;  %v3355_v22 = vld [vmem:[%s3464_s16 + $0x384] ss:$8 sps:$4 sm:$0xff]  }
  0xc1   : > { %2374 = vmatprep.subr.bf16.mxu0 %v3286_v23  ;;  %v3358_v23 = vld [vmem:[%s3464_s16 + $0x784] ss:$8 sps:$4 sm:$0xff]  }
  0xc3   : > { %2163 = vmatpush1.bf16.msra.mxu1 %v3281_v24  ;;  %v3353_v24 = vld [vmem:[%s3464_s16 + $0x380] ss:$8 sps:$4 sm:$0xff]  }
  0xc4   : > { %2375 = vmatpush1.bf16.msra.mxu0 %v3284_v25  ;;  %2164 = vmatprep.subr.bf16.mxu1 %v3289_v26  ;;  %v3356_v25 = vld [vmem:[%s3464_s16 + $0x780] ss:$8 sps:$4 sm:$0xff]   ;;  %v3361_v26 = vld [vmem:[%s3464_s16 + $0x394] ss:$8 sps:$4 sm:$0xff]  }
  0xc5   : > { %2376 = vmatprep.subr.bf16.mxu0 %v3292_v27  ;;  %v3364_v27 = vld [vmem:[%s3464_s16 + $0x794] ss:$8 sps:$4 sm:$0xff]  }
  0xc7   : > { %2165 = vmatpush1.bf16.msra.mxu1 %v3287_v28  ;;  %v3359_v28 = vld [vmem:[%s3464_s16 + $0x390] ss:$8 sps:$4 sm:$0xff]  }
  0xc8   : > { %2377 = vmatpush1.bf16.msra.mxu0 %v3290_v29  ;;  %2166 = vmatprep.subr.bf16.mxu1 %v3295_v30  ;;  %v3362_v29 = vld [vmem:[%s3464_s16 + $0x790] ss:$8 sps:$4 sm:$0xff]   ;;  %v3367_v30 = vld [vmem:[%s3464_s16 + $0x3a4] ss:$8 sps:$4 sm:$0xff]  }
  0xc9   : > { %2378 = vmatprep.subr.bf16.mxu0 %v3298_v31  ;;  %v3370_v31 = vld [vmem:[%s3464_s16 + $0x7a4] ss:$8 sps:$4 sm:$0xff]  }
  0xcb   : > { %2167 = vmatpush1.bf16.msra.mxu1 %v3293_v32  ;;  %v3365_v32 = vld [vmem:[%s3464_s16 + $0x3a0] ss:$8 sps:$4 sm:$0xff]  }
  0xcc   : > { %2379 = vmatpush1.bf16.msra.mxu0 %v3296_v33  ;;  %2168 = vmatprep.subr.bf16.mxu1 %v3301_v34  ;;  %v3368_v33 = vld [vmem:[%s3464_s16 + $0x7a0] ss:$8 sps:$4 sm:$0xff]   ;;  %v3373_v34 = vld [vmem:[%s3464_s16 + $0x3b4] ss:$8 sps:$4 sm:$0xff]  }
  0xcd   : > { %2380 = vmatprep.subr.bf16.mxu0 %v3304_v35  ;;  %v3376_v35 = vld [vmem:[%s3464_s16 + $0x7b4] ss:$8 sps:$4 sm:$0xff]  }
  0xcf   : > { %2169 = vmatpush1.bf16.msra.mxu1 %v3299_v36  ;;  %v3371_v36 = vld [vmem:[%s3464_s16 + $0x3b0] ss:$8 sps:$4 sm:$0xff]  }
  0xd0   : > { %2381 = vmatpush1.bf16.msra.mxu0 %v3302_v37  ;;  %2191 = vmatprep.subr.bf16.mxu1 %v3307_v38  ;;  %v3374_v37 = vld [vmem:[%s3464_s16 + $0x7b0] ss:$8 sps:$4 sm:$0xff]   ;;  %v3379_v38 = vld [vmem:[%s3464_s16 + $0x3c4] ss:$8 sps:$4 sm:$0xff]  }
  0xd1   : > { %2403 = vmatprep.subr.bf16.mxu0 %v3310_v39  ;;  %v3382_v39 = vld [vmem:[%s3464_s16 + $0x7c4] ss:$8 sps:$4 sm:$0xff]  }
  0xd2   : > { %2171 = vmatmul.mubr.bf16.vlgmr.msra.gmra.mrb[0].mxu1 %v2648_v41  ;;  %v3380_v41 = vld [vmem:[%s3464_s16 + $0x7c0] ss:$8 sps:$4 sm:$0xff]  }
  0xd3   : > { %2383 = vmatmul.mubr.bf16.vlgmr.msra.gmra.mrb[0].mxu0 %v2656_v43  ;;  %2192 = vmatpush1.bf16.msra.mxu1 %v3305_v50  ;;  %v3385_v43 = vld [vmem:[%s3464_s16 + $0x3d4] ss:$8 sps:$4 sm:$0xff]   ;;  %v3391_v50 = vld [vmem:[%s3464_s16 + $0x3e4] ss:$8 sps:$4 sm:$0xff]  }
  0xd4   : > { %2404 = vmatpush1.bf16.msra.mxu0 %v3308_v51  ;;  %2193 = vmatprep.subr.bf16.mxu1 %v3313_v52  ;;  %v3394_v51 = vld [vmem:[%s3464_s16 + $0x7e4] ss:$8 sps:$4 sm:$0xff]   ;;  %v3389_v52 = vld [vmem:[%s3464_s16 + $0x3e0] ss:$8 sps:$4 sm:$0xff]  }
  0xd5   : > { %2405 = vmatprep.subr.bf16.mxu0 %v3316_v53  ;;  %2180 = vmatprep.mubr.bf16.mxu1 %v2665_v42  ;;  %v3392_v53 = vld [vmem:[%s3464_s16 + $0x7e0] ss:$8 sps:$4 sm:$0xff]   ;;  %v3397_v42 = vld [vmem:[%s3464_s16 + $0x3f4] ss:$8 sps:$4 sm:$0xff]  }
  0xd6   : > { %2392 = vmatprep.mubr.bf16.mxu0 %v2673_v45  ;;  %v3400_v45 = vld [vmem:[%s3464_s16 + $0x7f4] ss:$8 sps:$4 sm:$0xff]  }
  0xd7   : > { %2194 = vmatpush1.bf16.msra.mxu1 %v3311_v46  ;;  %v3395_v46 = vld [vmem:[%s3464_s16 + $0x3f0] ss:$8 sps:$4 sm:$0xff]  }
  0xd8   : > { %2406 = vmatpush1.bf16.msra.mxu0 %v3314_v47  ;;  %2195 = vmatprep.subr.bf16.mxu1 %v3319_v54  ;;  %v3398_v47 = vld [vmem:[%s3464_s16 + $0x7f0] ss:$8 sps:$4 sm:$0xff]  }
  0xd9   : > { %2407 = vmatprep.subr.bf16.mxu0 %v3322_v55  ;;  %v323_v54 = vld [vmem:[%s3514_s20 + $0x98] sm:$0xff] }
  0xda   : > { %2181 = vmatmul.mubr.bf16.gmra.mrb[4].mxu1 %v2664_v57  ;;  %v331_v55 = vld [vmem:[%s3514_s20 + $0xd8] sm:$0xff] }
  0xdb   : > { %2393 = vmatmul.mubr.bf16.gmra.mrb[4].mxu0 %v2672_v58  ;;  %2196 = vmatpush1.bf16.msra.mxu1 %v3317_v62  ;;  %v327_v57 = vld [vmem:[%s3514_s20 + $0xb8] sm:$0xff]  ;;  %v2650_v62 = vcombine.low %v3731_v56, %v3734_v59 }
  0xdc   : > { %2408 = vmatpush1.bf16.msra.mxu0 %v3320_v63  ;;  %2197 = vmatprep.subr.bf16.mxu1 %v3325_v0  ;;  %v335_v58 = vld [vmem:[%s3514_s20 + $0xf8] sm:$0xff]  ;;  %v2658_v63 = vcombine.low %v3737_v60, %v3740_v61  ;;  %v2667_v0 = vcombine.high %v323_v54, %v331_v55 }
  0xdd   : > { %2409 = vmatprep.subr.bf16.mxu0 %v3328_v1  ;;  %2223 = vmatprep.mubr.bf16.mxu1 %v2651_v2  ;;  %v2675_v1 = vcombine.high %v327_v57, %v335_v58  ;;  %v2666_v2 = vcombine.low %v323_v54, %v331_v55 }
  0xde   : > { %2435 = vmatprep.mubr.bf16.mxu0 %v2659_v3  ;;  %v2674_v3 = vcombine.low %v327_v57, %v335_v58 }
  0xdf   : > { %2198 = vmatpush1.bf16.msra.mxu1 %v3323_v4 }
  0xe0   : > { %2410 = vmatpush1.bf16.msra.mxu0 %v3326_v5  ;;  %2199 = vmatprep.subr.bf16.mxu1 %v3331_v6 }
  0xe1   : > { %2411 = vmatprep.subr.bf16.mxu0 %v3334_v7 }
  0xe3   : > { %2200 = vmatpush1.bf16.msra.mxu1 %v3329_v8 }
  0xe4   : > { %2412 = vmatpush1.bf16.msra.mxu0 %v3332_v9  ;;  %2201 = vmatprep.subr.bf16.mxu1 %v3337_v10 }
  0xe5   : > { %2413 = vmatprep.subr.bf16.mxu0 %v3340_v11 }
  0xe7   : > { %2202 = vmatpush1.bf16.msra.mxu1 %v3335_v12 }
  0xe8   : > { %2414 = vmatpush1.bf16.msra.mxu0 %v3338_v13  ;;  %2203 = vmatprep.subr.bf16.mxu1 %v3343_v14 }
  0xe9   : > { %2415 = vmatprep.subr.bf16.mxu0 %v3346_v15 }
  0xeb   : > { %2204 = vmatpush1.bf16.msra.mxu1 %v3341_v16 }
  0xec   : > { %2416 = vmatpush1.bf16.msra.mxu0 %v3344_v17  ;;  %2205 = vmatprep.subr.bf16.mxu1 %v3349_v18 }
  0xed   : > { %2417 = vmatprep.subr.bf16.mxu0 %v3352_v19 }
  0xef   : > { %2206 = vmatpush1.bf16.msra.mxu1 %v3347_v20 }
  0xf0   : > { %2418 = vmatpush1.bf16.msra.mxu0 %v3350_v21  ;;  %2207 = vmatprep.subr.bf16.mxu1 %v3355_v22 }
  0xf1   : > { %2419 = vmatprep.subr.bf16.mxu0 %v3358_v23 }
  0xf3   : > { %2208 = vmatpush1.bf16.msra.mxu1 %v3353_v24 }
  0xf4   : > { %2420 = vmatpush1.bf16.msra.mxu0 %v3356_v25  ;;  %2209 = vmatprep.subr.bf16.mxu1 %v3361_v26 }
  0xf5   : > { %2421 = vmatprep.subr.bf16.mxu0 %v3364_v27 }
  0xf7   : > { %2210 = vmatpush1.bf16.msra.mxu1 %v3359_v28 }
  0xf8   : > { %2422 = vmatpush1.bf16.msra.mxu0 %v3362_v29  ;;  %2211 = vmatprep.subr.bf16.mxu1 %v3367_v30 }
  0xf9   : > { %2423 = vmatprep.subr.bf16.mxu0 %v3370_v31 }
  0xfb   : > { %2212 = vmatpush1.bf16.msra.mxu1 %v3365_v32 }
  0xfc   : > { %2424 = vmatpush1.bf16.msra.mxu0 %v3368_v33  ;;  %2213 = vmatprep.subr.bf16.mxu1 %v3373_v34 }
  0xfd   : > { %2425 = vmatprep.subr.bf16.mxu0 %v3376_v35 }
  0xff   : > { %2214 = vmatpush1.bf16.msra.mxu1 %v3371_v36 }
 0x100   : > { %2426 = vmatpush1.bf16.msra.mxu0 %v3374_v37  ;;  %2215 = vmatprep.subr.bf16.mxu1 %v3379_v38 }
 0x101   : > { %2427 = vmatprep.subr.bf16.mxu0 %v3382_v39 }
 0x103   : > { %2216 = vmatpush1.bf16.msra.mxu1 %v3377_v40 }
 0x104   : > { %2428 = vmatpush1.bf16.msra.mxu0 %v3380_v41  ;;  %2217 = vmatprep.subr.bf16.mxu1 %v3385_v43 }
 0x105   : > { %2429 = vmatprep.subr.bf16.mxu0 %v3388_v44 }
 0x107   : > { %2218 = vmatpush1.bf16.msra.mxu1 %v3383_v48 }
 0x108   : > { %2430 = vmatpush1.bf16.msra.mxu0 %v3386_v49  ;;  %2219 = vmatprep.subr.bf16.mxu1 %v3391_v50 }
 0x109   : > { %2431 = vmatprep.subr.bf16.mxu0 %v3394_v51 }
 0x10b   : > { %2220 = vmatpush1.bf16.msra.mxu1 %v3389_v52 }
 0x10c   : > { %2432 = vmatpush1.bf16.msra.mxu0 %v3392_v53  ;;  %2221 = vmatprep.subr.bf16.mxu1 %v3397_v42 }
 0x10d   : > { %2433 = vmatprep.subr.bf16.mxu0 %v3400_v45 }
 0x10f   : > { %2222 = vmatpush1.bf16.msra.mxu1 %v3395_v46 }
 0x110   : > { %2434 = vmatpush1.bf16.msra.mxu0 %v3398_v47 }
 0x112   : > { %2224 = vmatmul.mubr.bf16.vlgmr.msra.gmra.mrb[0].mxu1 %v2650_v62 }
 0x113   : > { %2436 = vmatmul.mubr.bf16.vlgmr.msra.gmra.mrb[0].mxu0 %v2658_v63  ;;  %2233 = vmatprep.mubr.bf16.mxu1 %v2667_v0 }
 0x114   : > { %2445 = vmatprep.mubr.bf16.mxu0 %v2675_v1 }
 0x11a   : > { %2234 = vmatmul.mubr.bf16.gmra.mrb[4].mxu1 %v2666_v2 }
 0x11b   : > { %2446 = vmatmul.mubr.bf16.gmra.mrb[4].mxu0 %v2674_v3 }
 0x1e5   : > { %v2225_v4 = vpop.f32.mrb[0].mxu1 }
 0x1e6   : > { %v2437_v56 = vpop.f32.mrb[0].mxu0  ;;  %v2227_v60 = vpop.f32.mrb[1].mxu1 }
 0x1e7   : > { %v2937_v59 = vadd.f32 %v2437_v56, %v2225_v4  ;;  %v2439_v61 = vpop.f32.mrb[1].mxu0  ;;  %v2229_v6 = vpop.f32.mrb[2].mxu1 }
 0x1e8   : > { %v2938_v5 = vadd.f32 %v2439_v61, %v2227_v60  ;;  %v2441_v7 = vpop.f32.mrb[2].mxu0  ;;  %v2231_v9 = vpop.f32.mrb[3].mxu1 }
 0x1e9   : > { %2483 = vst [vmem:[%s3812_s24] sm:$0xff] %v2937_v59  ;;  %v2939_v8 = vadd.f32 %v2441_v7, %v2229_v6  ;;  %v2443_v10 = vpop.f32.mrb[3].mxu0 }
 0x1ea   : > { %2484 = vst [vmem:[%s3812_s24 + $0x8] sm:$0xff] %v2938_v5  ;;  %v2940_v11 = vadd.f32 %v2443_v10, %v2231_v9 }
 0x1eb   : > { %2485 = vst [vmem:[%s3812_s24 + $0x10] sm:$0xff] %v2939_v8 }
 0x1ec   : > { %2486 = vst [vmem:[%s3812_s24 + $0x18] sm:$0xff] %v2940_v11 }
 0x1ed   : > { %v2235_v12 = vpop.f32.mrb[4].mxu1 }
 0x1ee   : > { %v2447_v13 = vpop.f32.mrb[4].mxu0  ;;  %v2237_v15 = vpop.f32.mrb[5].mxu1 }
 0x1ef   : > { %v2941_v14 = vadd.f32 %v2447_v13, %v2235_v12  ;;  %v2449_v16 = vpop.f32.mrb[5].mxu0  ;;  %v2239_v18 = vpop.f32.mrb[6].mxu1 }
 0x1f0   : > { %v2942_v17 = vadd.f32 %v2449_v16, %v2237_v15  ;;  %v2451_v19 = vpop.f32.mrb[6].mxu0  ;;  %v2241_v21 = vpop.f32.mrb[7].mxu1 }
 0x1f1   : > { %2487 = vst [vmem:[%s3812_s24 + $0x20] sm:$0xff] %v2941_v14  ;;  %v2943_v20 = vadd.f32 %v2451_v19, %v2239_v18  ;;  %v2453_v22 = vpop.f32.mrb[7].mxu0 }
 0x1f2   : > { %2488 = vst [vmem:[%s3812_s24 + $0x28] sm:$0xff] %v2942_v17  ;;  %v2944_v23 = vadd.f32 %v2453_v22, %v2241_v21 }
 0x1f3   : > { %2489 = vst [vmem:[%s3812_s24 + $0x30] sm:$0xff] %v2943_v20 }
 0x1f4   : > { %2490 = vst [vmem:[%s3812_s24 + $0x38] sm:$0xff] %v2944_v23 }
 0x1f5 PF: > { %s12_s11 = sadd.s32 1, %s3423_s11   ;;  %s3834_s9 = smov %s3419_s10 }
 0x1f6   : > { %p9_p5 = scmp.ge.s32.totalorder %s12_s11, 6   ;;  %s3835_s10 = smov %s3837_s12 }
 0x1f8   :  { %11 = sbr.rel (!%p9_p5) target bundleno = 2 (0x2), region = 69 }

// kernel: generator_forward.13
= control target key start
LH: loop header
LB: loop body
LE: loop exit
PB: predicated region body
PF: predicated region fallthrough
CT: control target
= control target key end

     0   :  { %s2316_s9 = smov 0   ;;  %s2318_s10 = smov 0   ;;  %s2558_s0 = inlined_call_operand.vmem [shape: bf16[4,128,1024], index: 0, kind: input, shape index: {}]   ;;  %s2559_s1 = inlined_call_operand.vmem [shape: bf16[4,1024,128], index: 1, kind: input, shape index: {}]   ;;  %s2560_s2 = inlined_call_operand.vmem [shape: f32[4,128,128], index: 2, kind: output, shape index: {}]  }
   0x1   :  { %s2320_s11 = smov 0  }
   0x2 LB: > { %s38_s12 = sadd.s32 1, %s2295_s10  ;;  %p1793_p0 = scmp.ge.s32.totalorder %s2299_s11, 1  ;;  %s2299_s11 = sphi %s2320_s11, %s12_s11   ;;  %s2295_s10 = sphi %s2318_s10, %s2562_s10   ;;  %s2291_s9 = sphi %s2316_s9, %s2561_s9  }
   0x3   : > { %p40_p1 = scmp.ge.s32.totalorder %s38_s12, 4  ;;  %p179_p2 = scmp.lt.s32.totalorder %s2299_s11, 5 }
   0x5   : > { %s2564_s12 = smov (%p40_p1, %s38_s12), 0  ;;  %p180_p3 = pnand %p1793_p0, %p179_p2 }
   0x6   : > { %p231_p4 = scmp.lt.s32.totalorder (!%p180_p3), %s2291_s9, 3 }
   0x7   : > { %183 = sbr.rel (%p180_p3) target bundleno = 393 (0x189), region = 28 }
   0xe   : > { %s2566_s9 = smov (!%p231_p4, %s2291_s9), 3 }
   0xf   : > { %s1930_s13 = sshll.u32 %s2566_s9, 9  ;;  %s1932_s20 = sshll.u32 %s2566_s9, 7 }
  0x10   : > { %s2342_s16 = scalar_lea.vmem %s2559_s1, %s1930_s13  ;;  %s2379_s19 = scalar_lea.vmem %s2558_s0, %s1930_s13 }
  0x11   : > { %v2213_v0 = vld [vmem:[%s2342_s16 + $0x40] sm:$0xff]   ;;  %v2217_v4 = vld [vmem:[%s2342_s16 + $0x48] sm:$0xff]   ;;  %v2221_v8 = vld [vmem:[%s2342_s16 + $0x50] sm:$0xff]   ;;  %s2516_s23 = scalar_lea.vmem %s2560_s2, %s1932_s20 }
  0x12   : > { %v2214_v1 = vld [vmem:[%s2342_s16 + $0xc0] sm:$0xff]   ;;  %1933 = vmatprep.subr.bf16.mxu0 %v2213_v0  ;;  %v2218_v5 = vld [vmem:[%s2342_s16 + $0xc8] sm:$0xff]   ;;  %v2222_v9 = vld [vmem:[%s2342_s16 + $0xd0] sm:$0xff]  }
  0x13   : > { %v2215_v2 = vld [vmem:[%s2342_s16] sm:$0xff]   ;;  %1997 = vmatprep.subr.bf16.mxu1 %v2214_v1  ;;  %v2219_v6 = vld [vmem:[%s2342_s16 + $0x8] sm:$0xff]   ;;  %v2223_v10 = vld [vmem:[%s2342_s16 + $0x10] sm:$0xff]  }
  0x14   : > { %v2216_v3 = vld [vmem:[%s2342_s16 + $0x80] sm:$0xff]   ;;  %1934 = vmatpush3.bf16.msra.mxu0 %v2215_v2  ;;  %v2220_v7 = vld [vmem:[%s2342_s16 + $0x88] sm:$0xff]   ;;  %v2224_v11 = vld [vmem:[%s2342_s16 + $0x90] sm:$0xff]  }
  0x15   : > { %1998 = vmatpush3.bf16.msra.mxu1 %v2216_v3  ;;  %1935 = vmatprep.subr.bf16.mxu0 %v2217_v4  ;;  %v2225_v12 = vld [vmem:[%s2342_s16 + $0x58] sm:$0xff]   ;;  %v2229_v16 = vld [vmem:[%s2342_s16 + $0x60] sm:$0xff]   ;;  %v2233_v20 = vld [vmem:[%s2342_s16 + $0x68] sm:$0xff]  }
  0x16   : > { %1999 = vmatprep.subr.bf16.mxu1 %v2218_v5  ;;  %v2226_v13 = vld [vmem:[%s2342_s16 + $0xd8] sm:$0xff]   ;;  %v2230_v17 = vld [vmem:[%s2342_s16 + $0xe0] sm:$0xff]   ;;  %v2234_v21 = vld [vmem:[%s2342_s16 + $0xe8] sm:$0xff]  }
  0x17   : > { %v2227_v14 = vld [vmem:[%s2342_s16 + $0x18] sm:$0xff]   ;;  %v2231_v18 = vld [vmem:[%s2342_s16 + $0x20] sm:$0xff]   ;;  %v2235_v22 = vld [vmem:[%s2342_s16 + $0x28] sm:$0xff]  }
  0x18   : > { %1936 = vmatpush3.bf16.msra.mxu0 %v2219_v6  ;;  %v2228_v15 = vld [vmem:[%s2342_s16 + $0x98] sm:$0xff]   ;;  %v2232_v19 = vld [vmem:[%s2342_s16 + $0xa0] sm:$0xff]   ;;  %v2236_v23 = vld [vmem:[%s2342_s16 + $0xa8] sm:$0xff]  }
  0x19   : > { %2000 = vmatpush3.bf16.msra.mxu1 %v2220_v7  ;;  %1937 = vmatprep.subr.bf16.mxu0 %v2221_v8  ;;  %v2237_v24 = vld [vmem:[%s2342_s16 + $0x70] sm:$0xff]   ;;  %v2241_v28 = vld [vmem:[%s2342_s16 + $0x78] sm:$0xff]   ;;  %v308_v32 = vld [vmem:[%s2379_s19] sm:$0xff] }
  0x1a   : > { %2001 = vmatprep.subr.bf16.mxu1 %v2222_v9  ;;  %v2238_v25 = vld [vmem:[%s2342_s16 + $0xf0] sm:$0xff]   ;;  %v2242_v29 = vld [vmem:[%s2342_s16 + $0xf8] sm:$0xff]   ;;  %v312_v33 = vld [vmem:[%s2379_s19 + $0x20] sm:$0xff] }
  0x1b   : > { %v2239_v26 = vld [vmem:[%s2342_s16 + $0x30] sm:$0xff]   ;;  %v2243_v30 = vld [vmem:[%s2342_s16 + $0x38] sm:$0xff]   ;;  %v309_v34 = vld [vmem:[%s2379_s19 + $0x8] sm:$0xff]  ;;  %v1800_v35 = vcombine.low %v308_v32, %v312_v33  ;;  %v1801_v36 = vcombine.high %v308_v32, %v312_v33 }
  0x1c   : > { %1938 = vmatpush3.bf16.msra.mxu0 %v2223_v10  ;;  %v2240_v27 = vld [vmem:[%s2342_s16 + $0xb0] sm:$0xff]   ;;  %v2244_v31 = vld [vmem:[%s2342_s16 + $0xb8] sm:$0xff]   ;;  %v313_v37 = vld [vmem:[%s2379_s19 + $0x28] sm:$0xff] }
  0x1d   : > { %2002 = vmatpush3.bf16.msra.mxu1 %v2224_v11  ;;  %1939 = vmatprep.subr.bf16.mxu0 %v2225_v12  ;;  %v1802_v38 = vcombine.low %v309_v34, %v313_v37  ;;  %v1803_v39 = vcombine.high %v309_v34, %v313_v37  ;;  %v2245_v40 = vld [vmem:[%s2342_s16 + $0x140] sm:$0xff]   ;;  %v317_v47 = vld [vmem:[%s2379_s19 + $0x48] sm:$0xff]  ;;  %v2253_v62 = vld [vmem:[%s2342_s16 + $0x150] sm:$0xff]  }
  0x1e   : > { %2003 = vmatprep.subr.bf16.mxu1 %v2226_v13  ;;  %1236 = vmatprep.mubr.bf16.mxu0 %v1801_v36  ;;  %v2246_v41 = vld [vmem:[%s2342_s16 + $0x100] sm:$0xff]   ;;  %v321_v48 = vld [vmem:[%s2379_s19 + $0x68] sm:$0xff]  ;;  %v2254_v63 = vld [vmem:[%s2342_s16 + $0x110] sm:$0xff]  }
  0x1f   : > { %1333 = vmatprep.mubr.bf16.mxu1 %v1803_v39  ;;  %v2247_v42 = vld [vmem:[%s2342_s16 + $0x1c0] sm:$0xff]   ;;  %v1811_v49 = vcombine.high %v317_v47, %v321_v48  ;;  %v2249_v50 = vld [vmem:[%s2342_s16 + $0x148] sm:$0xff]   ;;  %v1810_v53 = vcombine.low %v317_v47, %v321_v48  ;;  %v2255_v0 = vld [vmem:[%s2342_s16 + $0x1d0] sm:$0xff]  }
  0x20   : > { %1940 = vmatpush3.bf16.msra.mxu0 %v2227_v14  ;;  %v2248_v43 = vld [vmem:[%s2342_s16 + $0x180] sm:$0xff]   ;;  %v2250_v52 = vld [vmem:[%s2342_s16 + $0x108] sm:$0xff]   ;;  %v2256_v1 = vld [vmem:[%s2342_s16 + $0x190] sm:$0xff]  }
  0x21   : > { %2004 = vmatpush3.bf16.msra.mxu1 %v2228_v15  ;;  %1941 = vmatprep.subr.bf16.mxu0 %v2229_v16  ;;  %v316_v44 = vld [vmem:[%s2379_s19 + $0x40] sm:$0xff]  ;;  %v2251_v54 = vld [vmem:[%s2342_s16 + $0x1c8] sm:$0xff]   ;;  %v2257_v10 = vld [vmem:[%s2342_s16 + $0x158] sm:$0xff]  }
  0x22   : > { %2005 = vmatprep.subr.bf16.mxu1 %v2230_v17  ;;  %v320_v45 = vld [vmem:[%s2379_s19 + $0x60] sm:$0xff]  ;;  %v2252_v55 = vld [vmem:[%s2342_s16 + $0x188] sm:$0xff]   ;;  %v2258_v11 = vld [vmem:[%s2342_s16 + $0x118] sm:$0xff]  }
  0x23   : > { %v1809_v46 = vcombine.high %v316_v44, %v320_v45  ;;  %v1808_v51 = vcombine.low %v316_v44, %v320_v45  ;;  %v324_v56 = vld [vmem:[%s2379_s19 + $0x80] sm:$0xff]  ;;  %v325_v58 = vld [vmem:[%s2379_s19 + $0x88] sm:$0xff]  ;;  %v2259_v12 = vld [vmem:[%s2342_s16 + $0x1d8] sm:$0xff]  }
  0x24   : > { %1942 = vmatpush3.bf16.msra.mxu0 %v2231_v18  ;;  %v328_v57 = vld [vmem:[%s2379_s19 + $0xa0] sm:$0xff]  ;;  %v329_v59 = vld [vmem:[%s2379_s19 + $0xa8] sm:$0xff]  ;;  %v2260_v13 = vld [vmem:[%s2342_s16 + $0x198] sm:$0xff]  }
  0x25   : > { %2006 = vmatpush3.bf16.msra.mxu1 %v2232_v19  ;;  %1943 = vmatprep.subr.bf16.mxu0 %v2233_v20  ;;  %v1817_v60 = vcombine.high %v324_v56, %v328_v57  ;;  %v1819_v61 = vcombine.high %v325_v58, %v329_v59  ;;  %v1816_v2 = vcombine.low %v324_v56, %v328_v57  ;;  %v332_v3 = vld [vmem:[%s2379_s19 + $0xc0] sm:$0xff]  ;;  %v333_v5 = vld [vmem:[%s2379_s19 + $0xc8] sm:$0xff]  ;;  %v2270_v39 = vld [vmem:[%s2342_s16 + $0x130] sm:$0xff]  }
  0x26   : > { %2007 = vmatprep.subr.bf16.mxu1 %v2234_v21  ;;  %v336_v4 = vld [vmem:[%s2379_s19 + $0xe0] sm:$0xff]  ;;  %v1818_v6 = vcombine.low %v325_v58, %v329_v59  ;;  %v337_v8 = vld [vmem:[%s2379_s19 + $0xe8] sm:$0xff]  ;;  %v2274_v48 = vld [vmem:[%s2342_s16 + $0x138] sm:$0xff]  }
  0x27   : > { %v1825_v7 = vcombine.high %v332_v3, %v336_v4  ;;  %v1827_v9 = vcombine.high %v333_v5, %v337_v8  ;;  %v340_v14 = vld [vmem:[%s2379_s19 + $0x100] sm:$0xff]  ;;  %v341_v16 = vld [vmem:[%s2379_s19 + $0x108] sm:$0xff]  ;;  %v1824_v19 = vcombine.low %v332_v3, %v336_v4  ;;  %v1826_v21 = vcombine.low %v333_v5, %v337_v8  ;;  %v319_v8 = vld [vmem:[%s2379_s19 + $0x58] sm:$0xff] }
  0x28   : > { %1944 = vmatpush3.bf16.msra.mxu0 %v2235_v22  ;;  %v344_v15 = vld [vmem:[%s2379_s19 + $0x120] sm:$0xff]  ;;  %v345_v17 = vld [vmem:[%s2379_s19 + $0x128] sm:$0xff] }
  0x29   : > { %2008 = vmatpush3.bf16.msra.mxu1 %v2236_v23  ;;  %1945 = vmatprep.subr.bf16.mxu0 %v2237_v24  ;;  %v2261_v18 = vld [vmem:[%s2342_s16 + $0x160] sm:$0xff]   ;;  %v1833_v22 = vcombine.high %v340_v14, %v344_v15  ;;  %v1835_v24 = vcombine.high %v341_v16, %v345_v17  ;;  %v2267_v32 = vld [vmem:[%s2342_s16 + $0x1e8] sm:$0xff]   ;;  %v1832_v34 = vcombine.low %v340_v14, %v344_v15  ;;  %v326_v14 = vld [vmem:[%s2379_s19 + $0x90] sm:$0xff] }
  0x2a   : > { %2009 = vmatprep.subr.bf16.mxu1 %v2238_v25  ;;  %v2262_v20 = vld [vmem:[%s2342_s16 + $0x120] sm:$0xff]   ;;  %v2268_v33 = vld [vmem:[%s2342_s16 + $0x1a8] sm:$0xff]   ;;  %v330_v15 = vld [vmem:[%s2379_s19 + $0xb0] sm:$0xff] }
  0x2b   : > { %v2263_v23 = vld [vmem:[%s2342_s16 + $0x1e0] sm:$0xff]   ;;  %v357_v44 = vld [vmem:[%s2379_s19 + $0x188] sm:$0xff] }
  0x2c   : > { %1946 = vmatpush3.bf16.msra.mxu0 %v2239_v26  ;;  %v2264_v25 = vld [vmem:[%s2342_s16 + $0x1a0] sm:$0xff]   ;;  %v361_v45 = vld [vmem:[%s2379_s19 + $0x1a8] sm:$0xff] }
  0x2d   : > { %2010 = vmatpush3.bf16.msra.mxu1 %v2240_v27  ;;  %1947 = vmatprep.subr.bf16.mxu0 %v2241_v28  ;;  %v348_v26 = vld [vmem:[%s2379_s19 + $0x140] sm:$0xff]  ;;  %v2265_v28 = vld [vmem:[%s2342_s16 + $0x168] sm:$0xff]   ;;  %v1850_v59 = vcombine.low %v357_v44, %v361_v45 }
  0x2e   : > { %2011 = vmatprep.subr.bf16.mxu1 %v2242_v29  ;;  %v352_v27 = vld [vmem:[%s2379_s19 + $0x160] sm:$0xff]  ;;  %v349_v29 = vld [vmem:[%s2379_s19 + $0x148] sm:$0xff] }
  0x2f   : > { %v1841_v36 = vcombine.high %v348_v26, %v352_v27  ;;  %v1840_v47 = vcombine.low %v348_v26, %v352_v27  ;;  %v365_v56 = vld [vmem:[%s2379_s19 + $0x1c8] sm:$0xff]  ;;  %v1820_v26 = vcombine.low %v326_v14, %v330_v15 }
  0x30   : > { %1948 = vmatpush3.bf16.msra.mxu0 %v2243_v30  ;;  %v353_v30 = vld [vmem:[%s2379_s19 + $0x168] sm:$0xff] }
  0x31   : > { %2012 = vmatpush3.bf16.msra.mxu1 %v2244_v31  ;;  %2061 = vmatprep.subr.bf16.mxu0 %v2245_v40  ;;  %v2266_v31 = vld [vmem:[%s2342_s16 + $0x128] sm:$0xff]   ;;  %v1843_v37 = vcombine.high %v349_v29, %v353_v30  ;;  %v2271_v40 = vld [vmem:[%s2342_s16 + $0x1f0] sm:$0xff]  }
  0x32   : > { %2125 = vmatprep.subr.bf16.mxu1 %v2247_v42  ;;  %v360_v42 = vld [vmem:[%s2379_s19 + $0x1a0] sm:$0xff]  ;;  %v369_v57 = vld [vmem:[%s2379_s19 + $0x1e8] sm:$0xff] }
  0x33   : > { %1237 = vmatmul.mubr.bf16.vlgmr.msra.gmra.mrb[0].mxu0 %v1800_v35  ;;  %v1834_v35 = vcombine.low %v341_v16, %v345_v17  ;;  %v1858_v3 = vcombine.low %v365_v56, %v369_v57  ;;  %v327_v16 = vld [vmem:[%s2379_s19 + $0x98] sm:$0xff] }
  0x34   : > { %1334 = vmatmul.mubr.bf16.vlgmr.msra.gmra.mrb[0].mxu1 %v1802_v38  ;;  %2062 = vmatpush3.bf16.msra.mxu0 %v2246_v41  ;;  %v2269_v38 = vld [vmem:[%s2342_s16 + $0x170] sm:$0xff]   ;;  %v356_v41 = vld [vmem:[%s2379_s19 + $0x180] sm:$0xff]  ;;  %v331_v17 = vld [vmem:[%s2379_s19 + $0xb8] sm:$0xff] }
  0x35   : > { %2126 = vmatpush3.bf16.msra.mxu1 %v2248_v43  ;;  %1244 = vmatprep.mubr.bf16.mxu0 %v1809_v46  ;;  %v2272_v43 = vld [vmem:[%s2342_s16 + $0x1b0] sm:$0xff]   ;;  %v2273_v46 = vld [vmem:[%s2342_s16 + $0x178] sm:$0xff]   ;;  %v1848_v58 = vcombine.low %v356_v41, %v360_v42  ;;  %v1822_v27 = vcombine.low %v327_v16, %v331_v17 }
  0x36   : > { %1341 = vmatprep.mubr.bf16.mxu1 %v1811_v49  ;;  %2063 = vmatprep.subr.bf16.mxu0 %v2249_v50  ;;  %v1842_v49 = vcombine.low %v349_v29, %v353_v30  ;;  %v1849_v50 = vcombine.high %v356_v41, %v360_v42  ;;  %v342_v30 = vld [vmem:[%s2379_s19 + $0x110] sm:$0xff]  ;;  %v355_v41 = vld [vmem:[%s2379_s19 + $0x178] sm:$0xff] }
  0x37   : > { %2127 = vmatprep.subr.bf16.mxu1 %v2251_v54  ;;  %v364_v54 = vld [vmem:[%s2379_s19 + $0x1c0] sm:$0xff] }
  0x38   : > { %2064 = vmatpush3.bf16.msra.mxu0 %v2250_v52  ;;  %v1851_v52 = vcombine.high %v357_v44, %v361_v45 }
  0x39   : > { %2128 = vmatpush3.bf16.msra.mxu1 %v2252_v55  ;;  %2065 = vmatprep.subr.bf16.mxu0 %v2253_v62  ;;  %v368_v55 = vld [vmem:[%s2379_s19 + $0x1e0] sm:$0xff]  ;;  %v310_v62 = vld [vmem:[%s2379_s19 + $0x10] sm:$0xff] }
  0x3a   : > { %2129 = vmatprep.subr.bf16.mxu1 %v2255_v0  ;;  %v311_v0 = vld [vmem:[%s2379_s19 + $0x18] sm:$0xff] }
  0x3b   : > { %1245 = vmatmul.mubr.bf16.gmra.mrb[4].mxu0 %v1808_v51  ;;  %v2275_v51 = vld [vmem:[%s2342_s16 + $0x1f8] sm:$0xff]  }
  0x3c   : > { %1342 = vmatmul.mubr.bf16.gmra.mrb[4].mxu1 %v1810_v53  ;;  %1252 = vmatprep.mubr.bf16.mxu0 %v1817_v60  ;;  %v2276_v53 = vld [vmem:[%s2342_s16 + $0x1b8] sm:$0xff]   ;;  %v1857_v60 = vcombine.high %v364_v54, %v368_v55 }
  0x3d   : > { %1349 = vmatprep.mubr.bf16.mxu1 %v1819_v61  ;;  %2066 = vmatpush3.bf16.msra.mxu0 %v2254_v63  ;;  %v1859_v61 = vcombine.high %v365_v56, %v369_v57  ;;  %v314_v63 = vld [vmem:[%s2379_s19 + $0x30] sm:$0xff]  ;;  %v367_v56 = vld [vmem:[%s2379_s19 + $0x1d8] sm:$0xff] }
  0x3e   : > { %2130 = vmatpush3.bf16.msra.mxu1 %v2256_v1  ;;  %2067 = vmatprep.subr.bf16.mxu0 %v2257_v10  ;;  %v315_v1 = vld [vmem:[%s2379_s19 + $0x38] sm:$0xff]  ;;  %v1805_v4 = vcombine.high %v310_v62, %v314_v63  ;;  %v1804_v10 = vcombine.low %v310_v62, %v314_v63 }
  0x3f   : > { %2131 = vmatprep.subr.bf16.mxu1 %v2259_v12  ;;  %v1807_v5 = vcombine.high %v311_v0, %v315_v1  ;;  %v371_v57 = vld [vmem:[%s2379_s19 + $0x1f8] sm:$0xff] }
  0x40   : > { %v1862_v63 = vcombine.low %v367_v56, %v371_v57 }
  0x41   : > { %2068 = vmatpush3.bf16.msra.mxu0 %v2258_v11  ;;  %v1806_v11 = vcombine.low %v311_v0, %v315_v1 }
  0x42   : > { %2132 = vmatpush3.bf16.msra.mxu1 %v2260_v13  ;;  %2069 = vmatprep.subr.bf16.mxu0 %v2261_v18 }
  0x43   : > { %1253 = vmatmul.mubr.bf16.gmra.mrb[8].mxu0 %v1816_v2  ;;  %2133 = vmatprep.subr.bf16.mxu1 %v2263_v23  ;;  %v1856_v2 = vcombine.low %v364_v54, %v368_v55  ;;  %v338_v23 = vld [vmem:[%s2379_s19 + $0xf0] sm:$0xff] }
  0x44   : > { %1350 = vmatmul.mubr.bf16.gmra.mrb[8].mxu1 %v1818_v6  ;;  %1260 = vmatprep.mubr.bf16.mxu0 %v1825_v7  ;;  %v318_v6 = vld [vmem:[%s2379_s19 + $0x50] sm:$0xff] }
  0x45   : > { %1357 = vmatprep.mubr.bf16.mxu1 %v1827_v9  ;;  %2070 = vmatpush3.bf16.msra.mxu0 %v2262_v20  ;;  %v322_v7 = vld [vmem:[%s2379_s19 + $0x70] sm:$0xff]  ;;  %v323_v9 = vld [vmem:[%s2379_s19 + $0x78] sm:$0xff]  ;;  %v1821_v20 = vcombine.high %v326_v14, %v330_v15 }
  0x46   : > { %2134 = vmatpush3.bf16.msra.mxu1 %v2264_v25  ;;  %2071 = vmatprep.subr.bf16.mxu0 %v2265_v28  ;;  %v1813_v12 = vcombine.high %v318_v6, %v322_v7  ;;  %v1815_v13 = vcombine.high %v319_v8, %v323_v9  ;;  %v1812_v18 = vcombine.low %v318_v6, %v322_v7  ;;  %v339_v25 = vld [vmem:[%s2379_s19 + $0xf8] sm:$0xff]  ;;  %v366_v54 = vld [vmem:[%s2379_s19 + $0x1d0] sm:$0xff] }
  0x47   : > { %2135 = vmatprep.subr.bf16.mxu1 %v2267_v32  ;;  %v343_v32 = vld [vmem:[%s2379_s19 + $0x118] sm:$0xff]  ;;  %v370_v55 = vld [vmem:[%s2379_s19 + $0x1f0] sm:$0xff] }
  0x48   : > { %v1860_v62 = vcombine.low %v366_v54, %v370_v55 }
  0x49   : > { %2072 = vmatpush3.bf16.msra.mxu0 %v2266_v31  ;;  %v346_v31 = vld [vmem:[%s2379_s19 + $0x130] sm:$0xff] }
  0x4a   : > { %2136 = vmatpush3.bf16.msra.mxu1 %v2268_v33  ;;  %2073 = vmatprep.subr.bf16.mxu0 %v2269_v38  ;;  %v347_v33 = vld [vmem:[%s2379_s19 + $0x138] sm:$0xff]  ;;  %v350_v38 = vld [vmem:[%s2379_s19 + $0x150] sm:$0xff]  ;;  %v1836_v42 = vcombine.low %v342_v30, %v346_v31 }
  0x4b   : > { %1261 = vmatmul.mubr.bf16.gmra.mrb[12].mxu0 %v1824_v19  ;;  %2137 = vmatprep.subr.bf16.mxu1 %v2271_v40  ;;  %v1814_v19 = vcombine.low %v319_v8, %v323_v9  ;;  %v351_v40 = vld [vmem:[%s2379_s19 + $0x158] sm:$0xff] }
  0x4c   : > { %1358 = vmatmul.mubr.bf16.gmra.mrb[12].mxu1 %v1826_v21  ;;  %1268 = vmatprep.mubr.bf16.mxu0 %v1833_v22  ;;  %v1823_v21 = vcombine.high %v327_v16, %v331_v17  ;;  %v334_v22 = vld [vmem:[%s2379_s19 + $0xd0] sm:$0xff]  ;;  %v1847_v45 = vcombine.high %v351_v40, %v355_v41 }
  0x4d   : > { %1365 = vmatprep.mubr.bf16.mxu1 %v1835_v24  ;;  %2074 = vmatpush3.bf16.msra.mxu0 %v2270_v39  ;;  %v335_v24 = vld [vmem:[%s2379_s19 + $0xd8] sm:$0xff]  ;;  %v1829_v28 = vcombine.high %v334_v22, %v338_v23  ;;  %v354_v39 = vld [vmem:[%s2379_s19 + $0x170] sm:$0xff] }
  0x4e   : > { %2138 = vmatpush3.bf16.msra.mxu1 %v2272_v43  ;;  %2075 = vmatprep.subr.bf16.mxu0 %v2273_v46  ;;  %v1831_v29 = vcombine.high %v335_v24, %v339_v25  ;;  %v1838_v43 = vcombine.low %v343_v32, %v347_v33  ;;  %v1845_v44 = vcombine.high %v350_v38, %v354_v39  ;;  %v358_v46 = vld [vmem:[%s2379_s19 + $0x190] sm:$0xff] }
  0x4f   : > { %2139 = vmatprep.subr.bf16.mxu1 %v2275_v51  ;;  %v1846_v51 = vcombine.low %v351_v40, %v355_v41 }
  0x51   : > { %2076 = vmatpush3.bf16.msra.mxu0 %v2274_v48  ;;  %v359_v48 = vld [vmem:[%s2379_s19 + $0x198] sm:$0xff] }
  0x52   : > { %2140 = vmatpush3.bf16.msra.mxu1 %v2276_v53 }
  0x53   : > { %1269 = vmatmul.mubr.bf16.gmra.mrb[16].mxu0 %v1832_v34  ;;  %v1828_v34 = vcombine.low %v334_v22, %v338_v23 }
  0x54   : > { %1366 = vmatmul.mubr.bf16.gmra.mrb[16].mxu1 %v1834_v35  ;;  %1276 = vmatprep.mubr.bf16.mxu0 %v1841_v36  ;;  %v1830_v35 = vcombine.low %v335_v24, %v339_v25  ;;  %v1837_v36 = vcombine.high %v342_v30, %v346_v31 }
  0x55   : > { %1373 = vmatprep.mubr.bf16.mxu1 %v1843_v37  ;;  %v1839_v37 = vcombine.high %v343_v32, %v347_v33 }
  0x5b   : > { %1277 = vmatmul.mubr.bf16.gmra.mrb[20].mxu0 %v1840_v47  ;;  %v362_v47 = vld [vmem:[%s2379_s19 + $0x1b0] sm:$0xff] }
  0x5c   : > { %1374 = vmatmul.mubr.bf16.gmra.mrb[20].mxu1 %v1842_v49  ;;  %1284 = vmatprep.mubr.bf16.mxu0 %v1849_v50  ;;  %v363_v49 = vld [vmem:[%s2379_s19 + $0x1b8] sm:$0xff]  ;;  %v1844_v50 = vcombine.low %v350_v38, %v354_v39 }
  0x5d   : > { %1381 = vmatprep.mubr.bf16.mxu1 %v1851_v52  ;;  %v1853_v52 = vcombine.high %v358_v46, %v362_v47  ;;  %v1855_v53 = vcombine.high %v359_v48, %v363_v49 }
  0x63   : > { %1285 = vmatmul.mubr.bf16.gmra.mrb[24].mxu0 %v1848_v58  ;;  %v1852_v58 = vcombine.low %v358_v46, %v362_v47 }
  0x64   : > { %1382 = vmatmul.mubr.bf16.gmra.mrb[24].mxu1 %v1850_v59  ;;  %1292 = vmatprep.mubr.bf16.mxu0 %v1857_v60  ;;  %v1854_v59 = vcombine.low %v359_v48, %v363_v49  ;;  %v1861_v60 = vcombine.high %v366_v54, %v370_v55 }
  0x65   : > { %1389 = vmatprep.mubr.bf16.mxu1 %v1859_v61  ;;  %v1863_v61 = vcombine.high %v367_v56, %v371_v57 }
  0x6b   : > { %1293 = vmatmul.mubr.bf16.gmra.mrb[28].mxu0 %v1856_v2 }
  0x6c   : > { %1390 = vmatmul.mubr.bf16.gmra.mrb[28].mxu1 %v1858_v3  ;;  %1430 = vmatprep.mubr.bf16.mxu0 %v1805_v4 }
  0x6d   : > { %1527 = vmatprep.mubr.bf16.mxu1 %v1807_v5 }
  0x73   : > { %1431 = vmatmul.mubr.bf16.vlgmr.msra.gmra.mrb[32].mxu0 %v1804_v10 }
  0x74   : > { %1528 = vmatmul.mubr.bf16.vlgmr.msra.gmra.mrb[32].mxu1 %v1806_v11  ;;  %1438 = vmatprep.mubr.bf16.mxu0 %v1813_v12 }
  0x75   : > { %1535 = vmatprep.mubr.bf16.mxu1 %v1815_v13 }
  0x7b   : > { %1439 = vmatmul.mubr.bf16.gmra.mrb[36].mxu0 %v1812_v18 }
  0x7c   : > { %1536 = vmatmul.mubr.bf16.gmra.mrb[36].mxu1 %v1814_v19  ;;  %1446 = vmatprep.mubr.bf16.mxu0 %v1821_v20 }
  0x7d   : > { %1543 = vmatprep.mubr.bf16.mxu1 %v1823_v21 }
  0x83   : > { %1447 = vmatmul.mubr.bf16.gmra.mrb[40].mxu0 %v1820_v26 }
  0x84   : > { %1544 = vmatmul.mubr.bf16.gmra.mrb[40].mxu1 %v1822_v27  ;;  %1454 = vmatprep.mubr.bf16.mxu0 %v1829_v28 }
  0x85   : > { %1551 = vmatprep.mubr.bf16.mxu1 %v1831_v29 }
  0x8b   : > { %1455 = vmatmul.mubr.bf16.gmra.mrb[44].mxu0 %v1828_v34 }
  0x8c   : > { %1552 = vmatmul.mubr.bf16.gmra.mrb[44].mxu1 %v1830_v35  ;;  %1462 = vmatprep.mubr.bf16.mxu0 %v1837_v36 }
  0x8d   : > { %1559 = vmatprep.mubr.bf16.mxu1 %v1839_v37 }
  0x93   : > { %1463 = vmatmul.mubr.bf16.gmra.mrb[48].mxu0 %v1836_v42 }
  0x94   : > { %1560 = vmatmul.mubr.bf16.gmra.mrb[48].mxu1 %v1838_v43  ;;  %1470 = vmatprep.mubr.bf16.mxu0 %v1845_v44 }
  0x95   : > { %1567 = vmatprep.mubr.bf16.mxu1 %v1847_v45 }
  0x9b   : > { %1471 = vmatmul.mubr.bf16.gmra.mrb[52].mxu0 %v1844_v50 }
  0x9c   : > { %1568 = vmatmul.mubr.bf16.gmra.mrb[52].mxu1 %v1846_v51  ;;  %1478 = vmatprep.mubr.bf16.mxu0 %v1853_v52 }
  0x9d   : > { %1575 = vmatprep.mubr.bf16.mxu1 %v1855_v53 }
  0xa3   : > { %1479 = vmatmul.mubr.bf16.gmra.mrb[56].mxu0 %v1852_v58 }
  0xa4   : > { %1576 = vmatmul.mubr.bf16.gmra.mrb[56].mxu1 %v1854_v59  ;;  %1486 = vmatprep.mubr.bf16.mxu0 %v1861_v60 }
  0xa5   : > { %1583 = vmatprep.mubr.bf16.mxu1 %v1863_v61 }
  0xab   : > { %1487 = vmatmul.mubr.bf16.gmra.mrb[60].mxu0 %v1860_v62 }
  0xac   : > { %1584 = vmatmul.mubr.bf16.gmra.mrb[60].mxu1 %v1862_v63 }
 0x106   : > { %v1949_v0 = vpop.f32.mrb[0].mxu0 }
 0x107   : > { %v2013_v1 = vpop.f32.mrb[0].mxu1  ;;  %v1950_v2 = vpop.f32.mrb[1].mxu0 }
 0x108   : > { %v1951_v3 = vadd.f32 %v1950_v2, %v1949_v0  ;;  %v2014_v4 = vpop.f32.mrb[1].mxu1  ;;  %v1952_v5 = vpop.f32.mrb[2].mxu0 }
 0x109   : > { %v2015_v6 = vadd.f32 %v2014_v4, %v2013_v1  ;;  %v2016_v7 = vpop.f32.mrb[2].mxu1  ;;  %v1953_v8 = vpop.f32.mrb[3].mxu0 }
 0x10a   : > { %v1954_v9 = vadd.f32 %v1953_v8, %v1952_v5  ;;  %v2017_v10 = vpop.f32.mrb[3].mxu1 }
 0x10b   : > { %v2479_v11 = vadd.f32 %v2015_v6, %v1951_v3  ;;  %v2018_v12 = vadd.f32 %v2017_v10, %v2016_v7 }
 0x10d   : > { %v2481_v13 = vadd.f32 %v2018_v12, %v1954_v9 }
 0x10e   : > { %v1955_v14 = vpop.f32.mrb[4].mxu0 }
 0x10f   : > { %v2019_v15 = vpop.f32.mrb[4].mxu1  ;;  %v1956_v16 = vpop.f32.mrb[5].mxu0 }
 0x110   : > { %v1957_v17 = vadd.f32 %v1956_v16, %v1955_v14  ;;  %v2020_v18 = vpop.f32.mrb[5].mxu1  ;;  %v1958_v19 = vpop.f32.mrb[6].mxu0 }
 0x111   : > { %v2021_v20 = vadd.f32 %v2020_v18, %v2019_v15  ;;  %v2022_v21 = vpop.f32.mrb[6].mxu1  ;;  %v1959_v22 = vpop.f32.mrb[7].mxu0 }
 0x112   : > { %v1960_v23 = vadd.f32 %v1959_v22, %v1958_v19  ;;  %v2023_v24 = vpop.f32.mrb[7].mxu1 }
 0x113   : > { %v2483_v25 = vadd.f32 %v2021_v20, %v1957_v17  ;;  %v2024_v26 = vadd.f32 %v2023_v24, %v2022_v21 }
 0x115   : > { %v2485_v27 = vadd.f32 %v2024_v26, %v1960_v23 }
 0x116   : > { %v1961_v28 = vpop.f32.mrb[8].mxu0 }
 0x117   : > { %v2025_v29 = vpop.f32.mrb[8].mxu1  ;;  %v1962_v30 = vpop.f32.mrb[9].mxu0 }
 0x118   : > { %v1963_v31 = vadd.f32 %v1962_v30, %v1961_v28  ;;  %v2026_v32 = vpop.f32.mrb[9].mxu1  ;;  %v1964_v33 = vpop.f32.mrb[10].mxu0 }
 0x119   : > { %v2027_v34 = vadd.f32 %v2026_v32, %v2025_v29  ;;  %v2028_v35 = vpop.f32.mrb[10].mxu1  ;;  %v1965_v36 = vpop.f32.mrb[11].mxu0 }
 0x11a   : > { %v1966_v37 = vadd.f32 %v1965_v36, %v1964_v33  ;;  %v2029_v38 = vpop.f32.mrb[11].mxu1 }
 0x11b   : > { %v2487_v39 = vadd.f32 %v2027_v34, %v1963_v31  ;;  %v2030_v40 = vadd.f32 %v2029_v38, %v2028_v35 }
 0x11d   : > { %v2489_v41 = vadd.f32 %v2030_v40, %v1966_v37 }
 0x11e   : > { %v1967_v42 = vpop.f32.mrb[12].mxu0 }
 0x11f   : > { %v2031_v43 = vpop.f32.mrb[12].mxu1  ;;  %v1968_v44 = vpop.f32.mrb[13].mxu0 }
 0x120   : > { %v1969_v45 = vadd.f32 %v1968_v44, %v1967_v42  ;;  %v2032_v46 = vpop.f32.mrb[13].mxu1  ;;  %v1970_v47 = vpop.f32.mrb[14].mxu0 }
 0x121   : > { %v2033_v48 = vadd.f32 %v2032_v46, %v2031_v43  ;;  %v2034_v49 = vpop.f32.mrb[14].mxu1  ;;  %v1971_v50 = vpop.f32.mrb[15].mxu0 }
 0x122   : > { %v1972_v51 = vadd.f32 %v1971_v50, %v1970_v47  ;;  %v2035_v52 = vpop.f32.mrb[15].mxu1 }
 0x123   : > { %v2491_v53 = vadd.f32 %v2033_v48, %v1969_v45  ;;  %v2036_v54 = vadd.f32 %v2035_v52, %v2034_v49 }
 0x125   : > { %v2493_v55 = vadd.f32 %v2036_v54, %v1972_v51 }
 0x126   : > { %v1973_v56 = vpop.f32.mrb[16].mxu0 }
 0x127   : > { %v2037_v57 = vpop.f32.mrb[16].mxu1  ;;  %v1974_v58 = vpop.f32.mrb[17].mxu0 }
 0x128   : > { %v1975_v59 = vadd.f32 %v1974_v58, %v1973_v56  ;;  %v2038_v60 = vpop.f32.mrb[17].mxu1  ;;  %v1976_v61 = vpop.f32.mrb[18].mxu0 }
 0x129   : > { %v2039_v62 = vadd.f32 %v2038_v60, %v2037_v57  ;;  %v2040_v63 = vpop.f32.mrb[18].mxu1  ;;  %v1977_v0 = vpop.f32.mrb[19].mxu0 }
 0x12a   : > { %v1978_v1 = vadd.f32 %v1977_v0, %v1976_v61  ;;  %v2041_v2 = vpop.f32.mrb[19].mxu1 }
 0x12b   : > { %v2495_v3 = vadd.f32 %v2039_v62, %v1975_v59  ;;  %v2042_v4 = vadd.f32 %v2041_v2, %v2040_v63 }
 0x12d   : > { %v2497_v5 = vadd.f32 %v2042_v4, %v1978_v1 }
 0x12e   : > { %v1979_v6 = vpop.f32.mrb[20].mxu0 }
 0x12f   : > { %v2043_v7 = vpop.f32.mrb[20].mxu1  ;;  %v1980_v8 = vpop.f32.mrb[21].mxu0 }
 0x130   : > { %v1981_v9 = vadd.f32 %v1980_v8, %v1979_v6  ;;  %v2044_v10 = vpop.f32.mrb[21].mxu1  ;;  %v1982_v12 = vpop.f32.mrb[22].mxu0 }
 0x131   : > { %v2045_v14 = vadd.f32 %v2044_v10, %v2043_v7  ;;  %v2046_v15 = vpop.f32.mrb[22].mxu1  ;;  %v1983_v16 = vpop.f32.mrb[23].mxu0 }
 0x132   : > { %v1984_v17 = vadd.f32 %v1983_v16, %v1982_v12  ;;  %v2047_v18 = vpop.f32.mrb[23].mxu1 }
 0x133   : > { %v2499_v19 = vadd.f32 %v2045_v14, %v1981_v9  ;;  %v2048_v20 = vadd.f32 %v2047_v18, %v2046_v15 }
 0x135   : > { %v2501_v21 = vadd.f32 %v2048_v20, %v1984_v17 }
 0x136   : > { %v1985_v22 = vpop.f32.mrb[24].mxu0 }
 0x137   : > { %v2049_v23 = vpop.f32.mrb[24].mxu1  ;;  %v1986_v24 = vpop.f32.mrb[25].mxu0 }
 0x138   : > { %v1987_v26 = vadd.f32 %v1986_v24, %v1985_v22  ;;  %v2050_v28 = vpop.f32.mrb[25].mxu1  ;;  %v1988_v29 = vpop.f32.mrb[26].mxu0 }
 0x139   : > { %v2051_v30 = vadd.f32 %v2050_v28, %v2049_v23  ;;  %v2052_v31 = vpop.f32.mrb[26].mxu1  ;;  %v1989_v32 = vpop.f32.mrb[27].mxu0 }
 0x13a   : > { %v1990_v33 = vadd.f32 %v1989_v32, %v1988_v29  ;;  %v2053_v34 = vpop.f32.mrb[27].mxu1 }
 0x13b   : > { %v2503_v35 = vadd.f32 %v2051_v30, %v1987_v26  ;;  %v2054_v36 = vadd.f32 %v2053_v34, %v2052_v31 }
 0x13d   : > { %v2505_v37 = vadd.f32 %v2054_v36, %v1990_v33 }
 0x13e   : > { %v1991_v38 = vpop.f32.mrb[28].mxu0 }
 0x13f   : > { %v2055_v40 = vpop.f32.mrb[28].mxu1  ;;  %v1992_v42 = vpop.f32.mrb[29].mxu0 }
 0x140   : > { %v1993_v43 = vadd.f32 %v1992_v42, %v1991_v38  ;;  %v2056_v44 = vpop.f32.mrb[29].mxu1  ;;  %v1994_v45 = vpop.f32.mrb[30].mxu0 }
 0x141   : > { %v2057_v46 = vadd.f32 %v2056_v44, %v2055_v40  ;;  %v2058_v47 = vpop.f32.mrb[30].mxu1  ;;  %v1995_v48 = vpop.f32.mrb[31].mxu0 }
 0x142   : > { %v1996_v49 = vadd.f32 %v1995_v48, %v1994_v45  ;;  %v2059_v50 = vpop.f32.mrb[31].mxu1 }
 0x143   : > { %v2507_v51 = vadd.f32 %v2057_v46, %v1993_v43  ;;  %v2060_v52 = vadd.f32 %v2059_v50, %v2058_v47 }
 0x145   : > { %v2509_v54 = vadd.f32 %v2060_v52, %v1996_v49 }
 0x146   : > { %v2077_v56 = vpop.f32.mrb[32].mxu0 }
 0x147   : > { %v2141_v57 = vpop.f32.mrb[32].mxu1  ;;  %v2078_v58 = vpop.f32.mrb[33].mxu0 }
 0x148   : > { %v2079_v59 = vadd.f32 %v2078_v58, %v2077_v56  ;;  %v2142_v60 = vpop.f32.mrb[33].mxu1  ;;  %v2080_v61 = vpop.f32.mrb[34].mxu0 }
 0x149   : > { %v2143_v62 = vadd.f32 %v2142_v60, %v2141_v57  ;;  %v2144_v63 = vpop.f32.mrb[34].mxu1  ;;  %v2081_v0 = vpop.f32.mrb[35].mxu0 }
 0x14a   : > { %v1433_v1 = vadd.f32 %v2079_v59, %v2479_v11  ;;  %v2082_v2 = vadd.f32 %v2081_v0, %v2080_v61  ;;  %v2145_v4 = vpop.f32.mrb[35].mxu1 }
 0x14b   : > { %v2146_v6 = vadd.f32 %v2145_v4, %v2144_v63 }
 0x14c   : > { %v1530_v7 = vadd.f32 %v2143_v62, %v1433_v1  ;;  %v1436_v8 = vadd.f32 %v2082_v2, %v2481_v13 }
 0x14e   : > { %1643 = vst [vmem:[%s2516_s23] sm:$0xff] %v1530_v7  ;;  %v1533_v9 = vadd.f32 %v2146_v6, %v1436_v8  ;;  %v2083_v10 = vpop.f32.mrb[36].mxu0 }
 0x14f   : > { %v2147_v12 = vpop.f32.mrb[36].mxu1  ;;  %v2084_v14 = vpop.f32.mrb[37].mxu0 }
 0x150   : > { %1644 = vst [vmem:[%s2516_s23 + $0x8] sm:$0xff] %v1533_v9  ;;  %v2085_v11 = vadd.f32 %v2084_v14, %v2083_v10  ;;  %v2148_v15 = vpop.f32.mrb[37].mxu1  ;;  %v2086_v16 = vpop.f32.mrb[38].mxu0 }
 0x151   : > { %v2149_v17 = vadd.f32 %v2148_v15, %v2147_v12  ;;  %v2150_v18 = vpop.f32.mrb[38].mxu1  ;;  %v2087_v20 = vpop.f32.mrb[39].mxu0 }
 0x152   : > { %v1441_v22 = vadd.f32 %v2085_v11, %v2483_v25  ;;  %v2088_v23 = vadd.f32 %v2087_v20, %v2086_v16  ;;  %v2151_v24 = vpop.f32.mrb[39].mxu1 }
 0x153   : > { %v2152_v26 = vadd.f32 %v2151_v24, %v2150_v18 }
 0x154   : > { %v1538_v13 = vadd.f32 %v2149_v17, %v1441_v22  ;;  %v1444_v28 = vadd.f32 %v2088_v23, %v2485_v27 }
 0x156   : > { %1645 = vst [vmem:[%s2516_s23 + $0x10] sm:$0xff] %v1538_v13  ;;  %v1541_v29 = vadd.f32 %v2152_v26, %v1444_v28  ;;  %v2089_v30 = vpop.f32.mrb[40].mxu0 }
 0x157   : > { %v2153_v31 = vpop.f32.mrb[40].mxu1  ;;  %v2090_v32 = vpop.f32.mrb[41].mxu0 }
 0x158   : > { %1646 = vst [vmem:[%s2516_s23 + $0x18] sm:$0xff] %v1541_v29  ;;  %v2091_v33 = vadd.f32 %v2090_v32, %v2089_v30  ;;  %v2154_v34 = vpop.f32.mrb[41].mxu1  ;;  %v2092_v36 = vpop.f32.mrb[42].mxu0 }
 0x159   : > { %v2155_v38 = vadd.f32 %v2154_v34, %v2153_v31  ;;  %v2156_v40 = vpop.f32.mrb[42].mxu1  ;;  %v2093_v25 = vpop.f32.mrb[43].mxu0 }
 0x15a   : > { %v1449_v42 = vadd.f32 %v2091_v33, %v2487_v39  ;;  %v2094_v43 = vadd.f32 %v2093_v25, %v2092_v36  ;;  %v2157_v44 = vpop.f32.mrb[43].mxu1 }
 0x15b   : > { %v2158_v45 = vadd.f32 %v2157_v44, %v2156_v40 }
 0x15c   : > { %v1546_v27 = vadd.f32 %v2155_v38, %v1449_v42  ;;  %v1452_v46 = vadd.f32 %v2094_v43, %v2489_v41 }
 0x15e   : > { %1647 = vst [vmem:[%s2516_s23 + $0x20] sm:$0xff] %v1546_v27  ;;  %v1549_v47 = vadd.f32 %v2158_v45, %v1452_v46  ;;  %v2095_v48 = vpop.f32.mrb[44].mxu0 }
 0x15f   : > { %v2159_v49 = vpop.f32.mrb[44].mxu1  ;;  %v2096_v50 = vpop.f32.mrb[45].mxu0 }
 0x160   : > { %1648 = vst [vmem:[%s2516_s23 + $0x28] sm:$0xff] %v1549_v47  ;;  %v2097_v52 = vadd.f32 %v2096_v50, %v2095_v48  ;;  %v2160_v56 = vpop.f32.mrb[45].mxu1  ;;  %v2098_v57 = vpop.f32.mrb[46].mxu0 }
 0x161   : > { %v2161_v58 = vadd.f32 %v2160_v56, %v2159_v49  ;;  %v2162_v59 = vpop.f32.mrb[46].mxu1  ;;  %v2099_v39 = vpop.f32.mrb[47].mxu0 }
 0x162   : > { %v1457_v60 = vadd.f32 %v2097_v52, %v2491_v53  ;;  %v2100_v61 = vadd.f32 %v2099_v39, %v2098_v57  ;;  %v2163_v62 = vpop.f32.mrb[47].mxu1 }
 0x163   : > { %v2164_v63 = vadd.f32 %v2163_v62, %v2162_v59 }
 0x164   : > { %v1554_v41 = vadd.f32 %v2161_v58, %v1457_v60  ;;  %v1460_v0 = vadd.f32 %v2100_v61, %v2493_v55 }
 0x166   : > { %1649 = vst [vmem:[%s2516_s23 + $0x30] sm:$0xff] %v1554_v41  ;;  %v1557_v1 = vadd.f32 %v2164_v63, %v1460_v0  ;;  %v2101_v2 = vpop.f32.mrb[48].mxu0 }
 0x167   : > { %v2165_v4 = vpop.f32.mrb[48].mxu1  ;;  %v2102_v6 = vpop.f32.mrb[49].mxu0 }
 0x168   : > { %1650 = vst [vmem:[%s2516_s23 + $0x38] sm:$0xff] %v1557_v1  ;;  %v2103_v7 = vadd.f32 %v2102_v6, %v2101_v2  ;;  %v2166_v8 = vpop.f32.mrb[49].mxu1  ;;  %v2104_v9 = vpop.f32.mrb[50].mxu0 }
 0x169   : > { %v2167_v10 = vadd.f32 %v2166_v8, %v2165_v4  ;;  %v2168_v12 = vpop.f32.mrb[50].mxu1  ;;  %v2105_v53 = vpop.f32.mrb[51].mxu0 }
 0x16a   : > { %v1465_v14 = vadd.f32 %v2103_v7, %v2495_v3  ;;  %v2106_v11 = vadd.f32 %v2105_v53, %v2104_v9  ;;  %v2169_v15 = vpop.f32.mrb[51].mxu1 }
 0x16b   : > { %v2170_v16 = vadd.f32 %v2169_v15, %v2168_v12 }
 0x16c   : > { %v1562_v55 = vadd.f32 %v2167_v10, %v1465_v14  ;;  %v1468_v17 = vadd.f32 %v2106_v11, %v2497_v5 }
 0x16e   : > { %1651 = vst [vmem:[%s2516_s23 + $0x40] sm:$0xff] %v1562_v55  ;;  %v1565_v18 = vadd.f32 %v2170_v16, %v1468_v17  ;;  %v2107_v20 = vpop.f32.mrb[52].mxu0 }
 0x16f   : > { %v2171_v22 = vpop.f32.mrb[52].mxu1  ;;  %v2108_v23 = vpop.f32.mrb[53].mxu0 }
 0x170   : > { %1652 = vst [vmem:[%s2516_s23 + $0x48] sm:$0xff] %v1565_v18  ;;  %v2109_v24 = vadd.f32 %v2108_v23, %v2107_v20  ;;  %v2172_v26 = vpop.f32.mrb[53].mxu1  ;;  %v2110_v13 = vpop.f32.mrb[54].mxu0 }
 0x171   : > { %v2173_v28 = vadd.f32 %v2172_v26, %v2171_v22  ;;  %v2174_v29 = vpop.f32.mrb[54].mxu1  ;;  %v2111_v3 = vpop.f32.mrb[55].mxu0 }
 0x172   : > { %v1473_v30 = vadd.f32 %v2109_v24, %v2499_v19  ;;  %v2112_v31 = vadd.f32 %v2111_v3, %v2110_v13  ;;  %v2175_v32 = vpop.f32.mrb[55].mxu1 }
 0x173   : > { %v2176_v33 = vadd.f32 %v2175_v32, %v2174_v29 }
 0x174   : > { %v1570_v5 = vadd.f32 %v2173_v28, %v1473_v30  ;;  %v1476_v34 = vadd.f32 %v2112_v31, %v2501_v21 }
 0x176   : > { %1653 = vst [vmem:[%s2516_s23 + $0x50] sm:$0xff] %v1570_v5  ;;  %v1573_v36 = vadd.f32 %v2176_v33, %v1476_v34  ;;  %v2113_v38 = vpop.f32.mrb[56].mxu0 }
 0x177   : > { %v2177_v40 = vpop.f32.mrb[56].mxu1  ;;  %v2114_v25 = vpop.f32.mrb[57].mxu0 }
 0x178   : > { %1654 = vst [vmem:[%s2516_s23 + $0x58] sm:$0xff] %v1573_v36  ;;  %v2115_v42 = vadd.f32 %v2114_v25, %v2113_v38  ;;  %v2178_v43 = vpop.f32.mrb[57].mxu1  ;;  %v2116_v44 = vpop.f32.mrb[58].mxu0 }
 0x179   : > { %v2179_v45 = vadd.f32 %v2178_v43, %v2177_v40  ;;  %v2180_v27 = vpop.f32.mrb[58].mxu1  ;;  %v2117_v19 = vpop.f32.mrb[59].mxu0 }
 0x17a   : > { %v1481_v46 = vadd.f32 %v2115_v42, %v2503_v35  ;;  %v2118_v47 = vadd.f32 %v2117_v19, %v2116_v44  ;;  %v2181_v48 = vpop.f32.mrb[59].mxu1 }
 0x17b   : > { %v2182_v49 = vadd.f32 %v2181_v48, %v2180_v27 }
 0x17c   : > { %v1578_v21 = vadd.f32 %v2179_v45, %v1481_v46  ;;  %v1484_v50 = vadd.f32 %v2118_v47, %v2505_v37 }
 0x17e   : > { %1655 = vst [vmem:[%s2516_s23 + $0x60] sm:$0xff] %v1578_v21  ;;  %v1581_v52 = vadd.f32 %v2182_v49, %v1484_v50  ;;  %v2119_v56 = vpop.f32.mrb[60].mxu0 }
 0x17f   : > { %v2183_v57 = vpop.f32.mrb[60].mxu1  ;;  %v2120_v58 = vpop.f32.mrb[61].mxu0 }
 0x180   : > { %1656 = vst [vmem:[%s2516_s23 + $0x68] sm:$0xff] %v1581_v52  ;;  %v2121_v59 = vadd.f32 %v2120_v58, %v2119_v56  ;;  %v2184_v39 = vpop.f32.mrb[61].mxu1  ;;  %v2122_v60 = vpop.f32.mrb[62].mxu0 }
 0x181   : > { %v2185_v61 = vadd.f32 %v2184_v39, %v2183_v57  ;;  %v2186_v62 = vpop.f32.mrb[62].mxu1  ;;  %v2123_v35 = vpop.f32.mrb[63].mxu0 }
 0x182   : > { %v1489_v63 = vadd.f32 %v2121_v59, %v2507_v51  ;;  %v2124_v41 = vadd.f32 %v2123_v35, %v2122_v60  ;;  %v2187_v0 = vpop.f32.mrb[63].mxu1 }
 0x183   : > { %v2188_v1 = vadd.f32 %v2187_v0, %v2186_v62 }
 0x184   : > { %v1586_v37 = vadd.f32 %v2185_v61, %v1489_v63  ;;  %v1492_v2 = vadd.f32 %v2124_v41, %v2509_v54 }
 0x186   : > { %1657 = vst [vmem:[%s2516_s23 + $0x70] sm:$0xff] %v1586_v37  ;;  %v1589_v4 = vadd.f32 %v2188_v1, %v1492_v2 }
 0x188   : > { %1658 = vst [vmem:[%s2516_s23 + $0x78] sm:$0xff] %v1589_v4 }
 0x189 PF: > { %s12_s11 = sadd.s32 1, %s2299_s11   ;;  %s2561_s9 = smov %s2295_s10 }
 0x18a   : > { %p9_p5 = scmp.ge.s32.totalorder %s12_s11, 6   ;;  %s2562_s10 = smov %s2564_s12 }
 0x18c   :  { %11 = sbr.rel (!%p9_p5) target bundleno = 2 (0x2), region = 69 }

// kernel: generator_forward.14
= control target key start
LH: loop header
LB: loop body
LE: loop exit
PB: predicated region body
PF: predicated region fallthrough
CT: control target
= control target key end

     0   :  { %s1375_s0 = inlined_call_operand.vmem [shape: f32[512,128], index: 0, kind: input, shape index: {}]   ;;  %s1376_s1 = inlined_call_operand.vmem [shape: f32[1,128], index: 1, kind: input, shape index: {}]   ;;  %s1377_s2 = inlined_call_operand.vmem [shape: f32[1,128], index: 2, kind: input, shape index: {}]   ;;  %s1378_s3 = inlined_call_operand.vmem [shape: bf16[512,128], index: 3, kind: output, shape index: {}]  }
   0x1   :  { %v14_v0 = vld [vmem:[%s1375_s0] sm:$0xff]  ;;  %v15_v1 = vld [vmem:[%s1375_s0 + $0x8] sm:$0xff]  ;;  %v16_v6 = vld [vmem:[%s1375_s0 + $0x10] sm:$0xff] }
   0x2   :  { %v958_v2 = vld [vmem:[%s1376_s1] ss:$0 sm:$0xff]  ;;  %v17_v7 = vld [vmem:[%s1375_s0 + $0x18] sm:$0xff]  ;;  %v19_v11 = vld [vmem:[%s1375_s0 + $0x28] sm:$0xff] }
   0x3   :  { %v85_v3 = vmul.f32 %v958_v2, %v14_v0  ;;  %v86_v4 = vmul.f32 %v958_v2, %v15_v1  ;;  %v965_v5 = vld [vmem:[%s1377_s2] ss:$0 sm:$0xff]  ;;  %v87_v8 = vmul.f32 %v958_v2, %v16_v6  ;;  %v88_v9 = vmul.f32 %v958_v2, %v17_v7  ;;  %v20_v12 = vld [vmem:[%s1375_s0 + $0x30] sm:$0xff]  ;;  %v21_v17 = vld [vmem:[%s1375_s0 + $0x38] sm:$0xff] }
   0x4   :  { %v18_v10 = vld [vmem:[%s1375_s0 + $0x20] sm:$0xff]  ;;  %v90_v16 = vmul.f32 %v958_v2, %v19_v11  ;;  %v91_v20 = vmul.f32 %v958_v2, %v20_v12  ;;  %v92_v21 = vmul.f32 %v958_v2, %v21_v17  ;;  %v23_v27 = vld [vmem:[%s1375_s0 + $0x48] sm:$0xff]  ;;  %v24_v32 = vld [vmem:[%s1375_s0 + $0x50] sm:$0xff] }
   0x5   :  { %v156_v13 = vadd.f32 %v965_v5, %v85_v3  ;;  %v157_v14 = vadd.f32 %v965_v5, %v86_v4  ;;  %v89_v15 = vmul.f32 %v958_v2, %v18_v10  ;;  %v158_v18 = vadd.f32 %v965_v5, %v87_v8  ;;  %v22_v22 = vld [vmem:[%s1375_s0 + $0x40] sm:$0xff]  ;;  %v25_v33 = vld [vmem:[%s1375_s0 + $0x58] sm:$0xff]  ;;  %v27_v39 = vld [vmem:[%s1375_s0 + $0x68] sm:$0xff] }
   0x6   :  { %v159_v19 = vadd.f32 %v965_v5, %v88_v9  ;;  %v161_v26 = vadd.f32 %v965_v5, %v90_v16  ;;  %v162_v30 = vadd.f32 %v965_v5, %v91_v20  ;;  %v163_v31 = vadd.f32 %v965_v5, %v92_v21  ;;  %v26_v38 = vld [vmem:[%s1375_s0 + $0x60] sm:$0xff]  ;;  %v28_v44 = vld [vmem:[%s1375_s0 + $0x70] sm:$0xff]  ;;  %v29_v49 = vld [vmem:[%s1375_s0 + $0x78] sm:$0xff] }
   0x7   :  { %v220_v23 = vmax.f32 %v156_v13, 0.0  ;;  %v221_v24 = vmax.f32 %v157_v14, 0.0  ;;  %v160_v25 = vadd.f32 %v965_v5, %v89_v15  ;;  %v222_v28 = vmax.f32 %v158_v18, 0.0  ;;  %v30_v54 = vld [vmem:[%s1375_s0 + $0x80] sm:$0xff]  ;;  %v31_v63 = vld [vmem:[%s1375_s0 + $0x88] sm:$0xff]  ;;  %v32_v6 = vld [vmem:[%s1375_s0 + $0x90] sm:$0xff] }
   0x8   :  { %v223_v29 = vmax.f32 %v159_v19, 0.0  ;;  %v225_v36 = vmax.f32 %v161_v26, 0.0  ;;  %v93_v37 = vmul.f32 %v958_v2, %v22_v22  ;;  %v226_v41 = vmax.f32 %v162_v30, 0.0  ;;  %v33_v7 = vld [vmem:[%s1375_s0 + $0x98] sm:$0xff]  ;;  %v34_v12 = vld [vmem:[%s1375_s0 + $0xa0] sm:$0xff]  ;;  %v35_v13 = vld [vmem:[%s1375_s0 + $0xa8] sm:$0xff] }
   0x9   :  { %v741_v34 = vpack.c.bf16 %v221_v24, %v220_v23  ;;  %v224_v35 = vmax.f32 %v160_v25, 0.0  ;;  %v227_v42 = vmax.f32 %v163_v31, 0.0  ;;  %v94_v43 = vmul.f32 %v958_v2, %v23_v27  ;;  %v36_v18 = vld [vmem:[%s1375_s0 + $0xb0] sm:$0xff]  ;;  %v37_v23 = vld [vmem:[%s1375_s0 + $0xb8] sm:$0xff] }
   0xa   :  { %v746_v40 = vpack.c.bf16 %v223_v29, %v222_v28  ;;  %v164_v46 = vadd.f32 %v965_v5, %v93_v37  ;;  %v95_v47 = vmul.f32 %v958_v2, %v24_v32  ;;  %v96_v48 = vmul.f32 %v958_v2, %v25_v33  ;;  %v38_v28 = vld [vmem:[%s1375_s0 + $0xc0] sm:$0xff]  ;;  %v39_v37 = vld [vmem:[%s1375_s0 + $0xc8] sm:$0xff] }
   0xb   :  { %742 = vst [vmem:[%s1378_s3] sm:$0xff] %v741_v34   ;;  %v751_v45 = vpack.c.bf16 %v225_v36, %v224_v35  ;;  %v756_v50 = vpack.c.bf16 %v227_v42, %v226_v41  ;;  %v165_v51 = vadd.f32 %v965_v5, %v94_v43  ;;  %v97_v52 = vmul.f32 %v958_v2, %v26_v38  ;;  %v40_v42 = vld [vmem:[%s1375_s0 + $0xd0] sm:$0xff]  ;;  %v41_v43 = vld [vmem:[%s1375_s0 + $0xd8] sm:$0xff] }
   0xc   :  { %898 = vst [vmem:[%s1378_s3 + $0x8] sm:$0xff] %v746_v40   ;;  %v98_v53 = vmul.f32 %v958_v2, %v27_v39  ;;  %v228_v55 = vmax.f32 %v164_v46, 0.0  ;;  %v166_v56 = vadd.f32 %v965_v5, %v95_v47  ;;  %v167_v57 = vadd.f32 %v965_v5, %v96_v48  ;;  %v42_v48 = vld [vmem:[%s1375_s0 + $0xe0] sm:$0xff] }
   0xd   :  { %899 = vst [vmem:[%s1378_s3 + $0x10] sm:$0xff] %v751_v45   ;;  %v99_v58 = vmul.f32 %v958_v2, %v28_v44  ;;  %900 = vst [vmem:[%s1378_s3 + $0x18] sm:$0xff] %v756_v50   ;;  %v229_v59 = vmax.f32 %v165_v51, 0.0  ;;  %v168_v60 = vadd.f32 %v965_v5, %v97_v52  ;;  %v100_v62 = vmul.f32 %v958_v2, %v29_v49  ;;  %v43_v49 = vld [vmem:[%s1375_s0 + $0xe8] sm:$0xff] }
   0xe   :  { %v169_v61 = vadd.f32 %v965_v5, %v98_v53  ;;  %v230_v0 = vmax.f32 %v166_v56, 0.0  ;;  %v231_v1 = vmax.f32 %v167_v57, 0.0  ;;  %v101_v4 = vmul.f32 %v958_v2, %v30_v54  ;;  %v44_v54 = vld [vmem:[%s1375_s0 + $0xf0] sm:$0xff] }
   0xf   :  { %v170_v3 = vadd.f32 %v965_v5, %v99_v58  ;;  %v761_v8 = vpack.c.bf16 %v229_v59, %v228_v55  ;;  %v232_v9 = vmax.f32 %v168_v60, 0.0  ;;  %v171_v11 = vadd.f32 %v965_v5, %v100_v62  ;;  %v45_v59 = vld [vmem:[%s1375_s0 + $0xf8] sm:$0xff] }
  0x10   :  { %v233_v10 = vmax.f32 %v169_v61, 0.0  ;;  %v766_v14 = vpack.c.bf16 %v231_v1, %v230_v0  ;;  %v102_v16 = vmul.f32 %v958_v2, %v31_v63  ;;  %v172_v17 = vadd.f32 %v965_v5, %v101_v4  ;;  %v46_v0 = vld [vmem:[%s1375_s0 + $0x100] sm:$0xff] }
  0x11   :  { %v234_v15 = vmax.f32 %v170_v3, 0.0  ;;  %901 = vst [vmem:[%s1378_s3 + $0x20] sm:$0xff] %v761_v8   ;;  %v235_v20 = vmax.f32 %v171_v11, 0.0  ;;  %v103_v21 = vmul.f32 %v958_v2, %v32_v6  ;;  %v104_v22 = vmul.f32 %v958_v2, %v33_v7  ;;  %v47_v11 = vld [vmem:[%s1375_s0 + $0x108] sm:$0xff] }
  0x12   :  { %v771_v19 = vpack.c.bf16 %v233_v10, %v232_v9  ;;  %902 = vst [vmem:[%s1378_s3 + $0x28] sm:$0xff] %v766_v14   ;;  %v173_v24 = vadd.f32 %v965_v5, %v102_v16  ;;  %v236_v25 = vmax.f32 %v172_v17, 0.0  ;;  %v105_v26 = vmul.f32 %v958_v2, %v34_v12  ;;  %v48_v16 = vld [vmem:[%s1375_s0 + $0x110] sm:$0xff]  ;;  %v49_v17 = vld [vmem:[%s1375_s0 + $0x118] sm:$0xff] }
  0x13   :  { %v106_v27 = vmul.f32 %v958_v2, %v35_v13  ;;  %v776_v29 = vpack.c.bf16 %v235_v20, %v234_v15  ;;  %v174_v30 = vadd.f32 %v965_v5, %v103_v21  ;;  %v175_v31 = vadd.f32 %v965_v5, %v104_v22  ;;  %v50_v22 = vld [vmem:[%s1375_s0 + $0x120] sm:$0xff] }
  0x14   :  { %903 = vst [vmem:[%s1378_s3 + $0x30] sm:$0xff] %v771_v19   ;;  %v107_v32 = vmul.f32 %v958_v2, %v36_v18  ;;  %v237_v33 = vmax.f32 %v173_v24, 0.0  ;;  %v176_v34 = vadd.f32 %v965_v5, %v105_v26  ;;  %v108_v36 = vmul.f32 %v958_v2, %v37_v23  ;;  %v51_v23 = vld [vmem:[%s1375_s0 + $0x128] sm:$0xff] }
  0x15   :  { %v177_v35 = vadd.f32 %v965_v5, %v106_v27  ;;  %904 = vst [vmem:[%s1378_s3 + $0x38] sm:$0xff] %v776_v29   ;;  %v238_v38 = vmax.f32 %v174_v30, 0.0  ;;  %v239_v39 = vmax.f32 %v175_v31, 0.0  ;;  %v109_v41 = vmul.f32 %v958_v2, %v38_v28  ;;  %v52_v28 = vld [vmem:[%s1375_s0 + $0x130] sm:$0xff] }
  0x16   :  { %v178_v40 = vadd.f32 %v965_v5, %v107_v32  ;;  %v781_v44 = vpack.c.bf16 %v237_v33, %v236_v25  ;;  %v240_v45 = vmax.f32 %v176_v34, 0.0  ;;  %v179_v47 = vadd.f32 %v965_v5, %v108_v36  ;;  %v53_v33 = vld [vmem:[%s1375_s0 + $0x138] sm:$0xff] }
  0x17   :  { %v241_v46 = vmax.f32 %v177_v35, 0.0  ;;  %v786_v50 = vpack.c.bf16 %v239_v39, %v238_v38  ;;  %v110_v52 = vmul.f32 %v958_v2, %v39_v37  ;;  %v180_v53 = vadd.f32 %v965_v5, %v109_v41  ;;  %v54_v38 = vld [vmem:[%s1375_s0 + $0x140] sm:$0xff] }
  0x18   :  { %v242_v51 = vmax.f32 %v178_v40, 0.0  ;;  %905 = vst [vmem:[%s1378_s3 + $0x40] sm:$0xff] %v781_v44   ;;  %v243_v56 = vmax.f32 %v179_v47, 0.0  ;;  %v111_v57 = vmul.f32 %v958_v2, %v40_v42  ;;  %v112_v58 = vmul.f32 %v958_v2, %v41_v43  ;;  %v55_v47 = vld [vmem:[%s1375_s0 + $0x148] sm:$0xff] }
  0x19   :  { %v791_v55 = vpack.c.bf16 %v241_v46, %v240_v45  ;;  %906 = vst [vmem:[%s1378_s3 + $0x48] sm:$0xff] %v786_v50   ;;  %v181_v60 = vadd.f32 %v965_v5, %v110_v52  ;;  %v244_v61 = vmax.f32 %v180_v53, 0.0  ;;  %v113_v62 = vmul.f32 %v958_v2, %v42_v48  ;;  %v56_v52 = vld [vmem:[%s1375_s0 + $0x150] sm:$0xff]  ;;  %v57_v53 = vld [vmem:[%s1375_s0 + $0x158] sm:$0xff] }
  0x1a   :  { %v114_v63 = vmul.f32 %v958_v2, %v43_v49  ;;  %v796_v1 = vpack.c.bf16 %v243_v56, %v242_v51  ;;  %v182_v3 = vadd.f32 %v965_v5, %v111_v57  ;;  %v183_v4 = vadd.f32 %v965_v5, %v112_v58  ;;  %v58_v58 = vld [vmem:[%s1375_s0 + $0x160] sm:$0xff] }
  0x1b   :  { %907 = vst [vmem:[%s1378_s3 + $0x50] sm:$0xff] %v791_v55   ;;  %v115_v6 = vmul.f32 %v958_v2, %v44_v54  ;;  %v245_v7 = vmax.f32 %v181_v60, 0.0  ;;  %v184_v8 = vadd.f32 %v965_v5, %v113_v62  ;;  %v116_v10 = vmul.f32 %v958_v2, %v45_v59  ;;  %v59_v59 = vld [vmem:[%s1375_s0 + $0x168] sm:$0xff] }
  0x1c   :  { %v185_v9 = vadd.f32 %v965_v5, %v114_v63  ;;  %908 = vst [vmem:[%s1378_s3 + $0x58] sm:$0xff] %v796_v1   ;;  %v246_v12 = vmax.f32 %v182_v3, 0.0  ;;  %v247_v13 = vmax.f32 %v183_v4, 0.0  ;;  %v117_v15 = vmul.f32 %v958_v2, %v46_v0  ;;  %v60_v0 = vld [vmem:[%s1375_s0 + $0x170] sm:$0xff] }
  0x1d   :  { %v186_v14 = vadd.f32 %v965_v5, %v115_v6  ;;  %v801_v18 = vpack.c.bf16 %v245_v7, %v244_v61  ;;  %v248_v19 = vmax.f32 %v184_v8, 0.0  ;;  %v187_v21 = vadd.f32 %v965_v5, %v116_v10  ;;  %v61_v7 = vld [vmem:[%s1375_s0 + $0x178] sm:$0xff] }
  0x1e   :  { %v249_v20 = vmax.f32 %v185_v9, 0.0  ;;  %v806_v24 = vpack.c.bf16 %v247_v13, %v246_v12  ;;  %v118_v26 = vmul.f32 %v958_v2, %v47_v11  ;;  %v188_v27 = vadd.f32 %v965_v5, %v117_v15  ;;  %v62_v12 = vld [vmem:[%s1375_s0 + $0x180] sm:$0xff] }
  0x1f   :  { %v250_v25 = vmax.f32 %v186_v14, 0.0  ;;  %909 = vst [vmem:[%s1378_s3 + $0x60] sm:$0xff] %v801_v18   ;;  %v251_v30 = vmax.f32 %v187_v21, 0.0  ;;  %v119_v31 = vmul.f32 %v958_v2, %v48_v16  ;;  %v120_v32 = vmul.f32 %v958_v2, %v49_v17  ;;  %v63_v21 = vld [vmem:[%s1375_s0 + $0x188] sm:$0xff] }
  0x20   :  { %v811_v29 = vpack.c.bf16 %v249_v20, %v248_v19  ;;  %910 = vst [vmem:[%s1378_s3 + $0x68] sm:$0xff] %v806_v24   ;;  %v189_v34 = vadd.f32 %v965_v5, %v118_v26  ;;  %v252_v35 = vmax.f32 %v188_v27, 0.0  ;;  %v121_v36 = vmul.f32 %v958_v2, %v50_v22  ;;  %v64_v26 = vld [vmem:[%s1375_s0 + $0x190] sm:$0xff]  ;;  %v65_v27 = vld [vmem:[%s1375_s0 + $0x198] sm:$0xff] }
  0x21   :  { %v122_v37 = vmul.f32 %v958_v2, %v51_v23  ;;  %v816_v39 = vpack.c.bf16 %v251_v30, %v250_v25  ;;  %v190_v40 = vadd.f32 %v965_v5, %v119_v31  ;;  %v191_v41 = vadd.f32 %v965_v5, %v120_v32  ;;  %v66_v32 = vld [vmem:[%s1375_s0 + $0x1a0] sm:$0xff] }
  0x22   :  { %911 = vst [vmem:[%s1378_s3 + $0x70] sm:$0xff] %v811_v29   ;;  %v123_v42 = vmul.f32 %v958_v2, %v52_v28  ;;  %v253_v43 = vmax.f32 %v189_v34, 0.0  ;;  %v192_v44 = vadd.f32 %v965_v5, %v121_v36  ;;  %v124_v46 = vmul.f32 %v958_v2, %v53_v33  ;;  %v67_v33 = vld [vmem:[%s1375_s0 + $0x1a8] sm:$0xff] }
  0x23   :  { %v193_v45 = vadd.f32 %v965_v5, %v122_v37  ;;  %912 = vst [vmem:[%s1378_s3 + $0x78] sm:$0xff] %v816_v39   ;;  %v254_v48 = vmax.f32 %v190_v40, 0.0  ;;  %v255_v49 = vmax.f32 %v191_v41, 0.0  ;;  %v125_v51 = vmul.f32 %v958_v2, %v54_v38  ;;  %v68_v38 = vld [vmem:[%s1375_s0 + $0x1b0] sm:$0xff] }
  0x24   :  { %v194_v50 = vadd.f32 %v965_v5, %v123_v42  ;;  %v821_v54 = vpack.c.bf16 %v253_v43, %v252_v35  ;;  %v256_v55 = vmax.f32 %v192_v44, 0.0  ;;  %v195_v57 = vadd.f32 %v965_v5, %v124_v46  ;;  %v69_v43 = vld [vmem:[%s1375_s0 + $0x1b8] sm:$0xff] }
  0x25   :  { %v257_v56 = vmax.f32 %v193_v45, 0.0  ;;  %v826_v60 = vpack.c.bf16 %v255_v49, %v254_v48  ;;  %v126_v62 = vmul.f32 %v958_v2, %v55_v47  ;;  %v196_v63 = vadd.f32 %v965_v5, %v125_v51  ;;  %v70_v48 = vld [vmem:[%s1375_s0 + $0x1c0] sm:$0xff] }
  0x26   :  { %v258_v61 = vmax.f32 %v194_v50, 0.0  ;;  %913 = vst [vmem:[%s1378_s3 + $0x80] sm:$0xff] %v821_v54   ;;  %v259_v3 = vmax.f32 %v195_v57, 0.0  ;;  %v127_v4 = vmul.f32 %v958_v2, %v56_v52  ;;  %v128_v6 = vmul.f32 %v958_v2, %v57_v53  ;;  %v71_v57 = vld [vmem:[%s1375_s0 + $0x1c8] sm:$0xff] }
  0x27   :  { %v831_v1 = vpack.c.bf16 %v257_v56, %v256_v55  ;;  %914 = vst [vmem:[%s1378_s3 + $0x88] sm:$0xff] %v826_v60   ;;  %v197_v8 = vadd.f32 %v965_v5, %v126_v62  ;;  %v260_v9 = vmax.f32 %v196_v63, 0.0  ;;  %v129_v10 = vmul.f32 %v958_v2, %v58_v58  ;;  %v72_v62 = vld [vmem:[%s1375_s0 + $0x1d0] sm:$0xff]  ;;  %v73_v63 = vld [vmem:[%s1375_s0 + $0x1d8] sm:$0xff] }
  0x28   :  { %v130_v11 = vmul.f32 %v958_v2, %v59_v59  ;;  %v836_v13 = vpack.c.bf16 %v259_v3, %v258_v61  ;;  %v198_v14 = vadd.f32 %v965_v5, %v127_v4  ;;  %v199_v15 = vadd.f32 %v965_v5, %v128_v6  ;;  %v74_v6 = vld [vmem:[%s1375_s0 + $0x1e0] sm:$0xff] }
  0x29   :  { %915 = vst [vmem:[%s1378_s3 + $0x90] sm:$0xff] %v831_v1   ;;  %v131_v16 = vmul.f32 %v958_v2, %v60_v0  ;;  %v261_v17 = vmax.f32 %v197_v8, 0.0  ;;  %v200_v18 = vadd.f32 %v965_v5, %v129_v10  ;;  %v132_v20 = vmul.f32 %v958_v2, %v61_v7  ;;  %v75_v7 = vld [vmem:[%s1375_s0 + $0x1e8] sm:$0xff] }
  0x2a   :  { %v201_v19 = vadd.f32 %v965_v5, %v130_v11  ;;  %916 = vst [vmem:[%s1378_s3 + $0x98] sm:$0xff] %v836_v13   ;;  %v262_v22 = vmax.f32 %v198_v14, 0.0  ;;  %v263_v23 = vmax.f32 %v199_v15, 0.0  ;;  %v133_v25 = vmul.f32 %v958_v2, %v62_v12  ;;  %v76_v12 = vld [vmem:[%s1375_s0 + $0x1f0] sm:$0xff] }
  0x2b   :  { %v202_v24 = vadd.f32 %v965_v5, %v131_v16  ;;  %v841_v28 = vpack.c.bf16 %v261_v17, %v260_v9  ;;  %v264_v29 = vmax.f32 %v200_v18, 0.0  ;;  %v203_v31 = vadd.f32 %v965_v5, %v132_v20  ;;  %v77_v17 = vld [vmem:[%s1375_s0 + $0x1f8] sm:$0xff] }
  0x2c   :  { %v265_v30 = vmax.f32 %v201_v19, 0.0  ;;  %v846_v34 = vpack.c.bf16 %v263_v23, %v262_v22  ;;  %v134_v36 = vmul.f32 %v958_v2, %v63_v21  ;;  %v204_v37 = vadd.f32 %v965_v5, %v133_v25 }
  0x2d   :  { %v266_v35 = vmax.f32 %v202_v24, 0.0  ;;  %917 = vst [vmem:[%s1378_s3 + $0xa0] sm:$0xff] %v841_v28   ;;  %v267_v40 = vmax.f32 %v203_v31, 0.0  ;;  %v135_v41 = vmul.f32 %v958_v2, %v64_v26  ;;  %v136_v42 = vmul.f32 %v958_v2, %v65_v27 }
  0x2e   :  { %v851_v39 = vpack.c.bf16 %v265_v30, %v264_v29  ;;  %918 = vst [vmem:[%s1378_s3 + $0xa8] sm:$0xff] %v846_v34   ;;  %v205_v44 = vadd.f32 %v965_v5, %v134_v36  ;;  %v268_v45 = vmax.f32 %v204_v37, 0.0  ;;  %v137_v46 = vmul.f32 %v958_v2, %v66_v32 }
  0x2f   :  { %v138_v47 = vmul.f32 %v958_v2, %v67_v33  ;;  %v856_v49 = vpack.c.bf16 %v267_v40, %v266_v35  ;;  %v206_v50 = vadd.f32 %v965_v5, %v135_v41  ;;  %v207_v51 = vadd.f32 %v965_v5, %v136_v42 }
  0x30   :  { %919 = vst [vmem:[%s1378_s3 + $0xb0] sm:$0xff] %v851_v39   ;;  %v139_v52 = vmul.f32 %v958_v2, %v68_v38  ;;  %v269_v53 = vmax.f32 %v205_v44, 0.0  ;;  %v208_v54 = vadd.f32 %v965_v5, %v137_v46  ;;  %v140_v56 = vmul.f32 %v958_v2, %v69_v43 }
  0x31   :  { %v209_v55 = vadd.f32 %v965_v5, %v138_v47  ;;  %920 = vst [vmem:[%s1378_s3 + $0xb8] sm:$0xff] %v856_v49   ;;  %v270_v58 = vmax.f32 %v206_v50, 0.0  ;;  %v271_v59 = vmax.f32 %v207_v51, 0.0  ;;  %v141_v61 = vmul.f32 %v958_v2, %v70_v48 }
  0x32   :  { %v210_v60 = vadd.f32 %v965_v5, %v139_v52  ;;  %v861_v0 = vpack.c.bf16 %v269_v53, %v268_v45  ;;  %v272_v1 = vmax.f32 %v208_v54, 0.0  ;;  %v211_v4 = vadd.f32 %v965_v5, %v140_v56 }
  0x33   :  { %v273_v3 = vmax.f32 %v209_v55, 0.0  ;;  %v866_v8 = vpack.c.bf16 %v271_v59, %v270_v58  ;;  %v142_v10 = vmul.f32 %v958_v2, %v71_v57  ;;  %v212_v11 = vadd.f32 %v965_v5, %v141_v61 }
  0x34   :  { %v274_v9 = vmax.f32 %v210_v60, 0.0  ;;  %921 = vst [vmem:[%s1378_s3 + $0xc0] sm:$0xff] %v861_v0   ;;  %v275_v14 = vmax.f32 %v211_v4, 0.0  ;;  %v143_v15 = vmul.f32 %v958_v2, %v72_v62  ;;  %v144_v16 = vmul.f32 %v958_v2, %v73_v63 }
  0x35   :  { %v871_v13 = vpack.c.bf16 %v273_v3, %v272_v1  ;;  %922 = vst [vmem:[%s1378_s3 + $0xc8] sm:$0xff] %v866_v8   ;;  %v213_v18 = vadd.f32 %v965_v5, %v142_v10  ;;  %v276_v19 = vmax.f32 %v212_v11, 0.0  ;;  %v145_v20 = vmul.f32 %v958_v2, %v74_v6 }
  0x36   :  { %v146_v21 = vmul.f32 %v958_v2, %v75_v7  ;;  %v876_v22 = vpack.c.bf16 %v275_v14, %v274_v9  ;;  %v214_v23 = vadd.f32 %v965_v5, %v143_v15  ;;  %v215_v24 = vadd.f32 %v965_v5, %v144_v16 }
  0x37   :  { %923 = vst [vmem:[%s1378_s3 + $0xd0] sm:$0xff] %v871_v13   ;;  %v147_v25 = vmul.f32 %v958_v2, %v76_v12  ;;  %v277_v26 = vmax.f32 %v213_v18, 0.0  ;;  %v216_v27 = vadd.f32 %v965_v5, %v145_v20  ;;  %v148_v29 = vmul.f32 %v958_v2, %v77_v17 }
  0x38   :  { %v217_v28 = vadd.f32 %v965_v5, %v146_v21  ;;  %924 = vst [vmem:[%s1378_s3 + $0xd8] sm:$0xff] %v876_v22   ;;  %v278_v30 = vmax.f32 %v214_v23, 0.0  ;;  %v279_v31 = vmax.f32 %v215_v24, 0.0 }
  0x39   :  { %v218_v32 = vadd.f32 %v965_v5, %v147_v25  ;;  %v881_v33 = vpack.c.bf16 %v277_v26, %v276_v19  ;;  %v280_v34 = vmax.f32 %v216_v27, 0.0  ;;  %v219_v36 = vadd.f32 %v965_v5, %v148_v29 }
  0x3a   :  { %v281_v35 = vmax.f32 %v217_v28, 0.0  ;;  %v886_v37 = vpack.c.bf16 %v279_v31, %v278_v30 }
  0x3b   :  { %v282_v38 = vmax.f32 %v218_v32, 0.0  ;;  %925 = vst [vmem:[%s1378_s3 + $0xe0] sm:$0xff] %v881_v33   ;;  %v283_v39 = vmax.f32 %v219_v36, 0.0 }
  0x3c   :  { %v891_v2 = vpack.c.bf16 %v281_v35, %v280_v34  ;;  %926 = vst [vmem:[%s1378_s3 + $0xe8] sm:$0xff] %v886_v37  }
  0x3d   :  { %v896_v40 = vpack.c.bf16 %v283_v39, %v282_v38 }
  0x3e   :  { %927 = vst [vmem:[%s1378_s3 + $0xf0] sm:$0xff] %v891_v2  }
  0x3f   :  { %928 = vst [vmem:[%s1378_s3 + $0xf8] sm:$0xff] %v896_v40  }

// kernel: generator_forward.15
= control target key start
LH: loop header
LB: loop body
LE: loop exit
PB: predicated region body
PF: predicated region fallthrough
CT: control target
= control target key end

     0   :  { %s2126_s9 = smov 0   ;;  %s2128_s10 = smov 0   ;;  %s2329_s0 = inlined_call_operand.vmem [shape: bf16[4,512,512], index: 0, kind: input, shape index: {}]   ;;  %s2330_s1 = inlined_call_operand.vmem [shape: bf16[4,512,128], index: 1, kind: input, shape index: {}]   ;;  %s2331_s2 = inlined_call_operand.vmem [shape: f32[4,512,128], index: 2, kind: output, shape index: {}]  }
   0x1   :  { %s2130_s11 = smov 0   ;;  %s2132_s12 = smov 0  }
   0x2   :  { %s2134_s13 = smov 0  }
   0x3 LB: > { %s34_s14 = sadd.s32 1, %s2101_s11  ;;  %s38_s15 = sadd.s32 1, %s2105_s12  ;;  %s2109_s13 = sphi %s2134_s13, %s12_s13   ;;  %s2105_s12 = sphi %s2132_s12, %s2335_s12   ;;  %s2101_s11 = sphi %s2130_s11, %s2334_s11   ;;  %s2097_s10 = sphi %s2128_s10, %s2333_s10   ;;  %s2093_s9 = sphi %s2126_s9, %s2332_s9  }
   0x4   : > { %p36_p0 = scmp.ge.s32.totalorder %s34_s14, 2  ;;  %p1570_p1 = scmp.ge.s32.totalorder %s2109_s13, 1 }
   0x5   : > { %p179_p2 = scmp.lt.s32.totalorder %s2109_s13, 9 }
   0x6   : > { %s2337_s14 = smov (%p36_p0, %s34_s14), 0  ;;  %s2339_s15 = smov (!%p36_p0, %s38_s15), %s2105_s12 }
   0x7   : > { %p180_p3 = pnand %p1570_p1, %p179_p2  ;;  %p40_p4 = scmp.ge.s32.totalorder %s2339_s15, 4 }
   0x8   : > { %p231_p5 = scmp.lt.s32.totalorder (!%p180_p3), %s2097_s10, 3  ;;  %s1571_s20 = sshll.u32 (!%p180_p3), %s2093_s9, 5 }
   0x9   : > { %s2341_s15 = smov (%p40_p4, %s2339_s15), 0  ;;  %183 = sbr.rel (%p180_p3) target bundleno = 394 (0x18a), region = 28 }
   0xa   : > { %p233_p6 = scmp.lt.s32.totalorder (!%p180_p3), %s1571_s20, 63 }
  0x10   : > { %s2343_s10 = smov (!%p231_p5, %s2097_s10), 3  ;;  %s2345_s20 = smov (!%p233_p6, %s1571_s20), 63 }
  0x11   : > { %s1573_s16 = sshll.u32 %s2343_s10, 8  ;;  %s1572_s21 = sshll.u32 %s2345_s20, 2 }
  0x12   : > { %s2166_s19 = scalar_lea.vmem %s2330_s1, %s1573_s16  ;;  %s240_s22 = sadd.s32 %s1573_s16, %s1572_s21 }
  0x13   : > { %v1943_v0 = vld [vmem:[%s2166_s19 + $0x40] sm:$0xff]   ;;  %v1947_v4 = vld [vmem:[%s2166_s19 + $0x48] sm:$0xff]   ;;  %v1951_v8 = vld [vmem:[%s2166_s19 + $0x50] sm:$0xff]   ;;  %s1574_s23 = sshll.u32 %s240_s22, 2  ;;  %s1578_s27 = sshll.u32 %s2343_s10, 6 }
  0x14   : > { %v1944_v1 = vld [vmem:[%s2166_s19 + $0xc0] sm:$0xff]   ;;  %1679 = vmatprep.subr.bf16.mxu0 %v1943_v0  ;;  %v1948_v5 = vld [vmem:[%s2166_s19 + $0xc8] sm:$0xff]   ;;  %v1952_v9 = vld [vmem:[%s2166_s19 + $0xd0] sm:$0xff]   ;;  %s2207_s26 = scalar_lea.vmem %s2329_s0, %s1574_s23  ;;  %s267_s28 = sadd.s32 %s1578_s27, %s2345_s20 }
  0x15   : > { %v1945_v2 = vld [vmem:[%s2166_s19] sm:$0xff]   ;;  %1791 = vmatprep.subr.bf16.mxu1 %v1944_v1  ;;  %v1949_v6 = vld [vmem:[%s2166_s19 + $0x8] sm:$0xff]   ;;  %v1953_v10 = vld [vmem:[%s2166_s19 + $0x10] sm:$0xff]   ;;  %s1579_s29 = sshll.u32 %s267_s28, 3 }
  0x16   : > { %v1946_v3 = vld [vmem:[%s2166_s19 + $0x80] sm:$0xff]   ;;  %1680 = vmatpush3.bf16.msra.mxu0 %v1945_v2  ;;  %v1950_v7 = vld [vmem:[%s2166_s19 + $0x88] sm:$0xff]   ;;  %v1954_v11 = vld [vmem:[%s2166_s19 + $0x90] sm:$0xff]   ;;  %s2280_s4 = scalar_lea.vmem %s2331_s2, %s1579_s29 }
  0x17   : > { %1792 = vmatpush3.bf16.msra.mxu1 %v1946_v3  ;;  %1681 = vmatprep.subr.bf16.mxu0 %v1947_v4  ;;  %v1955_v12 = vld [vmem:[%s2166_s19 + $0x58] sm:$0xff]   ;;  %v1959_v16 = vld [vmem:[%s2166_s19 + $0x60] sm:$0xff]   ;;  %v1963_v20 = vld [vmem:[%s2166_s19 + $0x68] sm:$0xff]  }
  0x18   : > { %1793 = vmatprep.subr.bf16.mxu1 %v1948_v5  ;;  %v1956_v13 = vld [vmem:[%s2166_s19 + $0xd8] sm:$0xff]   ;;  %v1960_v17 = vld [vmem:[%s2166_s19 + $0xe0] sm:$0xff]   ;;  %v1964_v21 = vld [vmem:[%s2166_s19 + $0xe8] sm:$0xff]  }
  0x19   : > { %v1957_v14 = vld [vmem:[%s2166_s19 + $0x18] sm:$0xff]   ;;  %v1961_v18 = vld [vmem:[%s2166_s19 + $0x20] sm:$0xff]   ;;  %v1965_v22 = vld [vmem:[%s2166_s19 + $0x28] sm:$0xff]  }
  0x1a   : > { %1682 = vmatpush3.bf16.msra.mxu0 %v1949_v6  ;;  %v1958_v15 = vld [vmem:[%s2166_s19 + $0x98] sm:$0xff]   ;;  %v1962_v19 = vld [vmem:[%s2166_s19 + $0xa0] sm:$0xff]   ;;  %v1966_v23 = vld [vmem:[%s2166_s19 + $0xa8] sm:$0xff]  }
  0x1b   : > { %1794 = vmatpush3.bf16.msra.mxu1 %v1950_v7  ;;  %1683 = vmatprep.subr.bf16.mxu0 %v1951_v8  ;;  %v1967_v24 = vld [vmem:[%s2166_s19 + $0x70] sm:$0xff]   ;;  %v1971_v28 = vld [vmem:[%s2166_s19 + $0x78] sm:$0xff]  }
  0x1c   : > { %1795 = vmatprep.subr.bf16.mxu1 %v1952_v9  ;;  %v1968_v25 = vld [vmem:[%s2166_s19 + $0xf0] sm:$0xff]   ;;  %v1972_v29 = vld [vmem:[%s2166_s19 + $0xf8] sm:$0xff]  }
  0x1d   : > { %v1969_v26 = vld [vmem:[%s2166_s19 + $0x30] sm:$0xff]   ;;  %v1973_v30 = vld [vmem:[%s2166_s19 + $0x38] sm:$0xff]  }
  0x1e   : > { %1684 = vmatpush3.bf16.msra.mxu0 %v1953_v10  ;;  %v1970_v27 = vld [vmem:[%s2166_s19 + $0xb0] sm:$0xff]   ;;  %v1974_v31 = vld [vmem:[%s2166_s19 + $0xb8] sm:$0xff]  }
  0x1f   : > { %1796 = vmatpush3.bf16.msra.mxu1 %v1954_v11  ;;  %1685 = vmatprep.subr.bf16.mxu0 %v1955_v12  ;;  %v1975_v32 = vld [vmem:[%s2207_s26] ss:$16 sps:$4 sm:$0xff]   ;;  %v1977_v33 = vld [vmem:[%s2207_s26 + $0x4] ss:$16 sps:$4 sm:$0xff]   ;;  %v1978_v34 = vld [vmem:[%s2207_s26 + $0x8] ss:$16 sps:$4 sm:$0xff]  }
  0x20   : > { %1797 = vmatprep.subr.bf16.mxu1 %v1956_v13  ;;  %v1980_v35 = vld [vmem:[%s2207_s26 + $0xc] ss:$16 sps:$4 sm:$0xff]   ;;  %1012 = vmatprep.mubr.bf16.mxu0 %v1977_v33  ;;  %v1981_v36 = vld [vmem:[%s2207_s26 + $0x24] ss:$16 sps:$4 sm:$0xff]   ;;  %v1985_v38 = vld [vmem:[%s2207_s26 + $0x20] ss:$16 sps:$4 sm:$0xff]  }
  0x21   : > { %1173 = vmatprep.mubr.bf16.mxu1 %v1980_v35  ;;  %v1983_v37 = vld [vmem:[%s2207_s26 + $0x2c] ss:$16 sps:$4 sm:$0xff]   ;;  %v1986_v39 = vld [vmem:[%s2207_s26 + $0x28] ss:$16 sps:$4 sm:$0xff]   ;;  %v1987_v40 = vld [vmem:[%s2207_s26 + $0x44] ss:$16 sps:$4 sm:$0xff]  }
  0x22   : > { %1686 = vmatpush3.bf16.msra.mxu0 %v1957_v14  ;;  %v1989_v41 = vld [vmem:[%s2207_s26 + $0x4c] ss:$16 sps:$4 sm:$0xff]   ;;  %v1991_v42 = vld [vmem:[%s2207_s26 + $0x40] ss:$16 sps:$4 sm:$0xff]   ;;  %v1992_v43 = vld [vmem:[%s2207_s26 + $0x48] ss:$16 sps:$4 sm:$0xff]  }
  0x23   : > { %1798 = vmatpush3.bf16.msra.mxu1 %v1958_v15  ;;  %1687 = vmatprep.subr.bf16.mxu0 %v1959_v16  ;;  %v1993_v44 = vld [vmem:[%s2207_s26 + $0x64] ss:$16 sps:$4 sm:$0xff]   ;;  %v1995_v45 = vld [vmem:[%s2207_s26 + $0x6c] ss:$16 sps:$4 sm:$0xff]   ;;  %v1997_v46 = vld [vmem:[%s2207_s26 + $0x60] ss:$16 sps:$4 sm:$0xff]  }
  0x24   : > { %1799 = vmatprep.subr.bf16.mxu1 %v1960_v17  ;;  %v1998_v47 = vld [vmem:[%s2207_s26 + $0x68] ss:$16 sps:$4 sm:$0xff]   ;;  %v1999_v48 = vld [vmem:[%s2207_s26 + $0x84] ss:$16 sps:$4 sm:$0xff]   ;;  %v2001_v49 = vld [vmem:[%s2207_s26 + $0x8c] ss:$16 sps:$4 sm:$0xff]  }
  0x25   : > { %v2003_v50 = vld [vmem:[%s2207_s26 + $0x80] ss:$16 sps:$4 sm:$0xff]   ;;  %v2004_v51 = vld [vmem:[%s2207_s26 + $0x88] ss:$16 sps:$4 sm:$0xff]   ;;  %v2005_v52 = vld [vmem:[%s2207_s26 + $0xa4] ss:$16 sps:$4 sm:$0xff]  }
  0x26   : > { %1688 = vmatpush3.bf16.msra.mxu0 %v1961_v18  ;;  %v2007_v53 = vld [vmem:[%s2207_s26 + $0xac] ss:$16 sps:$4 sm:$0xff]   ;;  %v2009_v54 = vld [vmem:[%s2207_s26 + $0xa0] ss:$16 sps:$4 sm:$0xff]   ;;  %v2010_v55 = vld [vmem:[%s2207_s26 + $0xa8] ss:$16 sps:$4 sm:$0xff]  }
  0x27   : > { %1800 = vmatpush3.bf16.msra.mxu1 %v1962_v19  ;;  %1689 = vmatprep.subr.bf16.mxu0 %v1963_v20  ;;  %v2011_v56 = vld [vmem:[%s2207_s26 + $0xc4] ss:$16 sps:$4 sm:$0xff]   ;;  %v2013_v57 = vld [vmem:[%s2207_s26 + $0xcc] ss:$16 sps:$4 sm:$0xff]   ;;  %v2015_v58 = vld [vmem:[%s2207_s26 + $0xc0] ss:$16 sps:$4 sm:$0xff]  }
  0x28   : > { %1801 = vmatprep.subr.bf16.mxu1 %v1964_v21  ;;  %v2016_v59 = vld [vmem:[%s2207_s26 + $0xc8] ss:$16 sps:$4 sm:$0xff]   ;;  %v2017_v60 = vld [vmem:[%s2207_s26 + $0xe4] ss:$16 sps:$4 sm:$0xff]   ;;  %v2019_v61 = vld [vmem:[%s2207_s26 + $0xec] ss:$16 sps:$4 sm:$0xff]  }
  0x29   : > { %v2021_v62 = vld [vmem:[%s2207_s26 + $0xe0] ss:$16 sps:$4 sm:$0xff]   ;;  %v2022_v63 = vld [vmem:[%s2207_s26 + $0xe8] ss:$16 sps:$4 sm:$0xff]   ;;  %v2023_v0 = vld [vmem:[%s2207_s26 + $0x104] ss:$16 sps:$4 sm:$0xff]  }
  0x2a   : > { %1690 = vmatpush3.bf16.msra.mxu0 %v1965_v22  ;;  %v2025_v1 = vld [vmem:[%s2207_s26 + $0x10c] ss:$16 sps:$4 sm:$0xff]   ;;  %v2027_v2 = vld [vmem:[%s2207_s26 + $0x100] ss:$16 sps:$4 sm:$0xff]   ;;  %v2028_v3 = vld [vmem:[%s2207_s26 + $0x108] ss:$16 sps:$4 sm:$0xff]  }
  0x2b   : > { %1802 = vmatpush3.bf16.msra.mxu1 %v1966_v23  ;;  %1691 = vmatprep.subr.bf16.mxu0 %v1967_v24  ;;  %v2029_v4 = vld [vmem:[%s2207_s26 + $0x124] ss:$16 sps:$4 sm:$0xff]   ;;  %v2031_v5 = vld [vmem:[%s2207_s26 + $0x12c] ss:$16 sps:$4 sm:$0xff]   ;;  %v2033_v6 = vld [vmem:[%s2207_s26 + $0x120] ss:$16 sps:$4 sm:$0xff]  }
  0x2c   : > { %1803 = vmatprep.subr.bf16.mxu1 %v1968_v25  ;;  %v2034_v7 = vld [vmem:[%s2207_s26 + $0x128] ss:$16 sps:$4 sm:$0xff]   ;;  %v2035_v8 = vld [vmem:[%s2207_s26 + $0x144] ss:$16 sps:$4 sm:$0xff]   ;;  %v2037_v9 = vld [vmem:[%s2207_s26 + $0x14c] ss:$16 sps:$4 sm:$0xff]  }
  0x2d   : > { %v2039_v10 = vld [vmem:[%s2207_s26 + $0x140] ss:$16 sps:$4 sm:$0xff]   ;;  %v2040_v11 = vld [vmem:[%s2207_s26 + $0x148] ss:$16 sps:$4 sm:$0xff]   ;;  %v2041_v12 = vld [vmem:[%s2207_s26 + $0x164] ss:$16 sps:$4 sm:$0xff]  }
  0x2e   : > { %1692 = vmatpush3.bf16.msra.mxu0 %v1969_v26  ;;  %v2043_v13 = vld [vmem:[%s2207_s26 + $0x16c] ss:$16 sps:$4 sm:$0xff]   ;;  %v2045_v14 = vld [vmem:[%s2207_s26 + $0x160] ss:$16 sps:$4 sm:$0xff]   ;;  %v2046_v15 = vld [vmem:[%s2207_s26 + $0x168] ss:$16 sps:$4 sm:$0xff]  }
  0x2f   : > { %1804 = vmatpush3.bf16.msra.mxu1 %v1970_v27  ;;  %1693 = vmatprep.subr.bf16.mxu0 %v1971_v28  ;;  %v2047_v16 = vld [vmem:[%s2207_s26 + $0x184] ss:$16 sps:$4 sm:$0xff]   ;;  %v2049_v17 = vld [vmem:[%s2207_s26 + $0x18c] ss:$16 sps:$4 sm:$0xff]   ;;  %v2051_v18 = vld [vmem:[%s2207_s26 + $0x180] ss:$16 sps:$4 sm:$0xff]  }
  0x30   : > { %1805 = vmatprep.subr.bf16.mxu1 %v1972_v29  ;;  %v2052_v19 = vld [vmem:[%s2207_s26 + $0x188] ss:$16 sps:$4 sm:$0xff]   ;;  %v2053_v20 = vld [vmem:[%s2207_s26 + $0x1a4] ss:$16 sps:$4 sm:$0xff]   ;;  %v2055_v21 = vld [vmem:[%s2207_s26 + $0x1ac] ss:$16 sps:$4 sm:$0xff]  }
  0x31   : > { %v2057_v22 = vld [vmem:[%s2207_s26 + $0x1a0] ss:$16 sps:$4 sm:$0xff]   ;;  %v2058_v23 = vld [vmem:[%s2207_s26 + $0x1a8] ss:$16 sps:$4 sm:$0xff]   ;;  %v2059_v24 = vld [vmem:[%s2207_s26 + $0x1c4] ss:$16 sps:$4 sm:$0xff]  }
  0x32   : > { %1694 = vmatpush3.bf16.msra.mxu0 %v1973_v30  ;;  %v2061_v25 = vld [vmem:[%s2207_s26 + $0x1cc] ss:$16 sps:$4 sm:$0xff]   ;;  %v2063_v26 = vld [vmem:[%s2207_s26 + $0x1c0] ss:$16 sps:$4 sm:$0xff]   ;;  %v2064_v27 = vld [vmem:[%s2207_s26 + $0x1c8] ss:$16 sps:$4 sm:$0xff]  }
  0x33   : > { %1806 = vmatpush3.bf16.msra.mxu1 %v1974_v31  ;;  %v2065_v28 = vld [vmem:[%s2207_s26 + $0x1e4] ss:$16 sps:$4 sm:$0xff]   ;;  %v2067_v29 = vld [vmem:[%s2207_s26 + $0x1ec] ss:$16 sps:$4 sm:$0xff]   ;;  %v2069_v30 = vld [vmem:[%s2207_s26 + $0x1e0] ss:$16 sps:$4 sm:$0xff]  }
  0x34   : > { %v2070_v31 = vld [vmem:[%s2207_s26 + $0x1e8] ss:$16 sps:$4 sm:$0xff]  }
  0x35   : > { %1013 = vmatmul.mubr.bf16.vlgmr.msra.gmra.mrb[0].mxu0 %v1975_v32 }
  0x36   : > { %1174 = vmatmul.mubr.bf16.vlgmr.msra.gmra.mrb[0].mxu1 %v1978_v34  ;;  %1020 = vmatprep.mubr.bf16.mxu0 %v1981_v36 }
  0x37   : > { %1181 = vmatprep.mubr.bf16.mxu1 %v1983_v37 }
  0x3d   : > { %1021 = vmatmul.mubr.bf16.gmra.mrb[4].mxu0 %v1985_v38 }
  0x3e   : > { %1182 = vmatmul.mubr.bf16.gmra.mrb[4].mxu1 %v1986_v39  ;;  %1028 = vmatprep.mubr.bf16.mxu0 %v1987_v40 }
  0x3f   : > { %1189 = vmatprep.mubr.bf16.mxu1 %v1989_v41 }
  0x45   : > { %1029 = vmatmul.mubr.bf16.gmra.mrb[8].mxu0 %v1991_v42 }
  0x46   : > { %1190 = vmatmul.mubr.bf16.gmra.mrb[8].mxu1 %v1992_v43  ;;  %1036 = vmatprep.mubr.bf16.mxu0 %v1993_v44 }
  0x47   : > { %1197 = vmatprep.mubr.bf16.mxu1 %v1995_v45 }
  0x4d   : > { %1037 = vmatmul.mubr.bf16.gmra.mrb[12].mxu0 %v1997_v46 }
  0x4e   : > { %1198 = vmatmul.mubr.bf16.gmra.mrb[12].mxu1 %v1998_v47  ;;  %1044 = vmatprep.mubr.bf16.mxu0 %v1999_v48 }
  0x4f   : > { %1205 = vmatprep.mubr.bf16.mxu1 %v2001_v49 }
  0x55   : > { %1045 = vmatmul.mubr.bf16.gmra.mrb[16].mxu0 %v2003_v50 }
  0x56   : > { %1206 = vmatmul.mubr.bf16.gmra.mrb[16].mxu1 %v2004_v51  ;;  %1052 = vmatprep.mubr.bf16.mxu0 %v2005_v52 }
  0x57   : > { %1213 = vmatprep.mubr.bf16.mxu1 %v2007_v53 }
  0x5d   : > { %1053 = vmatmul.mubr.bf16.gmra.mrb[20].mxu0 %v2009_v54 }
  0x5e   : > { %1214 = vmatmul.mubr.bf16.gmra.mrb[20].mxu1 %v2010_v55  ;;  %1060 = vmatprep.mubr.bf16.mxu0 %v2011_v56 }
  0x5f   : > { %1221 = vmatprep.mubr.bf16.mxu1 %v2013_v57 }
  0x65   : > { %1061 = vmatmul.mubr.bf16.gmra.mrb[24].mxu0 %v2015_v58 }
  0x66   : > { %1222 = vmatmul.mubr.bf16.gmra.mrb[24].mxu1 %v2016_v59  ;;  %1068 = vmatprep.mubr.bf16.mxu0 %v2017_v60 }
  0x67   : > { %1229 = vmatprep.mubr.bf16.mxu1 %v2019_v61 }
  0x6d   : > { %1069 = vmatmul.mubr.bf16.gmra.mrb[28].mxu0 %v2021_v62 }
  0x6e   : > { %1230 = vmatmul.mubr.bf16.gmra.mrb[28].mxu1 %v2022_v63  ;;  %1076 = vmatprep.mubr.bf16.mxu0 %v2023_v0 }
  0x6f   : > { %1237 = vmatprep.mubr.bf16.mxu1 %v2025_v1 }
  0x75   : > { %1077 = vmatmul.mubr.bf16.gmra.mrb[32].mxu0 %v2027_v2 }
  0x76   : > { %1238 = vmatmul.mubr.bf16.gmra.mrb[32].mxu1 %v2028_v3  ;;  %1084 = vmatprep.mubr.bf16.mxu0 %v2029_v4 }
  0x77   : > { %1245 = vmatprep.mubr.bf16.mxu1 %v2031_v5 }
  0x7d   : > { %1085 = vmatmul.mubr.bf16.gmra.mrb[36].mxu0 %v2033_v6 }
  0x7e   : > { %1246 = vmatmul.mubr.bf16.gmra.mrb[36].mxu1 %v2034_v7  ;;  %1092 = vmatprep.mubr.bf16.mxu0 %v2035_v8 }
  0x7f   : > { %1253 = vmatprep.mubr.bf16.mxu1 %v2037_v9 }
  0x85   : > { %1093 = vmatmul.mubr.bf16.gmra.mrb[40].mxu0 %v2039_v10 }
  0x86   : > { %1254 = vmatmul.mubr.bf16.gmra.mrb[40].mxu1 %v2040_v11  ;;  %1100 = vmatprep.mubr.bf16.mxu0 %v2041_v12 }
  0x87   : > { %1261 = vmatprep.mubr.bf16.mxu1 %v2043_v13 }
  0x8d   : > { %1101 = vmatmul.mubr.bf16.gmra.mrb[44].mxu0 %v2045_v14 }
  0x8e   : > { %1262 = vmatmul.mubr.bf16.gmra.mrb[44].mxu1 %v2046_v15  ;;  %1108 = vmatprep.mubr.bf16.mxu0 %v2047_v16 }
  0x8f   : > { %1269 = vmatprep.mubr.bf16.mxu1 %v2049_v17 }
  0x95   : > { %1109 = vmatmul.mubr.bf16.gmra.mrb[48].mxu0 %v2051_v18 }
  0x96   : > { %1270 = vmatmul.mubr.bf16.gmra.mrb[48].mxu1 %v2052_v19  ;;  %1116 = vmatprep.mubr.bf16.mxu0 %v2053_v20 }
  0x97   : > { %1277 = vmatprep.mubr.bf16.mxu1 %v2055_v21 }
  0x9d   : > { %1117 = vmatmul.mubr.bf16.gmra.mrb[52].mxu0 %v2057_v22 }
  0x9e   : > { %1278 = vmatmul.mubr.bf16.gmra.mrb[52].mxu1 %v2058_v23  ;;  %1124 = vmatprep.mubr.bf16.mxu0 %v2059_v24 }
  0x9f   : > { %1285 = vmatprep.mubr.bf16.mxu1 %v2061_v25 }
  0xa5   : > { %1125 = vmatmul.mubr.bf16.gmra.mrb[56].mxu0 %v2063_v26 }
  0xa6   : > { %1286 = vmatmul.mubr.bf16.gmra.mrb[56].mxu1 %v2064_v27  ;;  %1132 = vmatprep.mubr.bf16.mxu0 %v2065_v28 }
  0xa7   : > { %1293 = vmatprep.mubr.bf16.mxu1 %v2067_v29 }
  0xad   : > { %1133 = vmatmul.mubr.bf16.gmra.mrb[60].mxu0 %v2069_v30 }
  0xae   : > { %1294 = vmatmul.mubr.bf16.gmra.mrb[60].mxu1 %v2070_v31 }
 0x108   : > { %v1695_v32 = vpop.f32.mrb[0].mxu0 }
 0x109   : > { %v1807_v33 = vpop.f32.mrb[0].mxu1  ;;  %v1696_v34 = vpop.f32.mrb[1].mxu0 }
 0x10a   : > { %v1697_v35 = vadd.f32 %v1696_v34, %v1695_v32  ;;  %v1808_v36 = vpop.f32.mrb[1].mxu1  ;;  %v1698_v37 = vpop.f32.mrb[2].mxu0 }
 0x10b   : > { %v1809_v38 = vadd.f32 %v1808_v36, %v1807_v33  ;;  %v1810_v39 = vpop.f32.mrb[2].mxu1  ;;  %v1699_v40 = vpop.f32.mrb[3].mxu0 }
 0x10c   : > { %v1700_v41 = vadd.f32 %v1699_v40, %v1698_v37  ;;  %v1811_v42 = vpop.f32.mrb[3].mxu1 }
 0x10d   : > { %v1176_v43 = vadd.f32 %v1809_v38, %v1697_v35  ;;  %v1812_v44 = vadd.f32 %v1811_v42, %v1810_v39 }
 0x10f   : > { %1401 = vst [vmem:[%s2280_s4] sm:$0xff] %v1176_v43  ;;  %v1179_v45 = vadd.f32 %v1812_v44, %v1700_v41 }
 0x110   : > { %v1701_v46 = vpop.f32.mrb[4].mxu0 }
 0x111   : > { %1402 = vst [vmem:[%s2280_s4 + $0x8] sm:$0xff] %v1179_v45  ;;  %v1813_v47 = vpop.f32.mrb[4].mxu1  ;;  %v1702_v48 = vpop.f32.mrb[5].mxu0 }
 0x112   : > { %v1703_v49 = vadd.f32 %v1702_v48, %v1701_v46  ;;  %v1814_v50 = vpop.f32.mrb[5].mxu1  ;;  %v1704_v51 = vpop.f32.mrb[6].mxu0 }
 0x113   : > { %v1815_v52 = vadd.f32 %v1814_v50, %v1813_v47  ;;  %v1816_v53 = vpop.f32.mrb[6].mxu1  ;;  %v1705_v54 = vpop.f32.mrb[7].mxu0 }
 0x114   : > { %v1706_v55 = vadd.f32 %v1705_v54, %v1704_v51  ;;  %v1817_v56 = vpop.f32.mrb[7].mxu1 }
 0x115   : > { %v1184_v57 = vadd.f32 %v1815_v52, %v1703_v49  ;;  %v1818_v58 = vadd.f32 %v1817_v56, %v1816_v53 }
 0x117   : > { %1403 = vst [vmem:[%s2280_s4 + $0x10] sm:$0xff] %v1184_v57  ;;  %v1187_v59 = vadd.f32 %v1818_v58, %v1706_v55 }
 0x118   : > { %v1707_v60 = vpop.f32.mrb[8].mxu0 }
 0x119   : > { %1404 = vst [vmem:[%s2280_s4 + $0x18] sm:$0xff] %v1187_v59  ;;  %v1819_v61 = vpop.f32.mrb[8].mxu1  ;;  %v1708_v62 = vpop.f32.mrb[9].mxu0 }
 0x11a   : > { %v1709_v63 = vadd.f32 %v1708_v62, %v1707_v60  ;;  %v1820_v0 = vpop.f32.mrb[9].mxu1  ;;  %v1710_v1 = vpop.f32.mrb[10].mxu0 }
 0x11b   : > { %v1821_v2 = vadd.f32 %v1820_v0, %v1819_v61  ;;  %v1822_v3 = vpop.f32.mrb[10].mxu1  ;;  %v1711_v4 = vpop.f32.mrb[11].mxu0 }
 0x11c   : > { %v1712_v5 = vadd.f32 %v1711_v4, %v1710_v1  ;;  %v1823_v6 = vpop.f32.mrb[11].mxu1 }
 0x11d   : > { %v1192_v7 = vadd.f32 %v1821_v2, %v1709_v63  ;;  %v1824_v8 = vadd.f32 %v1823_v6, %v1822_v3 }
 0x11f   : > { %1405 = vst [vmem:[%s2280_s4 + $0x20] sm:$0xff] %v1192_v7  ;;  %v1195_v9 = vadd.f32 %v1824_v8, %v1712_v5 }
 0x120   : > { %v1713_v10 = vpop.f32.mrb[12].mxu0 }
 0x121   : > { %1406 = vst [vmem:[%s2280_s4 + $0x28] sm:$0xff] %v1195_v9  ;;  %v1825_v11 = vpop.f32.mrb[12].mxu1  ;;  %v1714_v12 = vpop.f32.mrb[13].mxu0 }
 0x122   : > { %v1715_v13 = vadd.f32 %v1714_v12, %v1713_v10  ;;  %v1826_v14 = vpop.f32.mrb[13].mxu1  ;;  %v1716_v15 = vpop.f32.mrb[14].mxu0 }
 0x123   : > { %v1827_v16 = vadd.f32 %v1826_v14, %v1825_v11  ;;  %v1828_v17 = vpop.f32.mrb[14].mxu1  ;;  %v1717_v18 = vpop.f32.mrb[15].mxu0 }
 0x124   : > { %v1718_v19 = vadd.f32 %v1717_v18, %v1716_v15  ;;  %v1829_v20 = vpop.f32.mrb[15].mxu1 }
 0x125   : > { %v1200_v21 = vadd.f32 %v1827_v16, %v1715_v13  ;;  %v1830_v22 = vadd.f32 %v1829_v20, %v1828_v17 }
 0x127   : > { %1407 = vst [vmem:[%s2280_s4 + $0x30] sm:$0xff] %v1200_v21  ;;  %v1203_v23 = vadd.f32 %v1830_v22, %v1718_v19 }
 0x128   : > { %v1719_v24 = vpop.f32.mrb[16].mxu0 }
 0x129   : > { %1408 = vst [vmem:[%s2280_s4 + $0x38] sm:$0xff] %v1203_v23  ;;  %v1831_v25 = vpop.f32.mrb[16].mxu1  ;;  %v1720_v26 = vpop.f32.mrb[17].mxu0 }
 0x12a   : > { %v1721_v27 = vadd.f32 %v1720_v26, %v1719_v24  ;;  %v1832_v28 = vpop.f32.mrb[17].mxu1  ;;  %v1722_v29 = vpop.f32.mrb[18].mxu0 }
 0x12b   : > { %v1833_v30 = vadd.f32 %v1832_v28, %v1831_v25  ;;  %v1834_v31 = vpop.f32.mrb[18].mxu1  ;;  %v1723_v32 = vpop.f32.mrb[19].mxu0 }
 0x12c   : > { %v1724_v33 = vadd.f32 %v1723_v32, %v1722_v29  ;;  %v1835_v34 = vpop.f32.mrb[19].mxu1 }
 0x12d   : > { %v1208_v35 = vadd.f32 %v1833_v30, %v1721_v27  ;;  %v1836_v36 = vadd.f32 %v1835_v34, %v1834_v31 }
 0x12f   : > { %1409 = vst [vmem:[%s2280_s4 + $0x40] sm:$0xff] %v1208_v35  ;;  %v1211_v37 = vadd.f32 %v1836_v36, %v1724_v33 }
 0x130   : > { %v1725_v38 = vpop.f32.mrb[20].mxu0 }
 0x131   : > { %1410 = vst [vmem:[%s2280_s4 + $0x48] sm:$0xff] %v1211_v37  ;;  %v1837_v39 = vpop.f32.mrb[20].mxu1  ;;  %v1726_v40 = vpop.f32.mrb[21].mxu0 }
 0x132   : > { %v1727_v41 = vadd.f32 %v1726_v40, %v1725_v38  ;;  %v1838_v42 = vpop.f32.mrb[21].mxu1  ;;  %v1728_v43 = vpop.f32.mrb[22].mxu0 }
 0x133   : > { %v1839_v44 = vadd.f32 %v1838_v42, %v1837_v39  ;;  %v1840_v45 = vpop.f32.mrb[22].mxu1  ;;  %v1729_v46 = vpop.f32.mrb[23].mxu0 }
 0x134   : > { %v1730_v47 = vadd.f32 %v1729_v46, %v1728_v43  ;;  %v1841_v48 = vpop.f32.mrb[23].mxu1 }
 0x135   : > { %v1216_v49 = vadd.f32 %v1839_v44, %v1727_v41  ;;  %v1842_v50 = vadd.f32 %v1841_v48, %v1840_v45 }
 0x137   : > { %1411 = vst [vmem:[%s2280_s4 + $0x50] sm:$0xff] %v1216_v49  ;;  %v1219_v51 = vadd.f32 %v1842_v50, %v1730_v47 }
 0x138   : > { %v1731_v52 = vpop.f32.mrb[24].mxu0 }
 0x139   : > { %1412 = vst [vmem:[%s2280_s4 + $0x58] sm:$0xff] %v1219_v51  ;;  %v1843_v53 = vpop.f32.mrb[24].mxu1  ;;  %v1732_v54 = vpop.f32.mrb[25].mxu0 }
 0x13a   : > { %v1733_v55 = vadd.f32 %v1732_v54, %v1731_v52  ;;  %v1844_v56 = vpop.f32.mrb[25].mxu1  ;;  %v1734_v57 = vpop.f32.mrb[26].mxu0 }
 0x13b   : > { %v1845_v58 = vadd.f32 %v1844_v56, %v1843_v53  ;;  %v1846_v59 = vpop.f32.mrb[26].mxu1  ;;  %v1735_v60 = vpop.f32.mrb[27].mxu0 }
 0x13c   : > { %v1736_v61 = vadd.f32 %v1735_v60, %v1734_v57  ;;  %v1847_v62 = vpop.f32.mrb[27].mxu1 }
 0x13d   : > { %v1224_v63 = vadd.f32 %v1845_v58, %v1733_v55  ;;  %v1848_v0 = vadd.f32 %v1847_v62, %v1846_v59 }
 0x13f   : > { %1413 = vst [vmem:[%s2280_s4 + $0x60] sm:$0xff] %v1224_v63  ;;  %v1227_v1 = vadd.f32 %v1848_v0, %v1736_v61 }
 0x140   : > { %v1737_v2 = vpop.f32.mrb[28].mxu0 }
 0x141   : > { %1414 = vst [vmem:[%s2280_s4 + $0x68] sm:$0xff] %v1227_v1  ;;  %v1849_v3 = vpop.f32.mrb[28].mxu1  ;;  %v1738_v4 = vpop.f32.mrb[29].mxu0 }
 0x142   : > { %v1739_v5 = vadd.f32 %v1738_v4, %v1737_v2  ;;  %v1850_v6 = vpop.f32.mrb[29].mxu1  ;;  %v1740_v7 = vpop.f32.mrb[30].mxu0 }
 0x143   : > { %v1851_v8 = vadd.f32 %v1850_v6, %v1849_v3  ;;  %v1852_v9 = vpop.f32.mrb[30].mxu1  ;;  %v1741_v10 = vpop.f32.mrb[31].mxu0 }
 0x144   : > { %v1742_v11 = vadd.f32 %v1741_v10, %v1740_v7  ;;  %v1853_v12 = vpop.f32.mrb[31].mxu1 }
 0x145   : > { %v1232_v13 = vadd.f32 %v1851_v8, %v1739_v5  ;;  %v1854_v14 = vadd.f32 %v1853_v12, %v1852_v9 }
 0x147   : > { %1415 = vst [vmem:[%s2280_s4 + $0x70] sm:$0xff] %v1232_v13  ;;  %v1235_v15 = vadd.f32 %v1854_v14, %v1742_v11 }
 0x148   : > { %v1743_v16 = vpop.f32.mrb[32].mxu0 }
 0x149   : > { %1416 = vst [vmem:[%s2280_s4 + $0x78] sm:$0xff] %v1235_v15  ;;  %v1855_v17 = vpop.f32.mrb[32].mxu1  ;;  %v1744_v18 = vpop.f32.mrb[33].mxu0 }
 0x14a   : > { %v1745_v19 = vadd.f32 %v1744_v18, %v1743_v16  ;;  %v1856_v20 = vpop.f32.mrb[33].mxu1  ;;  %v1746_v21 = vpop.f32.mrb[34].mxu0 }
 0x14b   : > { %v1857_v22 = vadd.f32 %v1856_v20, %v1855_v17  ;;  %v1858_v23 = vpop.f32.mrb[34].mxu1  ;;  %v1747_v24 = vpop.f32.mrb[35].mxu0 }
 0x14c   : > { %v1748_v25 = vadd.f32 %v1747_v24, %v1746_v21  ;;  %v1859_v26 = vpop.f32.mrb[35].mxu1 }
 0x14d   : > { %v1240_v27 = vadd.f32 %v1857_v22, %v1745_v19  ;;  %v1860_v28 = vadd.f32 %v1859_v26, %v1858_v23 }
 0x14f   : > { %1417 = vst [vmem:[%s2280_s4 + $0x80] sm:$0xff] %v1240_v27  ;;  %v1243_v29 = vadd.f32 %v1860_v28, %v1748_v25 }
 0x150   : > { %v1749_v30 = vpop.f32.mrb[36].mxu0 }
 0x151   : > { %1418 = vst [vmem:[%s2280_s4 + $0x88] sm:$0xff] %v1243_v29  ;;  %v1861_v31 = vpop.f32.mrb[36].mxu1  ;;  %v1750_v32 = vpop.f32.mrb[37].mxu0 }
 0x152   : > { %v1751_v33 = vadd.f32 %v1750_v32, %v1749_v30  ;;  %v1862_v34 = vpop.f32.mrb[37].mxu1  ;;  %v1752_v35 = vpop.f32.mrb[38].mxu0 }
 0x153   : > { %v1863_v36 = vadd.f32 %v1862_v34, %v1861_v31  ;;  %v1864_v37 = vpop.f32.mrb[38].mxu1  ;;  %v1753_v38 = vpop.f32.mrb[39].mxu0 }
 0x154   : > { %v1754_v39 = vadd.f32 %v1753_v38, %v1752_v35  ;;  %v1865_v40 = vpop.f32.mrb[39].mxu1 }
 0x155   : > { %v1248_v41 = vadd.f32 %v1863_v36, %v1751_v33  ;;  %v1866_v42 = vadd.f32 %v1865_v40, %v1864_v37 }
 0x157   : > { %1419 = vst [vmem:[%s2280_s4 + $0x90] sm:$0xff] %v1248_v41  ;;  %v1251_v43 = vadd.f32 %v1866_v42, %v1754_v39 }
 0x158   : > { %v1755_v44 = vpop.f32.mrb[40].mxu0 }
 0x159   : > { %1420 = vst [vmem:[%s2280_s4 + $0x98] sm:$0xff] %v1251_v43  ;;  %v1867_v45 = vpop.f32.mrb[40].mxu1  ;;  %v1756_v46 = vpop.f32.mrb[41].mxu0 }
 0x15a   : > { %v1757_v47 = vadd.f32 %v1756_v46, %v1755_v44  ;;  %v1868_v48 = vpop.f32.mrb[41].mxu1  ;;  %v1758_v49 = vpop.f32.mrb[42].mxu0 }
 0x15b   : > { %v1869_v50 = vadd.f32 %v1868_v48, %v1867_v45  ;;  %v1870_v51 = vpop.f32.mrb[42].mxu1  ;;  %v1759_v52 = vpop.f32.mrb[43].mxu0 }
 0x15c   : > { %v1760_v53 = vadd.f32 %v1759_v52, %v1758_v49  ;;  %v1871_v54 = vpop.f32.mrb[43].mxu1 }
 0x15d   : > { %v1256_v55 = vadd.f32 %v1869_v50, %v1757_v47  ;;  %v1872_v56 = vadd.f32 %v1871_v54, %v1870_v51 }
 0x15f   : > { %1421 = vst [vmem:[%s2280_s4 + $0xa0] sm:$0xff] %v1256_v55  ;;  %v1259_v57 = vadd.f32 %v1872_v56, %v1760_v53 }
 0x160   : > { %v1761_v58 = vpop.f32.mrb[44].mxu0 }
 0x161   : > { %1422 = vst [vmem:[%s2280_s4 + $0xa8] sm:$0xff] %v1259_v57  ;;  %v1873_v59 = vpop.f32.mrb[44].mxu1  ;;  %v1762_v60 = vpop.f32.mrb[45].mxu0 }
 0x162   : > { %v1763_v61 = vadd.f32 %v1762_v60, %v1761_v58  ;;  %v1874_v62 = vpop.f32.mrb[45].mxu1  ;;  %v1764_v63 = vpop.f32.mrb[46].mxu0 }
 0x163   : > { %v1875_v0 = vadd.f32 %v1874_v62, %v1873_v59  ;;  %v1876_v1 = vpop.f32.mrb[46].mxu1  ;;  %v1765_v2 = vpop.f32.mrb[47].mxu0 }
 0x164   : > { %v1766_v3 = vadd.f32 %v1765_v2, %v1764_v63  ;;  %v1877_v4 = vpop.f32.mrb[47].mxu1 }
 0x165   : > { %v1264_v5 = vadd.f32 %v1875_v0, %v1763_v61  ;;  %v1878_v6 = vadd.f32 %v1877_v4, %v1876_v1 }
 0x167   : > { %1423 = vst [vmem:[%s2280_s4 + $0xb0] sm:$0xff] %v1264_v5  ;;  %v1267_v7 = vadd.f32 %v1878_v6, %v1766_v3 }
 0x168   : > { %v1767_v8 = vpop.f32.mrb[48].mxu0 }
 0x169   : > { %1424 = vst [vmem:[%s2280_s4 + $0xb8] sm:$0xff] %v1267_v7  ;;  %v1879_v9 = vpop.f32.mrb[48].mxu1  ;;  %v1768_v10 = vpop.f32.mrb[49].mxu0 }
 0x16a   : > { %v1769_v11 = vadd.f32 %v1768_v10, %v1767_v8  ;;  %v1880_v12 = vpop.f32.mrb[49].mxu1  ;;  %v1770_v13 = vpop.f32.mrb[50].mxu0 }
 0x16b   : > { %v1881_v14 = vadd.f32 %v1880_v12, %v1879_v9  ;;  %v1882_v15 = vpop.f32.mrb[50].mxu1  ;;  %v1771_v16 = vpop.f32.mrb[51].mxu0 }
 0x16c   : > { %v1772_v17 = vadd.f32 %v1771_v16, %v1770_v13  ;;  %v1883_v18 = vpop.f32.mrb[51].mxu1 }
 0x16d   : > { %v1272_v19 = vadd.f32 %v1881_v14, %v1769_v11  ;;  %v1884_v20 = vadd.f32 %v1883_v18, %v1882_v15 }
 0x16f   : > { %1425 = vst [vmem:[%s2280_s4 + $0xc0] sm:$0xff] %v1272_v19  ;;  %v1275_v21 = vadd.f32 %v1884_v20, %v1772_v17 }
 0x170   : > { %v1773_v22 = vpop.f32.mrb[52].mxu0 }
 0x171   : > { %1426 = vst [vmem:[%s2280_s4 + $0xc8] sm:$0xff] %v1275_v21  ;;  %v1885_v23 = vpop.f32.mrb[52].mxu1  ;;  %v1774_v24 = vpop.f32.mrb[53].mxu0 }
 0x172   : > { %v1775_v25 = vadd.f32 %v1774_v24, %v1773_v22  ;;  %v1886_v26 = vpop.f32.mrb[53].mxu1  ;;  %v1776_v27 = vpop.f32.mrb[54].mxu0 }
 0x173   : > { %v1887_v28 = vadd.f32 %v1886_v26, %v1885_v23  ;;  %v1888_v29 = vpop.f32.mrb[54].mxu1  ;;  %v1777_v30 = vpop.f32.mrb[55].mxu0 }
 0x174   : > { %v1778_v31 = vadd.f32 %v1777_v30, %v1776_v27  ;;  %v1889_v32 = vpop.f32.mrb[55].mxu1 }
 0x175   : > { %v1280_v33 = vadd.f32 %v1887_v28, %v1775_v25  ;;  %v1890_v34 = vadd.f32 %v1889_v32, %v1888_v29 }
 0x177   : > { %1427 = vst [vmem:[%s2280_s4 + $0xd0] sm:$0xff] %v1280_v33  ;;  %v1283_v35 = vadd.f32 %v1890_v34, %v1778_v31 }
 0x178   : > { %v1779_v36 = vpop.f32.mrb[56].mxu0 }
 0x179   : > { %1428 = vst [vmem:[%s2280_s4 + $0xd8] sm:$0xff] %v1283_v35  ;;  %v1891_v37 = vpop.f32.mrb[56].mxu1  ;;  %v1780_v38 = vpop.f32.mrb[57].mxu0 }
 0x17a   : > { %v1781_v39 = vadd.f32 %v1780_v38, %v1779_v36  ;;  %v1892_v40 = vpop.f32.mrb[57].mxu1  ;;  %v1782_v41 = vpop.f32.mrb[58].mxu0 }
 0x17b   : > { %v1893_v42 = vadd.f32 %v1892_v40, %v1891_v37  ;;  %v1894_v43 = vpop.f32.mrb[58].mxu1  ;;  %v1783_v44 = vpop.f32.mrb[59].mxu0 }
 0x17c   : > { %v1784_v45 = vadd.f32 %v1783_v44, %v1782_v41  ;;  %v1895_v46 = vpop.f32.mrb[59].mxu1 }
 0x17d   : > { %v1288_v47 = vadd.f32 %v1893_v42, %v1781_v39  ;;  %v1896_v48 = vadd.f32 %v1895_v46, %v1894_v43 }
 0x17f   : > { %1429 = vst [vmem:[%s2280_s4 + $0xe0] sm:$0xff] %v1288_v47  ;;  %v1291_v49 = vadd.f32 %v1896_v48, %v1784_v45 }
 0x180   : > { %v1785_v50 = vpop.f32.mrb[60].mxu0 }
 0x181   : > { %1430 = vst [vmem:[%s2280_s4 + $0xe8] sm:$0xff] %v1291_v49  ;;  %v1897_v51 = vpop.f32.mrb[60].mxu1  ;;  %v1786_v52 = vpop.f32.mrb[61].mxu0 }
 0x182   : > { %v1787_v53 = vadd.f32 %v1786_v52, %v1785_v50  ;;  %v1898_v54 = vpop.f32.mrb[61].mxu1  ;;  %v1788_v55 = vpop.f32.mrb[62].mxu0 }
 0x183   : > { %v1899_v56 = vadd.f32 %v1898_v54, %v1897_v51  ;;  %v1900_v57 = vpop.f32.mrb[62].mxu1  ;;  %v1789_v58 = vpop.f32.mrb[63].mxu0 }
 0x184   : > { %v1790_v59 = vadd.f32 %v1789_v58, %v1788_v55  ;;  %v1901_v60 = vpop.f32.mrb[63].mxu1 }
 0x185   : > { %v1296_v61 = vadd.f32 %v1899_v56, %v1787_v53  ;;  %v1902_v62 = vadd.f32 %v1901_v60, %v1900_v57 }
 0x187   : > { %1431 = vst [vmem:[%s2280_s4 + $0xf0] sm:$0xff] %v1296_v61  ;;  %v1299_v63 = vadd.f32 %v1902_v62, %v1790_v59 }
 0x189   : > { %1432 = vst [vmem:[%s2280_s4 + $0xf8] sm:$0xff] %v1299_v63 }
 0x18a PF: > { %s12_s13 = sadd.s32 1, %s2109_s13   ;;  %s2332_s9 = smov %s2101_s11 }
 0x18b   : > { %p9_p7 = scmp.ge.s32.totalorder %s12_s13, 10   ;;  %s2333_s10 = smov %s2105_s12 }
 0x18c   : > { %s2334_s11 = smov %s2337_s14  ;;  %s2335_s12 = smov %s2341_s15 }
 0x18d   :  { %11 = sbr.rel (!%p9_p7) target bundleno = 3 (0x3), region = 69 }

// kernel: generator_forward.16
= control target key start
LH: loop header
LB: loop body
LE: loop exit
PB: predicated region body
PF: predicated region fallthrough
CT: control target
= control target key end

     0   :  { %s2086_s12 = smov 0   ;;  %s2579_s0 = inlined_call_operand.vmem [shape: f32[2048,128], index: 0, kind: input, shape index: {}]   ;;  %s2580_s1 = inlined_call_operand.vmem [shape: f32[1,128], index: 1, kind: input, shape index: {}]   ;;  %s2581_s2 = inlined_call_operand.vmem [shape: f32[1,128], index: 2, kind: input, shape index: {}]   ;;  %s2582_s3 = inlined_call_operand.vmem [shape: bf16[2048,128], index: 3, kind: output, shape index: {}]  }
   0x1 LB: > { %s1396_s13 = sadd.s32 4294967295, %s2064_s12   ;;  %p1400_p0 = scmp.ge.s32.totalorder %s2064_s12, 1  ;;  %s2064_s12 = sphi %s2086_s12, %s13_s12  }
   0x2   : > { %p138_p1 = scmp.lt.s32.totalorder %s2064_s12, 3 }
   0x4   : > { %p139_p2 = pnand %p1400_p0, %p138_p1 }
   0x5   : > { %s1401_s14 = sshll.u32 (!%p139_p2), %s1396_s13, 7  ;;  %v2100_v0 = vld [vmem:[%s2580_s1] ss:$0 sm:$0xff] (!%p139_p2) }
   0x6   : > { %142 = sbr.rel (%p139_p2) target bundleno = 135 (0x87), region = 32  ;;  %p163_p3 = scmp.lt.s32.totalorder (!%p139_p2), %s1401_s14, 255  ;;  %v2110_v1 = vld [vmem:[%s2581_s2] ss:$0 sm:$0xff] (!%p139_p2) }
   0xd   : > { %s2584_s14 = smov (!%p163_p3, %s1401_s14), 255 }
   0xe   : > { %s1402_s15 = sshll.u32 %s2584_s14, 3  ;;  %s1404_s23 = sshll.u32 %s2584_s14, 2 }
   0xf   : > { %s2105_s20 = scalar_lea.vmem %s2579_s0, %s1402_s15  ;;  %s2142_s26 = scalar_lea.vmem %s2582_s3, %s1404_s23 }
  0x10   : > { %v174_v2 = vld [vmem:[%s2105_s20] sm:$0xff]  ;;  %v175_v3 = vld [vmem:[%s2105_s20 + $0x8] sm:$0xff]  ;;  %v176_v4 = vld [vmem:[%s2105_s20 + $0x10] sm:$0xff] }
  0x11   : > { %v309_v5 = vmul.f32 %v2100_v0, %v174_v2  ;;  %v310_v6 = vmul.f32 %v2100_v0, %v175_v3  ;;  %v177_v7 = vld [vmem:[%s2105_s20 + $0x18] sm:$0xff]  ;;  %v311_v8 = vmul.f32 %v2100_v0, %v176_v4  ;;  %v178_v9 = vld [vmem:[%s2105_s20 + $0x20] sm:$0xff]  ;;  %v179_v10 = vld [vmem:[%s2105_s20 + $0x28] sm:$0xff] }
  0x12   : > { %v312_v11 = vmul.f32 %v2100_v0, %v177_v7  ;;  %v313_v12 = vmul.f32 %v2100_v0, %v178_v9  ;;  %v314_v13 = vmul.f32 %v2100_v0, %v179_v10  ;;  %v180_v14 = vld [vmem:[%s2105_s20 + $0x30] sm:$0xff]  ;;  %v181_v15 = vld [vmem:[%s2105_s20 + $0x38] sm:$0xff]  ;;  %v182_v24 = vld [vmem:[%s2105_s20 + $0x40] sm:$0xff] }
  0x13   : > { %v444_v16 = vadd.f32 %v2110_v1, %v309_v5  ;;  %v445_v17 = vadd.f32 %v2110_v1, %v310_v6  ;;  %v446_v18 = vadd.f32 %v2110_v1, %v311_v8  ;;  %v315_v19 = vmul.f32 %v2100_v0, %v180_v14  ;;  %v183_v25 = vld [vmem:[%s2105_s20 + $0x48] sm:$0xff]  ;;  %v184_v30 = vld [vmem:[%s2105_s20 + $0x50] sm:$0xff]  ;;  %v185_v35 = vld [vmem:[%s2105_s20 + $0x58] sm:$0xff] }
  0x14   : > { %v447_v20 = vadd.f32 %v2110_v1, %v312_v11  ;;  %v448_v21 = vadd.f32 %v2110_v1, %v313_v12  ;;  %v449_v22 = vadd.f32 %v2110_v1, %v314_v13  ;;  %v316_v23 = vmul.f32 %v2100_v0, %v181_v15  ;;  %v186_v36 = vld [vmem:[%s2105_s20 + $0x60] sm:$0xff]  ;;  %v187_v41 = vld [vmem:[%s2105_s20 + $0x68] sm:$0xff]  ;;  %v188_v42 = vld [vmem:[%s2105_s20 + $0x70] sm:$0xff] }
  0x15   : > { %v572_v26 = vmax.f32 %v444_v16, 0.0  ;;  %v573_v27 = vmax.f32 %v445_v17, 0.0  ;;  %v574_v28 = vmax.f32 %v446_v18, 0.0  ;;  %v450_v29 = vadd.f32 %v2110_v1, %v315_v19  ;;  %v189_v51 = vld [vmem:[%s2105_s20 + $0x78] sm:$0xff]  ;;  %v190_v56 = vld [vmem:[%s2105_s20 + $0x80] sm:$0xff]  ;;  %v191_v61 = vld [vmem:[%s2105_s20 + $0x88] sm:$0xff] }
  0x16   : > { %v575_v31 = vmax.f32 %v447_v20, 0.0  ;;  %v576_v32 = vmax.f32 %v448_v21, 0.0  ;;  %v577_v33 = vmax.f32 %v449_v22, 0.0  ;;  %v451_v34 = vadd.f32 %v2110_v1, %v316_v23  ;;  %v192_v4 = vld [vmem:[%s2105_s20 + $0x90] sm:$0xff]  ;;  %v193_v5 = vld [vmem:[%s2105_s20 + $0x98] sm:$0xff]  ;;  %v194_v10 = vld [vmem:[%s2105_s20 + $0xa0] sm:$0xff] }
  0x17   : > { %v1668_v37 = vpack.c.bf16 %v573_v27, %v572_v26  ;;  %v578_v38 = vmax.f32 %v450_v29, 0.0  ;;  %v317_v39 = vmul.f32 %v2100_v0, %v182_v24  ;;  %v318_v40 = vmul.f32 %v2100_v0, %v183_v25  ;;  %v195_v15 = vld [vmem:[%s2105_s20 + $0xa8] sm:$0xff]  ;;  %v196_v20 = vld [vmem:[%s2105_s20 + $0xb0] sm:$0xff]  ;;  %v197_v25 = vld [vmem:[%s2105_s20 + $0xb8] sm:$0xff] }
  0x18   : > { %v1673_v43 = vpack.c.bf16 %v575_v31, %v574_v28  ;;  %v1678_v44 = vpack.c.bf16 %v577_v33, %v576_v32  ;;  %v579_v45 = vmax.f32 %v451_v34, 0.0  ;;  %v319_v46 = vmul.f32 %v2100_v0, %v184_v30  ;;  %v198_v30 = vld [vmem:[%s2105_s20 + $0xc0] sm:$0xff] }
  0x19   : > { %1669 = vst [vmem:[%s2142_s26] sm:$0xff] %v1668_v37   ;;  %v452_v47 = vadd.f32 %v2110_v1, %v317_v39  ;;  %v453_v48 = vadd.f32 %v2110_v1, %v318_v40  ;;  %v320_v49 = vmul.f32 %v2100_v0, %v185_v35  ;;  %v321_v50 = vmul.f32 %v2100_v0, %v186_v36  ;;  %v199_v35 = vld [vmem:[%s2105_s20 + $0xc8] sm:$0xff]  ;;  %v200_v40 = vld [vmem:[%s2105_s20 + $0xd0] sm:$0xff] }
  0x1a   : > { %1985 = vst [vmem:[%s2142_s26 + $0x8] sm:$0xff] %v1673_v43   ;;  %1986 = vst [vmem:[%s2142_s26 + $0x10] sm:$0xff] %v1678_v44   ;;  %v1683_v52 = vpack.c.bf16 %v579_v45, %v578_v38  ;;  %v454_v53 = vadd.f32 %v2110_v1, %v319_v46  ;;  %v322_v54 = vmul.f32 %v2100_v0, %v187_v41  ;;  %v201_v41 = vld [vmem:[%s2105_s20 + $0xd8] sm:$0xff]  ;;  %v202_v46 = vld [vmem:[%s2105_s20 + $0xe0] sm:$0xff] }
  0x1b   : > { %v323_v55 = vmul.f32 %v2100_v0, %v188_v42  ;;  %v580_v57 = vmax.f32 %v452_v47, 0.0  ;;  %v581_v58 = vmax.f32 %v453_v48, 0.0  ;;  %v455_v59 = vadd.f32 %v2110_v1, %v320_v49 }
  0x1c   : > { %v456_v60 = vadd.f32 %v2110_v1, %v321_v50  ;;  %1987 = vst [vmem:[%s2142_s26 + $0x18] sm:$0xff] %v1683_v52   ;;  %v582_v62 = vmax.f32 %v454_v53, 0.0  ;;  %v457_v63 = vadd.f32 %v2110_v1, %v322_v54  ;;  %v324_v2 = vmul.f32 %v2100_v0, %v189_v51  ;;  %v203_v51 = vld [vmem:[%s2105_s20 + $0xe8] sm:$0xff] }
  0x1d   : > { %v458_v3 = vadd.f32 %v2110_v1, %v323_v55  ;;  %v1688_v6 = vpack.c.bf16 %v581_v58, %v580_v57  ;;  %v583_v7 = vmax.f32 %v455_v59, 0.0  ;;  %v325_v9 = vmul.f32 %v2100_v0, %v190_v56  ;;  %v204_v56 = vld [vmem:[%s2105_s20 + $0xf0] sm:$0xff] }
  0x1e   : > { %v584_v8 = vmax.f32 %v456_v60, 0.0  ;;  %v585_v11 = vmax.f32 %v457_v63, 0.0  ;;  %v459_v12 = vadd.f32 %v2110_v1, %v324_v2  ;;  %v326_v14 = vmul.f32 %v2100_v0, %v191_v61  ;;  %v205_v61 = vld [vmem:[%s2105_s20 + $0xf8] sm:$0xff] }
  0x1f   : > { %v586_v13 = vmax.f32 %v458_v3, 0.0  ;;  %1988 = vst [vmem:[%s2142_s26 + $0x20] sm:$0xff] %v1688_v6   ;;  %v1693_v16 = vpack.c.bf16 %v583_v7, %v582_v62  ;;  %v460_v17 = vadd.f32 %v2110_v1, %v325_v9  ;;  %v327_v18 = vmul.f32 %v2100_v0, %v192_v4  ;;  %v206_v4 = vld [vmem:[%s2105_s20 + $0x100] sm:$0xff]  ;;  %v207_v9 = vld [vmem:[%s2105_s20 + $0x108] sm:$0xff] }
  0x20   : > { %v328_v19 = vmul.f32 %v2100_v0, %v193_v5  ;;  %v1698_v21 = vpack.c.bf16 %v585_v11, %v584_v8  ;;  %v587_v22 = vmax.f32 %v459_v12, 0.0  ;;  %v461_v23 = vadd.f32 %v2110_v1, %v326_v14  ;;  %v208_v14 = vld [vmem:[%s2105_s20 + $0x110] sm:$0xff] }
  0x21   : > { %v329_v24 = vmul.f32 %v2100_v0, %v194_v10  ;;  %1989 = vst [vmem:[%s2142_s26 + $0x28] sm:$0xff] %v1693_v16   ;;  %v588_v26 = vmax.f32 %v460_v17, 0.0  ;;  %v462_v27 = vadd.f32 %v2110_v1, %v327_v18  ;;  %v330_v29 = vmul.f32 %v2100_v0, %v195_v15  ;;  %v209_v15 = vld [vmem:[%s2105_s20 + $0x118] sm:$0xff] }
  0x22   : > { %v463_v28 = vadd.f32 %v2110_v1, %v328_v19  ;;  %1990 = vst [vmem:[%s2142_s26 + $0x30] sm:$0xff] %v1698_v21   ;;  %v1703_v31 = vpack.c.bf16 %v587_v22, %v586_v13  ;;  %v589_v32 = vmax.f32 %v461_v23, 0.0  ;;  %v331_v34 = vmul.f32 %v2100_v0, %v196_v20  ;;  %v210_v20 = vld [vmem:[%s2105_s20 + $0x120] sm:$0xff] }
  0x23   : > { %v464_v33 = vadd.f32 %v2110_v1, %v329_v24  ;;  %v590_v36 = vmax.f32 %v462_v27, 0.0  ;;  %v465_v38 = vadd.f32 %v2110_v1, %v330_v29  ;;  %v332_v39 = vmul.f32 %v2100_v0, %v197_v25  ;;  %v211_v25 = vld [vmem:[%s2105_s20 + $0x128] sm:$0xff] }
  0x24   : > { %v591_v37 = vmax.f32 %v463_v28, 0.0  ;;  %1991 = vst [vmem:[%s2142_s26 + $0x38] sm:$0xff] %v1703_v31   ;;  %v1708_v42 = vpack.c.bf16 %v589_v32, %v588_v26  ;;  %v466_v44 = vadd.f32 %v2110_v1, %v331_v34  ;;  %v333_v45 = vmul.f32 %v2100_v0, %v198_v30  ;;  %v212_v30 = vld [vmem:[%s2105_s20 + $0x130] sm:$0xff] }
  0x25   : > { %v592_v43 = vmax.f32 %v464_v33, 0.0  ;;  %v593_v48 = vmax.f32 %v465_v38, 0.0  ;;  %v467_v49 = vadd.f32 %v2110_v1, %v332_v39  ;;  %v334_v50 = vmul.f32 %v2100_v0, %v199_v35  ;;  %v213_v35 = vld [vmem:[%s2105_s20 + $0x138] sm:$0xff] }
  0x26   : > { %v1713_v47 = vpack.c.bf16 %v591_v37, %v590_v36  ;;  %1992 = vst [vmem:[%s2142_s26 + $0x40] sm:$0xff] %v1708_v42   ;;  %v594_v52 = vmax.f32 %v466_v44, 0.0  ;;  %v468_v53 = vadd.f32 %v2110_v1, %v333_v45  ;;  %v335_v54 = vmul.f32 %v2100_v0, %v200_v40  ;;  %v214_v40 = vld [vmem:[%s2105_s20 + $0x140] sm:$0xff]  ;;  %v215_v45 = vld [vmem:[%s2105_s20 + $0x148] sm:$0xff] }
  0x27   : > { %v336_v55 = vmul.f32 %v2100_v0, %v201_v41  ;;  %v1718_v57 = vpack.c.bf16 %v593_v48, %v592_v43  ;;  %v595_v58 = vmax.f32 %v467_v49, 0.0  ;;  %v469_v59 = vadd.f32 %v2110_v1, %v334_v50  ;;  %v216_v50 = vld [vmem:[%s2105_s20 + $0x150] sm:$0xff] }
  0x28   : > { %1993 = vst [vmem:[%s2142_s26 + $0x48] sm:$0xff] %v1713_v47   ;;  %v337_v60 = vmul.f32 %v2100_v0, %v202_v46  ;;  %v596_v62 = vmax.f32 %v468_v53, 0.0  ;;  %v470_v63 = vadd.f32 %v2110_v1, %v335_v54  ;;  %v338_v3 = vmul.f32 %v2100_v0, %v203_v51  ;;  %v217_v51 = vld [vmem:[%s2105_s20 + $0x158] sm:$0xff] }
  0x29   : > { %v471_v2 = vadd.f32 %v2110_v1, %v336_v55  ;;  %1994 = vst [vmem:[%s2142_s26 + $0x50] sm:$0xff] %v1718_v57   ;;  %v1723_v5 = vpack.c.bf16 %v595_v58, %v594_v52  ;;  %v597_v6 = vmax.f32 %v469_v59, 0.0  ;;  %v339_v8 = vmul.f32 %v2100_v0, %v204_v56  ;;  %v218_v56 = vld [vmem:[%s2105_s20 + $0x160] sm:$0xff] }
  0x2a   : > { %v472_v7 = vadd.f32 %v2110_v1, %v337_v60  ;;  %v598_v10 = vmax.f32 %v470_v63, 0.0  ;;  %v473_v12 = vadd.f32 %v2110_v1, %v338_v3  ;;  %v340_v13 = vmul.f32 %v2100_v0, %v205_v61  ;;  %v219_v61 = vld [vmem:[%s2105_s20 + $0x168] sm:$0xff] }
  0x2b   : > { %v599_v11 = vmax.f32 %v471_v2, 0.0  ;;  %1995 = vst [vmem:[%s2142_s26 + $0x58] sm:$0xff] %v1723_v5   ;;  %v1728_v16 = vpack.c.bf16 %v597_v6, %v596_v62  ;;  %v474_v18 = vadd.f32 %v2110_v1, %v339_v8  ;;  %v341_v19 = vmul.f32 %v2100_v0, %v206_v4  ;;  %v220_v4 = vld [vmem:[%s2105_s20 + $0x170] sm:$0xff] }
  0x2c   : > { %v600_v17 = vmax.f32 %v472_v7, 0.0  ;;  %v601_v22 = vmax.f32 %v473_v12, 0.0  ;;  %v475_v23 = vadd.f32 %v2110_v1, %v340_v13  ;;  %v342_v24 = vmul.f32 %v2100_v0, %v207_v9  ;;  %v221_v9 = vld [vmem:[%s2105_s20 + $0x178] sm:$0xff] }
  0x2d   : > { %v1733_v21 = vpack.c.bf16 %v599_v11, %v598_v10  ;;  %1996 = vst [vmem:[%s2142_s26 + $0x60] sm:$0xff] %v1728_v16   ;;  %v602_v26 = vmax.f32 %v474_v18, 0.0  ;;  %v476_v27 = vadd.f32 %v2110_v1, %v341_v19  ;;  %v343_v28 = vmul.f32 %v2100_v0, %v208_v14  ;;  %v222_v14 = vld [vmem:[%s2105_s20 + $0x180] sm:$0xff]  ;;  %v223_v19 = vld [vmem:[%s2105_s20 + $0x188] sm:$0xff] }
  0x2e   : > { %v344_v29 = vmul.f32 %v2100_v0, %v209_v15  ;;  %v1738_v31 = vpack.c.bf16 %v601_v22, %v600_v17  ;;  %v603_v32 = vmax.f32 %v475_v23, 0.0  ;;  %v477_v33 = vadd.f32 %v2110_v1, %v342_v24  ;;  %v224_v24 = vld [vmem:[%s2105_s20 + $0x190] sm:$0xff] }
  0x2f   : > { %1997 = vst [vmem:[%s2142_s26 + $0x68] sm:$0xff] %v1733_v21   ;;  %v345_v34 = vmul.f32 %v2100_v0, %v210_v20  ;;  %v604_v36 = vmax.f32 %v476_v27, 0.0  ;;  %v478_v37 = vadd.f32 %v2110_v1, %v343_v28  ;;  %v346_v39 = vmul.f32 %v2100_v0, %v211_v25  ;;  %v225_v25 = vld [vmem:[%s2105_s20 + $0x198] sm:$0xff] }
  0x30   : > { %v479_v38 = vadd.f32 %v2110_v1, %v344_v29  ;;  %1998 = vst [vmem:[%s2142_s26 + $0x70] sm:$0xff] %v1738_v31   ;;  %v1743_v41 = vpack.c.bf16 %v603_v32, %v602_v26  ;;  %v605_v42 = vmax.f32 %v477_v33, 0.0  ;;  %v347_v44 = vmul.f32 %v2100_v0, %v212_v30  ;;  %v226_v30 = vld [vmem:[%s2105_s20 + $0x1a0] sm:$0xff] }
  0x31   : > { %v480_v43 = vadd.f32 %v2110_v1, %v345_v34  ;;  %v606_v46 = vmax.f32 %v478_v37, 0.0  ;;  %v481_v48 = vadd.f32 %v2110_v1, %v346_v39  ;;  %v348_v49 = vmul.f32 %v2100_v0, %v213_v35  ;;  %v227_v35 = vld [vmem:[%s2105_s20 + $0x1a8] sm:$0xff] }
  0x32   : > { %v607_v47 = vmax.f32 %v479_v38, 0.0  ;;  %1999 = vst [vmem:[%s2142_s26 + $0x78] sm:$0xff] %v1743_v41   ;;  %v1748_v52 = vpack.c.bf16 %v605_v42, %v604_v36  ;;  %v482_v54 = vadd.f32 %v2110_v1, %v347_v44  ;;  %v349_v55 = vmul.f32 %v2100_v0, %v214_v40  ;;  %v228_v40 = vld [vmem:[%s2105_s20 + $0x1b0] sm:$0xff] }
  0x33   : > { %v608_v53 = vmax.f32 %v480_v43, 0.0  ;;  %v609_v58 = vmax.f32 %v481_v48, 0.0  ;;  %v483_v59 = vadd.f32 %v2110_v1, %v348_v49  ;;  %v350_v60 = vmul.f32 %v2100_v0, %v215_v45  ;;  %v229_v45 = vld [vmem:[%s2105_s20 + $0x1b8] sm:$0xff] }
  0x34   : > { %v1753_v57 = vpack.c.bf16 %v607_v47, %v606_v46  ;;  %2000 = vst [vmem:[%s2142_s26 + $0x80] sm:$0xff] %v1748_v52   ;;  %v610_v62 = vmax.f32 %v482_v54, 0.0  ;;  %v484_v63 = vadd.f32 %v2110_v1, %v349_v55  ;;  %v351_v2 = vmul.f32 %v2100_v0, %v216_v50  ;;  %v230_v50 = vld [vmem:[%s2105_s20 + $0x1c0] sm:$0xff]  ;;  %v231_v55 = vld [vmem:[%s2105_s20 + $0x1c8] sm:$0xff] }
  0x35   : > { %v352_v3 = vmul.f32 %v2100_v0, %v217_v51  ;;  %v1758_v5 = vpack.c.bf16 %v609_v58, %v608_v53  ;;  %v611_v6 = vmax.f32 %v483_v59, 0.0  ;;  %v485_v7 = vadd.f32 %v2110_v1, %v350_v60  ;;  %v232_v60 = vld [vmem:[%s2105_s20 + $0x1d0] sm:$0xff] }
  0x36   : > { %2001 = vst [vmem:[%s2142_s26 + $0x88] sm:$0xff] %v1753_v57   ;;  %v353_v8 = vmul.f32 %v2100_v0, %v218_v56  ;;  %v612_v10 = vmax.f32 %v484_v63, 0.0  ;;  %v486_v11 = vadd.f32 %v2110_v1, %v351_v2  ;;  %v354_v13 = vmul.f32 %v2100_v0, %v219_v61  ;;  %v233_v61 = vld [vmem:[%s2105_s20 + $0x1d8] sm:$0xff] }
  0x37   : > { %v487_v12 = vadd.f32 %v2110_v1, %v352_v3  ;;  %2002 = vst [vmem:[%s2142_s26 + $0x90] sm:$0xff] %v1758_v5   ;;  %v1763_v15 = vpack.c.bf16 %v611_v6, %v610_v62  ;;  %v613_v16 = vmax.f32 %v485_v7, 0.0  ;;  %v355_v18 = vmul.f32 %v2100_v0, %v220_v4  ;;  %v234_v4 = vld [vmem:[%s2105_s20 + $0x1e0] sm:$0xff] }
  0x38   : > { %v488_v17 = vadd.f32 %v2110_v1, %v353_v8  ;;  %v614_v20 = vmax.f32 %v486_v11, 0.0  ;;  %v489_v22 = vadd.f32 %v2110_v1, %v354_v13  ;;  %v356_v23 = vmul.f32 %v2100_v0, %v221_v9  ;;  %v235_v9 = vld [vmem:[%s2105_s20 + $0x1e8] sm:$0xff] }
  0x39   : > { %v615_v21 = vmax.f32 %v487_v12, 0.0  ;;  %2003 = vst [vmem:[%s2142_s26 + $0x98] sm:$0xff] %v1763_v15   ;;  %v1768_v26 = vpack.c.bf16 %v613_v16, %v612_v10  ;;  %v490_v28 = vadd.f32 %v2110_v1, %v355_v18  ;;  %v357_v29 = vmul.f32 %v2100_v0, %v222_v14  ;;  %v236_v14 = vld [vmem:[%s2105_s20 + $0x1f0] sm:$0xff] }
  0x3a   : > { %v616_v27 = vmax.f32 %v488_v17, 0.0  ;;  %v617_v32 = vmax.f32 %v489_v22, 0.0  ;;  %v491_v33 = vadd.f32 %v2110_v1, %v356_v23  ;;  %v358_v34 = vmul.f32 %v2100_v0, %v223_v19  ;;  %v237_v19 = vld [vmem:[%s2105_s20 + $0x1f8] sm:$0xff] }
  0x3b   : > { %v1773_v31 = vpack.c.bf16 %v615_v21, %v614_v20  ;;  %2004 = vst [vmem:[%s2142_s26 + $0xa0] sm:$0xff] %v1768_v26   ;;  %v618_v36 = vmax.f32 %v490_v28, 0.0  ;;  %v492_v37 = vadd.f32 %v2110_v1, %v357_v29  ;;  %v359_v38 = vmul.f32 %v2100_v0, %v224_v24  ;;  %v238_v24 = vld [vmem:[%s2105_s20 + $0x200] sm:$0xff]  ;;  %v239_v29 = vld [vmem:[%s2105_s20 + $0x208] sm:$0xff] }
  0x3c   : > { %v360_v39 = vmul.f32 %v2100_v0, %v225_v25  ;;  %v1778_v41 = vpack.c.bf16 %v617_v32, %v616_v27  ;;  %v619_v42 = vmax.f32 %v491_v33, 0.0  ;;  %v493_v43 = vadd.f32 %v2110_v1, %v358_v34  ;;  %v240_v34 = vld [vmem:[%s2105_s20 + $0x210] sm:$0xff] }
  0x3d   : > { %2005 = vst [vmem:[%s2142_s26 + $0xa8] sm:$0xff] %v1773_v31   ;;  %v361_v44 = vmul.f32 %v2100_v0, %v226_v30  ;;  %v620_v46 = vmax.f32 %v492_v37, 0.0  ;;  %v494_v47 = vadd.f32 %v2110_v1, %v359_v38  ;;  %v362_v49 = vmul.f32 %v2100_v0, %v227_v35  ;;  %v241_v35 = vld [vmem:[%s2105_s20 + $0x218] sm:$0xff] }
  0x3e   : > { %v495_v48 = vadd.f32 %v2110_v1, %v360_v39  ;;  %2006 = vst [vmem:[%s2142_s26 + $0xb0] sm:$0xff] %v1778_v41   ;;  %v1783_v51 = vpack.c.bf16 %v619_v42, %v618_v36  ;;  %v621_v52 = vmax.f32 %v493_v43, 0.0  ;;  %v363_v54 = vmul.f32 %v2100_v0, %v228_v40  ;;  %v242_v40 = vld [vmem:[%s2105_s20 + $0x220] sm:$0xff] }
  0x3f   : > { %v496_v53 = vadd.f32 %v2110_v1, %v361_v44  ;;  %v622_v56 = vmax.f32 %v494_v47, 0.0  ;;  %v497_v58 = vadd.f32 %v2110_v1, %v362_v49  ;;  %v364_v59 = vmul.f32 %v2100_v0, %v229_v45  ;;  %v243_v45 = vld [vmem:[%s2105_s20 + $0x228] sm:$0xff] }
  0x40   : > { %v623_v57 = vmax.f32 %v495_v48, 0.0  ;;  %2007 = vst [vmem:[%s2142_s26 + $0xb8] sm:$0xff] %v1783_v51   ;;  %v1788_v62 = vpack.c.bf16 %v621_v52, %v620_v46  ;;  %v498_v2 = vadd.f32 %v2110_v1, %v363_v54  ;;  %v365_v3 = vmul.f32 %v2100_v0, %v230_v50  ;;  %v244_v50 = vld [vmem:[%s2105_s20 + $0x230] sm:$0xff] }
  0x41   : > { %v624_v63 = vmax.f32 %v496_v53, 0.0  ;;  %v625_v6 = vmax.f32 %v497_v58, 0.0  ;;  %v499_v7 = vadd.f32 %v2110_v1, %v364_v59  ;;  %v366_v8 = vmul.f32 %v2100_v0, %v231_v55  ;;  %v245_v55 = vld [vmem:[%s2105_s20 + $0x238] sm:$0xff] }
  0x42   : > { %v1793_v5 = vpack.c.bf16 %v623_v57, %v622_v56  ;;  %2008 = vst [vmem:[%s2142_s26 + $0xc0] sm:$0xff] %v1788_v62   ;;  %v626_v10 = vmax.f32 %v498_v2, 0.0  ;;  %v500_v11 = vadd.f32 %v2110_v1, %v365_v3  ;;  %v367_v12 = vmul.f32 %v2100_v0, %v232_v60  ;;  %v246_v60 = vld [vmem:[%s2105_s20 + $0x240] sm:$0xff]  ;;  %v247_v3 = vld [vmem:[%s2105_s20 + $0x248] sm:$0xff] }
  0x43   : > { %v368_v13 = vmul.f32 %v2100_v0, %v233_v61  ;;  %v1798_v15 = vpack.c.bf16 %v625_v6, %v624_v63  ;;  %v627_v16 = vmax.f32 %v499_v7, 0.0  ;;  %v501_v17 = vadd.f32 %v2110_v1, %v366_v8  ;;  %v248_v8 = vld [vmem:[%s2105_s20 + $0x250] sm:$0xff] }
  0x44   : > { %2009 = vst [vmem:[%s2142_s26 + $0xc8] sm:$0xff] %v1793_v5   ;;  %v369_v18 = vmul.f32 %v2100_v0, %v234_v4  ;;  %v628_v20 = vmax.f32 %v500_v11, 0.0  ;;  %v502_v21 = vadd.f32 %v2110_v1, %v367_v12  ;;  %v370_v23 = vmul.f32 %v2100_v0, %v235_v9  ;;  %v249_v9 = vld [vmem:[%s2105_s20 + $0x258] sm:$0xff] }
  0x45   : > { %v503_v22 = vadd.f32 %v2110_v1, %v368_v13  ;;  %2010 = vst [vmem:[%s2142_s26 + $0xd0] sm:$0xff] %v1798_v15   ;;  %v1803_v25 = vpack.c.bf16 %v627_v16, %v626_v10  ;;  %v629_v26 = vmax.f32 %v501_v17, 0.0  ;;  %v371_v28 = vmul.f32 %v2100_v0, %v236_v14  ;;  %v250_v14 = vld [vmem:[%s2105_s20 + $0x260] sm:$0xff] }
  0x46   : > { %v504_v27 = vadd.f32 %v2110_v1, %v369_v18  ;;  %v630_v30 = vmax.f32 %v502_v21, 0.0  ;;  %v505_v32 = vadd.f32 %v2110_v1, %v370_v23  ;;  %v372_v33 = vmul.f32 %v2100_v0, %v237_v19  ;;  %v251_v19 = vld [vmem:[%s2105_s20 + $0x268] sm:$0xff] }
  0x47   : > { %v631_v31 = vmax.f32 %v503_v22, 0.0  ;;  %2011 = vst [vmem:[%s2142_s26 + $0xd8] sm:$0xff] %v1803_v25   ;;  %v1808_v36 = vpack.c.bf16 %v629_v26, %v628_v20  ;;  %v506_v38 = vadd.f32 %v2110_v1, %v371_v28  ;;  %v373_v39 = vmul.f32 %v2100_v0, %v238_v24  ;;  %v252_v24 = vld [vmem:[%s2105_s20 + $0x270] sm:$0xff] }
  0x48   : > { %v632_v37 = vmax.f32 %v504_v27, 0.0  ;;  %v633_v42 = vmax.f32 %v505_v32, 0.0  ;;  %v507_v43 = vadd.f32 %v2110_v1, %v372_v33  ;;  %v374_v44 = vmul.f32 %v2100_v0, %v239_v29  ;;  %v253_v29 = vld [vmem:[%s2105_s20 + $0x278] sm:$0xff] }
  0x49   : > { %v1813_v41 = vpack.c.bf16 %v631_v31, %v630_v30  ;;  %2012 = vst [vmem:[%s2142_s26 + $0xe0] sm:$0xff] %v1808_v36   ;;  %v634_v46 = vmax.f32 %v506_v38, 0.0  ;;  %v508_v47 = vadd.f32 %v2110_v1, %v373_v39  ;;  %v375_v48 = vmul.f32 %v2100_v0, %v240_v34  ;;  %v254_v34 = vld [vmem:[%s2105_s20 + $0x280] sm:$0xff]  ;;  %v255_v39 = vld [vmem:[%s2105_s20 + $0x288] sm:$0xff] }
  0x4a   : > { %v376_v49 = vmul.f32 %v2100_v0, %v241_v35  ;;  %v1818_v51 = vpack.c.bf16 %v633_v42, %v632_v37  ;;  %v635_v52 = vmax.f32 %v507_v43, 0.0  ;;  %v509_v53 = vadd.f32 %v2110_v1, %v374_v44  ;;  %v256_v44 = vld [vmem:[%s2105_s20 + $0x290] sm:$0xff] }
  0x4b   : > { %2013 = vst [vmem:[%s2142_s26 + $0xe8] sm:$0xff] %v1813_v41   ;;  %v377_v54 = vmul.f32 %v2100_v0, %v242_v40  ;;  %v636_v56 = vmax.f32 %v508_v47, 0.0  ;;  %v510_v57 = vadd.f32 %v2110_v1, %v375_v48  ;;  %v378_v59 = vmul.f32 %v2100_v0, %v243_v45  ;;  %v257_v45 = vld [vmem:[%s2105_s20 + $0x298] sm:$0xff] }
  0x4c   : > { %v511_v58 = vadd.f32 %v2110_v1, %v376_v49  ;;  %2014 = vst [vmem:[%s2142_s26 + $0xf0] sm:$0xff] %v1818_v51   ;;  %v1823_v61 = vpack.c.bf16 %v635_v52, %v634_v46  ;;  %v637_v62 = vmax.f32 %v509_v53, 0.0  ;;  %v379_v2 = vmul.f32 %v2100_v0, %v244_v50  ;;  %v258_v50 = vld [vmem:[%s2105_s20 + $0x2a0] sm:$0xff] }
  0x4d   : > { %v512_v63 = vadd.f32 %v2110_v1, %v377_v54  ;;  %v638_v4 = vmax.f32 %v510_v57, 0.0  ;;  %v513_v6 = vadd.f32 %v2110_v1, %v378_v59  ;;  %v380_v7 = vmul.f32 %v2100_v0, %v245_v55  ;;  %v259_v55 = vld [vmem:[%s2105_s20 + $0x2a8] sm:$0xff] }
  0x4e   : > { %v639_v5 = vmax.f32 %v511_v58, 0.0  ;;  %2015 = vst [vmem:[%s2142_s26 + $0xf8] sm:$0xff] %v1823_v61   ;;  %v1828_v10 = vpack.c.bf16 %v637_v62, %v636_v56  ;;  %v514_v12 = vadd.f32 %v2110_v1, %v379_v2  ;;  %v381_v13 = vmul.f32 %v2100_v0, %v246_v60  ;;  %v260_v60 = vld [vmem:[%s2105_s20 + $0x2b0] sm:$0xff] }
  0x4f   : > { %v640_v11 = vmax.f32 %v512_v63, 0.0  ;;  %v641_v16 = vmax.f32 %v513_v6, 0.0  ;;  %v515_v17 = vadd.f32 %v2110_v1, %v380_v7  ;;  %v382_v18 = vmul.f32 %v2100_v0, %v247_v3  ;;  %v261_v3 = vld [vmem:[%s2105_s20 + $0x2b8] sm:$0xff] }
  0x50   : > { %v1833_v15 = vpack.c.bf16 %v639_v5, %v638_v4  ;;  %2016 = vst [vmem:[%s2142_s26 + $0x100] sm:$0xff] %v1828_v10   ;;  %v642_v20 = vmax.f32 %v514_v12, 0.0  ;;  %v516_v21 = vadd.f32 %v2110_v1, %v381_v13  ;;  %v383_v22 = vmul.f32 %v2100_v0, %v248_v8  ;;  %v262_v8 = vld [vmem:[%s2105_s20 + $0x2c0] sm:$0xff]  ;;  %v263_v13 = vld [vmem:[%s2105_s20 + $0x2c8] sm:$0xff] }
  0x51   : > { %v384_v23 = vmul.f32 %v2100_v0, %v249_v9  ;;  %v1838_v25 = vpack.c.bf16 %v641_v16, %v640_v11  ;;  %v643_v26 = vmax.f32 %v515_v17, 0.0  ;;  %v517_v27 = vadd.f32 %v2110_v1, %v382_v18  ;;  %v264_v18 = vld [vmem:[%s2105_s20 + $0x2d0] sm:$0xff] }
  0x52   : > { %2017 = vst [vmem:[%s2142_s26 + $0x108] sm:$0xff] %v1833_v15   ;;  %v385_v28 = vmul.f32 %v2100_v0, %v250_v14  ;;  %v644_v30 = vmax.f32 %v516_v21, 0.0  ;;  %v518_v31 = vadd.f32 %v2110_v1, %v383_v22  ;;  %v386_v33 = vmul.f32 %v2100_v0, %v251_v19  ;;  %v265_v19 = vld [vmem:[%s2105_s20 + $0x2d8] sm:$0xff] }
  0x53   : > { %v519_v32 = vadd.f32 %v2110_v1, %v384_v23  ;;  %2018 = vst [vmem:[%s2142_s26 + $0x110] sm:$0xff] %v1838_v25   ;;  %v1843_v35 = vpack.c.bf16 %v643_v26, %v642_v20  ;;  %v645_v36 = vmax.f32 %v517_v27, 0.0  ;;  %v387_v38 = vmul.f32 %v2100_v0, %v252_v24  ;;  %v266_v24 = vld [vmem:[%s2105_s20 + $0x2e0] sm:$0xff] }
  0x54   : > { %v520_v37 = vadd.f32 %v2110_v1, %v385_v28  ;;  %v646_v40 = vmax.f32 %v518_v31, 0.0  ;;  %v521_v42 = vadd.f32 %v2110_v1, %v386_v33  ;;  %v388_v43 = vmul.f32 %v2100_v0, %v253_v29  ;;  %v267_v29 = vld [vmem:[%s2105_s20 + $0x2e8] sm:$0xff] }
  0x55   : > { %v647_v41 = vmax.f32 %v519_v32, 0.0  ;;  %2019 = vst [vmem:[%s2142_s26 + $0x118] sm:$0xff] %v1843_v35   ;;  %v1848_v46 = vpack.c.bf16 %v645_v36, %v644_v30  ;;  %v522_v48 = vadd.f32 %v2110_v1, %v387_v38  ;;  %v389_v49 = vmul.f32 %v2100_v0, %v254_v34  ;;  %v268_v34 = vld [vmem:[%s2105_s20 + $0x2f0] sm:$0xff] }
  0x56   : > { %v648_v47 = vmax.f32 %v520_v37, 0.0  ;;  %v649_v52 = vmax.f32 %v521_v42, 0.0  ;;  %v523_v53 = vadd.f32 %v2110_v1, %v388_v43  ;;  %v390_v54 = vmul.f32 %v2100_v0, %v255_v39  ;;  %v269_v39 = vld [vmem:[%s2105_s20 + $0x2f8] sm:$0xff] }
  0x57   : > { %v1853_v51 = vpack.c.bf16 %v647_v41, %v646_v40  ;;  %2020 = vst [vmem:[%s2142_s26 + $0x120] sm:$0xff] %v1848_v46   ;;  %v650_v56 = vmax.f32 %v522_v48, 0.0  ;;  %v524_v57 = vadd.f32 %v2110_v1, %v389_v49  ;;  %v391_v58 = vmul.f32 %v2100_v0, %v256_v44  ;;  %v270_v44 = vld [vmem:[%s2105_s20 + $0x300] sm:$0xff]  ;;  %v271_v49 = vld [vmem:[%s2105_s20 + $0x308] sm:$0xff] }
  0x58   : > { %v392_v59 = vmul.f32 %v2100_v0, %v257_v45  ;;  %v1858_v61 = vpack.c.bf16 %v649_v52, %v648_v47  ;;  %v651_v62 = vmax.f32 %v523_v53, 0.0  ;;  %v525_v63 = vadd.f32 %v2110_v1, %v390_v54  ;;  %v272_v54 = vld [vmem:[%s2105_s20 + $0x310] sm:$0xff] }
  0x59   : > { %2021 = vst [vmem:[%s2142_s26 + $0x128] sm:$0xff] %v1853_v51   ;;  %v393_v2 = vmul.f32 %v2100_v0, %v258_v50  ;;  %v652_v4 = vmax.f32 %v524_v57, 0.0  ;;  %v526_v5 = vadd.f32 %v2110_v1, %v391_v58  ;;  %v394_v7 = vmul.f32 %v2100_v0, %v259_v55  ;;  %v273_v55 = vld [vmem:[%s2105_s20 + $0x318] sm:$0xff] }
  0x5a   : > { %v527_v6 = vadd.f32 %v2110_v1, %v392_v59  ;;  %2022 = vst [vmem:[%s2142_s26 + $0x130] sm:$0xff] %v1858_v61   ;;  %v1863_v9 = vpack.c.bf16 %v651_v62, %v650_v56  ;;  %v653_v10 = vmax.f32 %v525_v63, 0.0  ;;  %v395_v12 = vmul.f32 %v2100_v0, %v260_v60  ;;  %v274_v60 = vld [vmem:[%s2105_s20 + $0x320] sm:$0xff] }
  0x5b   : > { %v528_v11 = vadd.f32 %v2110_v1, %v393_v2  ;;  %v654_v14 = vmax.f32 %v526_v5, 0.0  ;;  %v529_v16 = vadd.f32 %v2110_v1, %v394_v7  ;;  %v396_v17 = vmul.f32 %v2100_v0, %v261_v3  ;;  %v275_v3 = vld [vmem:[%s2105_s20 + $0x328] sm:$0xff] }
  0x5c   : > { %v655_v15 = vmax.f32 %v527_v6, 0.0  ;;  %2023 = vst [vmem:[%s2142_s26 + $0x138] sm:$0xff] %v1863_v9   ;;  %v1868_v20 = vpack.c.bf16 %v653_v10, %v652_v4  ;;  %v530_v22 = vadd.f32 %v2110_v1, %v395_v12  ;;  %v397_v23 = vmul.f32 %v2100_v0, %v262_v8  ;;  %v276_v8 = vld [vmem:[%s2105_s20 + $0x330] sm:$0xff] }
  0x5d   : > { %v656_v21 = vmax.f32 %v528_v11, 0.0  ;;  %v657_v26 = vmax.f32 %v529_v16, 0.0  ;;  %v531_v27 = vadd.f32 %v2110_v1, %v396_v17  ;;  %v398_v28 = vmul.f32 %v2100_v0, %v263_v13  ;;  %v277_v13 = vld [vmem:[%s2105_s20 + $0x338] sm:$0xff] }
  0x5e   : > { %v1873_v25 = vpack.c.bf16 %v655_v15, %v654_v14  ;;  %2024 = vst [vmem:[%s2142_s26 + $0x140] sm:$0xff] %v1868_v20   ;;  %v658_v30 = vmax.f32 %v530_v22, 0.0  ;;  %v532_v31 = vadd.f32 %v2110_v1, %v397_v23  ;;  %v399_v32 = vmul.f32 %v2100_v0, %v264_v18  ;;  %v278_v18 = vld [vmem:[%s2105_s20 + $0x340] sm:$0xff]  ;;  %v279_v23 = vld [vmem:[%s2105_s20 + $0x348] sm:$0xff] }
  0x5f   : > { %v400_v33 = vmul.f32 %v2100_v0, %v265_v19  ;;  %v1878_v35 = vpack.c.bf16 %v657_v26, %v656_v21  ;;  %v659_v36 = vmax.f32 %v531_v27, 0.0  ;;  %v533_v37 = vadd.f32 %v2110_v1, %v398_v28  ;;  %v280_v28 = vld [vmem:[%s2105_s20 + $0x350] sm:$0xff] }
  0x60   : > { %2025 = vst [vmem:[%s2142_s26 + $0x148] sm:$0xff] %v1873_v25   ;;  %v401_v38 = vmul.f32 %v2100_v0, %v266_v24  ;;  %v660_v40 = vmax.f32 %v532_v31, 0.0  ;;  %v534_v41 = vadd.f32 %v2110_v1, %v399_v32  ;;  %v402_v43 = vmul.f32 %v2100_v0, %v267_v29  ;;  %v281_v29 = vld [vmem:[%s2105_s20 + $0x358] sm:$0xff]  ;;  %v2483_v32 = vld [vmem:[%s2581_s2] ss:$0 sm:$0xff] }
  0x61   : > { %v535_v42 = vadd.f32 %v2110_v1, %v400_v33  ;;  %2026 = vst [vmem:[%s2142_s26 + $0x150] sm:$0xff] %v1878_v35   ;;  %v1883_v45 = vpack.c.bf16 %v659_v36, %v658_v30  ;;  %v661_v46 = vmax.f32 %v533_v37, 0.0  ;;  %v403_v48 = vmul.f32 %v2100_v0, %v268_v34  ;;  %v282_v34 = vld [vmem:[%s2105_s20 + $0x360] sm:$0xff] }
  0x62   : > { %v536_v47 = vadd.f32 %v2110_v1, %v401_v38  ;;  %v662_v50 = vmax.f32 %v534_v41, 0.0  ;;  %v537_v52 = vadd.f32 %v2110_v1, %v402_v43  ;;  %v404_v53 = vmul.f32 %v2100_v0, %v269_v39  ;;  %v283_v39 = vld [vmem:[%s2105_s20 + $0x368] sm:$0xff] }
  0x63   : > { %v663_v51 = vmax.f32 %v535_v42, 0.0  ;;  %2027 = vst [vmem:[%s2142_s26 + $0x158] sm:$0xff] %v1883_v45   ;;  %v1888_v56 = vpack.c.bf16 %v661_v46, %v660_v40  ;;  %v538_v58 = vadd.f32 %v2110_v1, %v403_v48  ;;  %v405_v59 = vmul.f32 %v2100_v0, %v270_v44  ;;  %v284_v44 = vld [vmem:[%s2105_s20 + $0x370] sm:$0xff] }
  0x64   : > { %v664_v57 = vmax.f32 %v536_v47, 0.0  ;;  %v665_v62 = vmax.f32 %v537_v52, 0.0  ;;  %v539_v63 = vadd.f32 %v2110_v1, %v404_v53  ;;  %v406_v2 = vmul.f32 %v2100_v0, %v271_v49  ;;  %v285_v49 = vld [vmem:[%s2105_s20 + $0x378] sm:$0xff] }
  0x65   : > { %v1893_v61 = vpack.c.bf16 %v663_v51, %v662_v50  ;;  %2028 = vst [vmem:[%s2142_s26 + $0x160] sm:$0xff] %v1888_v56   ;;  %v666_v4 = vmax.f32 %v538_v58, 0.0  ;;  %v540_v5 = vadd.f32 %v2110_v1, %v405_v59  ;;  %v407_v6 = vmul.f32 %v2100_v0, %v272_v54  ;;  %v286_v54 = vld [vmem:[%s2105_s20 + $0x380] sm:$0xff]  ;;  %v287_v59 = vld [vmem:[%s2105_s20 + $0x388] sm:$0xff] }
  0x66   : > { %v408_v7 = vmul.f32 %v2100_v0, %v273_v55  ;;  %v1898_v9 = vpack.c.bf16 %v665_v62, %v664_v57  ;;  %v667_v10 = vmax.f32 %v539_v63, 0.0  ;;  %v541_v11 = vadd.f32 %v2110_v1, %v406_v2  ;;  %v288_v2 = vld [vmem:[%s2105_s20 + $0x390] sm:$0xff] }
  0x67   : > { %2029 = vst [vmem:[%s2142_s26 + $0x168] sm:$0xff] %v1893_v61   ;;  %v409_v12 = vmul.f32 %v2100_v0, %v274_v60  ;;  %v668_v14 = vmax.f32 %v540_v5, 0.0  ;;  %v542_v15 = vadd.f32 %v2110_v1, %v407_v6  ;;  %v410_v17 = vmul.f32 %v2100_v0, %v275_v3  ;;  %v289_v3 = vld [vmem:[%s2105_s20 + $0x398] sm:$0xff] }
  0x68   : > { %v543_v16 = vadd.f32 %v2110_v1, %v408_v7  ;;  %2030 = vst [vmem:[%s2142_s26 + $0x170] sm:$0xff] %v1898_v9   ;;  %v1903_v19 = vpack.c.bf16 %v667_v10, %v666_v4  ;;  %v669_v20 = vmax.f32 %v541_v11, 0.0  ;;  %v411_v22 = vmul.f32 %v2100_v0, %v276_v8  ;;  %v290_v8 = vld [vmem:[%s2105_s20 + $0x3a0] sm:$0xff] }
  0x69   : > { %v544_v21 = vadd.f32 %v2110_v1, %v409_v12  ;;  %v670_v24 = vmax.f32 %v542_v15, 0.0  ;;  %v545_v26 = vadd.f32 %v2110_v1, %v410_v17  ;;  %v412_v27 = vmul.f32 %v2100_v0, %v277_v13  ;;  %v2489_v1 = vld [vmem:[%s2580_s1] ss:$0 sm:$0xff]  ;;  %v291_v13 = vld [vmem:[%s2105_s20 + $0x3a8] sm:$0xff] }
  0x6a   : > { %v671_v25 = vmax.f32 %v543_v16, 0.0  ;;  %2031 = vst [vmem:[%s2142_s26 + $0x178] sm:$0xff] %v1903_v19   ;;  %v1908_v30 = vpack.c.bf16 %v669_v20, %v668_v14  ;;  %v546_v33 = vadd.f32 %v2483_v32, %v411_v22  ;;  %v413_v0 = vmul.f32 %v2489_v1, %v278_v18  ;;  %v292_v18 = vld [vmem:[%s2105_s20 + $0x3b0] sm:$0xff] }
  0x6b   : > { %v672_v31 = vmax.f32 %v544_v21, 0.0  ;;  %v673_v36 = vmax.f32 %v545_v26, 0.0  ;;  %v547_v37 = vadd.f32 %v2483_v32, %v412_v27  ;;  %v414_v38 = vmul.f32 %v2489_v1, %v279_v23  ;;  %v293_v23 = vld [vmem:[%s2105_s20 + $0x3b8] sm:$0xff] }
  0x6c   : > { %v1913_v35 = vpack.c.bf16 %v671_v25, %v670_v24  ;;  %2032 = vst [vmem:[%s2142_s26 + $0x180] sm:$0xff] %v1908_v30   ;;  %v674_v40 = vmax.f32 %v546_v33, 0.0  ;;  %v548_v41 = vadd.f32 %v2483_v32, %v413_v0  ;;  %v415_v42 = vmul.f32 %v2489_v1, %v280_v28  ;;  %v294_v28 = vld [vmem:[%s2105_s20 + $0x3c0] sm:$0xff]  ;;  %v295_v0 = vld [vmem:[%s2105_s20 + $0x3c8] sm:$0xff] }
  0x6d   : > { %v416_v43 = vmul.f32 %v2489_v1, %v281_v29  ;;  %v1918_v45 = vpack.c.bf16 %v673_v36, %v672_v31  ;;  %v675_v46 = vmax.f32 %v547_v37, 0.0  ;;  %v549_v47 = vadd.f32 %v2483_v32, %v414_v38  ;;  %v296_v38 = vld [vmem:[%s2105_s20 + $0x3d0] sm:$0xff] }
  0x6e   : > { %2033 = vst [vmem:[%s2142_s26 + $0x188] sm:$0xff] %v1913_v35   ;;  %v417_v48 = vmul.f32 %v2489_v1, %v282_v34  ;;  %v676_v50 = vmax.f32 %v548_v41, 0.0  ;;  %v550_v51 = vadd.f32 %v2483_v32, %v415_v42  ;;  %v418_v53 = vmul.f32 %v2489_v1, %v283_v39  ;;  %v297_v39 = vld [vmem:[%s2105_s20 + $0x3d8] sm:$0xff] }
  0x6f   : > { %v551_v52 = vadd.f32 %v2483_v32, %v416_v43  ;;  %2034 = vst [vmem:[%s2142_s26 + $0x190] sm:$0xff] %v1918_v45   ;;  %v1923_v55 = vpack.c.bf16 %v675_v46, %v674_v40  ;;  %v677_v56 = vmax.f32 %v549_v47, 0.0  ;;  %v419_v58 = vmul.f32 %v2489_v1, %v284_v44  ;;  %v298_v44 = vld [vmem:[%s2105_s20 + $0x3e0] sm:$0xff] }
  0x70   : > { %v552_v57 = vadd.f32 %v2483_v32, %v417_v48  ;;  %v678_v60 = vmax.f32 %v550_v51, 0.0  ;;  %v553_v62 = vadd.f32 %v2483_v32, %v418_v53  ;;  %v420_v63 = vmul.f32 %v2489_v1, %v285_v49  ;;  %v299_v49 = vld [vmem:[%s2105_s20 + $0x3e8] sm:$0xff] }
  0x71   : > { %v679_v61 = vmax.f32 %v551_v52, 0.0  ;;  %2035 = vst [vmem:[%s2142_s26 + $0x198] sm:$0xff] %v1923_v55   ;;  %v1928_v4 = vpack.c.bf16 %v677_v56, %v676_v50  ;;  %v554_v6 = vadd.f32 %v2483_v32, %v419_v58  ;;  %v421_v7 = vmul.f32 %v2489_v1, %v286_v54  ;;  %v300_v54 = vld [vmem:[%s2105_s20 + $0x3f0] sm:$0xff] }
  0x72   : > { %v680_v5 = vmax.f32 %v552_v57, 0.0  ;;  %v681_v10 = vmax.f32 %v553_v62, 0.0  ;;  %v555_v11 = vadd.f32 %v2483_v32, %v420_v63  ;;  %v422_v12 = vmul.f32 %v2489_v1, %v287_v59  ;;  %v301_v59 = vld [vmem:[%s2105_s20 + $0x3f8] sm:$0xff] }
  0x73   : > { %v1933_v9 = vpack.c.bf16 %v679_v61, %v678_v60  ;;  %2036 = vst [vmem:[%s2142_s26 + $0x1a0] sm:$0xff] %v1928_v4   ;;  %v682_v14 = vmax.f32 %v554_v6, 0.0  ;;  %v556_v15 = vadd.f32 %v2483_v32, %v421_v7  ;;  %v423_v16 = vmul.f32 %v2489_v1, %v288_v2 }
  0x74   : > { %v424_v17 = vmul.f32 %v2489_v1, %v289_v3  ;;  %v1938_v19 = vpack.c.bf16 %v681_v10, %v680_v5  ;;  %v683_v20 = vmax.f32 %v555_v11, 0.0  ;;  %v557_v21 = vadd.f32 %v2483_v32, %v422_v12 }
  0x75   : > { %2037 = vst [vmem:[%s2142_s26 + $0x1a8] sm:$0xff] %v1933_v9   ;;  %v425_v22 = vmul.f32 %v2489_v1, %v290_v8  ;;  %v684_v24 = vmax.f32 %v556_v15, 0.0  ;;  %v558_v25 = vadd.f32 %v2483_v32, %v423_v16  ;;  %v426_v27 = vmul.f32 %v2489_v1, %v291_v13 }
  0x76   : > { %v559_v26 = vadd.f32 %v2483_v32, %v424_v17  ;;  %2038 = vst [vmem:[%s2142_s26 + $0x1b0] sm:$0xff] %v1938_v19   ;;  %v1943_v29 = vpack.c.bf16 %v683_v20, %v682_v14  ;;  %v685_v30 = vmax.f32 %v557_v21, 0.0  ;;  %v427_v33 = vmul.f32 %v2489_v1, %v292_v18 }
  0x77   : > { %v560_v31 = vadd.f32 %v2483_v32, %v425_v22  ;;  %v686_v34 = vmax.f32 %v558_v25, 0.0  ;;  %v561_v36 = vadd.f32 %v2483_v32, %v426_v27  ;;  %v428_v37 = vmul.f32 %v2489_v1, %v293_v23 }
  0x78   : > { %v687_v35 = vmax.f32 %v559_v26, 0.0  ;;  %2039 = vst [vmem:[%s2142_s26 + $0x1b8] sm:$0xff] %v1943_v29   ;;  %v1948_v40 = vpack.c.bf16 %v685_v30, %v684_v24  ;;  %v562_v42 = vadd.f32 %v2483_v32, %v427_v33  ;;  %v429_v43 = vmul.f32 %v2489_v1, %v294_v28 }
  0x79   : > { %v688_v41 = vmax.f32 %v560_v31, 0.0  ;;  %v689_v46 = vmax.f32 %v561_v36, 0.0  ;;  %v563_v47 = vadd.f32 %v2483_v32, %v428_v37  ;;  %v430_v48 = vmul.f32 %v2489_v1, %v295_v0 }
  0x7a   : > { %v1953_v45 = vpack.c.bf16 %v687_v35, %v686_v34  ;;  %2040 = vst [vmem:[%s2142_s26 + $0x1c0] sm:$0xff] %v1948_v40   ;;  %v690_v50 = vmax.f32 %v562_v42, 0.0  ;;  %v564_v51 = vadd.f32 %v2483_v32, %v429_v43  ;;  %v431_v52 = vmul.f32 %v2489_v1, %v296_v38 }
  0x7b   : > { %v432_v53 = vmul.f32 %v2489_v1, %v297_v39  ;;  %v1958_v55 = vpack.c.bf16 %v689_v46, %v688_v41  ;;  %v691_v56 = vmax.f32 %v563_v47, 0.0  ;;  %v565_v57 = vadd.f32 %v2483_v32, %v430_v48 }
  0x7c   : > { %2041 = vst [vmem:[%s2142_s26 + $0x1c8] sm:$0xff] %v1953_v45   ;;  %v433_v58 = vmul.f32 %v2489_v1, %v298_v44  ;;  %v692_v60 = vmax.f32 %v564_v51, 0.0  ;;  %v566_v61 = vadd.f32 %v2483_v32, %v431_v52  ;;  %v434_v63 = vmul.f32 %v2489_v1, %v299_v49 }
  0x7d   : > { %v567_v62 = vadd.f32 %v2483_v32, %v432_v53  ;;  %2042 = vst [vmem:[%s2142_s26 + $0x1d0] sm:$0xff] %v1958_v55   ;;  %v1963_v2 = vpack.c.bf16 %v691_v56, %v690_v50  ;;  %v693_v3 = vmax.f32 %v565_v57, 0.0  ;;  %v435_v5 = vmul.f32 %v2489_v1, %v300_v54 }
  0x7e   : > { %v568_v4 = vadd.f32 %v2483_v32, %v433_v58  ;;  %v694_v6 = vmax.f32 %v566_v61, 0.0  ;;  %v569_v8 = vadd.f32 %v2483_v32, %v434_v63  ;;  %v436_v9 = vmul.f32 %v2489_v1, %v301_v59 }
  0x7f   : > { %v695_v7 = vmax.f32 %v567_v62, 0.0  ;;  %2043 = vst [vmem:[%s2142_s26 + $0x1d8] sm:$0xff] %v1963_v2   ;;  %v1968_v10 = vpack.c.bf16 %v693_v3, %v692_v60  ;;  %v570_v12 = vadd.f32 %v2483_v32, %v435_v5 }
  0x80   : > { %v696_v11 = vmax.f32 %v568_v4, 0.0  ;;  %v697_v14 = vmax.f32 %v569_v8, 0.0  ;;  %v571_v15 = vadd.f32 %v2483_v32, %v436_v9 }
  0x81   : > { %v1973_v13 = vpack.c.bf16 %v695_v7, %v694_v6  ;;  %2044 = vst [vmem:[%s2142_s26 + $0x1e0] sm:$0xff] %v1968_v10   ;;  %v698_v16 = vmax.f32 %v570_v12, 0.0 }
  0x82   : > { %v1978_v17 = vpack.c.bf16 %v697_v14, %v696_v11  ;;  %v699_v18 = vmax.f32 %v571_v15, 0.0 }
  0x83   : > { %2045 = vst [vmem:[%s2142_s26 + $0x1e8] sm:$0xff] %v1973_v13  }
  0x84   : > { %2046 = vst [vmem:[%s2142_s26 + $0x1f0] sm:$0xff] %v1978_v17   ;;  %v1983_v19 = vpack.c.bf16 %v699_v18, %v698_v16 }
  0x86   : > { %2047 = vst [vmem:[%s2142_s26 + $0x1f8] sm:$0xff] %v1983_v19  }
  0x87 PF: > { %s13_s12 = sadd.s32 1, %s2064_s12  }
  0x88   : > { %p10_p4 = scmp.ge.s32.totalorder %s13_s12, 4  }
  0x8a   :  { %12 = sbr.rel (!%p10_p4) target bundleno = 1 (0x1), region = 62 }

// kernel: generator_forward.17
= control target key start
LH: loop header
LB: loop body
LE: loop exit
PB: predicated region body
PF: predicated region fallthrough
CT: control target
= control target key end

     0   :  { %s2222_s9 = smov 0   ;;  %s2224_s10 = smov 0   ;;  %s2425_s0 = inlined_call_operand.vmem [shape: bf16[4,2048,512], index: 0, kind: input, shape index: {}]   ;;  %s2426_s1 = inlined_call_operand.vmem [shape: bf16[4,512,128], index: 1, kind: input, shape index: {}]   ;;  %s2427_s2 = inlined_call_operand.vmem [shape: f32[4,2048,128], index: 2, kind: output, shape index: {}]  }
   0x1   :  { %s2226_s11 = smov 0   ;;  %s2228_s12 = smov 0  }
   0x2   :  { %s2230_s13 = smov 0  }
   0x3 LB: > { %s34_s14 = sadd.s32 1, %s2197_s11  ;;  %s38_s15 = sadd.s32 1, %s2201_s12  ;;  %s2205_s13 = sphi %s2230_s13, %s12_s13   ;;  %s2201_s12 = sphi %s2228_s12, %s2431_s12   ;;  %s2197_s11 = sphi %s2226_s11, %s2430_s11   ;;  %s2193_s10 = sphi %s2224_s10, %s2429_s10   ;;  %s2189_s9 = sphi %s2222_s9, %s2428_s9  }
   0x4   : > { %p36_p0 = scmp.ge.s32.totalorder %s34_s14, 8  ;;  %p1602_p1 = scmp.ge.s32.totalorder %s2205_s13, 1 }
   0x5   : > { %p179_p2 = scmp.lt.s32.totalorder %s2205_s13, 33 }
   0x6   : > { %s2433_s14 = smov (%p36_p0, %s34_s14), 0  ;;  %s2435_s15 = smov (!%p36_p0, %s38_s15), %s2201_s12 }
   0x7   : > { %p180_p3 = pnand %p1602_p1, %p179_p2  ;;  %p40_p4 = scmp.ge.s32.totalorder %s2435_s15, 4 }
   0x8   : > { %p231_p5 = scmp.lt.s32.totalorder (!%p180_p3), %s2193_s10, 3  ;;  %s1603_s20 = sshll.u32 (!%p180_p3), %s2189_s9, 5 }
   0x9   : > { %s2437_s15 = smov (%p40_p4, %s2435_s15), 0  ;;  %183 = sbr.rel (%p180_p3) target bundleno = 406 (0x196), region = 28 }
   0xa   : > { %p233_p6 = scmp.lt.s32.totalorder (!%p180_p3), %s1603_s20, 255 }
  0x10   : > { %s2439_s10 = smov (!%p231_p5, %s2193_s10), 3  ;;  %s2441_s20 = smov (!%p233_p6, %s1603_s20), 255 }
  0x11   : > { %s1710_s16 = sshll.u32 %s2439_s10, 8  ;;  %s1605_s21 = sshll.u32 %s2439_s10, 10 }
  0x12   : > { %s2262_s19 = scalar_lea.vmem %s2426_s1, %s1710_s16  ;;  %s1604_s22 = sshll.u32 %s2441_s20, 2 }
  0x13   : > { %v1975_v0 = vld [vmem:[%s2262_s19 + $0x40] sm:$0xff]   ;;  %v1979_v4 = vld [vmem:[%s2262_s19 + $0x48] sm:$0xff]   ;;  %v1983_v8 = vld [vmem:[%s2262_s19 + $0x50] sm:$0xff]   ;;  %s240_s23 = sadd.s32 %s1605_s21, %s1604_s22  ;;  %s267_s28 = sadd.s32 %s1710_s16, %s2441_s20 }
  0x14   : > { %v1976_v1 = vld [vmem:[%s2262_s19 + $0xc0] sm:$0xff]   ;;  %1711 = vmatprep.subr.bf16.mxu0 %v1975_v0  ;;  %v1980_v5 = vld [vmem:[%s2262_s19 + $0xc8] sm:$0xff]   ;;  %v1984_v9 = vld [vmem:[%s2262_s19 + $0xd0] sm:$0xff]   ;;  %s1606_s24 = sshll.u32 %s240_s23, 2  ;;  %s1611_s29 = sshll.u32 %s267_s28, 3 }
  0x15   : > { %v1977_v2 = vld [vmem:[%s2262_s19] sm:$0xff]   ;;  %1823 = vmatprep.subr.bf16.mxu1 %v1976_v1  ;;  %v1981_v6 = vld [vmem:[%s2262_s19 + $0x8] sm:$0xff]   ;;  %v1985_v10 = vld [vmem:[%s2262_s19 + $0x10] sm:$0xff]   ;;  %s2302_s27 = scalar_lea.vmem %s2425_s0, %s1606_s24  ;;  %s2376_s4 = scalar_lea.vmem %s2427_s2, %s1611_s29 }
  0x16   : > { %v1978_v3 = vld [vmem:[%s2262_s19 + $0x80] sm:$0xff]   ;;  %1712 = vmatpush3.bf16.msra.mxu0 %v1977_v2  ;;  %v1982_v7 = vld [vmem:[%s2262_s19 + $0x88] sm:$0xff]   ;;  %v1986_v11 = vld [vmem:[%s2262_s19 + $0x90] sm:$0xff]  }
  0x17   : > { %1824 = vmatpush3.bf16.msra.mxu1 %v1978_v3  ;;  %1713 = vmatprep.subr.bf16.mxu0 %v1979_v4  ;;  %v1987_v12 = vld [vmem:[%s2262_s19 + $0x58] sm:$0xff]   ;;  %v1991_v16 = vld [vmem:[%s2262_s19 + $0x60] sm:$0xff]   ;;  %v1995_v20 = vld [vmem:[%s2262_s19 + $0x68] sm:$0xff]  }
  0x18   : > { %1825 = vmatprep.subr.bf16.mxu1 %v1980_v5  ;;  %v1988_v13 = vld [vmem:[%s2262_s19 + $0xd8] sm:$0xff]   ;;  %v1992_v17 = vld [vmem:[%s2262_s19 + $0xe0] sm:$0xff]   ;;  %v1996_v21 = vld [vmem:[%s2262_s19 + $0xe8] sm:$0xff]  }
  0x19   : > { %v1989_v14 = vld [vmem:[%s2262_s19 + $0x18] sm:$0xff]   ;;  %v1993_v18 = vld [vmem:[%s2262_s19 + $0x20] sm:$0xff]   ;;  %v1997_v22 = vld [vmem:[%s2262_s19 + $0x28] sm:$0xff]  }
  0x1a   : > { %1714 = vmatpush3.bf16.msra.mxu0 %v1981_v6  ;;  %v1990_v15 = vld [vmem:[%s2262_s19 + $0x98] sm:$0xff]   ;;  %v1994_v19 = vld [vmem:[%s2262_s19 + $0xa0] sm:$0xff]   ;;  %v1998_v23 = vld [vmem:[%s2262_s19 + $0xa8] sm:$0xff]  }
  0x1b   : > { %1826 = vmatpush3.bf16.msra.mxu1 %v1982_v7  ;;  %1715 = vmatprep.subr.bf16.mxu0 %v1983_v8  ;;  %v1999_v24 = vld [vmem:[%s2262_s19 + $0x70] sm:$0xff]   ;;  %v2003_v28 = vld [vmem:[%s2262_s19 + $0x78] sm:$0xff]  }
  0x1c   : > { %1827 = vmatprep.subr.bf16.mxu1 %v1984_v9  ;;  %v2000_v25 = vld [vmem:[%s2262_s19 + $0xf0] sm:$0xff]   ;;  %v2004_v29 = vld [vmem:[%s2262_s19 + $0xf8] sm:$0xff]  }
  0x1d   : > { %v2001_v26 = vld [vmem:[%s2262_s19 + $0x30] sm:$0xff]   ;;  %v2005_v30 = vld [vmem:[%s2262_s19 + $0x38] sm:$0xff]  }
  0x1e   : > { %1716 = vmatpush3.bf16.msra.mxu0 %v1985_v10  ;;  %v2002_v27 = vld [vmem:[%s2262_s19 + $0xb0] sm:$0xff]   ;;  %v2006_v31 = vld [vmem:[%s2262_s19 + $0xb8] sm:$0xff]  }
  0x1f   : > { %1828 = vmatpush3.bf16.msra.mxu1 %v1986_v11  ;;  %1717 = vmatprep.subr.bf16.mxu0 %v1987_v12  ;;  %v2007_v32 = vld [vmem:[%s2302_s27] ss:$16 sps:$4 sm:$0xff]   ;;  %v2009_v33 = vld [vmem:[%s2302_s27 + $0x4] ss:$16 sps:$4 sm:$0xff]   ;;  %v2010_v34 = vld [vmem:[%s2302_s27 + $0x8] ss:$16 sps:$4 sm:$0xff]  }
  0x20   : > { %1829 = vmatprep.subr.bf16.mxu1 %v1988_v13  ;;  %v2012_v35 = vld [vmem:[%s2302_s27 + $0xc] ss:$16 sps:$4 sm:$0xff]   ;;  %1012 = vmatprep.mubr.bf16.mxu0 %v2009_v33  ;;  %v2013_v36 = vld [vmem:[%s2302_s27 + $0x24] ss:$16 sps:$4 sm:$0xff]   ;;  %v2017_v38 = vld [vmem:[%s2302_s27 + $0x20] ss:$16 sps:$4 sm:$0xff]  }
  0x21   : > { %1173 = vmatprep.mubr.bf16.mxu1 %v2012_v35  ;;  %v2015_v37 = vld [vmem:[%s2302_s27 + $0x2c] ss:$16 sps:$4 sm:$0xff]   ;;  %v2018_v39 = vld [vmem:[%s2302_s27 + $0x28] ss:$16 sps:$4 sm:$0xff]   ;;  %v2019_v40 = vld [vmem:[%s2302_s27 + $0x44] ss:$16 sps:$4 sm:$0xff]  }
  0x22   : > { %1718 = vmatpush3.bf16.msra.mxu0 %v1989_v14  ;;  %v2021_v41 = vld [vmem:[%s2302_s27 + $0x4c] ss:$16 sps:$4 sm:$0xff]   ;;  %v2023_v42 = vld [vmem:[%s2302_s27 + $0x40] ss:$16 sps:$4 sm:$0xff]   ;;  %v2024_v43 = vld [vmem:[%s2302_s27 + $0x48] ss:$16 sps:$4 sm:$0xff]  }
  0x23   : > { %1830 = vmatpush3.bf16.msra.mxu1 %v1990_v15  ;;  %1719 = vmatprep.subr.bf16.mxu0 %v1991_v16  ;;  %v2025_v44 = vld [vmem:[%s2302_s27 + $0x64] ss:$16 sps:$4 sm:$0xff]   ;;  %v2027_v45 = vld [vmem:[%s2302_s27 + $0x6c] ss:$16 sps:$4 sm:$0xff]   ;;  %v2029_v46 = vld [vmem:[%s2302_s27 + $0x60] ss:$16 sps:$4 sm:$0xff]  }
  0x24   : > { %1831 = vmatprep.subr.bf16.mxu1 %v1992_v17  ;;  %v2030_v47 = vld [vmem:[%s2302_s27 + $0x68] ss:$16 sps:$4 sm:$0xff]   ;;  %v2031_v48 = vld [vmem:[%s2302_s27 + $0x84] ss:$16 sps:$4 sm:$0xff]   ;;  %v2033_v49 = vld [vmem:[%s2302_s27 + $0x8c] ss:$16 sps:$4 sm:$0xff]  }
  0x25   : > { %v2035_v50 = vld [vmem:[%s2302_s27 + $0x80] ss:$16 sps:$4 sm:$0xff]   ;;  %v2036_v51 = vld [vmem:[%s2302_s27 + $0x88] ss:$16 sps:$4 sm:$0xff]   ;;  %v2037_v52 = vld [vmem:[%s2302_s27 + $0xa4] ss:$16 sps:$4 sm:$0xff]  }
  0x26   : > { %1720 = vmatpush3.bf16.msra.mxu0 %v1993_v18  ;;  %v2039_v53 = vld [vmem:[%s2302_s27 + $0xac] ss:$16 sps:$4 sm:$0xff]   ;;  %v2041_v54 = vld [vmem:[%s2302_s27 + $0xa0] ss:$16 sps:$4 sm:$0xff]   ;;  %v2042_v55 = vld [vmem:[%s2302_s27 + $0xa8] ss:$16 sps:$4 sm:$0xff]  }
  0x27   : > { %1832 = vmatpush3.bf16.msra.mxu1 %v1994_v19  ;;  %1721 = vmatprep.subr.bf16.mxu0 %v1995_v20  ;;  %v2043_v56 = vld [vmem:[%s2302_s27 + $0xc4] ss:$16 sps:$4 sm:$0xff]   ;;  %v2045_v57 = vld [vmem:[%s2302_s27 + $0xcc] ss:$16 sps:$4 sm:$0xff]   ;;  %v2047_v58 = vld [vmem:[%s2302_s27 + $0xc0] ss:$16 sps:$4 sm:$0xff]  }
  0x28   : > { %1833 = vmatprep.subr.bf16.mxu1 %v1996_v21  ;;  %v2048_v59 = vld [vmem:[%s2302_s27 + $0xc8] ss:$16 sps:$4 sm:$0xff]   ;;  %v2049_v60 = vld [vmem:[%s2302_s27 + $0xe4] ss:$16 sps:$4 sm:$0xff]   ;;  %v2051_v61 = vld [vmem:[%s2302_s27 + $0xec] ss:$16 sps:$4 sm:$0xff]  }
  0x29   : > { %v2053_v62 = vld [vmem:[%s2302_s27 + $0xe0] ss:$16 sps:$4 sm:$0xff]   ;;  %v2054_v63 = vld [vmem:[%s2302_s27 + $0xe8] ss:$16 sps:$4 sm:$0xff]   ;;  %v2055_v0 = vld [vmem:[%s2302_s27 + $0x104] ss:$16 sps:$4 sm:$0xff]  }
  0x2a   : > { %1722 = vmatpush3.bf16.msra.mxu0 %v1997_v22  ;;  %v2057_v1 = vld [vmem:[%s2302_s27 + $0x10c] ss:$16 sps:$4 sm:$0xff]   ;;  %v2059_v2 = vld [vmem:[%s2302_s27 + $0x100] ss:$16 sps:$4 sm:$0xff]   ;;  %v2060_v3 = vld [vmem:[%s2302_s27 + $0x108] ss:$16 sps:$4 sm:$0xff]  }
  0x2b   : > { %1834 = vmatpush3.bf16.msra.mxu1 %v1998_v23  ;;  %1723 = vmatprep.subr.bf16.mxu0 %v1999_v24  ;;  %v2061_v4 = vld [vmem:[%s2302_s27 + $0x124] ss:$16 sps:$4 sm:$0xff]   ;;  %v2063_v5 = vld [vmem:[%s2302_s27 + $0x12c] ss:$16 sps:$4 sm:$0xff]   ;;  %v2065_v6 = vld [vmem:[%s2302_s27 + $0x120] ss:$16 sps:$4 sm:$0xff]  }
  0x2c   : > { %1835 = vmatprep.subr.bf16.mxu1 %v2000_v25  ;;  %v2066_v7 = vld [vmem:[%s2302_s27 + $0x128] ss:$16 sps:$4 sm:$0xff]   ;;  %v2067_v8 = vld [vmem:[%s2302_s27 + $0x144] ss:$16 sps:$4 sm:$0xff]   ;;  %v2069_v9 = vld [vmem:[%s2302_s27 + $0x14c] ss:$16 sps:$4 sm:$0xff]  }
  0x2d   : > { %v2071_v10 = vld [vmem:[%s2302_s27 + $0x140] ss:$16 sps:$4 sm:$0xff]   ;;  %v2072_v11 = vld [vmem:[%s2302_s27 + $0x148] ss:$16 sps:$4 sm:$0xff]   ;;  %v2073_v12 = vld [vmem:[%s2302_s27 + $0x164] ss:$16 sps:$4 sm:$0xff]  }
  0x2e   : > { %1724 = vmatpush3.bf16.msra.mxu0 %v2001_v26  ;;  %v2075_v13 = vld [vmem:[%s2302_s27 + $0x16c] ss:$16 sps:$4 sm:$0xff]   ;;  %v2077_v14 = vld [vmem:[%s2302_s27 + $0x160] ss:$16 sps:$4 sm:$0xff]   ;;  %v2078_v15 = vld [vmem:[%s2302_s27 + $0x168] ss:$16 sps:$4 sm:$0xff]  }
  0x2f   : > { %1836 = vmatpush3.bf16.msra.mxu1 %v2002_v27  ;;  %1725 = vmatprep.subr.bf16.mxu0 %v2003_v28  ;;  %v2079_v16 = vld [vmem:[%s2302_s27 + $0x184] ss:$16 sps:$4 sm:$0xff]   ;;  %v2081_v17 = vld [vmem:[%s2302_s27 + $0x18c] ss:$16 sps:$4 sm:$0xff]   ;;  %v2083_v18 = vld [vmem:[%s2302_s27 + $0x180] ss:$16 sps:$4 sm:$0xff]  }
  0x30   : > { %1837 = vmatprep.subr.bf16.mxu1 %v2004_v29  ;;  %v2084_v19 = vld [vmem:[%s2302_s27 + $0x188] ss:$16 sps:$4 sm:$0xff]   ;;  %v2085_v20 = vld [vmem:[%s2302_s27 + $0x1a4] ss:$16 sps:$4 sm:$0xff]   ;;  %v2087_v21 = vld [vmem:[%s2302_s27 + $0x1ac] ss:$16 sps:$4 sm:$0xff]  }
  0x31   : > { %v2089_v22 = vld [vmem:[%s2302_s27 + $0x1a0] ss:$16 sps:$4 sm:$0xff]   ;;  %v2090_v23 = vld [vmem:[%s2302_s27 + $0x1a8] ss:$16 sps:$4 sm:$0xff]   ;;  %v2091_v24 = vld [vmem:[%s2302_s27 + $0x1c4] ss:$16 sps:$4 sm:$0xff]  }
  0x32   : > { %1726 = vmatpush3.bf16.msra.mxu0 %v2005_v30  ;;  %v2093_v25 = vld [vmem:[%s2302_s27 + $0x1cc] ss:$16 sps:$4 sm:$0xff]   ;;  %v2095_v26 = vld [vmem:[%s2302_s27 + $0x1c0] ss:$16 sps:$4 sm:$0xff]   ;;  %v2096_v27 = vld [vmem:[%s2302_s27 + $0x1c8] ss:$16 sps:$4 sm:$0xff]  }
  0x33   : > { %1838 = vmatpush3.bf16.msra.mxu1 %v2006_v31  ;;  %v2097_v28 = vld [vmem:[%s2302_s27 + $0x1e4] ss:$16 sps:$4 sm:$0xff]   ;;  %v2099_v29 = vld [vmem:[%s2302_s27 + $0x1ec] ss:$16 sps:$4 sm:$0xff]   ;;  %v2101_v30 = vld [vmem:[%s2302_s27 + $0x1e0] ss:$16 sps:$4 sm:$0xff]  }
  0x34   : > { %v2102_v31 = vld [vmem:[%s2302_s27 + $0x1e8] ss:$16 sps:$4 sm:$0xff]  }
  0x35   : > { %1013 = vmatmul.mubr.bf16.vlgmr.msra.gmra.mrb[0].mxu0 %v2007_v32 }
  0x36   : > { %1174 = vmatmul.mubr.bf16.vlgmr.msra.gmra.mrb[0].mxu1 %v2010_v34  ;;  %1020 = vmatprep.mubr.bf16.mxu0 %v2013_v36 }
  0x37   : > { %1181 = vmatprep.mubr.bf16.mxu1 %v2015_v37 }
  0x3d   : > { %1021 = vmatmul.mubr.bf16.gmra.mrb[4].mxu0 %v2017_v38 }
  0x3e   : > { %1182 = vmatmul.mubr.bf16.gmra.mrb[4].mxu1 %v2018_v39  ;;  %1028 = vmatprep.mubr.bf16.mxu0 %v2019_v40 }
  0x3f   : > { %1189 = vmatprep.mubr.bf16.mxu1 %v2021_v41 }
  0x45   : > { %1029 = vmatmul.mubr.bf16.gmra.mrb[8].mxu0 %v2023_v42 }
  0x46   : > { %1190 = vmatmul.mubr.bf16.gmra.mrb[8].mxu1 %v2024_v43  ;;  %1036 = vmatprep.mubr.bf16.mxu0 %v2025_v44 }
  0x47   : > { %1197 = vmatprep.mubr.bf16.mxu1 %v2027_v45 }
  0x4d   : > { %1037 = vmatmul.mubr.bf16.gmra.mrb[12].mxu0 %v2029_v46 }
  0x4e   : > { %1198 = vmatmul.mubr.bf16.gmra.mrb[12].mxu1 %v2030_v47  ;;  %1044 = vmatprep.mubr.bf16.mxu0 %v2031_v48 }
  0x4f   : > { %1205 = vmatprep.mubr.bf16.mxu1 %v2033_v49 }
  0x55   : > { %1045 = vmatmul.mubr.bf16.gmra.mrb[16].mxu0 %v2035_v50 }
  0x56   : > { %1206 = vmatmul.mubr.bf16.gmra.mrb[16].mxu1 %v2036_v51  ;;  %1052 = vmatprep.mubr.bf16.mxu0 %v2037_v52 }
  0x57   : > { %1213 = vmatprep.mubr.bf16.mxu1 %v2039_v53 }
  0x5d   : > { %1053 = vmatmul.mubr.bf16.gmra.mrb[20].mxu0 %v2041_v54 }
  0x5e   : > { %1214 = vmatmul.mubr.bf16.gmra.mrb[20].mxu1 %v2042_v55  ;;  %1060 = vmatprep.mubr.bf16.mxu0 %v2043_v56 }
  0x5f   : > { %1221 = vmatprep.mubr.bf16.mxu1 %v2045_v57 }
  0x65   : > { %1061 = vmatmul.mubr.bf16.gmra.mrb[24].mxu0 %v2047_v58 }
  0x66   : > { %1222 = vmatmul.mubr.bf16.gmra.mrb[24].mxu1 %v2048_v59  ;;  %1068 = vmatprep.mubr.bf16.mxu0 %v2049_v60 }
  0x67   : > { %1229 = vmatprep.mubr.bf16.mxu1 %v2051_v61 }
  0x6d   : > { %1069 = vmatmul.mubr.bf16.gmra.mrb[28].mxu0 %v2053_v62 }
  0x6e   : > { %1230 = vmatmul.mubr.bf16.gmra.mrb[28].mxu1 %v2054_v63  ;;  %1076 = vmatprep.mubr.bf16.mxu0 %v2055_v0 }
  0x6f   : > { %1237 = vmatprep.mubr.bf16.mxu1 %v2057_v1 }
  0x75   : > { %1077 = vmatmul.mubr.bf16.gmra.mrb[32].mxu0 %v2059_v2 }
  0x76   : > { %1238 = vmatmul.mubr.bf16.gmra.mrb[32].mxu1 %v2060_v3  ;;  %1084 = vmatprep.mubr.bf16.mxu0 %v2061_v4 }
  0x77   : > { %1245 = vmatprep.mubr.bf16.mxu1 %v2063_v5 }
  0x7d   : > { %1085 = vmatmul.mubr.bf16.gmra.mrb[36].mxu0 %v2065_v6 }
  0x7e   : > { %1246 = vmatmul.mubr.bf16.gmra.mrb[36].mxu1 %v2066_v7  ;;  %1092 = vmatprep.mubr.bf16.mxu0 %v2067_v8 }
  0x7f   : > { %1253 = vmatprep.mubr.bf16.mxu1 %v2069_v9 }
  0x85   : > { %1093 = vmatmul.mubr.bf16.gmra.mrb[40].mxu0 %v2071_v10 }
  0x86   : > { %1254 = vmatmul.mubr.bf16.gmra.mrb[40].mxu1 %v2072_v11  ;;  %1100 = vmatprep.mubr.bf16.mxu0 %v2073_v12 }
  0x87   : > { %1261 = vmatprep.mubr.bf16.mxu1 %v2075_v13 }
  0x8d   : > { %1101 = vmatmul.mubr.bf16.gmra.mrb[44].mxu0 %v2077_v14 }
  0x8e   : > { %1262 = vmatmul.mubr.bf16.gmra.mrb[44].mxu1 %v2078_v15  ;;  %1108 = vmatprep.mubr.bf16.mxu0 %v2079_v16 }
  0x8f   : > { %1269 = vmatprep.mubr.bf16.mxu1 %v2081_v17 }
  0x95   : > { %1109 = vmatmul.mubr.bf16.gmra.mrb[48].mxu0 %v2083_v18 }
  0x96   : > { %1270 = vmatmul.mubr.bf16.gmra.mrb[48].mxu1 %v2084_v19  ;;  %1116 = vmatprep.mubr.bf16.mxu0 %v2085_v20 }
  0x97   : > { %1277 = vmatprep.mubr.bf16.mxu1 %v2087_v21 }
  0x9d   : > { %1117 = vmatmul.mubr.bf16.gmra.mrb[52].mxu0 %v2089_v22 }
  0x9e   : > { %1278 = vmatmul.mubr.bf16.gmra.mrb[52].mxu1 %v2090_v23  ;;  %1124 = vmatprep.mubr.bf16.mxu0 %v2091_v24 }
  0x9f   : > { %1285 = vmatprep.mubr.bf16.mxu1 %v2093_v25 }
  0xa5   : > { %1125 = vmatmul.mubr.bf16.gmra.mrb[56].mxu0 %v2095_v26 }
  0xa6   : > { %1286 = vmatmul.mubr.bf16.gmra.mrb[56].mxu1 %v2096_v27  ;;  %1132 = vmatprep.mubr.bf16.mxu0 %v2097_v28 }
  0xa7   : > { %1293 = vmatprep.mubr.bf16.mxu1 %v2099_v29 }
  0xad   : > { %1133 = vmatmul.mubr.bf16.gmra.mrb[60].mxu0 %v2101_v30 }
  0xae   : > { %1294 = vmatmul.mubr.bf16.gmra.mrb[60].mxu1 %v2102_v31 }
 0x108   : > { %v1727_v32 = vpop.f32.mrb[0].mxu0 }
 0x109   : > { %v1839_v33 = vpop.f32.mrb[0].mxu1  ;;  %v1728_v34 = vpop.f32.mrb[1].mxu0 }
 0x10a   : > { %v1729_v35 = vadd.f32 %v1728_v34, %v1727_v32  ;;  %v1840_v36 = vpop.f32.mrb[1].mxu1  ;;  %v1730_v37 = vpop.f32.mrb[2].mxu0 }
 0x10b   : > { %v1841_v38 = vadd.f32 %v1840_v36, %v1839_v33  ;;  %v1842_v39 = vpop.f32.mrb[2].mxu1  ;;  %v1731_v40 = vpop.f32.mrb[3].mxu0 }
 0x10c   : > { %v1732_v41 = vadd.f32 %v1731_v40, %v1730_v37  ;;  %v1843_v42 = vpop.f32.mrb[3].mxu1 }
 0x10d   : > { %v1176_v43 = vadd.f32 %v1841_v38, %v1729_v35  ;;  %v1844_v44 = vadd.f32 %v1843_v42, %v1842_v39 }
 0x10f   : > { %2103 = vtanh.f32 %v1176_v43  ;;  %v1179_v45 = vadd.f32 %v1844_v44, %v1732_v41 }
 0x110   : > { %v1733_v46 = vpop.f32.mrb[4].mxu0 }
 0x111   : > { %2105 = vtanh.f32 %v1179_v45  ;;  %v1845_v47 = vpop.f32.mrb[4].mxu1  ;;  %v1734_v48 = vpop.f32.mrb[5].mxu0 }
 0x112   : > { %v1735_v49 = vadd.f32 %v1734_v48, %v1733_v46  ;;  %v1846_v50 = vpop.f32.mrb[5].mxu1  ;;  %v1736_v51 = vpop.f32.mrb[6].mxu0 }
 0x113   : > { %v1847_v52 = vadd.f32 %v1846_v50, %v1845_v47  ;;  %v1848_v53 = vpop.f32.mrb[6].mxu1  ;;  %v1737_v54 = vpop.f32.mrb[7].mxu0 }
 0x114   : > { %v1738_v55 = vadd.f32 %v1737_v54, %v1736_v51  ;;  %v1849_v56 = vpop.f32.mrb[7].mxu1 }
 0x115   : > { %v1184_v57 = vadd.f32 %v1847_v52, %v1735_v49  ;;  %v1850_v58 = vadd.f32 %v1849_v56, %v1848_v53 }
 0x117   : > { %2107 = vtanh.f32 %v1184_v57  ;;  %v1187_v59 = vadd.f32 %v1850_v58, %v1738_v55 }
 0x118   : > { %v1739_v60 = vpop.f32.mrb[8].mxu0 }
 0x119   : > { %v2104_v61 = vpop.eup %2103  ;;  %2109 = vtanh.f32 %v1187_v59  ;;  %v1851_v62 = vpop.f32.mrb[8].mxu1 }
 0x11a   : > { %v1740_v63 = vpop.f32.mrb[9].mxu0  ;;  %1433 = vst [vmem:[%s2376_s4] sm:$0xff] %v2104_v61  ;;  %v1852_v1 = vpop.f32.mrb[9].mxu1 }
 0x11b   : > { %v1741_v0 = vadd.f32 %v1740_v63, %v1739_v60  ;;  %v1742_v2 = vpop.f32.mrb[10].mxu0  ;;  %v2106_v3 = vpop.eup %2105  ;;  %v1853_v4 = vadd.f32 %v1852_v1, %v1851_v62 }
 0x11c   : > { %v1854_v5 = vpop.f32.mrb[10].mxu1  ;;  %v1743_v6 = vpop.f32.mrb[11].mxu0  ;;  %1434 = vst [vmem:[%s2376_s4 + $0x8] sm:$0xff] %v2106_v3 }
 0x11d   : > { %v1744_v7 = vadd.f32 %v1743_v6, %v1742_v2  ;;  %v1855_v8 = vpop.f32.mrb[11].mxu1  ;;  %v1192_v9 = vadd.f32 %v1853_v4, %v1741_v0 }
 0x11e   : > { %v1856_v10 = vadd.f32 %v1855_v8, %v1854_v5 }
 0x11f   : > { %2111 = vtanh.f32 %v1192_v9 }
 0x120   : > { %v1195_v11 = vadd.f32 %v1856_v10, %v1744_v7  ;;  %v1745_v12 = vpop.f32.mrb[12].mxu0 }
 0x121   : > { %v2108_v13 = vpop.eup %2107  ;;  %v1857_v14 = vpop.f32.mrb[12].mxu1 }
 0x122   : > { %2113 = vtanh.f32 %v1195_v11  ;;  %v1746_v15 = vpop.f32.mrb[13].mxu0  ;;  %1435 = vst [vmem:[%s2376_s4 + $0x10] sm:$0xff] %v2108_v13  ;;  %v1858_v17 = vpop.f32.mrb[13].mxu1 }
 0x123   : > { %v1747_v16 = vadd.f32 %v1746_v15, %v1745_v12  ;;  %v1748_v18 = vpop.f32.mrb[14].mxu0  ;;  %v2110_v19 = vpop.eup %2109  ;;  %v1859_v20 = vadd.f32 %v1858_v17, %v1857_v14 }
 0x124   : > { %v1860_v21 = vpop.f32.mrb[14].mxu1  ;;  %v1749_v22 = vpop.f32.mrb[15].mxu0  ;;  %1436 = vst [vmem:[%s2376_s4 + $0x18] sm:$0xff] %v2110_v19 }
 0x125   : > { %v1750_v23 = vadd.f32 %v1749_v22, %v1748_v18  ;;  %v1861_v24 = vpop.f32.mrb[15].mxu1  ;;  %v1200_v25 = vadd.f32 %v1859_v20, %v1747_v16 }
 0x126   : > { %v1862_v26 = vadd.f32 %v1861_v24, %v1860_v21 }
 0x127   : > { %2115 = vtanh.f32 %v1200_v25 }
 0x128   : > { %v1203_v27 = vadd.f32 %v1862_v26, %v1750_v23  ;;  %v1751_v28 = vpop.f32.mrb[16].mxu0 }
 0x129   : > { %v2112_v29 = vpop.eup %2111  ;;  %v1863_v30 = vpop.f32.mrb[16].mxu1 }
 0x12a   : > { %2117 = vtanh.f32 %v1203_v27  ;;  %v1752_v31 = vpop.f32.mrb[17].mxu0  ;;  %1437 = vst [vmem:[%s2376_s4 + $0x20] sm:$0xff] %v2112_v29  ;;  %v1864_v33 = vpop.f32.mrb[17].mxu1 }
 0x12b   : > { %v1753_v32 = vadd.f32 %v1752_v31, %v1751_v28  ;;  %v1754_v34 = vpop.f32.mrb[18].mxu0  ;;  %v1865_v36 = vadd.f32 %v1864_v33, %v1863_v30  ;;  %v1866_v37 = vpop.f32.mrb[18].mxu1 }
 0x12c   : > { %v2114_v35 = vpop.eup %2113  ;;  %v1755_v38 = vpop.f32.mrb[19].mxu0 }
 0x12d   : > { %1438 = vst [vmem:[%s2376_s4 + $0x28] sm:$0xff] %v2114_v35  ;;  %v1756_v39 = vadd.f32 %v1755_v38, %v1754_v34  ;;  %v1867_v40 = vpop.f32.mrb[19].mxu1  ;;  %v1208_v41 = vadd.f32 %v1865_v36, %v1753_v32 }
 0x12e   : > { %v1868_v42 = vadd.f32 %v1867_v40, %v1866_v37 }
 0x12f   : > { %2119 = vtanh.f32 %v1208_v41 }
 0x130   : > { %v1211_v43 = vadd.f32 %v1868_v42, %v1756_v39  ;;  %v1757_v44 = vpop.f32.mrb[20].mxu0 }
 0x131   : > { %v2116_v45 = vpop.eup %2115  ;;  %v1869_v46 = vpop.f32.mrb[20].mxu1 }
 0x132   : > { %2121 = vtanh.f32 %v1211_v43  ;;  %v1758_v47 = vpop.f32.mrb[21].mxu0  ;;  %1439 = vst [vmem:[%s2376_s4 + $0x30] sm:$0xff] %v2116_v45  ;;  %v1870_v49 = vpop.f32.mrb[21].mxu1 }
 0x133   : > { %v1759_v48 = vadd.f32 %v1758_v47, %v1757_v44  ;;  %v1760_v50 = vpop.f32.mrb[22].mxu0  ;;  %v1871_v52 = vadd.f32 %v1870_v49, %v1869_v46  ;;  %v1872_v53 = vpop.f32.mrb[22].mxu1 }
 0x134   : > { %v2118_v51 = vpop.eup %2117  ;;  %v1761_v54 = vpop.f32.mrb[23].mxu0 }
 0x135   : > { %1440 = vst [vmem:[%s2376_s4 + $0x38] sm:$0xff] %v2118_v51  ;;  %v1762_v55 = vadd.f32 %v1761_v54, %v1760_v50  ;;  %v1873_v56 = vpop.f32.mrb[23].mxu1  ;;  %v1216_v57 = vadd.f32 %v1871_v52, %v1759_v48 }
 0x136   : > { %v1874_v58 = vadd.f32 %v1873_v56, %v1872_v53 }
 0x137   : > { %2123 = vtanh.f32 %v1216_v57 }
 0x138   : > { %v1219_v59 = vadd.f32 %v1874_v58, %v1762_v55  ;;  %v1763_v60 = vpop.f32.mrb[24].mxu0 }
 0x139   : > { %v2120_v61 = vpop.eup %2119  ;;  %v1875_v62 = vpop.f32.mrb[24].mxu1 }
 0x13a   : > { %2125 = vtanh.f32 %v1219_v59  ;;  %v1764_v63 = vpop.f32.mrb[25].mxu0  ;;  %1441 = vst [vmem:[%s2376_s4 + $0x40] sm:$0xff] %v2120_v61  ;;  %v1876_v1 = vpop.f32.mrb[25].mxu1 }
 0x13b   : > { %v1765_v0 = vadd.f32 %v1764_v63, %v1763_v60  ;;  %v1766_v2 = vpop.f32.mrb[26].mxu0  ;;  %v1877_v4 = vadd.f32 %v1876_v1, %v1875_v62  ;;  %v1878_v5 = vpop.f32.mrb[26].mxu1 }
 0x13c   : > { %v2122_v3 = vpop.eup %2121  ;;  %v1767_v6 = vpop.f32.mrb[27].mxu0 }
 0x13d   : > { %1442 = vst [vmem:[%s2376_s4 + $0x48] sm:$0xff] %v2122_v3  ;;  %v1768_v7 = vadd.f32 %v1767_v6, %v1766_v2  ;;  %v1879_v8 = vpop.f32.mrb[27].mxu1  ;;  %v1224_v9 = vadd.f32 %v1877_v4, %v1765_v0 }
 0x13e   : > { %v1880_v10 = vadd.f32 %v1879_v8, %v1878_v5 }
 0x13f   : > { %2127 = vtanh.f32 %v1224_v9 }
 0x140   : > { %v1227_v11 = vadd.f32 %v1880_v10, %v1768_v7  ;;  %v1769_v12 = vpop.f32.mrb[28].mxu0 }
 0x141   : > { %v2124_v13 = vpop.eup %2123  ;;  %v1881_v14 = vpop.f32.mrb[28].mxu1 }
 0x142   : > { %2129 = vtanh.f32 %v1227_v11  ;;  %v1770_v15 = vpop.f32.mrb[29].mxu0  ;;  %1443 = vst [vmem:[%s2376_s4 + $0x50] sm:$0xff] %v2124_v13  ;;  %v1882_v17 = vpop.f32.mrb[29].mxu1 }
 0x143   : > { %v1771_v16 = vadd.f32 %v1770_v15, %v1769_v12  ;;  %v1772_v18 = vpop.f32.mrb[30].mxu0  ;;  %v1883_v20 = vadd.f32 %v1882_v17, %v1881_v14  ;;  %v1884_v21 = vpop.f32.mrb[30].mxu1 }
 0x144   : > { %v2126_v19 = vpop.eup %2125  ;;  %v1773_v22 = vpop.f32.mrb[31].mxu0 }
 0x145   : > { %1444 = vst [vmem:[%s2376_s4 + $0x58] sm:$0xff] %v2126_v19  ;;  %v1774_v23 = vadd.f32 %v1773_v22, %v1772_v18  ;;  %v1885_v24 = vpop.f32.mrb[31].mxu1  ;;  %v1232_v25 = vadd.f32 %v1883_v20, %v1771_v16 }
 0x146   : > { %v1886_v26 = vadd.f32 %v1885_v24, %v1884_v21 }
 0x147   : > { %2131 = vtanh.f32 %v1232_v25 }
 0x148   : > { %v1235_v27 = vadd.f32 %v1886_v26, %v1774_v23  ;;  %v1775_v28 = vpop.f32.mrb[32].mxu0 }
 0x149   : > { %v2128_v29 = vpop.eup %2127  ;;  %v1887_v30 = vpop.f32.mrb[32].mxu1 }
 0x14a   : > { %2133 = vtanh.f32 %v1235_v27  ;;  %v1776_v31 = vpop.f32.mrb[33].mxu0  ;;  %1445 = vst [vmem:[%s2376_s4 + $0x60] sm:$0xff] %v2128_v29  ;;  %v1888_v33 = vpop.f32.mrb[33].mxu1 }
 0x14b   : > { %v1777_v32 = vadd.f32 %v1776_v31, %v1775_v28  ;;  %v1778_v34 = vpop.f32.mrb[34].mxu0  ;;  %v1889_v36 = vadd.f32 %v1888_v33, %v1887_v30  ;;  %v1890_v37 = vpop.f32.mrb[34].mxu1 }
 0x14c   : > { %v2130_v35 = vpop.eup %2129  ;;  %v1779_v38 = vpop.f32.mrb[35].mxu0 }
 0x14d   : > { %1446 = vst [vmem:[%s2376_s4 + $0x68] sm:$0xff] %v2130_v35  ;;  %v1780_v39 = vadd.f32 %v1779_v38, %v1778_v34  ;;  %v1891_v40 = vpop.f32.mrb[35].mxu1  ;;  %v1240_v41 = vadd.f32 %v1889_v36, %v1777_v32 }
 0x14e   : > { %v1892_v42 = vadd.f32 %v1891_v40, %v1890_v37 }
 0x14f   : > { %2135 = vtanh.f32 %v1240_v41 }
 0x150   : > { %v1243_v43 = vadd.f32 %v1892_v42, %v1780_v39  ;;  %v1781_v44 = vpop.f32.mrb[36].mxu0 }
 0x151   : > { %v2132_v45 = vpop.eup %2131  ;;  %v1893_v46 = vpop.f32.mrb[36].mxu1 }
 0x152   : > { %2137 = vtanh.f32 %v1243_v43  ;;  %v1782_v47 = vpop.f32.mrb[37].mxu0  ;;  %1447 = vst [vmem:[%s2376_s4 + $0x70] sm:$0xff] %v2132_v45  ;;  %v1894_v49 = vpop.f32.mrb[37].mxu1 }
 0x153   : > { %v1783_v48 = vadd.f32 %v1782_v47, %v1781_v44  ;;  %v1784_v50 = vpop.f32.mrb[38].mxu0  ;;  %v1895_v52 = vadd.f32 %v1894_v49, %v1893_v46  ;;  %v1896_v53 = vpop.f32.mrb[38].mxu1 }
 0x154   : > { %v2134_v51 = vpop.eup %2133  ;;  %v1785_v54 = vpop.f32.mrb[39].mxu0 }
 0x155   : > { %1448 = vst [vmem:[%s2376_s4 + $0x78] sm:$0xff] %v2134_v51  ;;  %v1786_v55 = vadd.f32 %v1785_v54, %v1784_v50  ;;  %v1897_v56 = vpop.f32.mrb[39].mxu1  ;;  %v1248_v57 = vadd.f32 %v1895_v52, %v1783_v48 }
 0x156   : > { %v1898_v58 = vadd.f32 %v1897_v56, %v1896_v53 }
 0x157   : > { %2139 = vtanh.f32 %v1248_v57 }
 0x158   : > { %v1251_v59 = vadd.f32 %v1898_v58, %v1786_v55  ;;  %v1787_v60 = vpop.f32.mrb[40].mxu0 }
 0x159   : > { %v2136_v61 = vpop.eup %2135  ;;  %v1899_v62 = vpop.f32.mrb[40].mxu1 }
 0x15a   : > { %2141 = vtanh.f32 %v1251_v59  ;;  %v1788_v63 = vpop.f32.mrb[41].mxu0  ;;  %1449 = vst [vmem:[%s2376_s4 + $0x80] sm:$0xff] %v2136_v61  ;;  %v1900_v1 = vpop.f32.mrb[41].mxu1 }
 0x15b   : > { %v1789_v0 = vadd.f32 %v1788_v63, %v1787_v60  ;;  %v1790_v2 = vpop.f32.mrb[42].mxu0  ;;  %v1901_v4 = vadd.f32 %v1900_v1, %v1899_v62  ;;  %v1902_v5 = vpop.f32.mrb[42].mxu1 }
 0x15c   : > { %v2138_v3 = vpop.eup %2137  ;;  %v1791_v6 = vpop.f32.mrb[43].mxu0 }
 0x15d   : > { %1450 = vst [vmem:[%s2376_s4 + $0x88] sm:$0xff] %v2138_v3  ;;  %v1792_v7 = vadd.f32 %v1791_v6, %v1790_v2  ;;  %v1903_v8 = vpop.f32.mrb[43].mxu1  ;;  %v1256_v9 = vadd.f32 %v1901_v4, %v1789_v0 }
 0x15e   : > { %v1904_v10 = vadd.f32 %v1903_v8, %v1902_v5 }
 0x15f   : > { %2143 = vtanh.f32 %v1256_v9 }
 0x160   : > { %v1259_v11 = vadd.f32 %v1904_v10, %v1792_v7  ;;  %v1793_v12 = vpop.f32.mrb[44].mxu0 }
 0x161   : > { %v2140_v13 = vpop.eup %2139  ;;  %v1905_v14 = vpop.f32.mrb[44].mxu1 }
 0x162   : > { %2145 = vtanh.f32 %v1259_v11  ;;  %v1794_v15 = vpop.f32.mrb[45].mxu0  ;;  %1451 = vst [vmem:[%s2376_s4 + $0x90] sm:$0xff] %v2140_v13  ;;  %v1906_v17 = vpop.f32.mrb[45].mxu1 }
 0x163   : > { %v1795_v16 = vadd.f32 %v1794_v15, %v1793_v12  ;;  %v1796_v18 = vpop.f32.mrb[46].mxu0  ;;  %v1907_v20 = vadd.f32 %v1906_v17, %v1905_v14  ;;  %v1908_v21 = vpop.f32.mrb[46].mxu1 }
 0x164   : > { %v2142_v19 = vpop.eup %2141  ;;  %v1797_v22 = vpop.f32.mrb[47].mxu0 }
 0x165   : > { %1452 = vst [vmem:[%s2376_s4 + $0x98] sm:$0xff] %v2142_v19  ;;  %v1798_v23 = vadd.f32 %v1797_v22, %v1796_v18  ;;  %v1909_v24 = vpop.f32.mrb[47].mxu1  ;;  %v1264_v25 = vadd.f32 %v1907_v20, %v1795_v16 }
 0x166   : > { %v1910_v26 = vadd.f32 %v1909_v24, %v1908_v21 }
 0x167   : > { %2147 = vtanh.f32 %v1264_v25 }
 0x168   : > { %v1267_v27 = vadd.f32 %v1910_v26, %v1798_v23  ;;  %v1799_v28 = vpop.f32.mrb[48].mxu0 }
 0x169   : > { %v2144_v29 = vpop.eup %2143  ;;  %v1911_v30 = vpop.f32.mrb[48].mxu1 }
 0x16a   : > { %2149 = vtanh.f32 %v1267_v27  ;;  %v1800_v31 = vpop.f32.mrb[49].mxu0  ;;  %1453 = vst [vmem:[%s2376_s4 + $0xa0] sm:$0xff] %v2144_v29  ;;  %v1912_v33 = vpop.f32.mrb[49].mxu1 }
 0x16b   : > { %v1801_v32 = vadd.f32 %v1800_v31, %v1799_v28  ;;  %v1802_v34 = vpop.f32.mrb[50].mxu0  ;;  %v1913_v36 = vadd.f32 %v1912_v33, %v1911_v30  ;;  %v1914_v37 = vpop.f32.mrb[50].mxu1 }
 0x16c   : > { %v2146_v35 = vpop.eup %2145  ;;  %v1803_v38 = vpop.f32.mrb[51].mxu0 }
 0x16d   : > { %1454 = vst [vmem:[%s2376_s4 + $0xa8] sm:$0xff] %v2146_v35  ;;  %v1804_v39 = vadd.f32 %v1803_v38, %v1802_v34  ;;  %v1915_v40 = vpop.f32.mrb[51].mxu1  ;;  %v1272_v41 = vadd.f32 %v1913_v36, %v1801_v32 }
 0x16e   : > { %v1916_v42 = vadd.f32 %v1915_v40, %v1914_v37 }
 0x16f   : > { %2151 = vtanh.f32 %v1272_v41 }
 0x170   : > { %v1275_v43 = vadd.f32 %v1916_v42, %v1804_v39  ;;  %v1805_v44 = vpop.f32.mrb[52].mxu0 }
 0x171   : > { %v2148_v45 = vpop.eup %2147  ;;  %v1917_v46 = vpop.f32.mrb[52].mxu1 }
 0x172   : > { %2153 = vtanh.f32 %v1275_v43  ;;  %v1806_v47 = vpop.f32.mrb[53].mxu0  ;;  %1455 = vst [vmem:[%s2376_s4 + $0xb0] sm:$0xff] %v2148_v45  ;;  %v1918_v49 = vpop.f32.mrb[53].mxu1 }
 0x173   : > { %v1807_v48 = vadd.f32 %v1806_v47, %v1805_v44  ;;  %v1808_v50 = vpop.f32.mrb[54].mxu0  ;;  %v1919_v52 = vadd.f32 %v1918_v49, %v1917_v46  ;;  %v1920_v53 = vpop.f32.mrb[54].mxu1 }
 0x174   : > { %v2150_v51 = vpop.eup %2149  ;;  %v1809_v54 = vpop.f32.mrb[55].mxu0 }
 0x175   : > { %1456 = vst [vmem:[%s2376_s4 + $0xb8] sm:$0xff] %v2150_v51  ;;  %v1810_v55 = vadd.f32 %v1809_v54, %v1808_v50  ;;  %v1921_v56 = vpop.f32.mrb[55].mxu1  ;;  %v1280_v57 = vadd.f32 %v1919_v52, %v1807_v48 }
 0x176   : > { %v1922_v58 = vadd.f32 %v1921_v56, %v1920_v53 }
 0x177   : > { %2155 = vtanh.f32 %v1280_v57 }
 0x178   : > { %v1283_v59 = vadd.f32 %v1922_v58, %v1810_v55  ;;  %v1811_v60 = vpop.f32.mrb[56].mxu0 }
 0x179   : > { %v2152_v61 = vpop.eup %2151  ;;  %v1923_v62 = vpop.f32.mrb[56].mxu1 }
 0x17a   : > { %2157 = vtanh.f32 %v1283_v59  ;;  %v1812_v63 = vpop.f32.mrb[57].mxu0  ;;  %1457 = vst [vmem:[%s2376_s4 + $0xc0] sm:$0xff] %v2152_v61  ;;  %v1924_v1 = vpop.f32.mrb[57].mxu1 }
 0x17b   : > { %v1813_v0 = vadd.f32 %v1812_v63, %v1811_v60  ;;  %v1814_v2 = vpop.f32.mrb[58].mxu0  ;;  %v1925_v4 = vadd.f32 %v1924_v1, %v1923_v62  ;;  %v1926_v5 = vpop.f32.mrb[58].mxu1 }
 0x17c   : > { %v2154_v3 = vpop.eup %2153  ;;  %v1815_v6 = vpop.f32.mrb[59].mxu0 }
 0x17d   : > { %1458 = vst [vmem:[%s2376_s4 + $0xc8] sm:$0xff] %v2154_v3  ;;  %v1816_v7 = vadd.f32 %v1815_v6, %v1814_v2  ;;  %v1927_v8 = vpop.f32.mrb[59].mxu1  ;;  %v1288_v9 = vadd.f32 %v1925_v4, %v1813_v0 }
 0x17e   : > { %v1928_v10 = vadd.f32 %v1927_v8, %v1926_v5 }
 0x17f   : > { %2159 = vtanh.f32 %v1288_v9 }
 0x180   : > { %v1291_v11 = vadd.f32 %v1928_v10, %v1816_v7  ;;  %v1817_v12 = vpop.f32.mrb[60].mxu0 }
 0x181   : > { %v2156_v13 = vpop.eup %2155  ;;  %v1929_v14 = vpop.f32.mrb[60].mxu1 }
 0x182   : > { %2161 = vtanh.f32 %v1291_v11  ;;  %v1818_v15 = vpop.f32.mrb[61].mxu0  ;;  %1459 = vst [vmem:[%s2376_s4 + $0xd0] sm:$0xff] %v2156_v13  ;;  %v1930_v17 = vpop.f32.mrb[61].mxu1 }
 0x183   : > { %v1819_v16 = vadd.f32 %v1818_v15, %v1817_v12  ;;  %v1820_v18 = vpop.f32.mrb[62].mxu0  ;;  %v1931_v20 = vadd.f32 %v1930_v17, %v1929_v14  ;;  %v1932_v21 = vpop.f32.mrb[62].mxu1 }
 0x184   : > { %v2158_v19 = vpop.eup %2157  ;;  %v1821_v22 = vpop.f32.mrb[63].mxu0 }
 0x185   : > { %1460 = vst [vmem:[%s2376_s4 + $0xd8] sm:$0xff] %v2158_v19  ;;  %v1822_v23 = vadd.f32 %v1821_v22, %v1820_v18  ;;  %v1933_v24 = vpop.f32.mrb[63].mxu1  ;;  %v1296_v25 = vadd.f32 %v1931_v20, %v1819_v16 }
 0x186   : > { %v1934_v26 = vadd.f32 %v1933_v24, %v1932_v21 }
 0x187   : > { %2163 = vtanh.f32 %v1296_v25 }
 0x188   : > { %v1299_v27 = vadd.f32 %v1934_v26, %v1822_v23 }
 0x189   : > { %v2160_v28 = vpop.eup %2159 }
 0x18a   : > { %2165 = vtanh.f32 %v1299_v27  ;;  %1461 = vst [vmem:[%s2376_s4 + $0xe0] sm:$0xff] %v2160_v28 }
 0x18c   : > { %v2162_v29 = vpop.eup %2161 }
 0x18d   : > { %1462 = vst [vmem:[%s2376_s4 + $0xe8] sm:$0xff] %v2162_v29 }
 0x191   : > { %v2164_v30 = vpop.eup %2163 }
 0x192   : > { %1463 = vst [vmem:[%s2376_s4 + $0xf0] sm:$0xff] %v2164_v30 }
 0x194   : > { %v2166_v31 = vpop.eup %2165 }
 0x195   : > { %1464 = vst [vmem:[%s2376_s4 + $0xf8] sm:$0xff] %v2166_v31 }
 0x196 PF: > { %s12_s13 = sadd.s32 1, %s2205_s13   ;;  %s2428_s9 = smov %s2197_s11 }
 0x197   : > { %p9_p7 = scmp.ge.s32.totalorder %s12_s13, 34   ;;  %s2429_s10 = smov %s2201_s12 }
 0x198   : > { %s2430_s11 = smov %s2433_s14  ;;  %s2431_s12 = smov %s2437_s15 }
 0x199   :  { %11 = sbr.rel (!%p9_p7) target bundleno = 3 (0x3), region = 69 }

</bundles_post_ra>
